<compile_context>
chip_gen: v5e
topology: v5e:2x2
jax: 0.10.0
libtpu: 0.0.40
codegen_flags: <defaults>
</compile_context>

<pallas_src>
import jax
import jax.numpy as jnp
from jax.experimental import pallas as pl
from jax.experimental.pallas import tpu as pltpu

KSIZE = 5          # all three convs are 5x5, stride 1, no padding
BN_EPS = 1e-5
VMEM = pltpu.MemorySpace.VMEM


def _conv5x5_bn_relu(x, w_ref, b_ref):
    """One conv(5x5, stride 1, valid) + folded-BN bias + ReLU, fully in VMEM.

    x:     (H, W, Cin) bf16 activation value.
    w_ref: (KSIZE*KSIZE, Cin, Cout) bf16 ref, BN scale pre-folded.
    b_ref: (1, Cout) f32 ref, conv bias + BN shift pre-folded.
    returns (Ho, Wo, Cout) f32.
    """
    H, W, Cin = x.shape
    Cout = w_ref.shape[-1]
    Ho, Wo = H - (KSIZE - 1), W - (KSIZE - 1)

    acc = jnp.zeros((Ho, Wo, Cout), jnp.float32)
    # In-kernel im2col: 25 shifted views of the activation, each contracted
    # over Cin on the MXU as a batched matmul (batch = Ho output rows).
    # No patch matrix is materialized and no activation relayouts are needed.
    for ki in range(KSIZE):
        for kj in range(KSIZE):
            win = x[ki:ki + Ho, kj:kj + Wo, :]                    # (Ho, Wo, Cin)
            wk = w_ref[ki * KSIZE + kj]                           # (Cin, Cout)
            wk = jnp.broadcast_to(wk[None, :, :], (Ho, Cin, Cout))
            acc = acc + jnp.einsum("hwc,hco->hwo", win, wk,
                                   preferred_element_type=jnp.float32)
    return jnp.maximum(acc + b_ref[...], 0.0)                     # f32 epilogue


def _dqn_fused_kernel(x_ref, w1_ref, b1_ref, w2_ref, b2_ref, w3_ref, b3_ref,
                      o_ref):
    # x_ref block: (1, H, W, 3) f32 -- one image per grid step.
    x = x_ref[0].astype(jnp.bfloat16)                             # (H, W, 3)

    a1 = _conv5x5_bn_relu(x, w1_ref, b1_ref).astype(jnp.bfloat16)   # (H-4, W-4, 16)
    a2 = _conv5x5_bn_relu(a1, w2_ref, b2_ref).astype(jnp.bfloat16)  # (H-8, W-8, 32)
    y3 = _conv5x5_bn_relu(a2, w3_ref, b3_ref)                       # (Ho3, Wo3, 32) f32

    # Emit torch's x.view(N, -1) (NCHW flatten) directly: the per-image output
    # slab is (C3, Ho3*Wo3) with element [c, h*Wo3 + w] == y3[h, w, c].
    Ho3, Wo3, _ = y3.shape
    for h in range(Ho3):
        o_ref[0, :, h * Wo3:(h + 1) * Wo3] = jnp.transpose(y3[h], (1, 0))


def dqn_forward(x_nchw, prepared_params):
    """Fused DQN forward. x_nchw: (N, 3, H, W) f32 -> (N, 32*Ho3*Wo3) f32."""
    (w1, b1), (w2, b2), (w3, b3) = prepared_params
    N, Cin, H, W = x_nchw.shape
    Ho3 = H - 3 * (KSIZE - 1)
    Wo3 = W - 3 * (KSIZE - 1)
    C3 = w3.shape[-1]

    # Single tiny layout change in the wrapper: NCHW -> NHWC (channels to the
    # lane dim). Everything else, including the final flatten, is in-kernel.
    x_nhwc = jnp.transpose(x_nchw, (0, 2, 3, 1))

    out = pl.pallas_call(
        _dqn_fused_kernel,
        out_shape=jax.ShapeDtypeStruct((N, C3, Ho3 * Wo3), jnp.float32),
        grid=(N,),
        in_specs=[
            pl.BlockSpec((1, H, W, Cin), lambda n: (n, 0, 0, 0),
                         memory_space=VMEM),
            pl.BlockSpec(w1.shape, lambda n: (0, 0, 0), memory_space=VMEM),
            pl.BlockSpec(b1.shape, lambda n: (0, 0), memory_space=VMEM),
            pl.BlockSpec(w2.shape, lambda n: (0, 0, 0), memory_space=VMEM),
            pl.BlockSpec(b2.shape, lambda n: (0, 0), memory_space=VMEM),
            pl.BlockSpec(w3.shape, lambda n: (0, 0, 0), memory_space=VMEM),
            pl.BlockSpec(b3.shape, lambda n: (0, 0), memory_space=VMEM),
        ],
        out_specs=pl.BlockSpec((1, C3, Ho3 * Wo3), lambda n: (n, 0, 0),
                               memory_space=VMEM),
        compiler_params=pltpu.CompilerParams(
            dimension_semantics=("parallel",)),
    )(x_nhwc, w1, b1, w2, b2, w3, b3)

    # Already in NCHW-flatten order per image; this reshape is a bitcast.
    return out.reshape(N, C3 * Ho3 * Wo3)


def prepare_params(params, eps=BN_EPS):
    """One-time fold of conv bias + eval-mode BN into (weights, bias); cast
    weights to bf16 for the MXU. Done once at prep time, not per forward."""
    prepared = []
    for (w, b, gamma, beta, mean, var) in params:
        Cout, Cin, KH, KW = w.shape
        scale = gamma / jnp.sqrt(var + eps)                       # (Cout,)
        w_folded = w * scale[:, None, None, None]                 # (Cout,Cin,KH,KW)
        bias = (b - mean) * scale + beta                          # (Cout,)
        # (Cout, Cin, KH, KW) -> (KH*KW, Cin, Cout): kernel indexes ki*5+kj.
        w_k = jnp.transpose(w_folded, (2, 3, 1, 0)).reshape(KH * KW, Cin, Cout)
        prepared.append((w_k.astype(jnp.bfloat16),
                         bias.reshape(1, Cout).astype(jnp.float32)))
    return prepared


def init_params(key):
    def conv_layer_params(k, cin, cout, ksize):
        k1, k2, k3, k4, k5, k6 = jax.random.split(k, 6)
        fan_in = cin * ksize * ksize
        bound = 1.0 / (fan_in ** 0.5)
        w = jax.random.uniform(k1, (cout, cin, ksize, ksize), jnp.float32,
                               -bound, bound)
        b = jax.random.uniform(k2, (cout,), jnp.float32, -bound, bound)
        gamma = jax.random.uniform(k3, (cout,), jnp.float32, 0.5, 1.5)
        beta = jax.random.normal(k4, (cout,), jnp.float32) * 0.1
        mean = jax.random.normal(k5, (cout,), jnp.float32) * 0.1
        var = jax.random.uniform(k6, (cout,), jnp.float32, 0.5, 1.5)
        return (w, b, gamma, beta, mean, var)

    k1, k2, k3 = jax.random.split(key, 3)
    return [
        conv_layer_params(k1, 3, 16, KSIZE),
        conv_layer_params(k2, 16, 32, KSIZE),
        conv_layer_params(k3, 32, 32, KSIZE),
    ]


def reference_forward(x_nchw, params, eps=BN_EPS):
    """Pure-JAX f32 reference (conv + eval BN + ReLU, NCHW flatten)."""
    x = x_nchw
    for (w, b, gamma, beta, mean, var) in params:
        y = jax.lax.conv_general_dilated(
            x, w, window_strides=(1, 1), padding="VALID",
            dimension_numbers=("NCHW", "OIHW", "NCHW"))
        y = y + b[None, :, None, None]
        scale = (gamma / jnp.sqrt(var + eps))[None, :, None, None]
        y = (y - mean[None, :, None, None]) * scale + beta[None, :, None, None]
        x = jnp.maximum(y, 0.0)
    return x.reshape(x.shape[0], -1)


if __name__ == "__main__":
    key = jax.random.PRNGKey(0)
    pkey, xkey = jax.random.split(key)
    params = init_params(pkey)
    prepared = prepare_params(params)

    # batch=2, channels=3, 16x16 -> spatial 16 -> 12 -> 8 -> 4.
    x = jax.random.normal(xkey, (2, 3, 16, 16), jnp.float32)

    out = jax.jit(dqn_forward)(x, prepared)
    out = jax.block_until_ready(out)

    assert out.shape == (2, 32 * 4 * 4), out.shape
    assert bool(jnp.all(jnp.isfinite(out)))

    # Validate against the f32 reference (loose tolerance: the kernel feeds
    # the MXU bf16 inputs with f32 accumulation).
    ref = reference_forward(x, params)
    err = jnp.abs(out - ref)
    tol = 0.1 + 0.1 * jnp.abs(ref)
    assert bool(jnp.all(err <= tol)), float(jnp.max(err))

    print("KERNEL_OK")
</pallas_src>

<mosaic_0001>
module attributes {stable_mosaic.version = 11 : i64} {
  func.func @_dqn_fused_kernel(%arg0: i32, %arg1: memref<1x16x16x3xf32, #tpu.memory_space<vmem>>, %arg2: memref<25x3x16xbf16, #tpu.memory_space<vmem>>, %arg3: memref<1x16xf32, #tpu.memory_space<vmem>>, %arg4: memref<25x16x32xbf16, #tpu.memory_space<vmem>>, %arg5: memref<1x32xf32, #tpu.memory_space<vmem>>, %arg6: memref<25x32x32xbf16, #tpu.memory_space<vmem>>, %arg7: memref<1x32xf32, #tpu.memory_space<vmem>>, %arg8: memref<1x32x16xf32, #tpu.memory_space<vmem>>) attributes {dimension_semantics = [#tpu.dimension_semantics<parallel>], iteration_bounds = array<i64: 2>, scalar_prefetch = 0 : i64, scratch_operands = 0 : i64, tpu.core_type = #tpu.core_type<tc>, window_params = [{transform_indices = @transform_0, window_bounds = array<i64: 1, 16, 16, 3>}, {pipeline_mode = #tpu.pipeline_mode<synchronous>, transform_indices = @transform_1, window_bounds = array<i64: 25, 3, 16>}, {pipeline_mode = #tpu.pipeline_mode<synchronous>, transform_indices = @transform_2, window_bounds = array<i64: 1, 16>}, {pipeline_mode = #tpu.pipeline_mode<synchronous>, transform_indices = @transform_3, window_bounds = array<i64: 25, 16, 32>}, {pipeline_mode = #tpu.pipeline_mode<synchronous>, transform_indices = @transform_4, window_bounds = array<i64: 1, 32>}, {pipeline_mode = #tpu.pipeline_mode<synchronous>, transform_indices = @transform_5, window_bounds = array<i64: 25, 32, 32>}, {pipeline_mode = #tpu.pipeline_mode<synchronous>, transform_indices = @transform_6, window_bounds = array<i64: 1, 32>}, {transform_indices = @transform_7, window_bounds = array<i64: 1, 32, 16>}]} {
    %c0 = arith.constant 0 : index
    %c0_0 = arith.constant 0 : index
    %c0_1 = arith.constant 0 : index
    %c0_2 = arith.constant 0 : index
    %0 = vector.load %arg1[%c0, %c0_0, %c0_1, %c0_2] : memref<1x16x16x3xf32, #tpu.memory_space<vmem>>, vector<1x16x16x3xf32>
    %1 = vector.shape_cast %0 : vector<1x16x16x3xf32> to vector<16x16x3xf32>
    %2 = arith.truncf %1 : vector<16x16x3xf32> to vector<16x16x3xbf16>
    %cst = arith.constant 0.000000e+00 : f32
    %3 = vector.broadcast %cst : f32 to vector<12x12x16xf32>
    %4 = vector.extract_strided_slice %2 {offsets = [0, 0, 0], sizes = [12, 12, 3], strides = [1, 1, 1]} : vector<16x16x3xbf16> to vector<12x12x3xbf16>
    %c0_3 = arith.constant 0 : index
    %c0_4 = arith.constant 0 : index
    %c0_5 = arith.constant 0 : index
    %5 = vector.load %arg2[%c0_3, %c0_4, %c0_5] : memref<25x3x16xbf16, #tpu.memory_space<vmem>>, vector<1x3x16xbf16>
    %6 = vector.shape_cast %5 : vector<1x3x16xbf16> to vector<3x16xbf16>
    %7 = vector.shape_cast %6 : vector<3x16xbf16> to vector<1x3x16xbf16>
    %8 = vector.shape_cast %7 : vector<1x3x16xbf16> to vector<1x3x16xbf16>
    %9 = vector.broadcast %8 : vector<1x3x16xbf16> to vector<12x3x16xbf16>
    "tpu.trace_start"() <{level = 10 : i32, message = "hwc,hco->hwo"}> : () -> ()
    %cst_6 = arith.constant dense<0.000000e+00> : vector<12x12x16xf32>
    %10 = tpu.matmul %4, %9, %cst_6 {dimension_numbers = #tpu.dot_dimension_numbers<[2], [1], [1], [2], [0, 0, 0, 1, 1, 2], [0], [0]>} : vector<12x12x3xbf16>, vector<12x3x16xbf16>, vector<12x12x16xf32> -> vector<12x12x16xf32>
    "tpu.trace_stop"() : () -> ()
    %11 = arith.addf %3, %10 : vector<12x12x16xf32>
    %12 = vector.extract_strided_slice %2 {offsets = [0, 1, 0], sizes = [12, 12, 3], strides = [1, 1, 1]} : vector<16x16x3xbf16> to vector<12x12x3xbf16>
    %c1 = arith.constant 1 : index
    %c0_7 = arith.constant 0 : index
    %c0_8 = arith.constant 0 : index
    %13 = vector.load %arg2[%c1, %c0_7, %c0_8] : memref<25x3x16xbf16, #tpu.memory_space<vmem>>, vector<1x3x16xbf16>
    %14 = vector.shape_cast %13 : vector<1x3x16xbf16> to vector<3x16xbf16>
    %15 = vector.shape_cast %14 : vector<3x16xbf16> to vector<1x3x16xbf16>
    %16 = vector.shape_cast %15 : vector<1x3x16xbf16> to vector<1x3x16xbf16>
    %17 = vector.broadcast %16 : vector<1x3x16xbf16> to vector<12x3x16xbf16>
    "tpu.trace_start"() <{level = 10 : i32, message = "hwc,hco->hwo"}> : () -> ()
    %cst_9 = arith.constant dense<0.000000e+00> : vector<12x12x16xf32>
    %18 = tpu.matmul %12, %17, %cst_9 {dimension_numbers = #tpu.dot_dimension_numbers<[2], [1], [1], [2], [0, 0, 0, 1, 1, 2], [0], [0]>} : vector<12x12x3xbf16>, vector<12x3x16xbf16>, vector<12x12x16xf32> -> vector<12x12x16xf32>
    "tpu.trace_stop"() : () -> ()
    %19 = arith.addf %11, %18 : vector<12x12x16xf32>
    %20 = vector.extract_strided_slice %2 {offsets = [0, 2, 0], sizes = [12, 12, 3], strides = [1, 1, 1]} : vector<16x16x3xbf16> to vector<12x12x3xbf16>
    %c2 = arith.constant 2 : index
    %c0_10 = arith.constant 0 : index
    %c0_11 = arith.constant 0 : index
    %21 = vector.load %arg2[%c2, %c0_10, %c0_11] : memref<25x3x16xbf16, #tpu.memory_space<vmem>>, vector<1x3x16xbf16>
    %22 = vector.shape_cast %21 : vector<1x3x16xbf16> to vector<3x16xbf16>
    %23 = vector.shape_cast %22 : vector<3x16xbf16> to vector<1x3x16xbf16>
    %24 = vector.shape_cast %23 : vector<1x3x16xbf16> to vector<1x3x16xbf16>
    %25 = vector.broadcast %24 : vector<1x3x16xbf16> to vector<12x3x16xbf16>
    "tpu.trace_start"() <{level = 10 : i32, message = "hwc,hco->hwo"}> : () -> ()
    %cst_12 = arith.constant dense<0.000000e+00> : vector<12x12x16xf32>
    %26 = tpu.matmul %20, %25, %cst_12 {dimension_numbers = #tpu.dot_dimension_numbers<[2], [1], [1], [2], [0, 0, 0, 1, 1, 2], [0], [0]>} : vector<12x12x3xbf16>, vector<12x3x16xbf16>, vector<12x12x16xf32> -> vector<12x12x16xf32>
    "tpu.trace_stop"() : () -> ()
    %27 = arith.addf %19, %26 : vector<12x12x16xf32>
    %28 = vector.extract_strided_slice %2 {offsets = [0, 3, 0], sizes = [12, 12, 3], strides = [1, 1, 1]} : vector<16x16x3xbf16> to vector<12x12x3xbf16>
    %c3 = arith.constant 3 : index
    %c0_13 = arith.constant 0 : index
    %c0_14 = arith.constant 0 : index
    %29 = vector.load %arg2[%c3, %c0_13, %c0_14] : memref<25x3x16xbf16, #tpu.memory_space<vmem>>, vector<1x3x16xbf16>
    %30 = vector.shape_cast %29 : vector<1x3x16xbf16> to vector<3x16xbf16>
    %31 = vector.shape_cast %30 : vector<3x16xbf16> to vector<1x3x16xbf16>
    %32 = vector.shape_cast %31 : vector<1x3x16xbf16> to vector<1x3x16xbf16>
    %33 = vector.broadcast %32 : vector<1x3x16xbf16> to vector<12x3x16xbf16>
    "tpu.trace_start"() <{level = 10 : i32, message = "hwc,hco->hwo"}> : () -> ()
    %cst_15 = arith.constant dense<0.000000e+00> : vector<12x12x16xf32>
    %34 = tpu.matmul %28, %33, %cst_15 {dimension_numbers = #tpu.dot_dimension_numbers<[2], [1], [1], [2], [0, 0, 0, 1, 1, 2], [0], [0]>} : vector<12x12x3xbf16>, vector<12x3x16xbf16>, vector<12x12x16xf32> -> vector<12x12x16xf32>
    "tpu.trace_stop"() : () -> ()
    %35 = arith.addf %27, %34 : vector<12x12x16xf32>
    %36 = vector.extract_strided_slice %2 {offsets = [0, 4, 0], sizes = [12, 12, 3], strides = [1, 1, 1]} : vector<16x16x3xbf16> to vector<12x12x3xbf16>
    %c4 = arith.constant 4 : index
    %c0_16 = arith.constant 0 : index
    %c0_17 = arith.constant 0 : index
    %37 = vector.load %arg2[%c4, %c0_16, %c0_17] : memref<25x3x16xbf16, #tpu.memory_space<vmem>>, vector<1x3x16xbf16>
    %38 = vector.shape_cast %37 : vector<1x3x16xbf16> to vector<3x16xbf16>
    %39 = vector.shape_cast %38 : vector<3x16xbf16> to vector<1x3x16xbf16>
    %40 = vector.shape_cast %39 : vector<1x3x16xbf16> to vector<1x3x16xbf16>
    %41 = vector.broadcast %40 : vector<1x3x16xbf16> to vector<12x3x16xbf16>
    "tpu.trace_start"() <{level = 10 : i32, message = "hwc,hco->hwo"}> : () -> ()
    %cst_18 = arith.constant dense<0.000000e+00> : vector<12x12x16xf32>
    %42 = tpu.matmul %36, %41, %cst_18 {dimension_numbers = #tpu.dot_dimension_numbers<[2], [1], [1], [2], [0, 0, 0, 1, 1, 2], [0], [0]>} : vector<12x12x3xbf16>, vector<12x3x16xbf16>, vector<12x12x16xf32> -> vector<12x12x16xf32>
    "tpu.trace_stop"() : () -> ()
    %43 = arith.addf %35, %42 : vector<12x12x16xf32>
    %44 = vector.extract_strided_slice %2 {offsets = [1, 0, 0], sizes = [12, 12, 3], strides = [1, 1, 1]} : vector<16x16x3xbf16> to vector<12x12x3xbf16>
    %c5 = arith.constant 5 : index
    %c0_19 = arith.constant 0 : index
    %c0_20 = arith.constant 0 : index
    %45 = vector.load %arg2[%c5, %c0_19, %c0_20] : memref<25x3x16xbf16, #tpu.memory_space<vmem>>, vector<1x3x16xbf16>
    %46 = vector.shape_cast %45 : vector<1x3x16xbf16> to vector<3x16xbf16>
    %47 = vector.shape_cast %46 : vector<3x16xbf16> to vector<1x3x16xbf16>
    %48 = vector.shape_cast %47 : vector<1x3x16xbf16> to vector<1x3x16xbf16>
    %49 = vector.broadcast %48 : vector<1x3x16xbf16> to vector<12x3x16xbf16>
    "tpu.trace_start"() <{level = 10 : i32, message = "hwc,hco->hwo"}> : () -> ()
    %cst_21 = arith.constant dense<0.000000e+00> : vector<12x12x16xf32>
    %50 = tpu.matmul %44, %49, %cst_21 {dimension_numbers = #tpu.dot_dimension_numbers<[2], [1], [1], [2], [0, 0, 0, 1, 1, 2], [0], [0]>} : vector<12x12x3xbf16>, vector<12x3x16xbf16>, vector<12x12x16xf32> -> vector<12x12x16xf32>
    "tpu.trace_stop"() : () -> ()
    %51 = arith.addf %43, %50 : vector<12x12x16xf32>
    %52 = vector.extract_strided_slice %2 {offsets = [1, 1, 0], sizes = [12, 12, 3], strides = [1, 1, 1]} : vector<16x16x3xbf16> to vector<12x12x3xbf16>
    %c6 = arith.constant 6 : index
    %c0_22 = arith.constant 0 : index
    %c0_23 = arith.constant 0 : index
    %53 = vector.load %arg2[%c6, %c0_22, %c0_23] : memref<25x3x16xbf16, #tpu.memory_space<vmem>>, vector<1x3x16xbf16>
    %54 = vector.shape_cast %53 : vector<1x3x16xbf16> to vector<3x16xbf16>
    %55 = vector.shape_cast %54 : vector<3x16xbf16> to vector<1x3x16xbf16>
    %56 = vector.shape_cast %55 : vector<1x3x16xbf16> to vector<1x3x16xbf16>
    %57 = vector.broadcast %56 : vector<1x3x16xbf16> to vector<12x3x16xbf16>
    "tpu.trace_start"() <{level = 10 : i32, message = "hwc,hco->hwo"}> : () -> ()
    %cst_24 = arith.constant dense<0.000000e+00> : vector<12x12x16xf32>
    %58 = tpu.matmul %52, %57, %cst_24 {dimension_numbers = #tpu.dot_dimension_numbers<[2], [1], [1], [2], [0, 0, 0, 1, 1, 2], [0], [0]>} : vector<12x12x3xbf16>, vector<12x3x16xbf16>, vector<12x12x16xf32> -> vector<12x12x16xf32>
    "tpu.trace_stop"() : () -> ()
    %59 = arith.addf %51, %58 : vector<12x12x16xf32>
    %60 = vector.extract_strided_slice %2 {offsets = [1, 2, 0], sizes = [12, 12, 3], strides = [1, 1, 1]} : vector<16x16x3xbf16> to vector<12x12x3xbf16>
    %c7 = arith.constant 7 : index
    %c0_25 = arith.constant 0 : index
    %c0_26 = arith.constant 0 : index
    %61 = vector.load %arg2[%c7, %c0_25, %c0_26] : memref<25x3x16xbf16, #tpu.memory_space<vmem>>, vector<1x3x16xbf16>
    %62 = vector.shape_cast %61 : vector<1x3x16xbf16> to vector<3x16xbf16>
    %63 = vector.shape_cast %62 : vector<3x16xbf16> to vector<1x3x16xbf16>
    %64 = vector.shape_cast %63 : vector<1x3x16xbf16> to vector<1x3x16xbf16>
    %65 = vector.broadcast %64 : vector<1x3x16xbf16> to vector<12x3x16xbf16>
    "tpu.trace_start"() <{level = 10 : i32, message = "hwc,hco->hwo"}> : () -> ()
    %cst_27 = arith.constant dense<0.000000e+00> : vector<12x12x16xf32>
    %66 = tpu.matmul %60, %65, %cst_27 {dimension_numbers = #tpu.dot_dimension_numbers<[2], [1], [1], [2], [0, 0, 0, 1, 1, 2], [0], [0]>} : vector<12x12x3xbf16>, vector<12x3x16xbf16>, vector<12x12x16xf32> -> vector<12x12x16xf32>
    "tpu.trace_stop"() : () -> ()
    %67 = arith.addf %59, %66 : vector<12x12x16xf32>
    %68 = vector.extract_strided_slice %2 {offsets = [1, 3, 0], sizes = [12, 12, 3], strides = [1, 1, 1]} : vector<16x16x3xbf16> to vector<12x12x3xbf16>
    %c8 = arith.constant 8 : index
    %c0_28 = arith.constant 0 : index
    %c0_29 = arith.constant 0 : index
    %69 = vector.load %arg2[%c8, %c0_28, %c0_29] : memref<25x3x16xbf16, #tpu.memory_space<vmem>>, vector<1x3x16xbf16>
    %70 = vector.shape_cast %69 : vector<1x3x16xbf16> to vector<3x16xbf16>
    %71 = vector.shape_cast %70 : vector<3x16xbf16> to vector<1x3x16xbf16>
    %72 = vector.shape_cast %71 : vector<1x3x16xbf16> to vector<1x3x16xbf16>
    %73 = vector.broadcast %72 : vector<1x3x16xbf16> to vector<12x3x16xbf16>
    "tpu.trace_start"() <{level = 10 : i32, message = "hwc,hco->hwo"}> : () -> ()
    %cst_30 = arith.constant dense<0.000000e+00> : vector<12x12x16xf32>
    %74 = tpu.matmul %68, %73, %cst_30 {dimension_numbers = #tpu.dot_dimension_numbers<[2], [1], [1], [2], [0, 0, 0, 1, 1, 2], [0], [0]>} : vector<12x12x3xbf16>, vector<12x3x16xbf16>, vector<12x12x16xf32> -> vector<12x12x16xf32>
    "tpu.trace_stop"() : () -> ()
    %75 = arith.addf %67, %74 : vector<12x12x16xf32>
    %76 = vector.extract_strided_slice %2 {offsets = [1, 4, 0], sizes = [12, 12, 3], strides = [1, 1, 1]} : vector<16x16x3xbf16> to vector<12x12x3xbf16>
    %c9 = arith.constant 9 : index
    %c0_31 = arith.constant 0 : index
    %c0_32 = arith.constant 0 : index
    %77 = vector.load %arg2[%c9, %c0_31, %c0_32] : memref<25x3x16xbf16, #tpu.memory_space<vmem>>, vector<1x3x16xbf16>
    %78 = vector.shape_cast %77 : vector<1x3x16xbf16> to vector<3x16xbf16>
    %79 = vector.shape_cast %78 : vector<3x16xbf16> to vector<1x3x16xbf16>
    %80 = vector.shape_cast %79 : vector<1x3x16xbf16> to vector<1x3x16xbf16>
    %81 = vector.broadcast %80 : vector<1x3x16xbf16> to vector<12x3x16xbf16>
    "tpu.trace_start"() <{level = 10 : i32, message = "hwc,hco->hwo"}> : () -> ()
    %cst_33 = arith.constant dense<0.000000e+00> : vector<12x12x16xf32>
    %82 = tpu.matmul %76, %81, %cst_33 {dimension_numbers = #tpu.dot_dimension_numbers<[2], [1], [1], [2], [0, 0, 0, 1, 1, 2], [0], [0]>} : vector<12x12x3xbf16>, vector<12x3x16xbf16>, vector<12x12x16xf32> -> vector<12x12x16xf32>
    "tpu.trace_stop"() : () -> ()
    %83 = arith.addf %75, %82 : vector<12x12x16xf32>
    %84 = vector.extract_strided_slice %2 {offsets = [2, 0, 0], sizes = [12, 12, 3], strides = [1, 1, 1]} : vector<16x16x3xbf16> to vector<12x12x3xbf16>
    %c10 = arith.constant 10 : index
    %c0_34 = arith.constant 0 : index
    %c0_35 = arith.constant 0 : index
    %85 = vector.load %arg2[%c10, %c0_34, %c0_35] : memref<25x3x16xbf16, #tpu.memory_space<vmem>>, vector<1x3x16xbf16>
    %86 = vector.shape_cast %85 : vector<1x3x16xbf16> to vector<3x16xbf16>
    %87 = vector.shape_cast %86 : vector<3x16xbf16> to vector<1x3x16xbf16>
    %88 = vector.shape_cast %87 : vector<1x3x16xbf16> to vector<1x3x16xbf16>
    %89 = vector.broadcast %88 : vector<1x3x16xbf16> to vector<12x3x16xbf16>
    "tpu.trace_start"() <{level = 10 : i32, message = "hwc,hco->hwo"}> : () -> ()
    %cst_36 = arith.constant dense<0.000000e+00> : vector<12x12x16xf32>
    %90 = tpu.matmul %84, %89, %cst_36 {dimension_numbers = #tpu.dot_dimension_numbers<[2], [1], [1], [2], [0, 0, 0, 1, 1, 2], [0], [0]>} : vector<12x12x3xbf16>, vector<12x3x16xbf16>, vector<12x12x16xf32> -> vector<12x12x16xf32>
    "tpu.trace_stop"() : () -> ()
    %91 = arith.addf %83, %90 : vector<12x12x16xf32>
    %92 = vector.extract_strided_slice %2 {offsets = [2, 1, 0], sizes = [12, 12, 3], strides = [1, 1, 1]} : vector<16x16x3xbf16> to vector<12x12x3xbf16>
    %c11 = arith.constant 11 : index
    %c0_37 = arith.constant 0 : index
    %c0_38 = arith.constant 0 : index
    %93 = vector.load %arg2[%c11, %c0_37, %c0_38] : memref<25x3x16xbf16, #tpu.memory_space<vmem>>, vector<1x3x16xbf16>
    %94 = vector.shape_cast %93 : vector<1x3x16xbf16> to vector<3x16xbf16>
    %95 = vector.shape_cast %94 : vector<3x16xbf16> to vector<1x3x16xbf16>
    %96 = vector.shape_cast %95 : vector<1x3x16xbf16> to vector<1x3x16xbf16>
    %97 = vector.broadcast %96 : vector<1x3x16xbf16> to vector<12x3x16xbf16>
    "tpu.trace_start"() <{level = 10 : i32, message = "hwc,hco->hwo"}> : () -> ()
    %cst_39 = arith.constant dense<0.000000e+00> : vector<12x12x16xf32>
    %98 = tpu.matmul %92, %97, %cst_39 {dimension_numbers = #tpu.dot_dimension_numbers<[2], [1], [1], [2], [0, 0, 0, 1, 1, 2], [0], [0]>} : vector<12x12x3xbf16>, vector<12x3x16xbf16>, vector<12x12x16xf32> -> vector<12x12x16xf32>
    "tpu.trace_stop"() : () -> ()
    %99 = arith.addf %91, %98 : vector<12x12x16xf32>
    %100 = vector.extract_strided_slice %2 {offsets = [2, 2, 0], sizes = [12, 12, 3], strides = [1, 1, 1]} : vector<16x16x3xbf16> to vector<12x12x3xbf16>
    %c12 = arith.constant 12 : index
    %c0_40 = arith.constant 0 : index
    %c0_41 = arith.constant 0 : index
    %101 = vector.load %arg2[%c12, %c0_40, %c0_41] : memref<25x3x16xbf16, #tpu.memory_space<vmem>>, vector<1x3x16xbf16>
    %102 = vector.shape_cast %101 : vector<1x3x16xbf16> to vector<3x16xbf16>
    %103 = vector.shape_cast %102 : vector<3x16xbf16> to vector<1x3x16xbf16>
    %104 = vector.shape_cast %103 : vector<1x3x16xbf16> to vector<1x3x16xbf16>
    %105 = vector.broadcast %104 : vector<1x3x16xbf16> to vector<12x3x16xbf16>
    "tpu.trace_start"() <{level = 10 : i32, message = "hwc,hco->hwo"}> : () -> ()
    %cst_42 = arith.constant dense<0.000000e+00> : vector<12x12x16xf32>
    %106 = tpu.matmul %100, %105, %cst_42 {dimension_numbers = #tpu.dot_dimension_numbers<[2], [1], [1], [2], [0, 0, 0, 1, 1, 2], [0], [0]>} : vector<12x12x3xbf16>, vector<12x3x16xbf16>, vector<12x12x16xf32> -> vector<12x12x16xf32>
    "tpu.trace_stop"() : () -> ()
    %107 = arith.addf %99, %106 : vector<12x12x16xf32>
    %108 = vector.extract_strided_slice %2 {offsets = [2, 3, 0], sizes = [12, 12, 3], strides = [1, 1, 1]} : vector<16x16x3xbf16> to vector<12x12x3xbf16>
    %c13 = arith.constant 13 : index
    %c0_43 = arith.constant 0 : index
    %c0_44 = arith.constant 0 : index
    %109 = vector.load %arg2[%c13, %c0_43, %c0_44] : memref<25x3x16xbf16, #tpu.memory_space<vmem>>, vector<1x3x16xbf16>
    %110 = vector.shape_cast %109 : vector<1x3x16xbf16> to vector<3x16xbf16>
    %111 = vector.shape_cast %110 : vector<3x16xbf16> to vector<1x3x16xbf16>
    %112 = vector.shape_cast %111 : vector<1x3x16xbf16> to vector<1x3x16xbf16>
    %113 = vector.broadcast %112 : vector<1x3x16xbf16> to vector<12x3x16xbf16>
    "tpu.trace_start"() <{level = 10 : i32, message = "hwc,hco->hwo"}> : () -> ()
    %cst_45 = arith.constant dense<0.000000e+00> : vector<12x12x16xf32>
    %114 = tpu.matmul %108, %113, %cst_45 {dimension_numbers = #tpu.dot_dimension_numbers<[2], [1], [1], [2], [0, 0, 0, 1, 1, 2], [0], [0]>} : vector<12x12x3xbf16>, vector<12x3x16xbf16>, vector<12x12x16xf32> -> vector<12x12x16xf32>
    "tpu.trace_stop"() : () -> ()
    %115 = arith.addf %107, %114 : vector<12x12x16xf32>
    %116 = vector.extract_strided_slice %2 {offsets = [2, 4, 0], sizes = [12, 12, 3], strides = [1, 1, 1]} : vector<16x16x3xbf16> to vector<12x12x3xbf16>
    %c14 = arith.constant 14 : index
    %c0_46 = arith.constant 0 : index
    %c0_47 = arith.constant 0 : index
    %117 = vector.load %arg2[%c14, %c0_46, %c0_47] : memref<25x3x16xbf16, #tpu.memory_space<vmem>>, vector<1x3x16xbf16>
    %118 = vector.shape_cast %117 : vector<1x3x16xbf16> to vector<3x16xbf16>
    %119 = vector.shape_cast %118 : vector<3x16xbf16> to vector<1x3x16xbf16>
    %120 = vector.shape_cast %119 : vector<1x3x16xbf16> to vector<1x3x16xbf16>
    %121 = vector.broadcast %120 : vector<1x3x16xbf16> to vector<12x3x16xbf16>
    "tpu.trace_start"() <{level = 10 : i32, message = "hwc,hco->hwo"}> : () -> ()
    %cst_48 = arith.constant dense<0.000000e+00> : vector<12x12x16xf32>
    %122 = tpu.matmul %116, %121, %cst_48 {dimension_numbers = #tpu.dot_dimension_numbers<[2], [1], [1], [2], [0, 0, 0, 1, 1, 2], [0], [0]>} : vector<12x12x3xbf16>, vector<12x3x16xbf16>, vector<12x12x16xf32> -> vector<12x12x16xf32>
    "tpu.trace_stop"() : () -> ()
    %123 = arith.addf %115, %122 : vector<12x12x16xf32>
    %124 = vector.extract_strided_slice %2 {offsets = [3, 0, 0], sizes = [12, 12, 3], strides = [1, 1, 1]} : vector<16x16x3xbf16> to vector<12x12x3xbf16>
    %c15 = arith.constant 15 : index
    %c0_49 = arith.constant 0 : index
    %c0_50 = arith.constant 0 : index
    %125 = vector.load %arg2[%c15, %c0_49, %c0_50] : memref<25x3x16xbf16, #tpu.memory_space<vmem>>, vector<1x3x16xbf16>
    %126 = vector.shape_cast %125 : vector<1x3x16xbf16> to vector<3x16xbf16>
    %127 = vector.shape_cast %126 : vector<3x16xbf16> to vector<1x3x16xbf16>
    %128 = vector.shape_cast %127 : vector<1x3x16xbf16> to vector<1x3x16xbf16>
    %129 = vector.broadcast %128 : vector<1x3x16xbf16> to vector<12x3x16xbf16>
    "tpu.trace_start"() <{level = 10 : i32, message = "hwc,hco->hwo"}> : () -> ()
    %cst_51 = arith.constant dense<0.000000e+00> : vector<12x12x16xf32>
    %130 = tpu.matmul %124, %129, %cst_51 {dimension_numbers = #tpu.dot_dimension_numbers<[2], [1], [1], [2], [0, 0, 0, 1, 1, 2], [0], [0]>} : vector<12x12x3xbf16>, vector<12x3x16xbf16>, vector<12x12x16xf32> -> vector<12x12x16xf32>
    "tpu.trace_stop"() : () -> ()
    %131 = arith.addf %123, %130 : vector<12x12x16xf32>
    %132 = vector.extract_strided_slice %2 {offsets = [3, 1, 0], sizes = [12, 12, 3], strides = [1, 1, 1]} : vector<16x16x3xbf16> to vector<12x12x3xbf16>
    %c16 = arith.constant 16 : index
    %c0_52 = arith.constant 0 : index
    %c0_53 = arith.constant 0 : index
    %133 = vector.load %arg2[%c16, %c0_52, %c0_53] : memref<25x3x16xbf16, #tpu.memory_space<vmem>>, vector<1x3x16xbf16>
    %134 = vector.shape_cast %133 : vector<1x3x16xbf16> to vector<3x16xbf16>
    %135 = vector.shape_cast %134 : vector<3x16xbf16> to vector<1x3x16xbf16>
    %136 = vector.shape_cast %135 : vector<1x3x16xbf16> to vector<1x3x16xbf16>
    %137 = vector.broadcast %136 : vector<1x3x16xbf16> to vector<12x3x16xbf16>
    "tpu.trace_start"() <{level = 10 : i32, message = "hwc,hco->hwo"}> : () -> ()
    %cst_54 = arith.constant dense<0.000000e+00> : vector<12x12x16xf32>
    %138 = tpu.matmul %132, %137, %cst_54 {dimension_numbers = #tpu.dot_dimension_numbers<[2], [1], [1], [2], [0, 0, 0, 1, 1, 2], [0], [0]>} : vector<12x12x3xbf16>, vector<12x3x16xbf16>, vector<12x12x16xf32> -> vector<12x12x16xf32>
    "tpu.trace_stop"() : () -> ()
    %139 = arith.addf %131, %138 : vector<12x12x16xf32>
    %140 = vector.extract_strided_slice %2 {offsets = [3, 2, 0], sizes = [12, 12, 3], strides = [1, 1, 1]} : vector<16x16x3xbf16> to vector<12x12x3xbf16>
    %c17 = arith.constant 17 : index
    %c0_55 = arith.constant 0 : index
    %c0_56 = arith.constant 0 : index
    %141 = vector.load %arg2[%c17, %c0_55, %c0_56] : memref<25x3x16xbf16, #tpu.memory_space<vmem>>, vector<1x3x16xbf16>
    %142 = vector.shape_cast %141 : vector<1x3x16xbf16> to vector<3x16xbf16>
    %143 = vector.shape_cast %142 : vector<3x16xbf16> to vector<1x3x16xbf16>
    %144 = vector.shape_cast %143 : vector<1x3x16xbf16> to vector<1x3x16xbf16>
    %145 = vector.broadcast %144 : vector<1x3x16xbf16> to vector<12x3x16xbf16>
    "tpu.trace_start"() <{level = 10 : i32, message = "hwc,hco->hwo"}> : () -> ()
    %cst_57 = arith.constant dense<0.000000e+00> : vector<12x12x16xf32>
    %146 = tpu.matmul %140, %145, %cst_57 {dimension_numbers = #tpu.dot_dimension_numbers<[2], [1], [1], [2], [0, 0, 0, 1, 1, 2], [0], [0]>} : vector<12x12x3xbf16>, vector<12x3x16xbf16>, vector<12x12x16xf32> -> vector<12x12x16xf32>
    "tpu.trace_stop"() : () -> ()
    %147 = arith.addf %139, %146 : vector<12x12x16xf32>
    %148 = vector.extract_strided_slice %2 {offsets = [3, 3, 0], sizes = [12, 12, 3], strides = [1, 1, 1]} : vector<16x16x3xbf16> to vector<12x12x3xbf16>
    %c18 = arith.constant 18 : index
    %c0_58 = arith.constant 0 : index
    %c0_59 = arith.constant 0 : index
    %149 = vector.load %arg2[%c18, %c0_58, %c0_59] : memref<25x3x16xbf16, #tpu.memory_space<vmem>>, vector<1x3x16xbf16>
    %150 = vector.shape_cast %149 : vector<1x3x16xbf16> to vector<3x16xbf16>
    %151 = vector.shape_cast %150 : vector<3x16xbf16> to vector<1x3x16xbf16>
    %152 = vector.shape_cast %151 : vector<1x3x16xbf16> to vector<1x3x16xbf16>
    %153 = vector.broadcast %152 : vector<1x3x16xbf16> to vector<12x3x16xbf16>
    "tpu.trace_start"() <{level = 10 : i32, message = "hwc,hco->hwo"}> : () -> ()
    %cst_60 = arith.constant dense<0.000000e+00> : vector<12x12x16xf32>
    %154 = tpu.matmul %148, %153, %cst_60 {dimension_numbers = #tpu.dot_dimension_numbers<[2], [1], [1], [2], [0, 0, 0, 1, 1, 2], [0], [0]>} : vector<12x12x3xbf16>, vector<12x3x16xbf16>, vector<12x12x16xf32> -> vector<12x12x16xf32>
    "tpu.trace_stop"() : () -> ()
    %155 = arith.addf %147, %154 : vector<12x12x16xf32>
    %156 = vector.extract_strided_slice %2 {offsets = [3, 4, 0], sizes = [12, 12, 3], strides = [1, 1, 1]} : vector<16x16x3xbf16> to vector<12x12x3xbf16>
    %c19 = arith.constant 19 : index
    %c0_61 = arith.constant 0 : index
    %c0_62 = arith.constant 0 : index
    %157 = vector.load %arg2[%c19, %c0_61, %c0_62] : memref<25x3x16xbf16, #tpu.memory_space<vmem>>, vector<1x3x16xbf16>
    %158 = vector.shape_cast %157 : vector<1x3x16xbf16> to vector<3x16xbf16>
    %159 = vector.shape_cast %158 : vector<3x16xbf16> to vector<1x3x16xbf16>
    %160 = vector.shape_cast %159 : vector<1x3x16xbf16> to vector<1x3x16xbf16>
    %161 = vector.broadcast %160 : vector<1x3x16xbf16> to vector<12x3x16xbf16>
    "tpu.trace_start"() <{level = 10 : i32, message = "hwc,hco->hwo"}> : () -> ()
    %cst_63 = arith.constant dense<0.000000e+00> : vector<12x12x16xf32>
    %162 = tpu.matmul %156, %161, %cst_63 {dimension_numbers = #tpu.dot_dimension_numbers<[2], [1], [1], [2], [0, 0, 0, 1, 1, 2], [0], [0]>} : vector<12x12x3xbf16>, vector<12x3x16xbf16>, vector<12x12x16xf32> -> vector<12x12x16xf32>
    "tpu.trace_stop"() : () -> ()
    %163 = arith.addf %155, %162 : vector<12x12x16xf32>
    %164 = vector.extract_strided_slice %2 {offsets = [4, 0, 0], sizes = [12, 12, 3], strides = [1, 1, 1]} : vector<16x16x3xbf16> to vector<12x12x3xbf16>
    %c20 = arith.constant 20 : index
    %c0_64 = arith.constant 0 : index
    %c0_65 = arith.constant 0 : index
    %165 = vector.load %arg2[%c20, %c0_64, %c0_65] : memref<25x3x16xbf16, #tpu.memory_space<vmem>>, vector<1x3x16xbf16>
    %166 = vector.shape_cast %165 : vector<1x3x16xbf16> to vector<3x16xbf16>
    %167 = vector.shape_cast %166 : vector<3x16xbf16> to vector<1x3x16xbf16>
    %168 = vector.shape_cast %167 : vector<1x3x16xbf16> to vector<1x3x16xbf16>
    %169 = vector.broadcast %168 : vector<1x3x16xbf16> to vector<12x3x16xbf16>
    "tpu.trace_start"() <{level = 10 : i32, message = "hwc,hco->hwo"}> : () -> ()
    %cst_66 = arith.constant dense<0.000000e+00> : vector<12x12x16xf32>
    %170 = tpu.matmul %164, %169, %cst_66 {dimension_numbers = #tpu.dot_dimension_numbers<[2], [1], [1], [2], [0, 0, 0, 1, 1, 2], [0], [0]>} : vector<12x12x3xbf16>, vector<12x3x16xbf16>, vector<12x12x16xf32> -> vector<12x12x16xf32>
    "tpu.trace_stop"() : () -> ()
    %171 = arith.addf %163, %170 : vector<12x12x16xf32>
    %172 = vector.extract_strided_slice %2 {offsets = [4, 1, 0], sizes = [12, 12, 3], strides = [1, 1, 1]} : vector<16x16x3xbf16> to vector<12x12x3xbf16>
    %c21 = arith.constant 21 : index
    %c0_67 = arith.constant 0 : index
    %c0_68 = arith.constant 0 : index
    %173 = vector.load %arg2[%c21, %c0_67, %c0_68] : memref<25x3x16xbf16, #tpu.memory_space<vmem>>, vector<1x3x16xbf16>
    %174 = vector.shape_cast %173 : vector<1x3x16xbf16> to vector<3x16xbf16>
    %175 = vector.shape_cast %174 : vector<3x16xbf16> to vector<1x3x16xbf16>
    %176 = vector.shape_cast %175 : vector<1x3x16xbf16> to vector<1x3x16xbf16>
    %177 = vector.broadcast %176 : vector<1x3x16xbf16> to vector<12x3x16xbf16>
    "tpu.trace_start"() <{level = 10 : i32, message = "hwc,hco->hwo"}> : () -> ()
    %cst_69 = arith.constant dense<0.000000e+00> : vector<12x12x16xf32>
    %178 = tpu.matmul %172, %177, %cst_69 {dimension_numbers = #tpu.dot_dimension_numbers<[2], [1], [1], [2], [0, 0, 0, 1, 1, 2], [0], [0]>} : vector<12x12x3xbf16>, vector<12x3x16xbf16>, vector<12x12x16xf32> -> vector<12x12x16xf32>
    "tpu.trace_stop"() : () -> ()
    %179 = arith.addf %171, %178 : vector<12x12x16xf32>
    %180 = vector.extract_strided_slice %2 {offsets = [4, 2, 0], sizes = [12, 12, 3], strides = [1, 1, 1]} : vector<16x16x3xbf16> to vector<12x12x3xbf16>
    %c22 = arith.constant 22 : index
    %c0_70 = arith.constant 0 : index
    %c0_71 = arith.constant 0 : index
    %181 = vector.load %arg2[%c22, %c0_70, %c0_71] : memref<25x3x16xbf16, #tpu.memory_space<vmem>>, vector<1x3x16xbf16>
    %182 = vector.shape_cast %181 : vector<1x3x16xbf16> to vector<3x16xbf16>
    %183 = vector.shape_cast %182 : vector<3x16xbf16> to vector<1x3x16xbf16>
    %184 = vector.shape_cast %183 : vector<1x3x16xbf16> to vector<1x3x16xbf16>
    %185 = vector.broadcast %184 : vector<1x3x16xbf16> to vector<12x3x16xbf16>
    "tpu.trace_start"() <{level = 10 : i32, message = "hwc,hco->hwo"}> : () -> ()
    %cst_72 = arith.constant dense<0.000000e+00> : vector<12x12x16xf32>
    %186 = tpu.matmul %180, %185, %cst_72 {dimension_numbers = #tpu.dot_dimension_numbers<[2], [1], [1], [2], [0, 0, 0, 1, 1, 2], [0], [0]>} : vector<12x12x3xbf16>, vector<12x3x16xbf16>, vector<12x12x16xf32> -> vector<12x12x16xf32>
    "tpu.trace_stop"() : () -> ()
    %187 = arith.addf %179, %186 : vector<12x12x16xf32>
    %188 = vector.extract_strided_slice %2 {offsets = [4, 3, 0], sizes = [12, 12, 3], strides = [1, 1, 1]} : vector<16x16x3xbf16> to vector<12x12x3xbf16>
    %c23 = arith.constant 23 : index
    %c0_73 = arith.constant 0 : index
    %c0_74 = arith.constant 0 : index
    %189 = vector.load %arg2[%c23, %c0_73, %c0_74] : memref<25x3x16xbf16, #tpu.memory_space<vmem>>, vector<1x3x16xbf16>
    %190 = vector.shape_cast %189 : vector<1x3x16xbf16> to vector<3x16xbf16>
    %191 = vector.shape_cast %190 : vector<3x16xbf16> to vector<1x3x16xbf16>
    %192 = vector.shape_cast %191 : vector<1x3x16xbf16> to vector<1x3x16xbf16>
    %193 = vector.broadcast %192 : vector<1x3x16xbf16> to vector<12x3x16xbf16>
    "tpu.trace_start"() <{level = 10 : i32, message = "hwc,hco->hwo"}> : () -> ()
    %cst_75 = arith.constant dense<0.000000e+00> : vector<12x12x16xf32>
    %194 = tpu.matmul %188, %193, %cst_75 {dimension_numbers = #tpu.dot_dimension_numbers<[2], [1], [1], [2], [0, 0, 0, 1, 1, 2], [0], [0]>} : vector<12x12x3xbf16>, vector<12x3x16xbf16>, vector<12x12x16xf32> -> vector<12x12x16xf32>
    "tpu.trace_stop"() : () -> ()
    %195 = arith.addf %187, %194 : vector<12x12x16xf32>
    %196 = vector.extract_strided_slice %2 {offsets = [4, 4, 0], sizes = [12, 12, 3], strides = [1, 1, 1]} : vector<16x16x3xbf16> to vector<12x12x3xbf16>
    %c24 = arith.constant 24 : index
    %c0_76 = arith.constant 0 : index
    %c0_77 = arith.constant 0 : index
    %197 = vector.load %arg2[%c24, %c0_76, %c0_77] : memref<25x3x16xbf16, #tpu.memory_space<vmem>>, vector<1x3x16xbf16>
    %198 = vector.shape_cast %197 : vector<1x3x16xbf16> to vector<3x16xbf16>
    %199 = vector.shape_cast %198 : vector<3x16xbf16> to vector<1x3x16xbf16>
    %200 = vector.shape_cast %199 : vector<1x3x16xbf16> to vector<1x3x16xbf16>
    %201 = vector.broadcast %200 : vector<1x3x16xbf16> to vector<12x3x16xbf16>
    "tpu.trace_start"() <{level = 10 : i32, message = "hwc,hco->hwo"}> : () -> ()
    %cst_78 = arith.constant dense<0.000000e+00> : vector<12x12x16xf32>
    %202 = tpu.matmul %196, %201, %cst_78 {dimension_numbers = #tpu.dot_dimension_numbers<[2], [1], [1], [2], [0, 0, 0, 1, 1, 2], [0], [0]>} : vector<12x12x3xbf16>, vector<12x3x16xbf16>, vector<12x12x16xf32> -> vector<12x12x16xf32>
    "tpu.trace_stop"() : () -> ()
    %203 = arith.addf %195, %202 : vector<12x12x16xf32>
    %c0_79 = arith.constant 0 : index
    %c0_80 = arith.constant 0 : index
    %204 = vector.load %arg3[%c0_79, %c0_80] : memref<1x16xf32, #tpu.memory_space<vmem>>, vector<1x16xf32>
    %205 = vector.shape_cast %204 : vector<1x16xf32> to vector<1x1x16xf32>
    %206 = vector.broadcast %205 : vector<1x1x16xf32> to vector<12x12x16xf32>
    %207 = arith.addf %203, %206 : vector<12x12x16xf32>
    %cst_81 = arith.constant 0.000000e+00 : f32
    %208 = vector.broadcast %cst_81 : f32 to vector<12x12x16xf32>
    %209 = arith.maximumf %207, %208 : vector<12x12x16xf32>
    %210 = arith.truncf %209 : vector<12x12x16xf32> to vector<12x12x16xbf16>
    %cst_82 = arith.constant 0.000000e+00 : f32
    %211 = vector.broadcast %cst_82 : f32 to vector<8x8x32xf32>
    %212 = vector.extract_strided_slice %210 {offsets = [0, 0, 0], sizes = [8, 8, 16], strides = [1, 1, 1]} : vector<12x12x16xbf16> to vector<8x8x16xbf16>
    %c0_83 = arith.constant 0 : index
    %c0_84 = arith.constant 0 : index
    %c0_85 = arith.constant 0 : index
    %213 = vector.load %arg4[%c0_83, %c0_84, %c0_85] : memref<25x16x32xbf16, #tpu.memory_space<vmem>>, vector<1x16x32xbf16>
    %214 = vector.shape_cast %213 : vector<1x16x32xbf16> to vector<16x32xbf16>
    %215 = vector.shape_cast %214 : vector<16x32xbf16> to vector<1x16x32xbf16>
    %216 = vector.shape_cast %215 : vector<1x16x32xbf16> to vector<1x16x32xbf16>
    %217 = vector.broadcast %216 : vector<1x16x32xbf16> to vector<8x16x32xbf16>
    "tpu.trace_start"() <{level = 10 : i32, message = "hwc,hco->hwo"}> : () -> ()
    %cst_86 = arith.constant dense<0.000000e+00> : vector<8x8x32xf32>
    %218 = tpu.matmul %212, %217, %cst_86 {dimension_numbers = #tpu.dot_dimension_numbers<[2], [1], [1], [2], [0, 0, 0, 1, 1, 2], [0], [0]>} : vector<8x8x16xbf16>, vector<8x16x32xbf16>, vector<8x8x32xf32> -> vector<8x8x32xf32>
    "tpu.trace_stop"() : () -> ()
    %219 = arith.addf %211, %218 : vector<8x8x32xf32>
    %220 = vector.extract_strided_slice %210 {offsets = [0, 1, 0], sizes = [8, 8, 16], strides = [1, 1, 1]} : vector<12x12x16xbf16> to vector<8x8x16xbf16>
    %c1_87 = arith.constant 1 : index
    %c0_88 = arith.constant 0 : index
    %c0_89 = arith.constant 0 : index
    %221 = vector.load %arg4[%c1_87, %c0_88, %c0_89] : memref<25x16x32xbf16, #tpu.memory_space<vmem>>, vector<1x16x32xbf16>
    %222 = vector.shape_cast %221 : vector<1x16x32xbf16> to vector<16x32xbf16>
    %223 = vector.shape_cast %222 : vector<16x32xbf16> to vector<1x16x32xbf16>
    %224 = vector.shape_cast %223 : vector<1x16x32xbf16> to vector<1x16x32xbf16>
    %225 = vector.broadcast %224 : vector<1x16x32xbf16> to vector<8x16x32xbf16>
    "tpu.trace_start"() <{level = 10 : i32, message = "hwc,hco->hwo"}> : () -> ()
    %cst_90 = arith.constant dense<0.000000e+00> : vector<8x8x32xf32>
    %226 = tpu.matmul %220, %225, %cst_90 {dimension_numbers = #tpu.dot_dimension_numbers<[2], [1], [1], [2], [0, 0, 0, 1, 1, 2], [0], [0]>} : vector<8x8x16xbf16>, vector<8x16x32xbf16>, vector<8x8x32xf32> -> vector<8x8x32xf32>
    "tpu.trace_stop"() : () -> ()
    %227 = arith.addf %219, %226 : vector<8x8x32xf32>
    %228 = vector.extract_strided_slice %210 {offsets = [0, 2, 0], sizes = [8, 8, 16], strides = [1, 1, 1]} : vector<12x12x16xbf16> to vector<8x8x16xbf16>
    %c2_91 = arith.constant 2 : index
    %c0_92 = arith.constant 0 : index
    %c0_93 = arith.constant 0 : index
    %229 = vector.load %arg4[%c2_91, %c0_92, %c0_93] : memref<25x16x32xbf16, #tpu.memory_space<vmem>>, vector<1x16x32xbf16>
    %230 = vector.shape_cast %229 : vector<1x16x32xbf16> to vector<16x32xbf16>
    %231 = vector.shape_cast %230 : vector<16x32xbf16> to vector<1x16x32xbf16>
    %232 = vector.shape_cast %231 : vector<1x16x32xbf16> to vector<1x16x32xbf16>
    %233 = vector.broadcast %232 : vector<1x16x32xbf16> to vector<8x16x32xbf16>
    "tpu.trace_start"() <{level = 10 : i32, message = "hwc,hco->hwo"}> : () -> ()
    %cst_94 = arith.constant dense<0.000000e+00> : vector<8x8x32xf32>
    %234 = tpu.matmul %228, %233, %cst_94 {dimension_numbers = #tpu.dot_dimension_numbers<[2], [1], [1], [2], [0, 0, 0, 1, 1, 2], [0], [0]>} : vector<8x8x16xbf16>, vector<8x16x32xbf16>, vector<8x8x32xf32> -> vector<8x8x32xf32>
    "tpu.trace_stop"() : () -> ()
    %235 = arith.addf %227, %234 : vector<8x8x32xf32>
    %236 = vector.extract_strided_slice %210 {offsets = [0, 3, 0], sizes = [8, 8, 16], strides = [1, 1, 1]} : vector<12x12x16xbf16> to vector<8x8x16xbf16>
    %c3_95 = arith.constant 3 : index
    %c0_96 = arith.constant 0 : index
    %c0_97 = arith.constant 0 : index
    %237 = vector.load %arg4[%c3_95, %c0_96, %c0_97] : memref<25x16x32xbf16, #tpu.memory_space<vmem>>, vector<1x16x32xbf16>
    %238 = vector.shape_cast %237 : vector<1x16x32xbf16> to vector<16x32xbf16>
    %239 = vector.shape_cast %238 : vector<16x32xbf16> to vector<1x16x32xbf16>
    %240 = vector.shape_cast %239 : vector<1x16x32xbf16> to vector<1x16x32xbf16>
    %241 = vector.broadcast %240 : vector<1x16x32xbf16> to vector<8x16x32xbf16>
    "tpu.trace_start"() <{level = 10 : i32, message = "hwc,hco->hwo"}> : () -> ()
    %cst_98 = arith.constant dense<0.000000e+00> : vector<8x8x32xf32>
    %242 = tpu.matmul %236, %241, %cst_98 {dimension_numbers = #tpu.dot_dimension_numbers<[2], [1], [1], [2], [0, 0, 0, 1, 1, 2], [0], [0]>} : vector<8x8x16xbf16>, vector<8x16x32xbf16>, vector<8x8x32xf32> -> vector<8x8x32xf32>
    "tpu.trace_stop"() : () -> ()
    %243 = arith.addf %235, %242 : vector<8x8x32xf32>
    %244 = vector.extract_strided_slice %210 {offsets = [0, 4, 0], sizes = [8, 8, 16], strides = [1, 1, 1]} : vector<12x12x16xbf16> to vector<8x8x16xbf16>
    %c4_99 = arith.constant 4 : index
    %c0_100 = arith.constant 0 : index
    %c0_101 = arith.constant 0 : index
    %245 = vector.load %arg4[%c4_99, %c0_100, %c0_101] : memref<25x16x32xbf16, #tpu.memory_space<vmem>>, vector<1x16x32xbf16>
    %246 = vector.shape_cast %245 : vector<1x16x32xbf16> to vector<16x32xbf16>
    %247 = vector.shape_cast %246 : vector<16x32xbf16> to vector<1x16x32xbf16>
    %248 = vector.shape_cast %247 : vector<1x16x32xbf16> to vector<1x16x32xbf16>
    %249 = vector.broadcast %248 : vector<1x16x32xbf16> to vector<8x16x32xbf16>
    "tpu.trace_start"() <{level = 10 : i32, message = "hwc,hco->hwo"}> : () -> ()
    %cst_102 = arith.constant dense<0.000000e+00> : vector<8x8x32xf32>
    %250 = tpu.matmul %244, %249, %cst_102 {dimension_numbers = #tpu.dot_dimension_numbers<[2], [1], [1], [2], [0, 0, 0, 1, 1, 2], [0], [0]>} : vector<8x8x16xbf16>, vector<8x16x32xbf16>, vector<8x8x32xf32> -> vector<8x8x32xf32>
    "tpu.trace_stop"() : () -> ()
    %251 = arith.addf %243, %250 : vector<8x8x32xf32>
    %252 = vector.extract_strided_slice %210 {offsets = [1, 0, 0], sizes = [8, 8, 16], strides = [1, 1, 1]} : vector<12x12x16xbf16> to vector<8x8x16xbf16>
    %c5_103 = arith.constant 5 : index
    %c0_104 = arith.constant 0 : index
    %c0_105 = arith.constant 0 : index
    %253 = vector.load %arg4[%c5_103, %c0_104, %c0_105] : memref<25x16x32xbf16, #tpu.memory_space<vmem>>, vector<1x16x32xbf16>
    %254 = vector.shape_cast %253 : vector<1x16x32xbf16> to vector<16x32xbf16>
    %255 = vector.shape_cast %254 : vector<16x32xbf16> to vector<1x16x32xbf16>
    %256 = vector.shape_cast %255 : vector<1x16x32xbf16> to vector<1x16x32xbf16>
    %257 = vector.broadcast %256 : vector<1x16x32xbf16> to vector<8x16x32xbf16>
    "tpu.trace_start"() <{level = 10 : i32, message = "hwc,hco->hwo"}> : () -> ()
    %cst_106 = arith.constant dense<0.000000e+00> : vector<8x8x32xf32>
    %258 = tpu.matmul %252, %257, %cst_106 {dimension_numbers = #tpu.dot_dimension_numbers<[2], [1], [1], [2], [0, 0, 0, 1, 1, 2], [0], [0]>} : vector<8x8x16xbf16>, vector<8x16x32xbf16>, vector<8x8x32xf32> -> vector<8x8x32xf32>
    "tpu.trace_stop"() : () -> ()
    %259 = arith.addf %251, %258 : vector<8x8x32xf32>
    %260 = vector.extract_strided_slice %210 {offsets = [1, 1, 0], sizes = [8, 8, 16], strides = [1, 1, 1]} : vector<12x12x16xbf16> to vector<8x8x16xbf16>
    %c6_107 = arith.constant 6 : index
    %c0_108 = arith.constant 0 : index
    %c0_109 = arith.constant 0 : index
    %261 = vector.load %arg4[%c6_107, %c0_108, %c0_109] : memref<25x16x32xbf16, #tpu.memory_space<vmem>>, vector<1x16x32xbf16>
    %262 = vector.shape_cast %261 : vector<1x16x32xbf16> to vector<16x32xbf16>
    %263 = vector.shape_cast %262 : vector<16x32xbf16> to vector<1x16x32xbf16>
    %264 = vector.shape_cast %263 : vector<1x16x32xbf16> to vector<1x16x32xbf16>
    %265 = vector.broadcast %264 : vector<1x16x32xbf16> to vector<8x16x32xbf16>
    "tpu.trace_start"() <{level = 10 : i32, message = "hwc,hco->hwo"}> : () -> ()
    %cst_110 = arith.constant dense<0.000000e+00> : vector<8x8x32xf32>
    %266 = tpu.matmul %260, %265, %cst_110 {dimension_numbers = #tpu.dot_dimension_numbers<[2], [1], [1], [2], [0, 0, 0, 1, 1, 2], [0], [0]>} : vector<8x8x16xbf16>, vector<8x16x32xbf16>, vector<8x8x32xf32> -> vector<8x8x32xf32>
    "tpu.trace_stop"() : () -> ()
    %267 = arith.addf %259, %266 : vector<8x8x32xf32>
    %268 = vector.extract_strided_slice %210 {offsets = [1, 2, 0], sizes = [8, 8, 16], strides = [1, 1, 1]} : vector<12x12x16xbf16> to vector<8x8x16xbf16>
    %c7_111 = arith.constant 7 : index
    %c0_112 = arith.constant 0 : index
    %c0_113 = arith.constant 0 : index
    %269 = vector.load %arg4[%c7_111, %c0_112, %c0_113] : memref<25x16x32xbf16, #tpu.memory_space<vmem>>, vector<1x16x32xbf16>
    %270 = vector.shape_cast %269 : vector<1x16x32xbf16> to vector<16x32xbf16>
    %271 = vector.shape_cast %270 : vector<16x32xbf16> to vector<1x16x32xbf16>
    %272 = vector.shape_cast %271 : vector<1x16x32xbf16> to vector<1x16x32xbf16>
    %273 = vector.broadcast %272 : vector<1x16x32xbf16> to vector<8x16x32xbf16>
    "tpu.trace_start"() <{level = 10 : i32, message = "hwc,hco->hwo"}> : () -> ()
    %cst_114 = arith.constant dense<0.000000e+00> : vector<8x8x32xf32>
    %274 = tpu.matmul %268, %273, %cst_114 {dimension_numbers = #tpu.dot_dimension_numbers<[2], [1], [1], [2], [0, 0, 0, 1, 1, 2], [0], [0]>} : vector<8x8x16xbf16>, vector<8x16x32xbf16>, vector<8x8x32xf32> -> vector<8x8x32xf32>
    "tpu.trace_stop"() : () -> ()
    %275 = arith.addf %267, %274 : vector<8x8x32xf32>
    %276 = vector.extract_strided_slice %210 {offsets = [1, 3, 0], sizes = [8, 8, 16], strides = [1, 1, 1]} : vector<12x12x16xbf16> to vector<8x8x16xbf16>
    %c8_115 = arith.constant 8 : index
    %c0_116 = arith.constant 0 : index
    %c0_117 = arith.constant 0 : index
    %277 = vector.load %arg4[%c8_115, %c0_116, %c0_117] : memref<25x16x32xbf16, #tpu.memory_space<vmem>>, vector<1x16x32xbf16>
    %278 = vector.shape_cast %277 : vector<1x16x32xbf16> to vector<16x32xbf16>
    %279 = vector.shape_cast %278 : vector<16x32xbf16> to vector<1x16x32xbf16>
    %280 = vector.shape_cast %279 : vector<1x16x32xbf16> to vector<1x16x32xbf16>
    %281 = vector.broadcast %280 : vector<1x16x32xbf16> to vector<8x16x32xbf16>
    "tpu.trace_start"() <{level = 10 : i32, message = "hwc,hco->hwo"}> : () -> ()
    %cst_118 = arith.constant dense<0.000000e+00> : vector<8x8x32xf32>
    %282 = tpu.matmul %276, %281, %cst_118 {dimension_numbers = #tpu.dot_dimension_numbers<[2], [1], [1], [2], [0, 0, 0, 1, 1, 2], [0], [0]>} : vector<8x8x16xbf16>, vector<8x16x32xbf16>, vector<8x8x32xf32> -> vector<8x8x32xf32>
    "tpu.trace_stop"() : () -> ()
    %283 = arith.addf %275, %282 : vector<8x8x32xf32>
    %284 = vector.extract_strided_slice %210 {offsets = [1, 4, 0], sizes = [8, 8, 16], strides = [1, 1, 1]} : vector<12x12x16xbf16> to vector<8x8x16xbf16>
    %c9_119 = arith.constant 9 : index
    %c0_120 = arith.constant 0 : index
    %c0_121 = arith.constant 0 : index
    %285 = vector.load %arg4[%c9_119, %c0_120, %c0_121] : memref<25x16x32xbf16, #tpu.memory_space<vmem>>, vector<1x16x32xbf16>
    %286 = vector.shape_cast %285 : vector<1x16x32xbf16> to vector<16x32xbf16>
    %287 = vector.shape_cast %286 : vector<16x32xbf16> to vector<1x16x32xbf16>
    %288 = vector.shape_cast %287 : vector<1x16x32xbf16> to vector<1x16x32xbf16>
    %289 = vector.broadcast %288 : vector<1x16x32xbf16> to vector<8x16x32xbf16>
    "tpu.trace_start"() <{level = 10 : i32, message = "hwc,hco->hwo"}> : () -> ()
    %cst_122 = arith.constant dense<0.000000e+00> : vector<8x8x32xf32>
    %290 = tpu.matmul %284, %289, %cst_122 {dimension_numbers = #tpu.dot_dimension_numbers<[2], [1], [1], [2], [0, 0, 0, 1, 1, 2], [0], [0]>} : vector<8x8x16xbf16>, vector<8x16x32xbf16>, vector<8x8x32xf32> -> vector<8x8x32xf32>
    "tpu.trace_stop"() : () -> ()
    %291 = arith.addf %283, %290 : vector<8x8x32xf32>
    %292 = vector.extract_strided_slice %210 {offsets = [2, 0, 0], sizes = [8, 8, 16], strides = [1, 1, 1]} : vector<12x12x16xbf16> to vector<8x8x16xbf16>
    %c10_123 = arith.constant 10 : index
    %c0_124 = arith.constant 0 : index
    %c0_125 = arith.constant 0 : index
    %293 = vector.load %arg4[%c10_123, %c0_124, %c0_125] : memref<25x16x32xbf16, #tpu.memory_space<vmem>>, vector<1x16x32xbf16>
    %294 = vector.shape_cast %293 : vector<1x16x32xbf16> to vector<16x32xbf16>
    %295 = vector.shape_cast %294 : vector<16x32xbf16> to vector<1x16x32xbf16>
    %296 = vector.shape_cast %295 : vector<1x16x32xbf16> to vector<1x16x32xbf16>
    %297 = vector.broadcast %296 : vector<1x16x32xbf16> to vector<8x16x32xbf16>
    "tpu.trace_start"() <{level = 10 : i32, message = "hwc,hco->hwo"}> : () -> ()
    %cst_126 = arith.constant dense<0.000000e+00> : vector<8x8x32xf32>
    %298 = tpu.matmul %292, %297, %cst_126 {dimension_numbers = #tpu.dot_dimension_numbers<[2], [1], [1], [2], [0, 0, 0, 1, 1, 2], [0], [0]>} : vector<8x8x16xbf16>, vector<8x16x32xbf16>, vector<8x8x32xf32> -> vector<8x8x32xf32>
    "tpu.trace_stop"() : () -> ()
    %299 = arith.addf %291, %298 : vector<8x8x32xf32>
    %300 = vector.extract_strided_slice %210 {offsets = [2, 1, 0], sizes = [8, 8, 16], strides = [1, 1, 1]} : vector<12x12x16xbf16> to vector<8x8x16xbf16>
    %c11_127 = arith.constant 11 : index
    %c0_128 = arith.constant 0 : index
    %c0_129 = arith.constant 0 : index
    %301 = vector.load %arg4[%c11_127, %c0_128, %c0_129] : memref<25x16x32xbf16, #tpu.memory_space<vmem>>, vector<1x16x32xbf16>
    %302 = vector.shape_cast %301 : vector<1x16x32xbf16> to vector<16x32xbf16>
    %303 = vector.shape_cast %302 : vector<16x32xbf16> to vector<1x16x32xbf16>
    %304 = vector.shape_cast %303 : vector<1x16x32xbf16> to vector<1x16x32xbf16>
    %305 = vector.broadcast %304 : vector<1x16x32xbf16> to vector<8x16x32xbf16>
    "tpu.trace_start"() <{level = 10 : i32, message = "hwc,hco->hwo"}> : () -> ()
    %cst_130 = arith.constant dense<0.000000e+00> : vector<8x8x32xf32>
    %306 = tpu.matmul %300, %305, %cst_130 {dimension_numbers = #tpu.dot_dimension_numbers<[2], [1], [1], [2], [0, 0, 0, 1, 1, 2], [0], [0]>} : vector<8x8x16xbf16>, vector<8x16x32xbf16>, vector<8x8x32xf32> -> vector<8x8x32xf32>
    "tpu.trace_stop"() : () -> ()
    %307 = arith.addf %299, %306 : vector<8x8x32xf32>
    %308 = vector.extract_strided_slice %210 {offsets = [2, 2, 0], sizes = [8, 8, 16], strides = [1, 1, 1]} : vector<12x12x16xbf16> to vector<8x8x16xbf16>
    %c12_131 = arith.constant 12 : index
    %c0_132 = arith.constant 0 : index
    %c0_133 = arith.constant 0 : index
    %309 = vector.load %arg4[%c12_131, %c0_132, %c0_133] : memref<25x16x32xbf16, #tpu.memory_space<vmem>>, vector<1x16x32xbf16>
    %310 = vector.shape_cast %309 : vector<1x16x32xbf16> to vector<16x32xbf16>
    %311 = vector.shape_cast %310 : vector<16x32xbf16> to vector<1x16x32xbf16>
    %312 = vector.shape_cast %311 : vector<1x16x32xbf16> to vector<1x16x32xbf16>
    %313 = vector.broadcast %312 : vector<1x16x32xbf16> to vector<8x16x32xbf16>
    "tpu.trace_start"() <{level = 10 : i32, message = "hwc,hco->hwo"}> : () -> ()
    %cst_134 = arith.constant dense<0.000000e+00> : vector<8x8x32xf32>
    %314 = tpu.matmul %308, %313, %cst_134 {dimension_numbers = #tpu.dot_dimension_numbers<[2], [1], [1], [2], [0, 0, 0, 1, 1, 2], [0], [0]>} : vector<8x8x16xbf16>, vector<8x16x32xbf16>, vector<8x8x32xf32> -> vector<8x8x32xf32>
    "tpu.trace_stop"() : () -> ()
    %315 = arith.addf %307, %314 : vector<8x8x32xf32>
    %316 = vector.extract_strided_slice %210 {offsets = [2, 3, 0], sizes = [8, 8, 16], strides = [1, 1, 1]} : vector<12x12x16xbf16> to vector<8x8x16xbf16>
    %c13_135 = arith.constant 13 : index
    %c0_136 = arith.constant 0 : index
    %c0_137 = arith.constant 0 : index
    %317 = vector.load %arg4[%c13_135, %c0_136, %c0_137] : memref<25x16x32xbf16, #tpu.memory_space<vmem>>, vector<1x16x32xbf16>
    %318 = vector.shape_cast %317 : vector<1x16x32xbf16> to vector<16x32xbf16>
    %319 = vector.shape_cast %318 : vector<16x32xbf16> to vector<1x16x32xbf16>
    %320 = vector.shape_cast %319 : vector<1x16x32xbf16> to vector<1x16x32xbf16>
    %321 = vector.broadcast %320 : vector<1x16x32xbf16> to vector<8x16x32xbf16>
    "tpu.trace_start"() <{level = 10 : i32, message = "hwc,hco->hwo"}> : () -> ()
    %cst_138 = arith.constant dense<0.000000e+00> : vector<8x8x32xf32>
    %322 = tpu.matmul %316, %321, %cst_138 {dimension_numbers = #tpu.dot_dimension_numbers<[2], [1], [1], [2], [0, 0, 0, 1, 1, 2], [0], [0]>} : vector<8x8x16xbf16>, vector<8x16x32xbf16>, vector<8x8x32xf32> -> vector<8x8x32xf32>
    "tpu.trace_stop"() : () -> ()
    %323 = arith.addf %315, %322 : vector<8x8x32xf32>
    %324 = vector.extract_strided_slice %210 {offsets = [2, 4, 0], sizes = [8, 8, 16], strides = [1, 1, 1]} : vector<12x12x16xbf16> to vector<8x8x16xbf16>
    %c14_139 = arith.constant 14 : index
    %c0_140 = arith.constant 0 : index
    %c0_141 = arith.constant 0 : index
    %325 = vector.load %arg4[%c14_139, %c0_140, %c0_141] : memref<25x16x32xbf16, #tpu.memory_space<vmem>>, vector<1x16x32xbf16>
    %326 = vector.shape_cast %325 : vector<1x16x32xbf16> to vector<16x32xbf16>
    %327 = vector.shape_cast %326 : vector<16x32xbf16> to vector<1x16x32xbf16>
    %328 = vector.shape_cast %327 : vector<1x16x32xbf16> to vector<1x16x32xbf16>
    %329 = vector.broadcast %328 : vector<1x16x32xbf16> to vector<8x16x32xbf16>
    "tpu.trace_start"() <{level = 10 : i32, message = "hwc,hco->hwo"}> : () -> ()
    %cst_142 = arith.constant dense<0.000000e+00> : vector<8x8x32xf32>
    %330 = tpu.matmul %324, %329, %cst_142 {dimension_numbers = #tpu.dot_dimension_numbers<[2], [1], [1], [2], [0, 0, 0, 1, 1, 2], [0], [0]>} : vector<8x8x16xbf16>, vector<8x16x32xbf16>, vector<8x8x32xf32> -> vector<8x8x32xf32>
    "tpu.trace_stop"() : () -> ()
    %331 = arith.addf %323, %330 : vector<8x8x32xf32>
    %332 = vector.extract_strided_slice %210 {offsets = [3, 0, 0], sizes = [8, 8, 16], strides = [1, 1, 1]} : vector<12x12x16xbf16> to vector<8x8x16xbf16>
    %c15_143 = arith.constant 15 : index
    %c0_144 = arith.constant 0 : index
    %c0_145 = arith.constant 0 : index
    %333 = vector.load %arg4[%c15_143, %c0_144, %c0_145] : memref<25x16x32xbf16, #tpu.memory_space<vmem>>, vector<1x16x32xbf16>
    %334 = vector.shape_cast %333 : vector<1x16x32xbf16> to vector<16x32xbf16>
    %335 = vector.shape_cast %334 : vector<16x32xbf16> to vector<1x16x32xbf16>
    %336 = vector.shape_cast %335 : vector<1x16x32xbf16> to vector<1x16x32xbf16>
    %337 = vector.broadcast %336 : vector<1x16x32xbf16> to vector<8x16x32xbf16>
    "tpu.trace_start"() <{level = 10 : i32, message = "hwc,hco->hwo"}> : () -> ()
    %cst_146 = arith.constant dense<0.000000e+00> : vector<8x8x32xf32>
    %338 = tpu.matmul %332, %337, %cst_146 {dimension_numbers = #tpu.dot_dimension_numbers<[2], [1], [1], [2], [0, 0, 0, 1, 1, 2], [0], [0]>} : vector<8x8x16xbf16>, vector<8x16x32xbf16>, vector<8x8x32xf32> -> vector<8x8x32xf32>
    "tpu.trace_stop"() : () -> ()
    %339 = arith.addf %331, %338 : vector<8x8x32xf32>
    %340 = vector.extract_strided_slice %210 {offsets = [3, 1, 0], sizes = [8, 8, 16], strides = [1, 1, 1]} : vector<12x12x16xbf16> to vector<8x8x16xbf16>
    %c16_147 = arith.constant 16 : index
    %c0_148 = arith.constant 0 : index
    %c0_149 = arith.constant 0 : index
    %341 = vector.load %arg4[%c16_147, %c0_148, %c0_149] : memref<25x16x32xbf16, #tpu.memory_space<vmem>>, vector<1x16x32xbf16>
    %342 = vector.shape_cast %341 : vector<1x16x32xbf16> to vector<16x32xbf16>
    %343 = vector.shape_cast %342 : vector<16x32xbf16> to vector<1x16x32xbf16>
    %344 = vector.shape_cast %343 : vector<1x16x32xbf16> to vector<1x16x32xbf16>
    %345 = vector.broadcast %344 : vector<1x16x32xbf16> to vector<8x16x32xbf16>
    "tpu.trace_start"() <{level = 10 : i32, message = "hwc,hco->hwo"}> : () -> ()
    %cst_150 = arith.constant dense<0.000000e+00> : vector<8x8x32xf32>
    %346 = tpu.matmul %340, %345, %cst_150 {dimension_numbers = #tpu.dot_dimension_numbers<[2], [1], [1], [2], [0, 0, 0, 1, 1, 2], [0], [0]>} : vector<8x8x16xbf16>, vector<8x16x32xbf16>, vector<8x8x32xf32> -> vector<8x8x32xf32>
    "tpu.trace_stop"() : () -> ()
    %347 = arith.addf %339, %346 : vector<8x8x32xf32>
    %348 = vector.extract_strided_slice %210 {offsets = [3, 2, 0], sizes = [8, 8, 16], strides = [1, 1, 1]} : vector<12x12x16xbf16> to vector<8x8x16xbf16>
    %c17_151 = arith.constant 17 : index
    %c0_152 = arith.constant 0 : index
    %c0_153 = arith.constant 0 : index
    %349 = vector.load %arg4[%c17_151, %c0_152, %c0_153] : memref<25x16x32xbf16, #tpu.memory_space<vmem>>, vector<1x16x32xbf16>
    %350 = vector.shape_cast %349 : vector<1x16x32xbf16> to vector<16x32xbf16>
    %351 = vector.shape_cast %350 : vector<16x32xbf16> to vector<1x16x32xbf16>
    %352 = vector.shape_cast %351 : vector<1x16x32xbf16> to vector<1x16x32xbf16>
    %353 = vector.broadcast %352 : vector<1x16x32xbf16> to vector<8x16x32xbf16>
    "tpu.trace_start"() <{level = 10 : i32, message = "hwc,hco->hwo"}> : () -> ()
    %cst_154 = arith.constant dense<0.000000e+00> : vector<8x8x32xf32>
    %354 = tpu.matmul %348, %353, %cst_154 {dimension_numbers = #tpu.dot_dimension_numbers<[2], [1], [1], [2], [0, 0, 0, 1, 1, 2], [0], [0]>} : vector<8x8x16xbf16>, vector<8x16x32xbf16>, vector<8x8x32xf32> -> vector<8x8x32xf32>
    "tpu.trace_stop"() : () -> ()
    %355 = arith.addf %347, %354 : vector<8x8x32xf32>
    %356 = vector.extract_strided_slice %210 {offsets = [3, 3, 0], sizes = [8, 8, 16], strides = [1, 1, 1]} : vector<12x12x16xbf16> to vector<8x8x16xbf16>
    %c18_155 = arith.constant 18 : index
    %c0_156 = arith.constant 0 : index
    %c0_157 = arith.constant 0 : index
    %357 = vector.load %arg4[%c18_155, %c0_156, %c0_157] : memref<25x16x32xbf16, #tpu.memory_space<vmem>>, vector<1x16x32xbf16>
    %358 = vector.shape_cast %357 : vector<1x16x32xbf16> to vector<16x32xbf16>
    %359 = vector.shape_cast %358 : vector<16x32xbf16> to vector<1x16x32xbf16>
    %360 = vector.shape_cast %359 : vector<1x16x32xbf16> to vector<1x16x32xbf16>
    %361 = vector.broadcast %360 : vector<1x16x32xbf16> to vector<8x16x32xbf16>
    "tpu.trace_start"() <{level = 10 : i32, message = "hwc,hco->hwo"}> : () -> ()
    %cst_158 = arith.constant dense<0.000000e+00> : vector<8x8x32xf32>
    %362 = tpu.matmul %356, %361, %cst_158 {dimension_numbers = #tpu.dot_dimension_numbers<[2], [1], [1], [2], [0, 0, 0, 1, 1, 2], [0], [0]>} : vector<8x8x16xbf16>, vector<8x16x32xbf16>, vector<8x8x32xf32> -> vector<8x8x32xf32>
    "tpu.trace_stop"() : () -> ()
    %363 = arith.addf %355, %362 : vector<8x8x32xf32>
    %364 = vector.extract_strided_slice %210 {offsets = [3, 4, 0], sizes = [8, 8, 16], strides = [1, 1, 1]} : vector<12x12x16xbf16> to vector<8x8x16xbf16>
    %c19_159 = arith.constant 19 : index
    %c0_160 = arith.constant 0 : index
    %c0_161 = arith.constant 0 : index
    %365 = vector.load %arg4[%c19_159, %c0_160, %c0_161] : memref<25x16x32xbf16, #tpu.memory_space<vmem>>, vector<1x16x32xbf16>
    %366 = vector.shape_cast %365 : vector<1x16x32xbf16> to vector<16x32xbf16>
    %367 = vector.shape_cast %366 : vector<16x32xbf16> to vector<1x16x32xbf16>
    %368 = vector.shape_cast %367 : vector<1x16x32xbf16> to vector<1x16x32xbf16>
    %369 = vector.broadcast %368 : vector<1x16x32xbf16> to vector<8x16x32xbf16>
    "tpu.trace_start"() <{level = 10 : i32, message = "hwc,hco->hwo"}> : () -> ()
    %cst_162 = arith.constant dense<0.000000e+00> : vector<8x8x32xf32>
    %370 = tpu.matmul %364, %369, %cst_162 {dimension_numbers = #tpu.dot_dimension_numbers<[2], [1], [1], [2], [0, 0, 0, 1, 1, 2], [0], [0]>} : vector<8x8x16xbf16>, vector<8x16x32xbf16>, vector<8x8x32xf32> -> vector<8x8x32xf32>
    "tpu.trace_stop"() : () -> ()
    %371 = arith.addf %363, %370 : vector<8x8x32xf32>
    %372 = vector.extract_strided_slice %210 {offsets = [4, 0, 0], sizes = [8, 8, 16], strides = [1, 1, 1]} : vector<12x12x16xbf16> to vector<8x8x16xbf16>
    %c20_163 = arith.constant 20 : index
    %c0_164 = arith.constant 0 : index
    %c0_165 = arith.constant 0 : index
    %373 = vector.load %arg4[%c20_163, %c0_164, %c0_165] : memref<25x16x32xbf16, #tpu.memory_space<vmem>>, vector<1x16x32xbf16>
    %374 = vector.shape_cast %373 : vector<1x16x32xbf16> to vector<16x32xbf16>
    %375 = vector.shape_cast %374 : vector<16x32xbf16> to vector<1x16x32xbf16>
    %376 = vector.shape_cast %375 : vector<1x16x32xbf16> to vector<1x16x32xbf16>
    %377 = vector.broadcast %376 : vector<1x16x32xbf16> to vector<8x16x32xbf16>
    "tpu.trace_start"() <{level = 10 : i32, message = "hwc,hco->hwo"}> : () -> ()
    %cst_166 = arith.constant dense<0.000000e+00> : vector<8x8x32xf32>
    %378 = tpu.matmul %372, %377, %cst_166 {dimension_numbers = #tpu.dot_dimension_numbers<[2], [1], [1], [2], [0, 0, 0, 1, 1, 2], [0], [0]>} : vector<8x8x16xbf16>, vector<8x16x32xbf16>, vector<8x8x32xf32> -> vector<8x8x32xf32>
    "tpu.trace_stop"() : () -> ()
    %379 = arith.addf %371, %378 : vector<8x8x32xf32>
    %380 = vector.extract_strided_slice %210 {offsets = [4, 1, 0], sizes = [8, 8, 16], strides = [1, 1, 1]} : vector<12x12x16xbf16> to vector<8x8x16xbf16>
    %c21_167 = arith.constant 21 : index
    %c0_168 = arith.constant 0 : index
    %c0_169 = arith.constant 0 : index
    %381 = vector.load %arg4[%c21_167, %c0_168, %c0_169] : memref<25x16x32xbf16, #tpu.memory_space<vmem>>, vector<1x16x32xbf16>
    %382 = vector.shape_cast %381 : vector<1x16x32xbf16> to vector<16x32xbf16>
    %383 = vector.shape_cast %382 : vector<16x32xbf16> to vector<1x16x32xbf16>
    %384 = vector.shape_cast %383 : vector<1x16x32xbf16> to vector<1x16x32xbf16>
    %385 = vector.broadcast %384 : vector<1x16x32xbf16> to vector<8x16x32xbf16>
    "tpu.trace_start"() <{level = 10 : i32, message = "hwc,hco->hwo"}> : () -> ()
    %cst_170 = arith.constant dense<0.000000e+00> : vector<8x8x32xf32>
    %386 = tpu.matmul %380, %385, %cst_170 {dimension_numbers = #tpu.dot_dimension_numbers<[2], [1], [1], [2], [0, 0, 0, 1, 1, 2], [0], [0]>} : vector<8x8x16xbf16>, vector<8x16x32xbf16>, vector<8x8x32xf32> -> vector<8x8x32xf32>
    "tpu.trace_stop"() : () -> ()
    %387 = arith.addf %379, %386 : vector<8x8x32xf32>
    %388 = vector.extract_strided_slice %210 {offsets = [4, 2, 0], sizes = [8, 8, 16], strides = [1, 1, 1]} : vector<12x12x16xbf16> to vector<8x8x16xbf16>
    %c22_171 = arith.constant 22 : index
    %c0_172 = arith.constant 0 : index
    %c0_173 = arith.constant 0 : index
    %389 = vector.load %arg4[%c22_171, %c0_172, %c0_173] : memref<25x16x32xbf16, #tpu.memory_space<vmem>>, vector<1x16x32xbf16>
    %390 = vector.shape_cast %389 : vector<1x16x32xbf16> to vector<16x32xbf16>
    %391 = vector.shape_cast %390 : vector<16x32xbf16> to vector<1x16x32xbf16>
    %392 = vector.shape_cast %391 : vector<1x16x32xbf16> to vector<1x16x32xbf16>
    %393 = vector.broadcast %392 : vector<1x16x32xbf16> to vector<8x16x32xbf16>
    "tpu.trace_start"() <{level = 10 : i32, message = "hwc,hco->hwo"}> : () -> ()
    %cst_174 = arith.constant dense<0.000000e+00> : vector<8x8x32xf32>
    %394 = tpu.matmul %388, %393, %cst_174 {dimension_numbers = #tpu.dot_dimension_numbers<[2], [1], [1], [2], [0, 0, 0, 1, 1, 2], [0], [0]>} : vector<8x8x16xbf16>, vector<8x16x32xbf16>, vector<8x8x32xf32> -> vector<8x8x32xf32>
    "tpu.trace_stop"() : () -> ()
    %395 = arith.addf %387, %394 : vector<8x8x32xf32>
    %396 = vector.extract_strided_slice %210 {offsets = [4, 3, 0], sizes = [8, 8, 16], strides = [1, 1, 1]} : vector<12x12x16xbf16> to vector<8x8x16xbf16>
    %c23_175 = arith.constant 23 : index
    %c0_176 = arith.constant 0 : index
    %c0_177 = arith.constant 0 : index
    %397 = vector.load %arg4[%c23_175, %c0_176, %c0_177] : memref<25x16x32xbf16, #tpu.memory_space<vmem>>, vector<1x16x32xbf16>
    %398 = vector.shape_cast %397 : vector<1x16x32xbf16> to vector<16x32xbf16>
    %399 = vector.shape_cast %398 : vector<16x32xbf16> to vector<1x16x32xbf16>
    %400 = vector.shape_cast %399 : vector<1x16x32xbf16> to vector<1x16x32xbf16>
    %401 = vector.broadcast %400 : vector<1x16x32xbf16> to vector<8x16x32xbf16>
    "tpu.trace_start"() <{level = 10 : i32, message = "hwc,hco->hwo"}> : () -> ()
    %cst_178 = arith.constant dense<0.000000e+00> : vector<8x8x32xf32>
    %402 = tpu.matmul %396, %401, %cst_178 {dimension_numbers = #tpu.dot_dimension_numbers<[2], [1], [1], [2], [0, 0, 0, 1, 1, 2], [0], [0]>} : vector<8x8x16xbf16>, vector<8x16x32xbf16>, vector<8x8x32xf32> -> vector<8x8x32xf32>
    "tpu.trace_stop"() : () -> ()
    %403 = arith.addf %395, %402 : vector<8x8x32xf32>
    %404 = vector.extract_strided_slice %210 {offsets = [4, 4, 0], sizes = [8, 8, 16], strides = [1, 1, 1]} : vector<12x12x16xbf16> to vector<8x8x16xbf16>
    %c24_179 = arith.constant 24 : index
    %c0_180 = arith.constant 0 : index
    %c0_181 = arith.constant 0 : index
    %405 = vector.load %arg4[%c24_179, %c0_180, %c0_181] : memref<25x16x32xbf16, #tpu.memory_space<vmem>>, vector<1x16x32xbf16>
    %406 = vector.shape_cast %405 : vector<1x16x32xbf16> to vector<16x32xbf16>
    %407 = vector.shape_cast %406 : vector<16x32xbf16> to vector<1x16x32xbf16>
    %408 = vector.shape_cast %407 : vector<1x16x32xbf16> to vector<1x16x32xbf16>
    %409 = vector.broadcast %408 : vector<1x16x32xbf16> to vector<8x16x32xbf16>
    "tpu.trace_start"() <{level = 10 : i32, message = "hwc,hco->hwo"}> : () -> ()
    %cst_182 = arith.constant dense<0.000000e+00> : vector<8x8x32xf32>
    %410 = tpu.matmul %404, %409, %cst_182 {dimension_numbers = #tpu.dot_dimension_numbers<[2], [1], [1], [2], [0, 0, 0, 1, 1, 2], [0], [0]>} : vector<8x8x16xbf16>, vector<8x16x32xbf16>, vector<8x8x32xf32> -> vector<8x8x32xf32>
    "tpu.trace_stop"() : () -> ()
    %411 = arith.addf %403, %410 : vector<8x8x32xf32>
    %c0_183 = arith.constant 0 : index
    %c0_184 = arith.constant 0 : index
    %412 = vector.load %arg5[%c0_183, %c0_184] : memref<1x32xf32, #tpu.memory_space<vmem>>, vector<1x32xf32>
    %413 = vector.shape_cast %412 : vector<1x32xf32> to vector<1x1x32xf32>
    %414 = vector.broadcast %413 : vector<1x1x32xf32> to vector<8x8x32xf32>
    %415 = arith.addf %411, %414 : vector<8x8x32xf32>
    %cst_185 = arith.constant 0.000000e+00 : f32
    %416 = vector.broadcast %cst_185 : f32 to vector<8x8x32xf32>
    %417 = arith.maximumf %415, %416 : vector<8x8x32xf32>
    %418 = arith.truncf %417 : vector<8x8x32xf32> to vector<8x8x32xbf16>
    %cst_186 = arith.constant 0.000000e+00 : f32
    %419 = vector.broadcast %cst_186 : f32 to vector<4x4x32xf32>
    %420 = vector.extract_strided_slice %418 {offsets = [0, 0, 0], sizes = [4, 4, 32], strides = [1, 1, 1]} : vector<8x8x32xbf16> to vector<4x4x32xbf16>
    %c0_187 = arith.constant 0 : index
    %c0_188 = arith.constant 0 : index
    %c0_189 = arith.constant 0 : index
    %421 = vector.load %arg6[%c0_187, %c0_188, %c0_189] : memref<25x32x32xbf16, #tpu.memory_space<vmem>>, vector<1x32x32xbf16>
    %422 = vector.shape_cast %421 : vector<1x32x32xbf16> to vector<32x32xbf16>
    %423 = vector.shape_cast %422 : vector<32x32xbf16> to vector<1x32x32xbf16>
    %424 = vector.shape_cast %423 : vector<1x32x32xbf16> to vector<1x32x32xbf16>
    %425 = vector.broadcast %424 : vector<1x32x32xbf16> to vector<4x32x32xbf16>
    "tpu.trace_start"() <{level = 10 : i32, message = "hwc,hco->hwo"}> : () -> ()
    %cst_190 = arith.constant dense<0.000000e+00> : vector<4x4x32xf32>
    %426 = tpu.matmul %420, %425, %cst_190 {dimension_numbers = #tpu.dot_dimension_numbers<[2], [1], [1], [2], [0, 0, 0, 1, 1, 2], [0], [0]>} : vector<4x4x32xbf16>, vector<4x32x32xbf16>, vector<4x4x32xf32> -> vector<4x4x32xf32>
    "tpu.trace_stop"() : () -> ()
    %427 = arith.addf %419, %426 : vector<4x4x32xf32>
    %428 = vector.extract_strided_slice %418 {offsets = [0, 1, 0], sizes = [4, 4, 32], strides = [1, 1, 1]} : vector<8x8x32xbf16> to vector<4x4x32xbf16>
    %c1_191 = arith.constant 1 : index
    %c0_192 = arith.constant 0 : index
    %c0_193 = arith.constant 0 : index
    %429 = vector.load %arg6[%c1_191, %c0_192, %c0_193] : memref<25x32x32xbf16, #tpu.memory_space<vmem>>, vector<1x32x32xbf16>
    %430 = vector.shape_cast %429 : vector<1x32x32xbf16> to vector<32x32xbf16>
    %431 = vector.shape_cast %430 : vector<32x32xbf16> to vector<1x32x32xbf16>
    %432 = vector.shape_cast %431 : vector<1x32x32xbf16> to vector<1x32x32xbf16>
    %433 = vector.broadcast %432 : vector<1x32x32xbf16> to vector<4x32x32xbf16>
    "tpu.trace_start"() <{level = 10 : i32, message = "hwc,hco->hwo"}> : () -> ()
    %cst_194 = arith.constant dense<0.000000e+00> : vector<4x4x32xf32>
    %434 = tpu.matmul %428, %433, %cst_194 {dimension_numbers = #tpu.dot_dimension_numbers<[2], [1], [1], [2], [0, 0, 0, 1, 1, 2], [0], [0]>} : vector<4x4x32xbf16>, vector<4x32x32xbf16>, vector<4x4x32xf32> -> vector<4x4x32xf32>
    "tpu.trace_stop"() : () -> ()
    %435 = arith.addf %427, %434 : vector<4x4x32xf32>
    %436 = vector.extract_strided_slice %418 {offsets = [0, 2, 0], sizes = [4, 4, 32], strides = [1, 1, 1]} : vector<8x8x32xbf16> to vector<4x4x32xbf16>
    %c2_195 = arith.constant 2 : index
    %c0_196 = arith.constant 0 : index
    %c0_197 = arith.constant 0 : index
    %437 = vector.load %arg6[%c2_195, %c0_196, %c0_197] : memref<25x32x32xbf16, #tpu.memory_space<vmem>>, vector<1x32x32xbf16>
    %438 = vector.shape_cast %437 : vector<1x32x32xbf16> to vector<32x32xbf16>
    %439 = vector.shape_cast %438 : vector<32x32xbf16> to vector<1x32x32xbf16>
    %440 = vector.shape_cast %439 : vector<1x32x32xbf16> to vector<1x32x32xbf16>
    %441 = vector.broadcast %440 : vector<1x32x32xbf16> to vector<4x32x32xbf16>
    "tpu.trace_start"() <{level = 10 : i32, message = "hwc,hco->hwo"}> : () -> ()
    %cst_198 = arith.constant dense<0.000000e+00> : vector<4x4x32xf32>
    %442 = tpu.matmul %436, %441, %cst_198 {dimension_numbers = #tpu.dot_dimension_numbers<[2], [1], [1], [2], [0, 0, 0, 1, 1, 2], [0], [0]>} : vector<4x4x32xbf16>, vector<4x32x32xbf16>, vector<4x4x32xf32> -> vector<4x4x32xf32>
    "tpu.trace_stop"() : () -> ()
    %443 = arith.addf %435, %442 : vector<4x4x32xf32>
    %444 = vector.extract_strided_slice %418 {offsets = [0, 3, 0], sizes = [4, 4, 32], strides = [1, 1, 1]} : vector<8x8x32xbf16> to vector<4x4x32xbf16>
    %c3_199 = arith.constant 3 : index
    %c0_200 = arith.constant 0 : index
    %c0_201 = arith.constant 0 : index
    %445 = vector.load %arg6[%c3_199, %c0_200, %c0_201] : memref<25x32x32xbf16, #tpu.memory_space<vmem>>, vector<1x32x32xbf16>
    %446 = vector.shape_cast %445 : vector<1x32x32xbf16> to vector<32x32xbf16>
    %447 = vector.shape_cast %446 : vector<32x32xbf16> to vector<1x32x32xbf16>
    %448 = vector.shape_cast %447 : vector<1x32x32xbf16> to vector<1x32x32xbf16>
    %449 = vector.broadcast %448 : vector<1x32x32xbf16> to vector<4x32x32xbf16>
    "tpu.trace_start"() <{level = 10 : i32, message = "hwc,hco->hwo"}> : () -> ()
    %cst_202 = arith.constant dense<0.000000e+00> : vector<4x4x32xf32>
    %450 = tpu.matmul %444, %449, %cst_202 {dimension_numbers = #tpu.dot_dimension_numbers<[2], [1], [1], [2], [0, 0, 0, 1, 1, 2], [0], [0]>} : vector<4x4x32xbf16>, vector<4x32x32xbf16>, vector<4x4x32xf32> -> vector<4x4x32xf32>
    "tpu.trace_stop"() : () -> ()
    %451 = arith.addf %443, %450 : vector<4x4x32xf32>
    %452 = vector.extract_strided_slice %418 {offsets = [0, 4, 0], sizes = [4, 4, 32], strides = [1, 1, 1]} : vector<8x8x32xbf16> to vector<4x4x32xbf16>
    %c4_203 = arith.constant 4 : index
    %c0_204 = arith.constant 0 : index
    %c0_205 = arith.constant 0 : index
    %453 = vector.load %arg6[%c4_203, %c0_204, %c0_205] : memref<25x32x32xbf16, #tpu.memory_space<vmem>>, vector<1x32x32xbf16>
    %454 = vector.shape_cast %453 : vector<1x32x32xbf16> to vector<32x32xbf16>
    %455 = vector.shape_cast %454 : vector<32x32xbf16> to vector<1x32x32xbf16>
    %456 = vector.shape_cast %455 : vector<1x32x32xbf16> to vector<1x32x32xbf16>
    %457 = vector.broadcast %456 : vector<1x32x32xbf16> to vector<4x32x32xbf16>
    "tpu.trace_start"() <{level = 10 : i32, message = "hwc,hco->hwo"}> : () -> ()
    %cst_206 = arith.constant dense<0.000000e+00> : vector<4x4x32xf32>
    %458 = tpu.matmul %452, %457, %cst_206 {dimension_numbers = #tpu.dot_dimension_numbers<[2], [1], [1], [2], [0, 0, 0, 1, 1, 2], [0], [0]>} : vector<4x4x32xbf16>, vector<4x32x32xbf16>, vector<4x4x32xf32> -> vector<4x4x32xf32>
    "tpu.trace_stop"() : () -> ()
    %459 = arith.addf %451, %458 : vector<4x4x32xf32>
    %460 = vector.extract_strided_slice %418 {offsets = [1, 0, 0], sizes = [4, 4, 32], strides = [1, 1, 1]} : vector<8x8x32xbf16> to vector<4x4x32xbf16>
    %c5_207 = arith.constant 5 : index
    %c0_208 = arith.constant 0 : index
    %c0_209 = arith.constant 0 : index
    %461 = vector.load %arg6[%c5_207, %c0_208, %c0_209] : memref<25x32x32xbf16, #tpu.memory_space<vmem>>, vector<1x32x32xbf16>
    %462 = vector.shape_cast %461 : vector<1x32x32xbf16> to vector<32x32xbf16>
    %463 = vector.shape_cast %462 : vector<32x32xbf16> to vector<1x32x32xbf16>
    %464 = vector.shape_cast %463 : vector<1x32x32xbf16> to vector<1x32x32xbf16>
    %465 = vector.broadcast %464 : vector<1x32x32xbf16> to vector<4x32x32xbf16>
    "tpu.trace_start"() <{level = 10 : i32, message = "hwc,hco->hwo"}> : () -> ()
    %cst_210 = arith.constant dense<0.000000e+00> : vector<4x4x32xf32>
    %466 = tpu.matmul %460, %465, %cst_210 {dimension_numbers = #tpu.dot_dimension_numbers<[2], [1], [1], [2], [0, 0, 0, 1, 1, 2], [0], [0]>} : vector<4x4x32xbf16>, vector<4x32x32xbf16>, vector<4x4x32xf32> -> vector<4x4x32xf32>
    "tpu.trace_stop"() : () -> ()
    %467 = arith.addf %459, %466 : vector<4x4x32xf32>
    %468 = vector.extract_strided_slice %418 {offsets = [1, 1, 0], sizes = [4, 4, 32], strides = [1, 1, 1]} : vector<8x8x32xbf16> to vector<4x4x32xbf16>
    %c6_211 = arith.constant 6 : index
    %c0_212 = arith.constant 0 : index
    %c0_213 = arith.constant 0 : index
    %469 = vector.load %arg6[%c6_211, %c0_212, %c0_213] : memref<25x32x32xbf16, #tpu.memory_space<vmem>>, vector<1x32x32xbf16>
    %470 = vector.shape_cast %469 : vector<1x32x32xbf16> to vector<32x32xbf16>
    %471 = vector.shape_cast %470 : vector<32x32xbf16> to vector<1x32x32xbf16>
    %472 = vector.shape_cast %471 : vector<1x32x32xbf16> to vector<1x32x32xbf16>
    %473 = vector.broadcast %472 : vector<1x32x32xbf16> to vector<4x32x32xbf16>
    "tpu.trace_start"() <{level = 10 : i32, message = "hwc,hco->hwo"}> : () -> ()
    %cst_214 = arith.constant dense<0.000000e+00> : vector<4x4x32xf32>
    %474 = tpu.matmul %468, %473, %cst_214 {dimension_numbers = #tpu.dot_dimension_numbers<[2], [1], [1], [2], [0, 0, 0, 1, 1, 2], [0], [0]>} : vector<4x4x32xbf16>, vector<4x32x32xbf16>, vector<4x4x32xf32> -> vector<4x4x32xf32>
    "tpu.trace_stop"() : () -> ()
    %475 = arith.addf %467, %474 : vector<4x4x32xf32>
    %476 = vector.extract_strided_slice %418 {offsets = [1, 2, 0], sizes = [4, 4, 32], strides = [1, 1, 1]} : vector<8x8x32xbf16> to vector<4x4x32xbf16>
    %c7_215 = arith.constant 7 : index
    %c0_216 = arith.constant 0 : index
    %c0_217 = arith.constant 0 : index
    %477 = vector.load %arg6[%c7_215, %c0_216, %c0_217] : memref<25x32x32xbf16, #tpu.memory_space<vmem>>, vector<1x32x32xbf16>
    %478 = vector.shape_cast %477 : vector<1x32x32xbf16> to vector<32x32xbf16>
    %479 = vector.shape_cast %478 : vector<32x32xbf16> to vector<1x32x32xbf16>
    %480 = vector.shape_cast %479 : vector<1x32x32xbf16> to vector<1x32x32xbf16>
    %481 = vector.broadcast %480 : vector<1x32x32xbf16> to vector<4x32x32xbf16>
    "tpu.trace_start"() <{level = 10 : i32, message = "hwc,hco->hwo"}> : () -> ()
    %cst_218 = arith.constant dense<0.000000e+00> : vector<4x4x32xf32>
    %482 = tpu.matmul %476, %481, %cst_218 {dimension_numbers = #tpu.dot_dimension_numbers<[2], [1], [1], [2], [0, 0, 0, 1, 1, 2], [0], [0]>} : vector<4x4x32xbf16>, vector<4x32x32xbf16>, vector<4x4x32xf32> -> vector<4x4x32xf32>
    "tpu.trace_stop"() : () -> ()
    %483 = arith.addf %475, %482 : vector<4x4x32xf32>
    %484 = vector.extract_strided_slice %418 {offsets = [1, 3, 0], sizes = [4, 4, 32], strides = [1, 1, 1]} : vector<8x8x32xbf16> to vector<4x4x32xbf16>
    %c8_219 = arith.constant 8 : index
    %c0_220 = arith.constant 0 : index
    %c0_221 = arith.constant 0 : index
    %485 = vector.load %arg6[%c8_219, %c0_220, %c0_221] : memref<25x32x32xbf16, #tpu.memory_space<vmem>>, vector<1x32x32xbf16>
    %486 = vector.shape_cast %485 : vector<1x32x32xbf16> to vector<32x32xbf16>
    %487 = vector.shape_cast %486 : vector<32x32xbf16> to vector<1x32x32xbf16>
    %488 = vector.shape_cast %487 : vector<1x32x32xbf16> to vector<1x32x32xbf16>
    %489 = vector.broadcast %488 : vector<1x32x32xbf16> to vector<4x32x32xbf16>
    "tpu.trace_start"() <{level = 10 : i32, message = "hwc,hco->hwo"}> : () -> ()
    %cst_222 = arith.constant dense<0.000000e+00> : vector<4x4x32xf32>
    %490 = tpu.matmul %484, %489, %cst_222 {dimension_numbers = #tpu.dot_dimension_numbers<[2], [1], [1], [2], [0, 0, 0, 1, 1, 2], [0], [0]>} : vector<4x4x32xbf16>, vector<4x32x32xbf16>, vector<4x4x32xf32> -> vector<4x4x32xf32>
    "tpu.trace_stop"() : () -> ()
    %491 = arith.addf %483, %490 : vector<4x4x32xf32>
    %492 = vector.extract_strided_slice %418 {offsets = [1, 4, 0], sizes = [4, 4, 32], strides = [1, 1, 1]} : vector<8x8x32xbf16> to vector<4x4x32xbf16>
    %c9_223 = arith.constant 9 : index
    %c0_224 = arith.constant 0 : index
    %c0_225 = arith.constant 0 : index
    %493 = vector.load %arg6[%c9_223, %c0_224, %c0_225] : memref<25x32x32xbf16, #tpu.memory_space<vmem>>, vector<1x32x32xbf16>
    %494 = vector.shape_cast %493 : vector<1x32x32xbf16> to vector<32x32xbf16>
    %495 = vector.shape_cast %494 : vector<32x32xbf16> to vector<1x32x32xbf16>
    %496 = vector.shape_cast %495 : vector<1x32x32xbf16> to vector<1x32x32xbf16>
    %497 = vector.broadcast %496 : vector<1x32x32xbf16> to vector<4x32x32xbf16>
    "tpu.trace_start"() <{level = 10 : i32, message = "hwc,hco->hwo"}> : () -> ()
    %cst_226 = arith.constant dense<0.000000e+00> : vector<4x4x32xf32>
    %498 = tpu.matmul %492, %497, %cst_226 {dimension_numbers = #tpu.dot_dimension_numbers<[2], [1], [1], [2], [0, 0, 0, 1, 1, 2], [0], [0]>} : vector<4x4x32xbf16>, vector<4x32x32xbf16>, vector<4x4x32xf32> -> vector<4x4x32xf32>
    "tpu.trace_stop"() : () -> ()
    %499 = arith.addf %491, %498 : vector<4x4x32xf32>
    %500 = vector.extract_strided_slice %418 {offsets = [2, 0, 0], sizes = [4, 4, 32], strides = [1, 1, 1]} : vector<8x8x32xbf16> to vector<4x4x32xbf16>
    %c10_227 = arith.constant 10 : index
    %c0_228 = arith.constant 0 : index
    %c0_229 = arith.constant 0 : index
    %501 = vector.load %arg6[%c10_227, %c0_228, %c0_229] : memref<25x32x32xbf16, #tpu.memory_space<vmem>>, vector<1x32x32xbf16>
    %502 = vector.shape_cast %501 : vector<1x32x32xbf16> to vector<32x32xbf16>
    %503 = vector.shape_cast %502 : vector<32x32xbf16> to vector<1x32x32xbf16>
    %504 = vector.shape_cast %503 : vector<1x32x32xbf16> to vector<1x32x32xbf16>
    %505 = vector.broadcast %504 : vector<1x32x32xbf16> to vector<4x32x32xbf16>
    "tpu.trace_start"() <{level = 10 : i32, message = "hwc,hco->hwo"}> : () -> ()
    %cst_230 = arith.constant dense<0.000000e+00> : vector<4x4x32xf32>
    %506 = tpu.matmul %500, %505, %cst_230 {dimension_numbers = #tpu.dot_dimension_numbers<[2], [1], [1], [2], [0, 0, 0, 1, 1, 2], [0], [0]>} : vector<4x4x32xbf16>, vector<4x32x32xbf16>, vector<4x4x32xf32> -> vector<4x4x32xf32>
    "tpu.trace_stop"() : () -> ()
    %507 = arith.addf %499, %506 : vector<4x4x32xf32>
    %508 = vector.extract_strided_slice %418 {offsets = [2, 1, 0], sizes = [4, 4, 32], strides = [1, 1, 1]} : vector<8x8x32xbf16> to vector<4x4x32xbf16>
    %c11_231 = arith.constant 11 : index
    %c0_232 = arith.constant 0 : index
    %c0_233 = arith.constant 0 : index
    %509 = vector.load %arg6[%c11_231, %c0_232, %c0_233] : memref<25x32x32xbf16, #tpu.memory_space<vmem>>, vector<1x32x32xbf16>
    %510 = vector.shape_cast %509 : vector<1x32x32xbf16> to vector<32x32xbf16>
    %511 = vector.shape_cast %510 : vector<32x32xbf16> to vector<1x32x32xbf16>
    %512 = vector.shape_cast %511 : vector<1x32x32xbf16> to vector<1x32x32xbf16>
    %513 = vector.broadcast %512 : vector<1x32x32xbf16> to vector<4x32x32xbf16>
    "tpu.trace_start"() <{level = 10 : i32, message = "hwc,hco->hwo"}> : () -> ()
    %cst_234 = arith.constant dense<0.000000e+00> : vector<4x4x32xf32>
    %514 = tpu.matmul %508, %513, %cst_234 {dimension_numbers = #tpu.dot_dimension_numbers<[2], [1], [1], [2], [0, 0, 0, 1, 1, 2], [0], [0]>} : vector<4x4x32xbf16>, vector<4x32x32xbf16>, vector<4x4x32xf32> -> vector<4x4x32xf32>
    "tpu.trace_stop"() : () -> ()
    %515 = arith.addf %507, %514 : vector<4x4x32xf32>
    %516 = vector.extract_strided_slice %418 {offsets = [2, 2, 0], sizes = [4, 4, 32], strides = [1, 1, 1]} : vector<8x8x32xbf16> to vector<4x4x32xbf16>
    %c12_235 = arith.constant 12 : index
    %c0_236 = arith.constant 0 : index
    %c0_237 = arith.constant 0 : index
    %517 = vector.load %arg6[%c12_235, %c0_236, %c0_237] : memref<25x32x32xbf16, #tpu.memory_space<vmem>>, vector<1x32x32xbf16>
    %518 = vector.shape_cast %517 : vector<1x32x32xbf16> to vector<32x32xbf16>
    %519 = vector.shape_cast %518 : vector<32x32xbf16> to vector<1x32x32xbf16>
    %520 = vector.shape_cast %519 : vector<1x32x32xbf16> to vector<1x32x32xbf16>
    %521 = vector.broadcast %520 : vector<1x32x32xbf16> to vector<4x32x32xbf16>
    "tpu.trace_start"() <{level = 10 : i32, message = "hwc,hco->hwo"}> : () -> ()
    %cst_238 = arith.constant dense<0.000000e+00> : vector<4x4x32xf32>
    %522 = tpu.matmul %516, %521, %cst_238 {dimension_numbers = #tpu.dot_dimension_numbers<[2], [1], [1], [2], [0, 0, 0, 1, 1, 2], [0], [0]>} : vector<4x4x32xbf16>, vector<4x32x32xbf16>, vector<4x4x32xf32> -> vector<4x4x32xf32>
    "tpu.trace_stop"() : () -> ()
    %523 = arith.addf %515, %522 : vector<4x4x32xf32>
    %524 = vector.extract_strided_slice %418 {offsets = [2, 3, 0], sizes = [4, 4, 32], strides = [1, 1, 1]} : vector<8x8x32xbf16> to vector<4x4x32xbf16>
    %c13_239 = arith.constant 13 : index
    %c0_240 = arith.constant 0 : index
    %c0_241 = arith.constant 0 : index
    %525 = vector.load %arg6[%c13_239, %c0_240, %c0_241] : memref<25x32x32xbf16, #tpu.memory_space<vmem>>, vector<1x32x32xbf16>
    %526 = vector.shape_cast %525 : vector<1x32x32xbf16> to vector<32x32xbf16>
    %527 = vector.shape_cast %526 : vector<32x32xbf16> to vector<1x32x32xbf16>
    %528 = vector.shape_cast %527 : vector<1x32x32xbf16> to vector<1x32x32xbf16>
    %529 = vector.broadcast %528 : vector<1x32x32xbf16> to vector<4x32x32xbf16>
    "tpu.trace_start"() <{level = 10 : i32, message = "hwc,hco->hwo"}> : () -> ()
    %cst_242 = arith.constant dense<0.000000e+00> : vector<4x4x32xf32>
    %530 = tpu.matmul %524, %529, %cst_242 {dimension_numbers = #tpu.dot_dimension_numbers<[2], [1], [1], [2], [0, 0, 0, 1, 1, 2], [0], [0]>} : vector<4x4x32xbf16>, vector<4x32x32xbf16>, vector<4x4x32xf32> -> vector<4x4x32xf32>
    "tpu.trace_stop"() : () -> ()
    %531 = arith.addf %523, %530 : vector<4x4x32xf32>
    %532 = vector.extract_strided_slice %418 {offsets = [2, 4, 0], sizes = [4, 4, 32], strides = [1, 1, 1]} : vector<8x8x32xbf16> to vector<4x4x32xbf16>
    %c14_243 = arith.constant 14 : index
    %c0_244 = arith.constant 0 : index
    %c0_245 = arith.constant 0 : index
    %533 = vector.load %arg6[%c14_243, %c0_244, %c0_245] : memref<25x32x32xbf16, #tpu.memory_space<vmem>>, vector<1x32x32xbf16>
    %534 = vector.shape_cast %533 : vector<1x32x32xbf16> to vector<32x32xbf16>
    %535 = vector.shape_cast %534 : vector<32x32xbf16> to vector<1x32x32xbf16>
    %536 = vector.shape_cast %535 : vector<1x32x32xbf16> to vector<1x32x32xbf16>
    %537 = vector.broadcast %536 : vector<1x32x32xbf16> to vector<4x32x32xbf16>
    "tpu.trace_start"() <{level = 10 : i32, message = "hwc,hco->hwo"}> : () -> ()
    %cst_246 = arith.constant dense<0.000000e+00> : vector<4x4x32xf32>
    %538 = tpu.matmul %532, %537, %cst_246 {dimension_numbers = #tpu.dot_dimension_numbers<[2], [1], [1], [2], [0, 0, 0, 1, 1, 2], [0], [0]>} : vector<4x4x32xbf16>, vector<4x32x32xbf16>, vector<4x4x32xf32> -> vector<4x4x32xf32>
    "tpu.trace_stop"() : () -> ()
    %539 = arith.addf %531, %538 : vector<4x4x32xf32>
    %540 = vector.extract_strided_slice %418 {offsets = [3, 0, 0], sizes = [4, 4, 32], strides = [1, 1, 1]} : vector<8x8x32xbf16> to vector<4x4x32xbf16>
    %c15_247 = arith.constant 15 : index
    %c0_248 = arith.constant 0 : index
    %c0_249 = arith.constant 0 : index
    %541 = vector.load %arg6[%c15_247, %c0_248, %c0_249] : memref<25x32x32xbf16, #tpu.memory_space<vmem>>, vector<1x32x32xbf16>
    %542 = vector.shape_cast %541 : vector<1x32x32xbf16> to vector<32x32xbf16>
    %543 = vector.shape_cast %542 : vector<32x32xbf16> to vector<1x32x32xbf16>
    %544 = vector.shape_cast %543 : vector<1x32x32xbf16> to vector<1x32x32xbf16>
    %545 = vector.broadcast %544 : vector<1x32x32xbf16> to vector<4x32x32xbf16>
    "tpu.trace_start"() <{level = 10 : i32, message = "hwc,hco->hwo"}> : () -> ()
    %cst_250 = arith.constant dense<0.000000e+00> : vector<4x4x32xf32>
    %546 = tpu.matmul %540, %545, %cst_250 {dimension_numbers = #tpu.dot_dimension_numbers<[2], [1], [1], [2], [0, 0, 0, 1, 1, 2], [0], [0]>} : vector<4x4x32xbf16>, vector<4x32x32xbf16>, vector<4x4x32xf32> -> vector<4x4x32xf32>
    "tpu.trace_stop"() : () -> ()
    %547 = arith.addf %539, %546 : vector<4x4x32xf32>
    %548 = vector.extract_strided_slice %418 {offsets = [3, 1, 0], sizes = [4, 4, 32], strides = [1, 1, 1]} : vector<8x8x32xbf16> to vector<4x4x32xbf16>
    %c16_251 = arith.constant 16 : index
    %c0_252 = arith.constant 0 : index
    %c0_253 = arith.constant 0 : index
    %549 = vector.load %arg6[%c16_251, %c0_252, %c0_253] : memref<25x32x32xbf16, #tpu.memory_space<vmem>>, vector<1x32x32xbf16>
    %550 = vector.shape_cast %549 : vector<1x32x32xbf16> to vector<32x32xbf16>
    %551 = vector.shape_cast %550 : vector<32x32xbf16> to vector<1x32x32xbf16>
    %552 = vector.shape_cast %551 : vector<1x32x32xbf16> to vector<1x32x32xbf16>
    %553 = vector.broadcast %552 : vector<1x32x32xbf16> to vector<4x32x32xbf16>
    "tpu.trace_start"() <{level = 10 : i32, message = "hwc,hco->hwo"}> : () -> ()
    %cst_254 = arith.constant dense<0.000000e+00> : vector<4x4x32xf32>
    %554 = tpu.matmul %548, %553, %cst_254 {dimension_numbers = #tpu.dot_dimension_numbers<[2], [1], [1], [2], [0, 0, 0, 1, 1, 2], [0], [0]>} : vector<4x4x32xbf16>, vector<4x32x32xbf16>, vector<4x4x32xf32> -> vector<4x4x32xf32>
    "tpu.trace_stop"() : () -> ()
    %555 = arith.addf %547, %554 : vector<4x4x32xf32>
    %556 = vector.extract_strided_slice %418 {offsets = [3, 2, 0], sizes = [4, 4, 32], strides = [1, 1, 1]} : vector<8x8x32xbf16> to vector<4x4x32xbf16>
    %c17_255 = arith.constant 17 : index
    %c0_256 = arith.constant 0 : index
    %c0_257 = arith.constant 0 : index
    %557 = vector.load %arg6[%c17_255, %c0_256, %c0_257] : memref<25x32x32xbf16, #tpu.memory_space<vmem>>, vector<1x32x32xbf16>
    %558 = vector.shape_cast %557 : vector<1x32x32xbf16> to vector<32x32xbf16>
    %559 = vector.shape_cast %558 : vector<32x32xbf16> to vector<1x32x32xbf16>
    %560 = vector.shape_cast %559 : vector<1x32x32xbf16> to vector<1x32x32xbf16>
    %561 = vector.broadcast %560 : vector<1x32x32xbf16> to vector<4x32x32xbf16>
    "tpu.trace_start"() <{level = 10 : i32, message = "hwc,hco->hwo"}> : () -> ()
    %cst_258 = arith.constant dense<0.000000e+00> : vector<4x4x32xf32>
    %562 = tpu.matmul %556, %561, %cst_258 {dimension_numbers = #tpu.dot_dimension_numbers<[2], [1], [1], [2], [0, 0, 0, 1, 1, 2], [0], [0]>} : vector<4x4x32xbf16>, vector<4x32x32xbf16>, vector<4x4x32xf32> -> vector<4x4x32xf32>
    "tpu.trace_stop"() : () -> ()
    %563 = arith.addf %555, %562 : vector<4x4x32xf32>
    %564 = vector.extract_strided_slice %418 {offsets = [3, 3, 0], sizes = [4, 4, 32], strides = [1, 1, 1]} : vector<8x8x32xbf16> to vector<4x4x32xbf16>
    %c18_259 = arith.constant 18 : index
    %c0_260 = arith.constant 0 : index
    %c0_261 = arith.constant 0 : index
    %565 = vector.load %arg6[%c18_259, %c0_260, %c0_261] : memref<25x32x32xbf16, #tpu.memory_space<vmem>>, vector<1x32x32xbf16>
    %566 = vector.shape_cast %565 : vector<1x32x32xbf16> to vector<32x32xbf16>
    %567 = vector.shape_cast %566 : vector<32x32xbf16> to vector<1x32x32xbf16>
    %568 = vector.shape_cast %567 : vector<1x32x32xbf16> to vector<1x32x32xbf16>
    %569 = vector.broadcast %568 : vector<1x32x32xbf16> to vector<4x32x32xbf16>
    "tpu.trace_start"() <{level = 10 : i32, message = "hwc,hco->hwo"}> : () -> ()
    %cst_262 = arith.constant dense<0.000000e+00> : vector<4x4x32xf32>
    %570 = tpu.matmul %564, %569, %cst_262 {dimension_numbers = #tpu.dot_dimension_numbers<[2], [1], [1], [2], [0, 0, 0, 1, 1, 2], [0], [0]>} : vector<4x4x32xbf16>, vector<4x32x32xbf16>, vector<4x4x32xf32> -> vector<4x4x32xf32>
    "tpu.trace_stop"() : () -> ()
    %571 = arith.addf %563, %570 : vector<4x4x32xf32>
    %572 = vector.extract_strided_slice %418 {offsets = [3, 4, 0], sizes = [4, 4, 32], strides = [1, 1, 1]} : vector<8x8x32xbf16> to vector<4x4x32xbf16>
    %c19_263 = arith.constant 19 : index
    %c0_264 = arith.constant 0 : index
    %c0_265 = arith.constant 0 : index
    %573 = vector.load %arg6[%c19_263, %c0_264, %c0_265] : memref<25x32x32xbf16, #tpu.memory_space<vmem>>, vector<1x32x32xbf16>
    %574 = vector.shape_cast %573 : vector<1x32x32xbf16> to vector<32x32xbf16>
    %575 = vector.shape_cast %574 : vector<32x32xbf16> to vector<1x32x32xbf16>
    %576 = vector.shape_cast %575 : vector<1x32x32xbf16> to vector<1x32x32xbf16>
    %577 = vector.broadcast %576 : vector<1x32x32xbf16> to vector<4x32x32xbf16>
    "tpu.trace_start"() <{level = 10 : i32, message = "hwc,hco->hwo"}> : () -> ()
    %cst_266 = arith.constant dense<0.000000e+00> : vector<4x4x32xf32>
    %578 = tpu.matmul %572, %577, %cst_266 {dimension_numbers = #tpu.dot_dimension_numbers<[2], [1], [1], [2], [0, 0, 0, 1, 1, 2], [0], [0]>} : vector<4x4x32xbf16>, vector<4x32x32xbf16>, vector<4x4x32xf32> -> vector<4x4x32xf32>
    "tpu.trace_stop"() : () -> ()
    %579 = arith.addf %571, %578 : vector<4x4x32xf32>
    %580 = vector.extract_strided_slice %418 {offsets = [4, 0, 0], sizes = [4, 4, 32], strides = [1, 1, 1]} : vector<8x8x32xbf16> to vector<4x4x32xbf16>
    %c20_267 = arith.constant 20 : index
    %c0_268 = arith.constant 0 : index
    %c0_269 = arith.constant 0 : index
    %581 = vector.load %arg6[%c20_267, %c0_268, %c0_269] : memref<25x32x32xbf16, #tpu.memory_space<vmem>>, vector<1x32x32xbf16>
    %582 = vector.shape_cast %581 : vector<1x32x32xbf16> to vector<32x32xbf16>
    %583 = vector.shape_cast %582 : vector<32x32xbf16> to vector<1x32x32xbf16>
    %584 = vector.shape_cast %583 : vector<1x32x32xbf16> to vector<1x32x32xbf16>
    %585 = vector.broadcast %584 : vector<1x32x32xbf16> to vector<4x32x32xbf16>
    "tpu.trace_start"() <{level = 10 : i32, message = "hwc,hco->hwo"}> : () -> ()
    %cst_270 = arith.constant dense<0.000000e+00> : vector<4x4x32xf32>
    %586 = tpu.matmul %580, %585, %cst_270 {dimension_numbers = #tpu.dot_dimension_numbers<[2], [1], [1], [2], [0, 0, 0, 1, 1, 2], [0], [0]>} : vector<4x4x32xbf16>, vector<4x32x32xbf16>, vector<4x4x32xf32> -> vector<4x4x32xf32>
    "tpu.trace_stop"() : () -> ()
    %587 = arith.addf %579, %586 : vector<4x4x32xf32>
    %588 = vector.extract_strided_slice %418 {offsets = [4, 1, 0], sizes = [4, 4, 32], strides = [1, 1, 1]} : vector<8x8x32xbf16> to vector<4x4x32xbf16>
    %c21_271 = arith.constant 21 : index
    %c0_272 = arith.constant 0 : index
    %c0_273 = arith.constant 0 : index
    %589 = vector.load %arg6[%c21_271, %c0_272, %c0_273] : memref<25x32x32xbf16, #tpu.memory_space<vmem>>, vector<1x32x32xbf16>
    %590 = vector.shape_cast %589 : vector<1x32x32xbf16> to vector<32x32xbf16>
    %591 = vector.shape_cast %590 : vector<32x32xbf16> to vector<1x32x32xbf16>
    %592 = vector.shape_cast %591 : vector<1x32x32xbf16> to vector<1x32x32xbf16>
    %593 = vector.broadcast %592 : vector<1x32x32xbf16> to vector<4x32x32xbf16>
    "tpu.trace_start"() <{level = 10 : i32, message = "hwc,hco->hwo"}> : () -> ()
    %cst_274 = arith.constant dense<0.000000e+00> : vector<4x4x32xf32>
    %594 = tpu.matmul %588, %593, %cst_274 {dimension_numbers = #tpu.dot_dimension_numbers<[2], [1], [1], [2], [0, 0, 0, 1, 1, 2], [0], [0]>} : vector<4x4x32xbf16>, vector<4x32x32xbf16>, vector<4x4x32xf32> -> vector<4x4x32xf32>
    "tpu.trace_stop"() : () -> ()
    %595 = arith.addf %587, %594 : vector<4x4x32xf32>
    %596 = vector.extract_strided_slice %418 {offsets = [4, 2, 0], sizes = [4, 4, 32], strides = [1, 1, 1]} : vector<8x8x32xbf16> to vector<4x4x32xbf16>
    %c22_275 = arith.constant 22 : index
    %c0_276 = arith.constant 0 : index
    %c0_277 = arith.constant 0 : index
    %597 = vector.load %arg6[%c22_275, %c0_276, %c0_277] : memref<25x32x32xbf16, #tpu.memory_space<vmem>>, vector<1x32x32xbf16>
    %598 = vector.shape_cast %597 : vector<1x32x32xbf16> to vector<32x32xbf16>
    %599 = vector.shape_cast %598 : vector<32x32xbf16> to vector<1x32x32xbf16>
    %600 = vector.shape_cast %599 : vector<1x32x32xbf16> to vector<1x32x32xbf16>
    %601 = vector.broadcast %600 : vector<1x32x32xbf16> to vector<4x32x32xbf16>
    "tpu.trace_start"() <{level = 10 : i32, message = "hwc,hco->hwo"}> : () -> ()
    %cst_278 = arith.constant dense<0.000000e+00> : vector<4x4x32xf32>
    %602 = tpu.matmul %596, %601, %cst_278 {dimension_numbers = #tpu.dot_dimension_numbers<[2], [1], [1], [2], [0, 0, 0, 1, 1, 2], [0], [0]>} : vector<4x4x32xbf16>, vector<4x32x32xbf16>, vector<4x4x32xf32> -> vector<4x4x32xf32>
    "tpu.trace_stop"() : () -> ()
    %603 = arith.addf %595, %602 : vector<4x4x32xf32>
    %604 = vector.extract_strided_slice %418 {offsets = [4, 3, 0], sizes = [4, 4, 32], strides = [1, 1, 1]} : vector<8x8x32xbf16> to vector<4x4x32xbf16>
    %c23_279 = arith.constant 23 : index
    %c0_280 = arith.constant 0 : index
    %c0_281 = arith.constant 0 : index
    %605 = vector.load %arg6[%c23_279, %c0_280, %c0_281] : memref<25x32x32xbf16, #tpu.memory_space<vmem>>, vector<1x32x32xbf16>
    %606 = vector.shape_cast %605 : vector<1x32x32xbf16> to vector<32x32xbf16>
    %607 = vector.shape_cast %606 : vector<32x32xbf16> to vector<1x32x32xbf16>
    %608 = vector.shape_cast %607 : vector<1x32x32xbf16> to vector<1x32x32xbf16>
    %609 = vector.broadcast %608 : vector<1x32x32xbf16> to vector<4x32x32xbf16>
    "tpu.trace_start"() <{level = 10 : i32, message = "hwc,hco->hwo"}> : () -> ()
    %cst_282 = arith.constant dense<0.000000e+00> : vector<4x4x32xf32>
    %610 = tpu.matmul %604, %609, %cst_282 {dimension_numbers = #tpu.dot_dimension_numbers<[2], [1], [1], [2], [0, 0, 0, 1, 1, 2], [0], [0]>} : vector<4x4x32xbf16>, vector<4x32x32xbf16>, vector<4x4x32xf32> -> vector<4x4x32xf32>
    "tpu.trace_stop"() : () -> ()
    %611 = arith.addf %603, %610 : vector<4x4x32xf32>
    %612 = vector.extract_strided_slice %418 {offsets = [4, 4, 0], sizes = [4, 4, 32], strides = [1, 1, 1]} : vector<8x8x32xbf16> to vector<4x4x32xbf16>
    %c24_283 = arith.constant 24 : index
    %c0_284 = arith.constant 0 : index
    %c0_285 = arith.constant 0 : index
    %613 = vector.load %arg6[%c24_283, %c0_284, %c0_285] : memref<25x32x32xbf16, #tpu.memory_space<vmem>>, vector<1x32x32xbf16>
    %614 = vector.shape_cast %613 : vector<1x32x32xbf16> to vector<32x32xbf16>
    %615 = vector.shape_cast %614 : vector<32x32xbf16> to vector<1x32x32xbf16>
    %616 = vector.shape_cast %615 : vector<1x32x32xbf16> to vector<1x32x32xbf16>
    %617 = vector.broadcast %616 : vector<1x32x32xbf16> to vector<4x32x32xbf16>
    "tpu.trace_start"() <{level = 10 : i32, message = "hwc,hco->hwo"}> : () -> ()
    %cst_286 = arith.constant dense<0.000000e+00> : vector<4x4x32xf32>
    %618 = tpu.matmul %612, %617, %cst_286 {dimension_numbers = #tpu.dot_dimension_numbers<[2], [1], [1], [2], [0, 0, 0, 1, 1, 2], [0], [0]>} : vector<4x4x32xbf16>, vector<4x32x32xbf16>, vector<4x4x32xf32> -> vector<4x4x32xf32>
    "tpu.trace_stop"() : () -> ()
    %619 = arith.addf %611, %618 : vector<4x4x32xf32>
    %c0_287 = arith.constant 0 : index
    %c0_288 = arith.constant 0 : index
    %620 = vector.load %arg7[%c0_287, %c0_288] : memref<1x32xf32, #tpu.memory_space<vmem>>, vector<1x32xf32>
    %621 = vector.shape_cast %620 : vector<1x32xf32> to vector<1x1x32xf32>
    %622 = vector.broadcast %621 : vector<1x1x32xf32> to vector<4x4x32xf32>
    %623 = arith.addf %619, %622 : vector<4x4x32xf32>
    %cst_289 = arith.constant 0.000000e+00 : f32
    %624 = vector.broadcast %cst_289 : f32 to vector<4x4x32xf32>
    %625 = arith.maximumf %623, %624 : vector<4x4x32xf32>
    %626 = vector.extract_strided_slice %625 {offsets = [0, 0, 0], sizes = [1, 4, 32], strides = [1, 1, 1]} : vector<4x4x32xf32> to vector<1x4x32xf32>
    %627 = vector.shape_cast %626 : vector<1x4x32xf32> to vector<4x32xf32>
    %628 = tpu.transpose %627, [1, 0] : vector<4x32xf32> -> vector<32x4xf32>
    %c0_290 = arith.constant 0 : index
    %c0_291 = arith.constant 0 : index
    %c0_292 = arith.constant 0 : index
    %629 = vector.load %arg8[%c0_290, %c0_291, %c0_292] : memref<1x32x16xf32, #tpu.memory_space<vmem>>, vector<1x32x4xf32>
    %630 = vector.shape_cast %629 : vector<1x32x4xf32> to vector<32x4xf32>
    %631 = vector.shape_cast %628 : vector<32x4xf32> to vector<1x32x4xf32>
    tpu.vector_store %arg8[%c0_290, %c0_291, %c0_292], %631 {strides = array<i32>} : memref<1x32x16xf32, #tpu.memory_space<vmem>>, vector<1x32x4xf32>,
    %632 = vector.extract_strided_slice %625 {offsets = [1, 0, 0], sizes = [1, 4, 32], strides = [1, 1, 1]} : vector<4x4x32xf32> to vector<1x4x32xf32>
    %633 = vector.shape_cast %632 : vector<1x4x32xf32> to vector<4x32xf32>
    %634 = tpu.transpose %633, [1, 0] : vector<4x32xf32> -> vector<32x4xf32>
    %c0_293 = arith.constant 0 : index
    %c0_294 = arith.constant 0 : index
    %c4_295 = arith.constant 4 : index
    %635 = vector.load %arg8[%c0_293, %c0_294, %c4_295] : memref<1x32x16xf32, #tpu.memory_space<vmem>>, vector<1x32x4xf32>
    %636 = vector.shape_cast %635 : vector<1x32x4xf32> to vector<32x4xf32>
    %637 = vector.shape_cast %634 : vector<32x4xf32> to vector<1x32x4xf32>
    tpu.vector_store %arg8[%c0_293, %c0_294, %c4_295], %637 {strides = array<i32>} : memref<1x32x16xf32, #tpu.memory_space<vmem>>, vector<1x32x4xf32>,
    %638 = vector.extract_strided_slice %625 {offsets = [2, 0, 0], sizes = [1, 4, 32], strides = [1, 1, 1]} : vector<4x4x32xf32> to vector<1x4x32xf32>
    %639 = vector.shape_cast %638 : vector<1x4x32xf32> to vector<4x32xf32>
    %640 = tpu.transpose %639, [1, 0] : vector<4x32xf32> -> vector<32x4xf32>
    %c0_296 = arith.constant 0 : index
    %c0_297 = arith.constant 0 : index
    %c8_298 = arith.constant 8 : index
    %641 = vector.load %arg8[%c0_296, %c0_297, %c8_298] : memref<1x32x16xf32, #tpu.memory_space<vmem>>, vector<1x32x4xf32>
    %642 = vector.shape_cast %641 : vector<1x32x4xf32> to vector<32x4xf32>
    %643 = vector.shape_cast %640 : vector<32x4xf32> to vector<1x32x4xf32>
    tpu.vector_store %arg8[%c0_296, %c0_297, %c8_298], %643 {strides = array<i32>} : memref<1x32x16xf32, #tpu.memory_space<vmem>>, vector<1x32x4xf32>,
    %644 = vector.extract_strided_slice %625 {offsets = [3, 0, 0], sizes = [1, 4, 32], strides = [1, 1, 1]} : vector<4x4x32xf32> to vector<1x4x32xf32>
    %645 = vector.shape_cast %644 : vector<1x4x32xf32> to vector<4x32xf32>
    %646 = tpu.transpose %645, [1, 0] : vector<4x32xf32> -> vector<32x4xf32>
    %c0_299 = arith.constant 0 : index
    %c0_300 = arith.constant 0 : index
    %c12_301 = arith.constant 12 : index
    %647 = vector.load %arg8[%c0_299, %c0_300, %c12_301] : memref<1x32x16xf32, #tpu.memory_space<vmem>>, vector<1x32x4xf32>
    %648 = vector.shape_cast %647 : vector<1x32x4xf32> to vector<32x4xf32>
    %649 = vector.shape_cast %646 : vector<32x4xf32> to vector<1x32x4xf32>
    tpu.vector_store %arg8[%c0_299, %c0_300, %c12_301], %649 {strides = array<i32>} : memref<1x32x16xf32, #tpu.memory_space<vmem>>, vector<1x32x4xf32>,
    return
  }
  func.func @transform_0(%arg0: i32) -> (i32, i32, i32, i32) {
    %c0_i32 = arith.constant 0 : i32
    %c0_i32_0 = arith.constant 0 : i32
    %c0_i32_1 = arith.constant 0 : i32
    %c0_i32_2 = arith.constant 0 : i32
    return %arg0, %c0_i32, %c0_i32_0, %c0_i32_1 : i32, i32, i32, i32
  }
  func.func @transform_1(%arg0: i32) -> (i32, i32, i32) {
    %c0_i32 = arith.constant 0 : i32
    %c0_i32_0 = arith.constant 0 : i32
    %c0_i32_1 = arith.constant 0 : i32
    %c0_i32_2 = arith.constant 0 : i32
    return %c0_i32, %c0_i32_0, %c0_i32_1 : i32, i32, i32
  }
  func.func @transform_2(%arg0: i32) -> (i32, i32) {
    %c0_i32 = arith.constant 0 : i32
    %c0_i32_0 = arith.constant 0 : i32
    %c0_i32_1 = arith.constant 0 : i32
    return %c0_i32, %c0_i32_0 : i32, i32
  }
  func.func @transform_3(%arg0: i32) -> (i32, i32, i32) {
    %c0_i32 = arith.constant 0 : i32
    %c0_i32_0 = arith.constant 0 : i32
    %c0_i32_1 = arith.constant 0 : i32
    %c0_i32_2 = arith.constant 0 : i32
    return %c0_i32, %c0_i32_0, %c0_i32_1 : i32, i32, i32
  }
  func.func @transform_4(%arg0: i32) -> (i32, i32) {
    %c0_i32 = arith.constant 0 : i32
    %c0_i32_0 = arith.constant 0 : i32
    %c0_i32_1 = arith.constant 0 : i32
    return %c0_i32, %c0_i32_0 : i32, i32
  }
  func.func @transform_5(%arg0: i32) -> (i32, i32, i32) {
    %c0_i32 = arith.constant 0 : i32
    %c0_i32_0 = arith.constant 0 : i32
    %c0_i32_1 = arith.constant 0 : i32
    %c0_i32_2 = arith.constant 0 : i32
    return %c0_i32, %c0_i32_0, %c0_i32_1 : i32, i32, i32
  }
  func.func @transform_6(%arg0: i32) -> (i32, i32) {
    %c0_i32 = arith.constant 0 : i32
    %c0_i32_0 = arith.constant 0 : i32
    %c0_i32_1 = arith.constant 0 : i32
    return %c0_i32, %c0_i32_0 : i32, i32
  }
  func.func @transform_7(%arg0: i32) -> (i32, i32, i32) {
    %c0_i32 = arith.constant 0 : i32
    %c0_i32_0 = arith.constant 0 : i32
    %c0_i32_1 = arith.constant 0 : i32
    return %arg0, %c0_i32, %c0_i32_0 : i32, i32, i32
  }
}

</mosaic_0001>

<bundles_post_ra>
// kernel: dqn_forward.1
= control target key start
LH: loop header
LB: loop body
LE: loop exit
PB: predicated region body
PF: predicated region fallthrough
CT: control target
= control target key end

     0   :  { %s12762_s24 = smov 0   ;;  %s17158_s0 = inlined_call_operand.vmem [shape: f32[2,16,16,3], index: 0, kind: input, shape index: {}]   ;;  %s17159_s1 = inlined_call_operand.vmem [shape: bf16[25,3,16], index: 1, kind: input, shape index: {}]   ;;  %s17160_s2 = inlined_call_operand.vmem [shape: f32[1,16], index: 2, kind: input, shape index: {}]   ;;  %s17161_s3 = inlined_call_operand.vmem [shape: bf16[25,16,32], index: 3, kind: input, shape index: {}]   ;;  %s17162_s4 = inlined_call_operand.vmem [shape: f32[1,32], index: 4, kind: input, shape index: {}]   ;;  %s17163_s5 = inlined_call_operand.vmem [shape: bf16[25,32,32], index: 5, kind: input, shape index: {}]   ;;  %s17164_s6 = inlined_call_operand.vmem [shape: f32[1,32], index: 6, kind: input, shape index: {}]   ;;  %s17165_s7 = inlined_call_operand.vmem [shape: f32[2,32,16], index: 7, kind: output, shape index: {}]  }
   0x1 LB: > { %s11538_s25 = sadd.s32 4294967295, %s12716_s24   ;;  %p11542_p0 = scmp.ge.s32.totalorder %s12716_s24, 1  ;;  %s12716_s24 = sphi %s12762_s24, %s17_s24  }
   0x2   : > { %p237_p1 = scmp.lt.s32.totalorder %s12716_s24, 3 }
   0x4   : > { %p238_p2 = pnand %p11542_p0, %p237_p1 }
   0x6   : > { %241 = sbr.rel (%p238_p2) target bundleno = 3107 (0xc23), region = 48 }
   0xb   : > { %v11547_v0 = vld [vmem:[%s17159_s1 + $0x2] sm:$0x3]  ;;  %vm363_vm0 = vcmask 1040384   ;;  %vm364_vm1 = vcmask 1041408   ;;  %p269_p3 = scmp.lt.s32.totalorder %s11538_s25, 1  ;;  %v12718_v1 = vmov 65535  }
   0xc   : > { %v365_v2 = vsel %vm363_vm0, 4294967295, %v12718_v1  ;;  %vm359_vm2 = vcmask 23552   ;;  %vm5820_vm3 = vcmask 130048   ;;  %vm9249_vm4 = vcmask 261120   ;;  %s12720_s9 = smov 4   ;;  %s12721_s10 = smov 8  }
   0xd   : > { %v12773_v3 = vsel %vm364_vm1, %v365_v2, 0  ;;  %s17490_s25 = smov (!%p269_p3, %s11538_s25), 1  ;;  %vm11319_vm5 = vcmask 31744   ;;  %vm11372_vm6 = vcmask 64544   ;;  %vm11425_vm7 = vcmask 97344  }
   0xe   : > { %v12778_v4 = vand.u32 %v11547_v0, %v12773_v3  ;;  %s12617_s28 = sshll.u32 %s17490_s25, 8  ;;  %s12618_s27 = sshll.u32 %s17490_s25, 5  ;;  %vm11478_vm8 = vcmask 130144  }
   0xf   : > { %s12786_s8 = scalar_lea.vmem %s17158_s0, %s12617_s28  ;;  %s17133_s30 = scalar_lea.vmem %s17165_s7, %s12618_s27 }
  0x10   : > { %377 = vmatpush.bf16.msra.mxu0 %v12778_v4  ;;  %406 = vmatpush.bf16.msra.mxu1 %v12778_v4  ;;  %v280_v5 = vld [vmem:[%s12786_s8] sm:$0xff]  ;;  %v281_v6 = vld [vmem:[%s12786_s8 + $0x8] sm:$0xff]  ;;  %v282_v7 = vld [vmem:[%s12786_s8 + $0x10] sm:$0xff]  ;;  %s12719_s25 = smov 12  }
  0x11   : > { %435 = vmatpush.bf16.msra.mxu2 %v12778_v4  ;;  %464 = vmatpush.bf16.msra.mxu3 %v12778_v4  ;;  %v312_v8 = vpack.c.bf16 %v280_v5, %v280_v5  ;;  %v313_v9 = vpack.c.bf16 %v281_v6, %v281_v6  ;;  %v283_v10 = vld [vmem:[%s12786_s8 + $0x18] sm:$0xff]  ;;  %v314_v11 = vpack.c.bf16 %v282_v7, %v282_v7  ;;  %v284_v12 = vld [vmem:[%s12786_s8 + $0x20] sm:$0xff]  ;;  %v285_v13 = vld [vmem:[%s12786_s8 + $0x28] sm:$0xff] }
  0x12   : > { %v315_v14 = vpack.c.bf16 %v283_v10, %v283_v10  ;;  %v316_v15 = vpack.c.bf16 %v284_v12, %v284_v12  ;;  %v317_v16 = vpack.c.bf16 %v285_v13, %v285_v13  ;;  %v286_v17 = vld [vmem:[%s12786_s8 + $0x30] sm:$0xff]  ;;  %v287_v18 = vld [vmem:[%s12786_s8 + $0x38] sm:$0xff]  ;;  %v288_v19 = vld [vmem:[%s12786_s8 + $0x40] sm:$0xff] }
  0x13   : > { %v349_v20 = vunpack.c.l.b16 %v312_v8  ;;  %v350_v21 = vunpack.c.l.b16 %v313_v9  ;;  %v386_v22 = vunpack.c.l.b16 %v314_v11  ;;  %v318_v23 = vpack.c.bf16 %v286_v17, %v286_v17  ;;  %v289_v24 = vld [vmem:[%s12786_s8 + $0x48] sm:$0xff]  ;;  %v290_v25 = vld [vmem:[%s12786_s8 + $0x50] sm:$0xff]  ;;  %v291_v54 = vld [vmem:[%s12786_s8 + $0x58] sm:$0xff] }
  0x14   : > { %493 = vmatpush.bf16.msrb.mxu0 %v12778_v4  ;;  %522 = vmatpush.bf16.msrb.mxu1 %v12778_v4  ;;  %v387_v26 = vunpack.c.l.b16 %v315_v14  ;;  %v415_v27 = vunpack.c.l.b16 %v316_v15  ;;  %v416_v28 = vunpack.c.l.b16 %v317_v16  ;;  %v319_v29 = vpack.c.bf16 %v287_v18, %v287_v18  ;;  %v292_v59 = vld [vmem:[%s12786_s8 + $0x60] sm:$0xff]  ;;  %v293_v60 = vld [vmem:[%s12786_s8 + $0x68] sm:$0xff]  ;;  %v294_v7 = vld [vmem:[%s12786_s8 + $0x70] sm:$0xff] }
  0x15   : > { %551 = vmatpush.bf16.msrb.mxu2 %v12778_v4  ;;  %580 = vmatpush.bf16.msrb.mxu3 %v12778_v4  ;;  %v12805_v30 = vpack.c.b16 %v350_v21, %v349_v20  ;;  %v444_v31 = vunpack.c.l.b16 %v318_v23  ;;  %v320_v32 = vpack.c.bf16 %v288_v19, %v288_v19  ;;  %v321_v33 = vpack.c.bf16 %v289_v24, %v289_v24  ;;  %v295_v11 = vld [vmem:[%s12786_s8 + $0x78] sm:$0xff]  ;;  %v296_v18 = vld [vmem:[%s12786_s8 + $0x80] sm:$0xff]  ;;  %v297_v21 = vld [vmem:[%s12786_s8 + $0x88] sm:$0xff] }
  0x16   : > { %v12807_v34 = vpack.c.b16 %v387_v26, %v386_v22  ;;  %v12809_v35 = vpack.c.b16 %v416_v28, %v415_v27  ;;  %v445_v36 = vunpack.c.l.b16 %v319_v29  ;;  %v322_v37 = vpack.c.bf16 %v290_v25, %v290_v25  ;;  %v298_v22 = vld [vmem:[%s12786_s8 + $0x90] sm:$0xff]  ;;  %v299_v26 = vld [vmem:[%s12786_s8 + $0x98] sm:$0xff] }
  0x17   : > { %v353_v38 = vshrl.u32 %v12805_v30, 16  ;;  %v355_v39 = vshll.u32 %v12805_v30, 16  ;;  %v473_v40 = vunpack.c.l.b16 %v320_v32  ;;  %v474_v41 = vunpack.c.l.b16 %v321_v33  ;;  %v300_v32 = vld [vmem:[%s12786_s8 + $0xa0] sm:$0xff]  ;;  %v301_v33 = vld [vmem:[%s12786_s8 + $0xa8] sm:$0xff] }
  0x18   : > { %v390_v42 = vshrl.u32 %v12807_v34, 16  ;;  %v392_v43 = vshll.u32 %v12807_v34, 16  ;;  %v419_v44 = vshrl.u32 %v12809_v35, 16  ;;  %v421_v45 = vshll.u32 %v12809_v35, 16 }
  0x19   : > { %v357_v46 = vrot.slane %v355_v39, 1  ;;  %v12817_v47 = vrot.slane %v353_v38, 1  ;;  %v12819_v48 = vrot.slane %v355_v39, 2  ;;  %v12821_v49 = vpack.c.b16 %v445_v36, %v444_v31 }
  0x1a   : > { %v394_v50 = vrot.slane %v392_v43, 1  ;;  %v1168_v51 = vrot.slane %v390_v42, 1  ;;  %v1169_v52 = vrot.slane %v392_v43, 2  ;;  %v423_v53 = vrot.slane %v421_v45, 1 }
  0x1b   : > { %17277 = vst [vmem:[#allocation2_spill] sm:$0xff] %v12821_v49  ;;  %v358_v55 = vor.u32 %v357_v46, %v353_v38  ;;  %v1147_v56 = vor.u32 %v12819_v48, %v12817_v47  ;;  %v1188_v57 = vrot.slane %v419_v44, 1  ;;  %v1189_v58 = vrot.slane %v421_v45, 2 }
  0x1c   : > { %v12828_v61 = vor.u32 %v394_v50, %v390_v42  ;;  %v12830_v62 = vor.u32 %v1169_v52, %v1168_v51  ;;  %v12832_v63 = vor.u32 %v423_v53, %v419_v44  ;;  %v448_v0 = vshrl.u32 %v12821_v49, 16  ;;  %v302_v53 = vld [vmem:[%s12786_s8 + $0xb0] sm:$0xff] }
  0x1d   : > { %11548 = vmatmul.msk.bf16.vlgmr.msra.gmra.mxu0 %vm359_vm2, %v358_v55  ;;  %v12836_v1 = vor.u32 %v1189_v58, %v1188_v57  ;;  %v450_v2 = vshll.u32 %v12821_v49, 16  ;;  %v12839_v5 = vpack.c.b16 %v474_v41, %v473_v40  ;;  %v323_v6 = vpack.c.bf16 %v291_v54, %v291_v54  ;;  %v303_v54 = vld [vmem:[%s12786_s8 + $0xb8] sm:$0xff]  ;;  %v344_v55 = vld [vmem:[%s17159_s1] sm:$0x3] }
  0x1e   : > { %17278 = vst [vmem:[#allocation3_spill] sm:$0xff] %v12830_v62  ;;  %11549 = vmatmul.msk.bf16.vlgmr.msra.gmra.mxu1 %vm359_vm2, %v12828_v61  ;;  %11550 = vmatmul.msk.bf16.vlgmr.msra.gmra.mxu2 %vm359_vm2, %v12832_v63  ;;  %v502_v8 = vunpack.c.l.b16 %v322_v37  ;;  %v324_v9 = vpack.c.bf16 %v292_v59, %v292_v59  ;;  %v325_v10 = vpack.c.bf16 %v293_v60, %v293_v60 }
  0x1f   : > { %17279 = vst [vmem:[#allocation4_spill] sm:$0xff] %v12836_v1  ;;  %v452_v12 = vrot.slane %v450_v2, 1  ;;  %v479_v13 = vshll.u32 %v12839_v5, 16  ;;  %609 = vmatpush.bf16.msra.mxu0 %v12778_v4  ;;  %638 = vmatpush.bf16.msra.mxu1 %v12778_v4  ;;  %v503_v14 = vunpack.c.l.b16 %v323_v6  ;;  %v326_v17 = vpack.c.bf16 %v294_v7, %v294_v7 }
  0x20   : > { %17280 = vst [vmem:[#allocation5_spill] sm:$0xff] %v12839_v5  ;;  %v531_v15 = vunpack.c.l.b16 %v324_v9  ;;  %v532_v16 = vunpack.c.l.b16 %v325_v10  ;;  %667 = vmatpush.bf16.msra.mxu2 %v12778_v4  ;;  %v327_v20 = vpack.c.bf16 %v295_v11, %v295_v11  ;;  %v477_v27 = vshrl.u32 %v12839_v5, 16 }
  0x21   : > { %v12856_v19 = vor.u32 %v452_v12, %v448_v0  ;;  %v12860_v23 = vpack.c.b16 %v503_v14, %v502_v8  ;;  %v560_v25 = vunpack.c.l.b16 %v326_v17  ;;  %v481_v28 = vrot.slane %v479_v13, 1 }
  0x22   : > { %v12862_v24 = vpack.c.b16 %v532_v16, %v531_v15  ;;  %v561_v29 = vunpack.c.l.b16 %v327_v20  ;;  %v328_v31 = vpack.c.bf16 %v296_v18, %v296_v18  ;;  %v329_v38 = vpack.c.bf16 %v297_v21, %v297_v21 }
  0x23   : > { %17281 = vst [vmem:[#allocation6_spill] sm:$0xff] %v12860_v23  ;;  %11551 = vmatmul.msk.bf16.vlgmr.msra.gmra.mxu3 %vm359_vm2, %v12856_v19  ;;  %v508_v36 = vshll.u32 %v12860_v23, 16  ;;  %v330_v39 = vpack.c.bf16 %v298_v22, %v298_v22  ;;  %v506_v40 = vshrl.u32 %v12860_v23, 16  ;;  %v331_v43 = vpack.c.bf16 %v299_v26, %v299_v26 }
  0x24   : > { %17282 = vst [vmem:[#allocation7_spill] sm:$0xff] %v12862_v24  ;;  %v537_v37 = vshll.u32 %v12862_v24, 16  ;;  %696 = vmatpush.bf16.msra.mxu3 %v12778_v4  ;;  %v535_v41 = vshrl.u32 %v12862_v24, 16  ;;  %v12877_v42 = vpack.c.b16 %v561_v29, %v560_v25  ;;  %v332_v46 = vpack.c.bf16 %v300_v32, %v300_v32 }
  0x25   : > { %v510_v44 = vrot.slane %v508_v36, 1  ;;  %v333_v50 = vpack.c.bf16 %v301_v33, %v301_v33  ;;  %v12886_v4 = vor.u32 %v481_v28, %v477_v27  ;;  %v589_v52 = vunpack.c.l.b16 %v328_v31 }
  0x26   : > { %17283 = vst [vmem:[#allocation8_spill] sm:$0xff] %v12877_v42  ;;  %v539_v45 = vrot.slane %v537_v37, 1  ;;  %v17175_v51 = vshll.u32 %v12877_v42, 16  ;;  %v17176_v57 = vshrl.u32 %v12877_v42, 16  ;;  %v590_v58 = vunpack.c.l.b16 %v329_v38 }
  0x27   : > { %v618_v59 = vunpack.c.l.b16 %v330_v39  ;;  %v619_v60 = vunpack.c.l.b16 %v331_v43  ;;  %v12896_v6 = vor.u32 %v510_v44, %v506_v40  ;;  %v647_v8 = vunpack.c.l.b16 %v332_v46 }
  0x28   : > { %v12900_v7 = vor.u32 %v539_v45, %v535_v41  ;;  %v648_v9 = vunpack.c.l.b16 %v333_v50  ;;  %v568_v10 = vrot.slane %v17175_v51, 1  ;;  %v334_v11 = vpack.c.bf16 %v302_v53, %v302_v53 }
  0x29   : > { %v335_v12 = vpack.c.bf16 %v303_v54, %v303_v54  ;;  %v706_v14 = vand.u32 %v12773_v3, %v344_v55  ;;  %v12907_v15 = vpack.c.b16 %v590_v58, %v589_v52  ;;  %v12913_v16 = vpack.c.b16 %v619_v60, %v618_v59  ;;  %v11572_v54 = vld [vmem:[%s17159_s1 + $0x4] sm:$0x3] }
  0x2a   : > { %v12915_v17 = vpack.c.b16 %v648_v9, %v647_v8  ;;  %v12919_v18 = vor.u32 %v568_v10, %v17176_v57  ;;  %v676_v20 = vunpack.c.l.b16 %v334_v11  ;;  %v905_v55 = vand.u32 %v11572_v54, %v12773_v3  ;;  %v11585_v9 = vld [vmem:[%s17159_s1 + $0x6] sm:$0x3] }
  0x2b   : > { %17284 = vst [vmem:[#allocation9_spill] sm:$0xff] %v12907_v15  ;;  %v677_v21 = vunpack.c.l.b16 %v335_v12  ;;  %v17173_v22 = vshll.u32 %v12907_v15, 16  ;;  %v17171_v25 = vshll.u32 %v12913_v16, 16  ;;  %v17174_v29 = vshrl.u32 %v12907_v15, 16 }
  0x2c   : > { %17285 = vst [vmem:[#allocation10_spill] sm:$0xff] %v12913_v16  ;;  %v17169_v26 = vshll.u32 %v12915_v17, 16  ;;  %v17172_v32 = vshrl.u32 %v12913_v16, 16  ;;  %v17170_v38 = vshrl.u32 %v12915_v17, 16  ;;  %v900_v58 = vrot.slane %v12805_v30, 1 }
  0x2d   : > { %11552 = vmatmul.msk.bf16.vlgmr.msrb.gmra.mxu0 %vm359_vm2, %v12886_v4  ;;  %17286 = vst [vmem:[#allocation11_spill] sm:$0xff] %v12915_v17  ;;  %v12926_v28 = vpack.c.b16 %v677_v21, %v676_v20  ;;  %v597_v31 = vrot.slane %v17173_v22, 1  ;;  %v626_v33 = vrot.slane %v17171_v25, 1  ;;  %v17166_v59 = vrot.slane %v12807_v34, 1 }
  0x2e   : > { %11553 = vmatmul.msk.bf16.vlgmr.msrb.gmra.mxu1 %vm359_vm2, %v12896_v6  ;;  %11554 = vmatmul.msk.bf16.vlgmr.msrb.gmra.mxu2 %vm359_vm2, %v12900_v7  ;;  %v655_v39 = vrot.slane %v17169_v26, 1  ;;  %v12996_v60 = vrot.slane %v12809_v35, 1  ;;  %v13005_v8 = vrot.slane %v12821_v49, 1  ;;  %v13013_v10 = vrot.slane %v12839_v5, 1 }
  0x2f   : > { %715 = vmatpush.bf16.msrb.mxu0 %v706_v14  ;;  %731 = vmatpush.bf16.msrb.mxu1 %v706_v14  ;;  %v17167_v43 = vshll.u32 %v12926_v28, 16  ;;  %v12940_v44 = vor.u32 %v597_v31, %v17174_v29  ;;  %v12944_v45 = vor.u32 %v626_v33, %v17172_v32  ;;  %v17168_v50 = vshrl.u32 %v12926_v28, 16 }
  0x30   : > { %747 = vmatpush.bf16.msrb.mxu2 %v706_v14  ;;  %v12948_v46 = vor.u32 %v655_v39, %v17170_v38  ;;  %17288 = vst [vmem:[#allocation13_spill] sm:$0xff] %v12996_v60  ;;  %v1208_v11 = vrot.slane %v448_v0, 1  ;;  %v1209_v12 = vrot.slane %v450_v2, 2  ;;  %v13023_v20 = vrot.slane %v12862_v24, 1 }
  0x31   : > { %v684_v52 = vrot.slane %v17167_v43, 1  ;;  %17289 = vst [vmem:[#allocation14_spill] sm:$0xff] %v13005_v8  ;;  %v1152_v21 = vand.u32 %v11585_v9, %v12773_v3  ;;  %v13035_v2 = vrot.slane %v12877_v42, 1  ;;  %v13040_v31 = vrot.slane %v12907_v15, 1 }
  0x32   : > { %17290 = vst [vmem:[#allocation15_spill] sm:$0xff] %v13013_v10  ;;  %v13032_v0 = vor.u32 %v1209_v12, %v1208_v11  ;;  %v13045_v39 = vrot.slane %v12913_v16, 1  ;;  %v1228_v48 = vrot.slane %v477_v27, 1  ;;  %v1248_v22 = vrot.slane %v506_v40, 1  ;;  %v11598_v27 = vld [vmem:[%s17159_s1 + $0x8] sm:$0x3] }
  0x33   : > { %11555 = vmatmul.msk.bf16.vlgmr.msrb.gmra.mxu3 %vm359_vm2, %v12919_v18  ;;  %v12961_v53 = vor.u32 %v684_v52, %v17168_v50  ;;  %17292 = vst [vmem:[#allocation17_spill] sm:$0xff] %v13023_v20  ;;  %v13048_v52 = vrot.slane %v12915_v17, 1  ;;  %v1249_v29 = vrot.slane %v508_v36, 2  ;;  %v1268_v51 = vrot.slane %v535_v41, 1 }
  0x34   : > { %763 = vmatpush.bf16.msrb.mxu3 %v706_v14  ;;  %17293 = vst [vmem:[#allocation18_spill] sm:$0xff] %v13032_v0  ;;  %v17302_v41 = vshrl.u32 %v12877_v42, 16 }
  0x35   : > { %17287 = vst [vmem:[#allocation12_spill] sm:$0xff] %v12961_v53  ;;  %v13118_v40 = vor.u32 %v1249_v29, %v1248_v22 }
  0x36   : > { %17294 = vst [vmem:[#allocation19_spill] sm:$0xff] %v13035_v2 }
  0x37   : > { %17295 = vst [vmem:[#allocation20_spill] sm:$0xff] %v13040_v31 }
  0x38   : > { %17296 = vst [vmem:[#allocation21_spill] sm:$0xff] %v13045_v39 }
  0x39   : > { %17297 = vst [vmem:[#allocation22_spill] sm:$0xff] %v13048_v52 }
  0x3a   : > { %17300 = vst [vmem:[#allocation25_spill] sm:$0xff] %v13118_v40 }
  0x3d   : > { %11556 = vmatmul.msk.bf16.vlgmr.msra.gmra.mxu0 %vm359_vm2, %v12940_v44 }
  0x3e   : > { %11557 = vmatmul.msk.bf16.vlgmr.msra.gmra.mxu1 %vm359_vm2, %v12944_v45  ;;  %11558 = vmatmul.msk.bf16.vlgmr.msra.gmra.mxu2 %vm359_vm2, %v12948_v46 }
  0x3f   : > { %779 = vmatpush.bf16.msra.mxu0 %v706_v14  ;;  %795 = vmatpush.bf16.msra.mxu1 %v706_v14 }
  0x40   : > { %811 = vmatpush.bf16.msra.mxu2 %v706_v14 }
  0x43   : > { %11559 = vmatmul.msk.bf16.vlgmr.msra.gmra.mxu3 %vm359_vm2, %v12961_v53 }
  0x44   : > { %827 = vmatpush.bf16.msra.mxu3 %v706_v14 }
  0x4d   : > { %11560 = vmatmul.msk.bf16.vlgmr.msrb.gmra.mxu0 %vm359_vm2, %v12805_v30 }
  0x4e   : > { %11561 = vmatmul.msk.bf16.vlgmr.msrb.gmra.mxu1 %vm359_vm2, %v12807_v34  ;;  %11562 = vmatmul.msk.bf16.vlgmr.msrb.gmra.mxu2 %vm359_vm2, %v12809_v35 }
  0x4f   : > { %843 = vmatpush.bf16.msrb.mxu0 %v706_v14  ;;  %859 = vmatpush.bf16.msrb.mxu1 %v706_v14 }
  0x50   : > { %875 = vmatpush.bf16.msrb.mxu2 %v706_v14 }
  0x53   : > { %11563 = vmatmul.msk.bf16.vlgmr.msrb.gmra.mxu3 %vm359_vm2, %v12821_v49 }
  0x54   : > { %891 = vmatpush.bf16.msrb.mxu3 %v706_v14  ;;  %v13020_v14 = vrot.slane %v12860_v23, 1 }
  0x56   : > { %17291 = vst [vmem:[#allocation16_spill] sm:$0xff] %v13020_v14 }
  0x5d   : > { %11564 = vmatmul.msk.bf16.vlgmr.msra.gmra.mxu0 %vm359_vm2, %v12839_v5 }
  0x5e   : > { %11565 = vmatmul.msk.bf16.vlgmr.msra.gmra.mxu1 %vm359_vm2, %v12860_v23  ;;  %11566 = vmatmul.msk.bf16.vlgmr.msra.gmra.mxu2 %vm359_vm2, %v12862_v24 }
  0x5f   : > { %914 = vmatpush.bf16.msra.mxu0 %v905_v55  ;;  %932 = vmatpush.bf16.msra.mxu1 %v905_v55 }
  0x60   : > { %950 = vmatpush.bf16.msra.mxu2 %v905_v55 }
  0x63   : > { %11567 = vmatmul.msk.bf16.vlgmr.msra.gmra.mxu3 %vm359_vm2, %v12877_v42 }
  0x64   : > { %968 = vmatpush.bf16.msra.mxu3 %v905_v55 }
  0x6d   : > { %11568 = vmatmul.msk.bf16.vlgmr.msrb.gmra.mxu0 %vm359_vm2, %v12907_v15 }
  0x6e   : > { %11569 = vmatmul.msk.bf16.vlgmr.msrb.gmra.mxu1 %vm359_vm2, %v12913_v16  ;;  %11570 = vmatmul.msk.bf16.vlgmr.msrb.gmra.mxu2 %vm359_vm2, %v12915_v17 }
  0x6f   : > { %986 = vmatpush.bf16.msrb.mxu0 %v905_v55  ;;  %1004 = vmatpush.bf16.msrb.mxu1 %v905_v55 }
  0x70   : > { %1022 = vmatpush.bf16.msrb.mxu2 %v905_v55 }
  0x73   : > { %11571 = vmatmul.msk.bf16.vlgmr.msrb.gmra.mxu3 %vm359_vm2, %v12926_v28 }
  0x74   : > { %1040 = vmatpush.bf16.msrb.mxu3 %v905_v55 }
  0x7d   : > { %11573 = vmatmul.msk.bf16.vlgmr.msra.gmra.mxu0 %vm359_vm2, %v900_v58 }
  0x7e   : > { %11574 = vmatmul.msk.bf16.vlgmr.msra.gmra.mxu1 %vm359_vm2, %v17166_v59  ;;  %11575 = vmatmul.msk.bf16.vlgmr.msra.gmra.mxu2 %vm359_vm2, %v12996_v60 }
  0x7f   : > { %1058 = vmatpush.bf16.msra.mxu0 %v905_v55  ;;  %1076 = vmatpush.bf16.msra.mxu1 %v905_v55 }
  0x80   : > { %1094 = vmatpush.bf16.msra.mxu2 %v905_v55 }
  0x83   : > { %11576 = vmatmul.msk.bf16.vlgmr.msra.gmra.mxu3 %vm359_vm2, %v13005_v8 }
  0x84   : > { %1112 = vmatpush.bf16.msra.mxu3 %v905_v55  ;;  %v13059_v55 = vrot.slane %v12926_v28, 1 }
  0x86   : > { %17298 = vst [vmem:[#allocation23_spill] sm:$0xff] %v13059_v55 }
  0x8d   : > { %11577 = vmatmul.msk.bf16.vlgmr.msrb.gmra.mxu0 %vm359_vm2, %v13013_v10 }
  0x8e   : > { %11578 = vmatmul.msk.bf16.vlgmr.msrb.gmra.mxu1 %vm359_vm2, %v13020_v14  ;;  %11579 = vmatmul.msk.bf16.vlgmr.msrb.gmra.mxu2 %vm359_vm2, %v13023_v20 }
  0x8f   : > { %1161 = vmatpush.bf16.msrb.mxu0 %v1152_v21  ;;  %1181 = vmatpush.bf16.msrb.mxu1 %v1152_v21 }
  0x90   : > { %1201 = vmatpush.bf16.msrb.mxu2 %v1152_v21 }
  0x93   : > { %11580 = vmatmul.msk.bf16.vlgmr.msrb.gmra.mxu3 %vm359_vm2, %v13035_v2 }
  0x94   : > { %1221 = vmatpush.bf16.msrb.mxu3 %v1152_v21 }
  0x9a   : > { %v13042_v33 = vpop.f32.mrf.mxu0 }
  0x9b   : > { %v13050_v54 = vpop.f32.mrf.mxu1 }
  0x9d   : > { %11581 = vmatmul.msk.bf16.vlgmr.msra.gmra.mxu0 %vm359_vm2, %v13040_v31  ;;  %v17310_v31 = vshll.u32 %v12915_v17, 16 }
  0x9e   : > { %11582 = vmatmul.msk.bf16.vlgmr.msra.gmra.mxu1 %vm359_vm2, %v13045_v39  ;;  %11583 = vmatmul.msk.bf16.vlgmr.msra.gmra.mxu2 %vm359_vm2, %v13048_v52  ;;  %v13129_v52 = vand.u32 %v11598_v27, %v12773_v3 }
  0x9f   : > { %1241 = vmatpush.bf16.msra.mxu0 %v1152_v21  ;;  %1261 = vmatpush.bf16.msra.mxu1 %v1152_v21  ;;  %v1349_v2 = vrot.slane %v17310_v31, 2 }
  0xa0   : > { %1281 = vmatpush.bf16.msra.mxu2 %v1152_v21 }
  0xa1   : > { %v13061_v58 = vpop.f32.mrf.mxu2 }
  0xa2   : > { %v13063_v9 = vpop.f32.mrf.mxu0 }
  0xa3   : > { %11584 = vmatmul.msk.bf16.vlgmr.msra.gmra.mxu3 %vm359_vm2, %v13059_v55  ;;  %v13067_v11 = vpop.f32.mrf.mxu1 }
  0xa4   : > { %1301 = vmatpush.bf16.msra.mxu3 %v1152_v21 }
  0xa6   : > { %v13069_v12 = vpop.f32.mrf.mxu3 }
  0xa9   : > { %v13071_v59 = vpop.f32.mrf.mxu2 }
  0xaa   : > { %v13073_v43 = vpop.f32.mrf.mxu0 }
  0xab   : > { %v13075_v50 = vpop.f32.mrf.mxu1 }
  0xad   : > { %11586 = vmatmul.msk.bf16.vlgmr.msrb.gmra.mxu0 %vm359_vm2, %v1147_v56  ;;  %v1229_v56 = vrot.slane %v479_v13, 2 }
  0xae   : > { %v13081_v26 = vpop.f32.mrf.mxu3  ;;  %11587 = vmatmul.msk.bf16.vlgmr.msrb.gmra.mxu1 %vm359_vm2, %v12830_v62  ;;  %11588 = vmatmul.msk.bf16.vlgmr.msrb.gmra.mxu2 %vm359_vm2, %v12836_v1  ;;  %v1288_v62 = vrot.slane %v17302_v41, 1 }
  0xaf   : > { %1321 = vmatpush.bf16.msrb.mxu0 %v1152_v21  ;;  %1341 = vmatpush.bf16.msrb.mxu1 %v1152_v21  ;;  %v13114_v13 = vor.u32 %v1229_v56, %v1228_v48 }
  0xb0   : > { %1361 = vmatpush.bf16.msrb.mxu2 %v1152_v21 }
  0xb1   : > { %v13087_v38 = vpop.f32.mrf.mxu2  ;;  %17299 = vst [vmem:[#allocation24_spill] sm:$0xff] %v13114_v13 }
  0xb2   : > { %v13089_v25 = vpop.f32.mrf.mxu0 }
  0xb3   : > { %11589 = vmatmul.msk.bf16.vlgmr.msrb.gmra.mxu3 %vm359_vm2, %v13032_v0  ;;  %v13093_v47 = vpop.f32.mrf.mxu1 }
  0xb4   : > { %1381 = vmatpush.bf16.msrb.mxu3 %v1152_v21  ;;  %v1269_v21 = vrot.slane %v537_v37, 2  ;;  %v17303_v37 = vshll.u32 %v12877_v42, 16 }
  0xb6   : > { %v13099_v32 = vpop.f32.mrf.mxu3  ;;  %v13120_v1 = vor.u32 %v1269_v21, %v1268_v51  ;;  %v1289_v55 = vrot.slane %v17303_v37, 2  ;;  %v17306_v21 = vshll.u32 %v12907_v15, 16  ;;  %v17307_v37 = vshrl.u32 %v12913_v16, 16 }
  0xb8   : > { %17301 = vst [vmem:[#allocation26_spill] sm:$0xff] %v13120_v1  ;;  %v13139_v51 = vor.u32 %v1289_v55, %v1288_v62  ;;  %v17305_v62 = vshrl.u32 %v12907_v15, 16  ;;  %v1309_v27 = vrot.slane %v17306_v21, 2 }
  0xb9   : > { %v13112_v57 = vpop.f32.mrf.mxu2 }
  0xba   : > { %v13116_v0 = vpop.f32.mrf.mxu0  ;;  %17304 = vst [vmem:[#allocation27_spill] sm:$0xff] %v13139_v51  ;;  %v1308_v55 = vrot.slane %v17305_v62, 1 }
  0xbb   : > { %v13122_v36 = vpop.f32.mrf.mxu1 }
  0xbc   : > { %v13169_v62 = vor.u32 %v1309_v27, %v1308_v55 }
  0xbd   : > { %11590 = vmatmul.msk.bf16.vlgmr.msra.gmra.mxu0 %vm359_vm2, %v13114_v13 }
  0xbe   : > { %v13133_v48 = vpop.f32.mrf.mxu3  ;;  %11591 = vmatmul.msk.bf16.vlgmr.msra.gmra.mxu1 %vm359_vm2, %v13118_v40  ;;  %11592 = vmatmul.msk.bf16.vlgmr.msra.gmra.mxu2 %vm359_vm2, %v13120_v1  ;;  %v1328_v1 = vrot.slane %v17307_v37, 1  ;;  %v17308_v40 = vshll.u32 %v12913_v16, 16  ;;  %17311 = vst [vmem:[#allocation28_spill] sm:$0xff] %v13169_v62 }
  0xbf   : > { %1428 = vmatpush.bf16.msra.mxu0 %v13129_v52  ;;  %1446 = vmatpush.bf16.msra.mxu1 %v13129_v52 }
  0xc0   : > { %1464 = vmatpush.bf16.msra.mxu2 %v13129_v52  ;;  %v1329_v13 = vrot.slane %v17308_v40, 2  ;;  %v17314_v40 = vshrl.u32 %v12926_v28, 16 }
  0xc1   : > { %v13144_v22 = vpop.f32.mrf.mxu2 }
  0xc2   : > { %v13146_v29 = vpop.f32.mrf.mxu0  ;;  %v13171_v21 = vor.u32 %v1329_v13, %v1328_v1  ;;  %v1368_v60 = vrot.slane %v17314_v40, 1 }
  0xc3   : > { %11593 = vmatmul.msk.bf16.vlgmr.msra.gmra.mxu3 %vm359_vm2, %v13139_v51  ;;  %v13150_v56 = vpop.f32.mrf.mxu1  ;;  %v17309_v51 = vshrl.u32 %v12915_v17, 16 }
  0xc4   : > { %1482 = vmatpush.bf16.msra.mxu3 %v13129_v52  ;;  %17312 = vst [vmem:[#allocation29_spill] sm:$0xff] %v13171_v21 }
  0xc5   : > { %v1348_v39 = vrot.slane %v17309_v51, 1  ;;  %v17315_v51 = vshll.u32 %v12926_v28, 16 }
  0xc6   : > { %v13157_v41 = vpop.f32.mrf.mxu3 }
  0xc7   : > { %v13173_v10 = vor.u32 %v1349_v2, %v1348_v39  ;;  %v1369_v53 = vrot.slane %v17315_v51, 2  ;;  %v13219_v51 = vrot.slane %v12809_v35, 2 }
  0xc9   : > { %v13167_v20 = vpop.f32.mrf.mxu2  ;;  %17313 = vst [vmem:[#allocation30_spill] sm:$0xff] %v13173_v10 }
  0xca   : > { %v717_v14 = vpop.f32.mrf.mxu0 }
  0xcb   : > { %v13176_v37 = vadd.f32 %v717_v14, %v13042_v33  ;;  %v733_v8 = vpop.f32.mrf.mxu1  ;;  %v13193_v14 = vor.u32 %v1369_v53, %v1368_v60 }
  0xcc   : > { %v13183_v31 = vadd.f32 %v733_v8, %v13050_v54 }
  0xcd   : > { %11594 = vmatmul.msk.bf16.vlgmr.msrb.gmra.mxu0 %vm359_vm2, %v13169_v62 }
  0xce   : > { %v13187_v1 = vpop.f32.mrf.mxu3  ;;  %11595 = vmatmul.msk.bf16.vlgmr.msrb.gmra.mxu1 %vm359_vm2, %v13171_v21  ;;  %11596 = vmatmul.msk.bf16.vlgmr.msrb.gmra.mxu2 %vm359_vm2, %v13173_v10 }
  0xcf   : > { %1500 = vmatpush.bf16.msrb.mxu0 %v13129_v52  ;;  %1518 = vmatpush.bf16.msrb.mxu1 %v13129_v52 }
  0xd0   : > { %1536 = vmatpush.bf16.msrb.mxu2 %v13129_v52 }
  0xd1   : > { %v749_v8 = vpop.f32.mrf.mxu2 }
  0xd2   : > { %v13199_v2 = vadd.f32 %v749_v8, %v13061_v58  ;;  %v719_v33 = vpop.f32.mrf.mxu0  ;;  %v1414_v58 = vrot.slane %v12805_v30, 2 }
  0xd3   : > { %11597 = vmatmul.msk.bf16.vlgmr.msrb.gmra.mxu3 %vm359_vm2, %v13193_v14  ;;  %v13204_v39 = vadd.f32 %v719_v33, %v13063_v9  ;;  %v735_v54 = vpop.f32.mrf.mxu1  ;;  %v17212_v9 = vrot.slane %v12807_v34, 2 }
  0xd4   : > { %v13207_v53 = vadd.f32 %v735_v54, %v13067_v11  ;;  %1554 = vmatpush.bf16.msrb.mxu3 %v13129_v52 }
  0xd6   : > { %v765_v60 = vpop.f32.mrf.mxu3 }
  0xd7   : > { %v13211_v13 = vadd.f32 %v765_v60, %v13069_v12 }
  0xd9   : > { %v751_v55 = vpop.f32.mrf.mxu2 }
  0xda   : > { %v13215_v27 = vadd.f32 %v751_v55, %v13071_v59  ;;  %v781_v40 = vpop.f32.mrf.mxu0 }
  0xdb   : > { %v13222_v11 = vadd.f32 %v781_v40, %v13073_v43  ;;  %v797_v8 = vpop.f32.mrf.mxu1  ;;  %v13237_v43 = vrot.slane %v12821_v49, 2 }
  0xdc   : > { %v13225_v33 = vadd.f32 %v797_v8, %v13075_v50 }
  0xdd   : > { %11599 = vmatmul.msk.bf16.vlgmr.msra.gmra.mxu0 %vm359_vm2, %v1414_v58 }
  0xde   : > { %v767_v12 = vpop.f32.mrf.mxu3  ;;  %11600 = vmatmul.msk.bf16.vlgmr.msra.gmra.mxu1 %vm359_vm2, %v17212_v9  ;;  %11601 = vmatmul.msk.bf16.vlgmr.msra.gmra.mxu2 %vm359_vm2, %v13219_v51 }
  0xdf   : > { %v13234_v30 = vadd.f32 %v767_v12, %v13081_v26  ;;  %1572 = vmatpush.bf16.msra.mxu0 %v13129_v52  ;;  %1590 = vmatpush.bf16.msra.mxu1 %v13129_v52  ;;  %v13261_v12 = vrot.slane %v12839_v5, 2 }
  0xe0   : > { %1608 = vmatpush.bf16.msra.mxu2 %v13129_v52 }
  0xe1   : > { %v813_v50 = vpop.f32.mrf.mxu2 }
  0xe2   : > { %v13243_v59 = vadd.f32 %v813_v50, %v13087_v38  ;;  %v783_v54 = vpop.f32.mrf.mxu0  ;;  %v11611_v38 = vld [vmem:[%s17159_s1 + $0xa] sm:$0x3] }
  0xe3   : > { %11602 = vmatmul.msk.bf16.vlgmr.msra.gmra.mxu3 %vm359_vm2, %v13237_v43  ;;  %v13248_v26 = vadd.f32 %v783_v54, %v13089_v25  ;;  %v799_v60 = vpop.f32.mrf.mxu1 }
  0xe4   : > { %v13251_v55 = vadd.f32 %v799_v60, %v13093_v47  ;;  %1626 = vmatpush.bf16.msra.mxu3 %v13129_v52  ;;  %v13267_v47 = vrot.slane %v12860_v23, 2  ;;  %v13270_v52 = vrot.slane %v12862_v24, 2  ;;  %v13276_v60 = vand.u32 %v11611_v38, %v12773_v3 }
  0xe6   : > { %v829_v58 = vpop.f32.mrf.mxu3  ;;  %17316 = vst [vmem:[#allocation31_spill] sm:$0xff] %v13267_v47 }
  0xe7   : > { %v13255_v40 = vadd.f32 %v829_v58, %v13099_v32  ;;  %17317 = vst [vmem:[#allocation32_spill] sm:$0xff] %v13270_v52 }
  0xe9   : > { %v815_v8 = vpop.f32.mrf.mxu2 }
  0xea   : > { %v13264_v25 = vadd.f32 %v815_v8, %v13112_v57  ;;  %v845_v50 = vpop.f32.mrf.mxu0  ;;  %v13291_v8 = vrot.slane %v12877_v42, 2 }
  0xeb   : > { %v13273_v32 = vadd.f32 %v845_v50, %v13116_v0  ;;  %v861_v54 = vpop.f32.mrf.mxu1 }
  0xec   : > { %v13279_v58 = vadd.f32 %v861_v54, %v13122_v36  ;;  %17318 = vst [vmem:[#allocation33_spill] sm:$0xff] %v13291_v8 }
  0xed   : > { %11603 = vmatmul.msk.bf16.vlgmr.msrb.gmra.mxu0 %vm359_vm2, %v13261_v12 }
  0xee   : > { %v831_v57 = vpop.f32.mrf.mxu3  ;;  %11604 = vmatmul.msk.bf16.vlgmr.msrb.gmra.mxu1 %vm359_vm2, %v13267_v47  ;;  %11605 = vmatmul.msk.bf16.vlgmr.msrb.gmra.mxu2 %vm359_vm2, %v13270_v52 }
  0xef   : > { %v13288_v0 = vadd.f32 %v831_v57, %v13133_v48  ;;  %1669 = vmatpush.bf16.msrb.mxu0 %v13276_v60  ;;  %1683 = vmatpush.bf16.msrb.mxu1 %v13276_v60 }
  0xf0   : > { %1697 = vmatpush.bf16.msrb.mxu2 %v13276_v60 }
  0xf1   : > { %v877_v36 = vpop.f32.mrf.mxu2 }
  0xf2   : > { %v13297_v38 = vadd.f32 %v877_v36, %v13144_v22  ;;  %v847_v50 = vpop.f32.mrf.mxu0  ;;  %v13312_v22 = vrot.slane %v12907_v15, 2 }
  0xf3   : > { %11606 = vmatmul.msk.bf16.vlgmr.msrb.gmra.mxu3 %vm359_vm2, %v13291_v8  ;;  %v13302_v48 = vadd.f32 %v847_v50, %v13146_v29  ;;  %v863_v54 = vpop.f32.mrf.mxu1  ;;  %v13318_v29 = vrot.slane %v12913_v16, 2 }
  0xf4   : > { %v13305_v57 = vadd.f32 %v863_v54, %v13150_v56  ;;  %1711 = vmatpush.bf16.msrb.mxu3 %v13276_v60  ;;  %17319 = vst [vmem:[#allocation34_spill] sm:$0xff] %v13312_v22  ;;  %v13321_v56 = vrot.slane %v12915_v17, 2 }
  0xf5   : > { %17320 = vst [vmem:[#allocation35_spill] sm:$0xff] %v13318_v29 }
  0xf6   : > { %v893_v9 = vpop.f32.mrf.mxu3  ;;  %17321 = vst [vmem:[#allocation36_spill] sm:$0xff] %v13321_v56 }
  0xf7   : > { %v13309_v52 = vadd.f32 %v893_v9, %v13157_v41 }
  0xf9   : > { %v879_v47 = vpop.f32.mrf.mxu2 }
  0xfa   : > { %v13315_v36 = vadd.f32 %v879_v47, %v13167_v20  ;;  %v916_v8 = vpop.f32.mrf.mxu0 }
  0xfb   : > { %v13324_v50 = vadd.f32 %v916_v8, %v13176_v37  ;;  %v934_v54 = vpop.f32.mrf.mxu1  ;;  %v13339_v37 = vrot.slane %v12926_v28, 2 }
  0xfc   : > { %v13327_v41 = vadd.f32 %v934_v54, %v13183_v31 }
  0xfd   : > { %11607 = vmatmul.msk.bf16.vlgmr.msra.gmra.mxu0 %vm359_vm2, %v13312_v22  ;;  %17322 = vst [vmem:[#allocation37_spill] sm:$0xff] %v13339_v37 }
  0xfe   : > { %v895_v9 = vpop.f32.mrf.mxu3  ;;  %11608 = vmatmul.msk.bf16.vlgmr.msra.gmra.mxu1 %vm359_vm2, %v13318_v29  ;;  %11609 = vmatmul.msk.bf16.vlgmr.msra.gmra.mxu2 %vm359_vm2, %v13321_v56 }
  0xff   : > { %v13336_v20 = vadd.f32 %v895_v9, %v13187_v1  ;;  %1725 = vmatpush.bf16.msra.mxu0 %v13276_v60  ;;  %1739 = vmatpush.bf16.msra.mxu1 %v13276_v60 }
 0x100   : > { %1753 = vmatpush.bf16.msra.mxu2 %v13276_v60 }
 0x101   : > { %v952_v31 = vpop.f32.mrf.mxu2 }
 0x102   : > { %v13345_v47 = vadd.f32 %v952_v31, %v13199_v2  ;;  %v918_v8 = vpop.f32.mrf.mxu0 }
 0x103   : > { %11610 = vmatmul.msk.bf16.vlgmr.msra.gmra.mxu3 %vm359_vm2, %v13339_v37  ;;  %v13350_v1 = vadd.f32 %v918_v8, %v13204_v39  ;;  %v936_v54 = vpop.f32.mrf.mxu1 }
 0x104   : > { %v13353_v9 = vadd.f32 %v936_v54, %v13207_v53  ;;  %1767 = vmatpush.bf16.msra.mxu3 %v13276_v60 }
 0x106   : > { %v970_v56 = vpop.f32.mrf.mxu3 }
 0x107   : > { %v13357_v29 = vadd.f32 %v970_v56, %v13211_v13 }
 0x109   : > { %v954_v22 = vpop.f32.mrf.mxu2 }
 0x10a   : > { %v13360_v2 = vadd.f32 %v954_v22, %v13215_v27  ;;  %v988_v31 = vpop.f32.mrf.mxu0 }
 0x10b   : > { %v13363_v37 = vadd.f32 %v988_v31, %v13222_v11  ;;  %v1006_v39 = vpop.f32.mrf.mxu1 }
 0x10c   : > { %v13366_v8 = vadd.f32 %v1006_v39, %v13225_v33 }
 0x10d   : > { %11612 = vmatmul.msk.bf16.vlgmr.msrb.gmra.mxu0 %vm359_vm2, %v12807_v34 }
 0x10e   : > { %v972_v53 = vpop.f32.mrf.mxu3  ;;  %11613 = vmatmul.msk.bf16.vlgmr.msrb.gmra.mxu1 %vm359_vm2, %v12809_v35  ;;  %11614 = vmatmul.msk.bf16.vlgmr.msrb.gmra.mxu2 %vm359_vm2, %v12821_v49 }
 0x10f   : > { %v13375_v13 = vadd.f32 %v972_v53, %v13234_v30  ;;  %1781 = vmatpush.bf16.msrb.mxu0 %v13276_v60  ;;  %1795 = vmatpush.bf16.msrb.mxu1 %v13276_v60 }
 0x110   : > { %1809 = vmatpush.bf16.msrb.mxu2 %v13276_v60 }
 0x111   : > { %v1024_v27 = vpop.f32.mrf.mxu2 }
 0x112   : > { %v13381_v11 = vadd.f32 %v1024_v27, %v13243_v59  ;;  %v990_v33 = vpop.f32.mrf.mxu0  ;;  %v11624_v59 = vld [vmem:[%s17159_s1 + $0xc] sm:$0x3] }
 0x113   : > { %11615 = vmatmul.msk.bf16.vlgmr.msrb.gmra.mxu3 %vm359_vm2, %v12839_v5  ;;  %v13386_v22 = vadd.f32 %v990_v33, %v13248_v26  ;;  %v1008_v56 = vpop.f32.mrf.mxu1  ;;  %v13405_v33 = vand.u32 %v11624_v59, %v12773_v3 }
 0x114   : > { %v13389_v30 = vadd.f32 %v1008_v56, %v13251_v55  ;;  %1831 = vmatpush.bf16.msrb.mxu3 %v13276_v60 }
 0x116   : > { %v1042_v54 = vpop.f32.mrf.mxu3 }
 0x117   : > { %v13393_v31 = vadd.f32 %v1042_v54, %v13255_v40 }
 0x119   : > { %v1026_v39 = vpop.f32.mrf.mxu2 }
 0x11a   : > { %v13399_v53 = vadd.f32 %v1026_v39, %v13264_v25  ;;  %v1060_v26 = vpop.f32.mrf.mxu0  ;;  %v304_v39 = vld [vmem:[%s12786_s8 + $0xc0] sm:$0xff] }
 0x11b   : > { %v13402_v27 = vadd.f32 %v1060_v26, %v13273_v32  ;;  %v1078_v55 = vpop.f32.mrf.mxu1  ;;  %v305_v26 = vld [vmem:[%s12786_s8 + $0xc8] sm:$0xff] }
 0x11c   : > { %v13408_v60 = vadd.f32 %v1078_v55, %v13279_v58 }
 0x11d   : > { %11616 = vmatmul.msk.bf16.vlgmr.msra.gmra.mxu0 %vm359_vm2, %v12860_v23 }
 0x11e   : > { %v1044_v40 = vpop.f32.mrf.mxu3  ;;  %11617 = vmatmul.msk.bf16.vlgmr.msra.gmra.mxu1 %vm359_vm2, %v12862_v24  ;;  %11618 = vmatmul.msk.bf16.vlgmr.msra.gmra.mxu2 %vm359_vm2, %v12877_v42 }
 0x11f   : > { %v13417_v25 = vadd.f32 %v1044_v40, %v13288_v0  ;;  %1874 = vmatpush.bf16.msra.mxu0 %v13405_v33  ;;  %1888 = vmatpush.bf16.msra.mxu1 %v13405_v33 }
 0x120   : > { %1902 = vmatpush.bf16.msra.mxu2 %v13405_v33 }
 0x121   : > { %v1096_v32 = vpop.f32.mrf.mxu2 }
 0x122   : > { %v13423_v58 = vadd.f32 %v1096_v32, %v13297_v38  ;;  %v1062_v56 = vpop.f32.mrf.mxu0  ;;  %v336_v38 = vpack.c.bf16 %v304_v39, %v304_v39  ;;  %v337_v32 = vpack.c.bf16 %v305_v26, %v305_v26 }
 0x123   : > { %11619 = vmatmul.msk.bf16.vlgmr.msra.gmra.mxu3 %vm359_vm2, %v12907_v15  ;;  %v13428_v54 = vadd.f32 %v1062_v56, %v13302_v48  ;;  %v1080_v59 = vpop.f32.mrf.mxu1 }
 0x124   : > { %v13431_v0 = vadd.f32 %v1080_v59, %v13305_v57  ;;  %1916 = vmatpush.bf16.msra.mxu3 %v13405_v33  ;;  %v1818_v59 = vunpack.c.l.b16 %v336_v38  ;;  %v1819_v24 = vunpack.c.l.b16 %v337_v32 }
 0x126   : > { %v1114_v55 = vpop.f32.mrf.mxu3 }
 0x127   : > { %v13437_v40 = vadd.f32 %v1114_v55, %v13309_v52 }
 0x129   : > { %v1098_v42 = vpop.f32.mrf.mxu2 }
 0x12a   : > { %v13440_v15 = vadd.f32 %v1098_v42, %v13315_v36  ;;  %v1163_v48 = vpop.f32.mrf.mxu0  ;;  %v13457_v36 = vpack.c.b16 %v1819_v24, %v1818_v59 }
 0x12b   : > { %v13443_v56 = vadd.f32 %v1163_v48, %v13324_v50  ;;  %v1183_v57 = vpop.f32.mrf.mxu1 }
 0x12c   : > { %v13446_v23 = vadd.f32 %v1183_v57, %v13327_v41 }
 0x12d   : > { %11620 = vmatmul.msk.bf16.vlgmr.msrb.gmra.mxu0 %vm359_vm2, %v12913_v16 }
 0x12e   : > { %v1116_v52 = vpop.f32.mrf.mxu3  ;;  %11621 = vmatmul.msk.bf16.vlgmr.msrb.gmra.mxu1 %vm359_vm2, %v12915_v17  ;;  %11622 = vmatmul.msk.bf16.vlgmr.msrb.gmra.mxu2 %vm359_vm2, %v12926_v28 }
 0x12f   : > { %v13455_v42 = vadd.f32 %v1116_v52, %v13336_v20  ;;  %1930 = vmatpush.bf16.msrb.mxu0 %v13405_v33  ;;  %1944 = vmatpush.bf16.msrb.mxu1 %v13405_v33 }
 0x130   : > { %1958 = vmatpush.bf16.msrb.mxu2 %v13405_v33 }
 0x131   : > { %v1203_v50 = vpop.f32.mrf.mxu2 }
 0x132   : > { %v13463_v41 = vadd.f32 %v1203_v50, %v13345_v47  ;;  %v1165_v39 = vpop.f32.mrf.mxu0 }
 0x133   : > { %11623 = vmatmul.msk.bf16.vlgmr.msrb.gmra.mxu3 %vm359_vm2, %v13457_v36  ;;  %v13468_v26 = vadd.f32 %v1165_v39, %v13350_v1  ;;  %v1185_v20 = vpop.f32.mrf.mxu1 }
 0x134   : > { %v13471_v24 = vadd.f32 %v1185_v20, %v13353_v9  ;;  %1972 = vmatpush.bf16.msrb.mxu3 %v13405_v33 }
 0x136   : > { %v1223_v55 = vpop.f32.mrf.mxu3 }
 0x137   : > { %v13475_v38 = vadd.f32 %v1223_v55, %v13357_v29 }
 0x139   : > { %v1205_v32 = vpop.f32.mrf.mxu2 }
 0x13a   : > { %v13478_v47 = vadd.f32 %v1205_v32, %v13360_v2  ;;  %v1243_v48 = vpop.f32.mrf.mxu0 }
 0x13b   : > { %v13481_v57 = vadd.f32 %v1243_v48, %v13363_v37  ;;  %v1263_v1 = vpop.f32.mrf.mxu1 }
 0x13c   : > { %v13484_v59 = vadd.f32 %v1263_v1, %v13366_v8 }
 0x13d   : > { %11625 = vmatmul.msk.bf16.vlgmr.msra.gmra.mxu0 %vm359_vm2, %v12828_v61 }
 0x13e   : > { %v1225_v9 = vpop.f32.mrf.mxu3  ;;  %11626 = vmatmul.msk.bf16.vlgmr.msra.gmra.mxu1 %vm359_vm2, %v12832_v63  ;;  %11627 = vmatmul.msk.bf16.vlgmr.msra.gmra.mxu2 %vm359_vm2, %v12856_v19 }
 0x13f   : > { %v13493_v29 = vadd.f32 %v1225_v9, %v13375_v13  ;;  %1986 = vmatpush.bf16.msra.mxu0 %v13405_v33  ;;  %2000 = vmatpush.bf16.msra.mxu1 %v13405_v33 }
 0x140   : > { %2014 = vmatpush.bf16.msra.mxu2 %v13405_v33 }
 0x141   : > { %v1283_v37 = vpop.f32.mrf.mxu2 }
 0x142   : > { %v13499_v2 = vadd.f32 %v1283_v37, %v13381_v11  ;;  %v1245_v61 = vpop.f32.mrf.mxu0  ;;  %v11637_v11 = vld [vmem:[%s17159_s1 + $0xe] sm:$0x3] }
 0x143   : > { %11628 = vmatmul.msk.bf16.vlgmr.msra.gmra.mxu3 %vm359_vm2, %v12886_v4  ;;  %v13504_v8 = vadd.f32 %v1245_v61, %v13386_v22  ;;  %v1265_v52 = vpop.f32.mrf.mxu1  ;;  %v13523_v48 = vand.u32 %v11637_v11, %v12773_v3 }
 0x144   : > { %v13507_v13 = vadd.f32 %v1265_v52, %v13389_v30  ;;  %2037 = vmatpush.bf16.msra.mxu3 %v13405_v33 }
 0x146   : > { %v1303_v50 = vpop.f32.mrf.mxu3 }
 0x147   : > { %v13511_v39 = vadd.f32 %v1303_v50, %v13393_v31 }
 0x149   : > { %v1285_v20 = vpop.f32.mrf.mxu2 }
 0x14a   : > { %v13517_v55 = vadd.f32 %v1285_v20, %v13399_v53  ;;  %v1323_v22 = vpop.f32.mrf.mxu0 }
 0x14b   : > { %v13520_v32 = vadd.f32 %v1323_v22, %v13402_v27  ;;  %v1343_v30 = vpop.f32.mrf.mxu1 }
 0x14c   : > { %v13526_v33 = vadd.f32 %v1343_v30, %v13408_v60 }
 0x14d   : > { %11629 = vmatmul.msk.bf16.vlgmr.msrb.gmra.mxu0 %vm359_vm2, %v12896_v6 }
 0x14e   : > { %v1305_v31 = vpop.f32.mrf.mxu3  ;;  %11630 = vmatmul.msk.bf16.vlgmr.msrb.gmra.mxu1 %vm359_vm2, %v12900_v7  ;;  %11631 = vmatmul.msk.bf16.vlgmr.msrb.gmra.mxu2 %vm359_vm2, %v12919_v18 }
 0x14f   : > { %v13535_v53 = vadd.f32 %v1305_v31, %v13417_v25  ;;  %2080 = vmatpush.bf16.msrb.mxu0 %v13523_v48  ;;  %2094 = vmatpush.bf16.msrb.mxu1 %v13523_v48 }
 0x150   : > { %2108 = vmatpush.bf16.msrb.mxu2 %v13523_v48 }
 0x151   : > { %v1363_v27 = vpop.f32.mrf.mxu2 }
 0x152   : > { %v13541_v60 = vadd.f32 %v1363_v27, %v13423_v58  ;;  %v1325_v1 = vpop.f32.mrf.mxu0  ;;  %v17235_v58 = vshll.u32 %v13457_v36, 16 }
 0x153   : > { %11632 = vmatmul.msk.bf16.vlgmr.msrb.gmra.mxu3 %vm359_vm2, %v12940_v44  ;;  %v13546_v9 = vadd.f32 %v1325_v1, %v13428_v54  ;;  %v1345_v37 = vpop.f32.mrf.mxu1 }
 0x154   : > { %v13549_v25 = vadd.f32 %v1345_v37, %v13431_v0  ;;  %2122 = vmatpush.bf16.msrb.mxu3 %v13523_v48  ;;  %v17236_v0 = vshrl.u32 %v13457_v36, 16  ;;  %v2025_v30 = vrot.slane %v17235_v58, 1  ;;  %v17325_v58 = vld [vmem:[#allocation13_spill] sm:$0xff] }
 0x156   : > { %v1383_v61 = vpop.f32.mrf.mxu3  ;;  %v13579_v27 = vor.u32 %v2025_v30, %v17236_v0 }
 0x157   : > { %v13553_v52 = vadd.f32 %v1383_v61, %v13437_v40 }
 0x159   : > { %v1365_v50 = vpop.f32.mrf.mxu2 }
 0x15a   : > { %v13557_v11 = vadd.f32 %v1365_v50, %v13440_v15  ;;  %v1430_v20 = vpop.f32.mrf.mxu0  ;;  %v17323_v15 = vld [vmem:[#allocation12_spill] sm:$0xff] }
 0x15b   : > { %v13560_v54 = vadd.f32 %v1430_v20, %v13443_v56  ;;  %v1448_v22 = vpop.f32.mrf.mxu1 }
 0x15c   : > { %v13566_v31 = vadd.f32 %v1448_v22, %v13446_v23 }
 0x15d   : > { %11633 = vmatmul.msk.bf16.vlgmr.msra.gmra.mxu0 %vm359_vm2, %v12944_v45 }
 0x15e   : > { %v1385_v40 = vpop.f32.mrf.mxu3  ;;  %11634 = vmatmul.msk.bf16.vlgmr.msra.gmra.mxu1 %vm359_vm2, %v12948_v46  ;;  %11635 = vmatmul.msk.bf16.vlgmr.msra.gmra.mxu2 %vm359_vm2, %v17323_v15 }
 0x15f   : > { %v13575_v56 = vadd.f32 %v1385_v40, %v13455_v42  ;;  %2136 = vmatpush.bf16.msra.mxu0 %v13523_v48  ;;  %2150 = vmatpush.bf16.msra.mxu1 %v13523_v48 }
 0x160   : > { %2164 = vmatpush.bf16.msra.mxu2 %v13523_v48 }
 0x161   : > { %v1466_v23 = vpop.f32.mrf.mxu2 }
 0x162   : > { %v13585_v1 = vadd.f32 %v1466_v23, %v13463_v41  ;;  %v1432_v37 = vpop.f32.mrf.mxu0 }
 0x163   : > { %11636 = vmatmul.msk.bf16.vlgmr.msra.gmra.mxu3 %vm359_vm2, %v13579_v27  ;;  %v13590_v42 = vadd.f32 %v1432_v37, %v13468_v26  ;;  %v1450_v61 = vpop.f32.mrf.mxu1 }
 0x164   : > { %v13593_v50 = vadd.f32 %v1450_v61, %v13471_v24  ;;  %2178 = vmatpush.bf16.msra.mxu3 %v13523_v48  ;;  %v17324_v24 = vrot.slane %v12807_v34, 1 }
 0x166   : > { %v1484_v20 = vpop.f32.mrf.mxu3 }
 0x167   : > { %v13597_v22 = vadd.f32 %v1484_v20, %v13475_v38  ;;  %v17326_v38 = vld [vmem:[#allocation14_spill] sm:$0xff] }
 0x169   : > { %v1468_v30 = vpop.f32.mrf.mxu2 }
 0x16a   : > { %v13600_v41 = vadd.f32 %v1468_v30, %v13478_v47  ;;  %v1502_v40 = vpop.f32.mrf.mxu0  ;;  %v17327_v30 = vld [vmem:[#allocation15_spill] sm:$0xff] }
 0x16b   : > { %v13603_v23 = vadd.f32 %v1502_v40, %v13481_v57  ;;  %v1520_v26 = vpop.f32.mrf.mxu1 }
 0x16c   : > { %v13606_v37 = vadd.f32 %v1520_v26, %v13484_v59 }
 0x16d   : > { %11638 = vmatmul.msk.bf16.vlgmr.msrb.gmra.mxu0 %vm359_vm2, %v17324_v24 }
 0x16e   : > { %v1486_v61 = vpop.f32.mrf.mxu3  ;;  %11639 = vmatmul.msk.bf16.vlgmr.msrb.gmra.mxu1 %vm359_vm2, %v17325_v58  ;;  %11640 = vmatmul.msk.bf16.vlgmr.msrb.gmra.mxu2 %vm359_vm2, %v17326_v38  ;;  %v17333_v38 = vld [vmem:[#allocation22_spill] sm:$0xff] }
 0x16f   : > { %v13616_v47 = vadd.f32 %v1486_v61, %v13493_v29  ;;  %2192 = vmatpush.bf16.msrb.mxu0 %v13523_v48  ;;  %2206 = vmatpush.bf16.msrb.mxu1 %v13523_v48 }
 0x170   : > { %2220 = vmatpush.bf16.msrb.mxu2 %v13523_v48 }
 0x171   : > { %v1538_v57 = vpop.f32.mrf.mxu2 }
 0x172   : > { %v13622_v59 = vadd.f32 %v1538_v57, %v13499_v2  ;;  %v1504_v20 = vpop.f32.mrf.mxu0  ;;  %v11650_v2 = vld [vmem:[%s17159_s1 + $0x10] sm:$0x3] }
 0x173   : > { %11641 = vmatmul.msk.bf16.vlgmr.msrb.gmra.mxu3 %vm359_vm2, %v17327_v30  ;;  %v13627_v40 = vadd.f32 %v1504_v20, %v13504_v8  ;;  %v1522_v26 = vpop.f32.mrf.mxu1  ;;  %v17329_v30 = vld [vmem:[#allocation17_spill] sm:$0xff] }
 0x174   : > { %v13630_v29 = vadd.f32 %v1522_v26, %v13507_v13  ;;  %2238 = vmatpush.bf16.msrb.mxu3 %v13523_v48  ;;  %v13646_v26 = vand.u32 %v11650_v2, %v12773_v3 }
 0x176   : > { %v1556_v24 = vpop.f32.mrf.mxu3 }
 0x177   : > { %v13634_v61 = vadd.f32 %v1556_v24, %v13511_v39  ;;  %v17328_v39 = vld [vmem:[#allocation16_spill] sm:$0xff] }
 0x179   : > { %v1540_v57 = vpop.f32.mrf.mxu2 }
 0x17a   : > { %v13640_v0 = vadd.f32 %v1540_v57, %v13517_v55  ;;  %v1574_v8 = vpop.f32.mrf.mxu0  ;;  %v17330_v55 = vld [vmem:[#allocation19_spill] sm:$0xff] }
 0x17b   : > { %v13643_v20 = vadd.f32 %v1574_v8, %v13520_v32  ;;  %v1592_v13 = vpop.f32.mrf.mxu1  ;;  %v17331_v8 = vld [vmem:[#allocation20_spill] sm:$0xff] }
 0x17c   : > { %v13649_v48 = vadd.f32 %v1592_v13, %v13526_v33 }
 0x17d   : > { %11642 = vmatmul.msk.bf16.vlgmr.msra.gmra.mxu0 %vm359_vm2, %v17328_v39 }
 0x17e   : > { %v1558_v24 = vpop.f32.mrf.mxu3  ;;  %11643 = vmatmul.msk.bf16.vlgmr.msra.gmra.mxu1 %vm359_vm2, %v17329_v30  ;;  %11644 = vmatmul.msk.bf16.vlgmr.msra.gmra.mxu2 %vm359_vm2, %v17330_v55 }
 0x17f   : > { %v13658_v32 = vadd.f32 %v1558_v24, %v13535_v53  ;;  %2281 = vmatpush.bf16.msra.mxu0 %v13646_v26  ;;  %2295 = vmatpush.bf16.msra.mxu1 %v13646_v26 }
 0x180   : > { %2309 = vmatpush.bf16.msra.mxu2 %v13646_v26 }
 0x181   : > { %v1610_v33 = vpop.f32.mrf.mxu2 }
 0x182   : > { %v13664_v2 = vadd.f32 %v1610_v33, %v13541_v60  ;;  %v1576_v57 = vpop.f32.mrf.mxu0 }
 0x183   : > { %11645 = vmatmul.msk.bf16.vlgmr.msra.gmra.mxu3 %vm359_vm2, %v17331_v8  ;;  %v13669_v13 = vadd.f32 %v1576_v57, %v13546_v9  ;;  %v1594_v55 = vpop.f32.mrf.mxu1 }
 0x184   : > { %v13672_v53 = vadd.f32 %v1594_v55, %v13549_v25  ;;  %2323 = vmatpush.bf16.msra.mxu3 %v13646_v26  ;;  %v17332_v25 = vld [vmem:[#allocation21_spill] sm:$0xff] }
 0x186   : > { %v1628_v24 = vpop.f32.mrf.mxu3 }
 0x187   : > { %v13676_v30 = vadd.f32 %v1628_v24, %v13553_v52  ;;  %v17334_v52 = vld [vmem:[#allocation23_spill] sm:$0xff] }
 0x189   : > { %v1612_v39 = vpop.f32.mrf.mxu2 }
 0x18a   : > { %v13679_v60 = vadd.f32 %v1612_v39, %v13557_v11  ;;  %v1671_v33 = vpop.f32.mrf.mxu0 }
 0x18b   : > { %v13682_v8 = vadd.f32 %v1671_v33, %v13560_v54  ;;  %v1685_v9 = vpop.f32.mrf.mxu1  ;;  %v13697_v54 = vrot.slane %v13457_v36, 1 }
 0x18c   : > { %v13685_v57 = vadd.f32 %v1685_v9, %v13566_v31 }
 0x18d   : > { %11646 = vmatmul.msk.bf16.vlgmr.msrb.gmra.mxu0 %vm359_vm2, %v17332_v25  ;;  %17335 = vst [vmem:[#allocation12_spill] sm:$0xff] %v13697_v54  ;;  %v17337_v25 = vld [vmem:[#allocation4_spill] sm:$0xff] }
 0x18e   : > { %v1630_v55 = vpop.f32.mrf.mxu3  ;;  %11647 = vmatmul.msk.bf16.vlgmr.msrb.gmra.mxu1 %vm359_vm2, %v17333_v38  ;;  %11648 = vmatmul.msk.bf16.vlgmr.msrb.gmra.mxu2 %vm359_vm2, %v17334_v52 }
 0x18f   : > { %v13694_v11 = vadd.f32 %v1630_v55, %v13575_v56  ;;  %2337 = vmatpush.bf16.msrb.mxu0 %v13646_v26  ;;  %2351 = vmatpush.bf16.msrb.mxu1 %v13646_v26 }
 0x190   : > { %2365 = vmatpush.bf16.msrb.mxu2 %v13646_v26 }
 0x191   : > { %v1699_v31 = vpop.f32.mrf.mxu2 }
 0x192   : > { %v13703_v39 = vadd.f32 %v1699_v31, %v13585_v1  ;;  %v1673_v24 = vpop.f32.mrf.mxu0 }
 0x193   : > { %11649 = vmatmul.msk.bf16.vlgmr.msrb.gmra.mxu3 %vm359_vm2, %v13697_v54  ;;  %v13708_v56 = vadd.f32 %v1673_v24, %v13590_v42  ;;  %v1687_v33 = vpop.f32.mrf.mxu1 }
 0x194   : > { %v13711_v9 = vadd.f32 %v1687_v33, %v13593_v50  ;;  %2379 = vmatpush.bf16.msrb.mxu3 %v13646_v26  ;;  %v17336_v50 = vld [vmem:[#allocation3_spill] sm:$0xff] }
 0x196   : > { %v1713_v55 = vpop.f32.mrf.mxu3 }
 0x197   : > { %v13715_v52 = vadd.f32 %v1713_v55, %v13597_v22  ;;  %v17338_v22 = vld [vmem:[#allocation18_spill] sm:$0xff]  ;;  %v17339_v55 = vld [vmem:[#allocation24_spill] sm:$0xff] }
 0x199   : > { %v1701_v38 = vpop.f32.mrf.mxu2 }
 0x19a   : > { %v13718_v1 = vadd.f32 %v1701_v38, %v13600_v41  ;;  %v1727_v31 = vpop.f32.mrf.mxu0 }
 0x19b   : > { %v13721_v54 = vadd.f32 %v1727_v31, %v13603_v23  ;;  %v1741_v42 = vpop.f32.mrf.mxu1 }
 0x19c   : > { %v13724_v24 = vadd.f32 %v1741_v42, %v13606_v37 }
 0x19d   : > { %11651 = vmatmul.msk.bf16.vlgmr.msra.gmra.mxu0 %vm359_vm2, %v17336_v50 }
 0x19e   : > { %v1715_v33 = vpop.f32.mrf.mxu3  ;;  %11652 = vmatmul.msk.bf16.vlgmr.msra.gmra.mxu1 %vm359_vm2, %v17337_v25  ;;  %11653 = vmatmul.msk.bf16.vlgmr.msra.gmra.mxu2 %vm359_vm2, %v17338_v22  ;;  %v17341_v22 = vld [vmem:[#allocation26_spill] sm:$0xff] }
 0x19f   : > { %v13733_v41 = vadd.f32 %v1715_v33, %v13616_v47  ;;  %2393 = vmatpush.bf16.msra.mxu0 %v13646_v26  ;;  %2407 = vmatpush.bf16.msra.mxu1 %v13646_v26 }
 0x1a0   : > { %2421 = vmatpush.bf16.msra.mxu2 %v13646_v26 }
 0x1a1   : > { %v1755_v23 = vpop.f32.mrf.mxu2 }
 0x1a2   : > { %v13739_v37 = vadd.f32 %v1755_v23, %v13622_v59  ;;  %v1729_v38 = vpop.f32.mrf.mxu0  ;;  %v11663_v59 = vld [vmem:[%s17159_s1 + $0x12] sm:$0x3] }
 0x1a3   : > { %11654 = vmatmul.msk.bf16.vlgmr.msra.gmra.mxu3 %vm359_vm2, %v17339_v55  ;;  %v13744_v31 = vadd.f32 %v1729_v38, %v13627_v40  ;;  %v1743_v42 = vpop.f32.mrf.mxu1 }
 0x1a4   : > { %v13747_v47 = vadd.f32 %v1743_v42, %v13630_v29  ;;  %2441 = vmatpush.bf16.msra.mxu3 %v13646_v26  ;;  %v13763_v42 = vand.u32 %v11663_v59, %v12773_v3 }
 0x1a6   : > { %v1769_v50 = vpop.f32.mrf.mxu3 }
 0x1a7   : > { %v13751_v33 = vadd.f32 %v1769_v50, %v13634_v61  ;;  %v17340_v61 = vld [vmem:[#allocation25_spill] sm:$0xff] }
 0x1a9   : > { %v1757_v23 = vpop.f32.mrf.mxu2 }
 0x1aa   : > { %v13757_v55 = vadd.f32 %v1757_v23, %v13640_v0  ;;  %v1783_v40 = vpop.f32.mrf.mxu0  ;;  %v17342_v0 = vld [vmem:[#allocation27_spill] sm:$0xff] }
 0x1ab   : > { %v13760_v38 = vadd.f32 %v1783_v40, %v13643_v20  ;;  %v1797_v29 = vpop.f32.mrf.mxu1 }
 0x1ac   : > { %v13766_v26 = vadd.f32 %v1797_v29, %v13649_v48 }
 0x1ad   : > { %11655 = vmatmul.msk.bf16.vlgmr.msrb.gmra.mxu0 %vm359_vm2, %v17340_v61 }
 0x1ae   : > { %v1771_v50 = vpop.f32.mrf.mxu3  ;;  %11656 = vmatmul.msk.bf16.vlgmr.msrb.gmra.mxu1 %vm359_vm2, %v17341_v22  ;;  %11657 = vmatmul.msk.bf16.vlgmr.msrb.gmra.mxu2 %vm359_vm2, %v17342_v0 }
 0x1af   : > { %v13775_v20 = vadd.f32 %v1771_v50, %v13658_v32  ;;  %2484 = vmatpush.bf16.msrb.mxu0 %v13763_v42  ;;  %2498 = vmatpush.bf16.msrb.mxu1 %v13763_v42 }
 0x1b0   : > { %2512 = vmatpush.bf16.msrb.mxu2 %v13763_v42 }
 0x1b1   : > { %v1811_v48 = vpop.f32.mrf.mxu2 }
 0x1b2   : > { %v13781_v59 = vadd.f32 %v1811_v48, %v13664_v2  ;;  %v1785_v23 = vpop.f32.mrf.mxu0 }
 0x1b3   : > { %11658 = vmatmul.msk.bf16.vlgmr.msrb.gmra.mxu3 %vm359_vm2, %v13169_v62  ;;  %v13786_v40 = vadd.f32 %v1785_v23, %v13669_v13  ;;  %v1799_v29 = vpop.f32.mrf.mxu1  ;;  %v17343_v23 = vshrl.u32 %v13457_v36, 16 }
 0x1b4   : > { %v13789_v32 = vadd.f32 %v1799_v29, %v13672_v53  ;;  %2526 = vmatpush.bf16.msrb.mxu3 %v13763_v42  ;;  %v17344_v53 = vshll.u32 %v13457_v36, 16 }
 0x1b5   : > { %v2428_v61 = vrot.slane %v17343_v23, 1 }
 0x1b6   : > { %v1833_v50 = vpop.f32.mrf.mxu3  ;;  %v2429_v29 = vrot.slane %v17344_v53, 2 }
 0x1b7   : > { %v13793_v0 = vadd.f32 %v1833_v50, %v13676_v30 }
 0x1b9   : > { %v1813_v22 = vpop.f32.mrf.mxu2 }
 0x1ba   : > { %v13796_v2 = vadd.f32 %v1813_v22, %v13679_v60  ;;  %v1876_v48 = vpop.f32.mrf.mxu0  ;;  %v13817_v60 = vor.u32 %v2429_v29, %v2428_v61 }
 0x1bb   : > { %v13799_v62 = vadd.f32 %v1876_v48, %v13682_v8  ;;  %v1890_v13 = vpop.f32.mrf.mxu1 }
 0x1bc   : > { %v13806_v25 = vadd.f32 %v1890_v13, %v13685_v57 }
 0x1bd   : > { %11659 = vmatmul.msk.bf16.vlgmr.msra.gmra.mxu0 %vm359_vm2, %v13171_v21 }
 0x1be   : > { %v1835_v30 = vpop.f32.mrf.mxu3  ;;  %11660 = vmatmul.msk.bf16.vlgmr.msra.gmra.mxu1 %vm359_vm2, %v13173_v10  ;;  %11661 = vmatmul.msk.bf16.vlgmr.msra.gmra.mxu2 %vm359_vm2, %v13193_v14 }
 0x1bf   : > { %v13815_v8 = vadd.f32 %v1835_v30, %v13694_v11  ;;  %2540 = vmatpush.bf16.msra.mxu0 %v13763_v42  ;;  %2554 = vmatpush.bf16.msra.mxu1 %v13763_v42 }
 0x1c0   : > { %2568 = vmatpush.bf16.msra.mxu2 %v13763_v42 }
 0x1c1   : > { %v1904_v57 = vpop.f32.mrf.mxu2 }
 0x1c2   : > { %v13823_v22 = vadd.f32 %v1904_v57, %v13703_v39  ;;  %v1878_v50 = vpop.f32.mrf.mxu0 }
 0x1c3   : > { %11662 = vmatmul.msk.bf16.vlgmr.msra.gmra.mxu3 %vm359_vm2, %v13817_v60  ;;  %v13828_v48 = vadd.f32 %v1878_v50, %v13708_v56  ;;  %v1892_v11 = vpop.f32.mrf.mxu1 }
 0x1c4   : > { %v13831_v61 = vadd.f32 %v1892_v11, %v13711_v9  ;;  %2582 = vmatpush.bf16.msra.mxu3 %v13763_v42  ;;  %v17345_v9 = vrot.slane %v12807_v34, 2 }
 0x1c6   : > { %v1918_v13 = vpop.f32.mrf.mxu3 }
 0x1c7   : > { %v13835_v23 = vadd.f32 %v1918_v13, %v13715_v52 }
 0x1c9   : > { %v1906_v53 = vpop.f32.mrf.mxu2 }
 0x1ca   : > { %v13838_v39 = vadd.f32 %v1906_v53, %v13718_v1  ;;  %v1932_v29 = vpop.f32.mrf.mxu0 }
 0x1cb   : > { %v13841_v30 = vadd.f32 %v1932_v29, %v13721_v54  ;;  %v1946_v56 = vpop.f32.mrf.mxu1 }
 0x1cc   : > { %v13844_v57 = vadd.f32 %v1946_v56, %v13724_v24 }
 0x1cd   : > { %11664 = vmatmul.msk.bf16.vlgmr.msrb.gmra.mxu0 %vm359_vm2, %v17345_v9 }
 0x1ce   : > { %v1920_v50 = vpop.f32.mrf.mxu3  ;;  %11665 = vmatmul.msk.bf16.vlgmr.msrb.gmra.mxu1 %vm359_vm2, %v13219_v51  ;;  %11666 = vmatmul.msk.bf16.vlgmr.msrb.gmra.mxu2 %vm359_vm2, %v13237_v43 }
 0x1cf   : > { %v13854_v52 = vadd.f32 %v1920_v50, %v13733_v41  ;;  %2596 = vmatpush.bf16.msrb.mxu0 %v13763_v42  ;;  %2610 = vmatpush.bf16.msrb.mxu1 %v13763_v42 }
 0x1d0   : > { %2624 = vmatpush.bf16.msrb.mxu2 %v13763_v42 }
 0x1d1   : > { %v1960_v54 = vpop.f32.mrf.mxu2 }
 0x1d2   : > { %v13860_v34 = vadd.f32 %v1960_v54, %v13739_v37  ;;  %v1934_v1 = vpop.f32.mrf.mxu0  ;;  %v11676_v37 = vld [vmem:[%s17159_s1 + $0x14] sm:$0x3] }
 0x1d3   : > { %11667 = vmatmul.msk.bf16.vlgmr.msrb.gmra.mxu3 %vm359_vm2, %v13261_v12  ;;  %v13865_v24 = vadd.f32 %v1934_v1, %v13744_v31  ;;  %v1948_v11 = vpop.f32.mrf.mxu1  ;;  %v13884_v50 = vand.u32 %v11676_v37, %v12773_v3  ;;  %v17347_v1 = vld [vmem:[#allocation32_spill] sm:$0xff]  ;;  %v17349_v37 = vld [vmem:[#allocation34_spill] sm:$0xff] }
 0x1d4   : > { %v13868_v41 = vadd.f32 %v1948_v11, %v13747_v47  ;;  %2642 = vmatpush.bf16.msrb.mxu3 %v13763_v42 }
 0x1d6   : > { %v1974_v13 = vpop.f32.mrf.mxu3 }
 0x1d7   : > { %v13872_v53 = vadd.f32 %v1974_v13, %v13751_v33  ;;  %v17346_v33 = vld [vmem:[#allocation31_spill] sm:$0xff] }
 0x1d9   : > { %v1962_v29 = vpop.f32.mrf.mxu2 }
 0x1da   : > { %v13878_v56 = vadd.f32 %v1962_v29, %v13757_v55  ;;  %v1988_v31 = vpop.f32.mrf.mxu0  ;;  %v17348_v55 = vld [vmem:[#allocation33_spill] sm:$0xff] }
 0x1db   : > { %v13881_v9 = vadd.f32 %v1988_v31, %v13760_v38  ;;  %v2002_v47 = vpop.f32.mrf.mxu1 }
 0x1dc   : > { %v13887_v42 = vadd.f32 %v2002_v47, %v13766_v26 }
 0x1dd   : > { %11668 = vmatmul.msk.bf16.vlgmr.msra.gmra.mxu0 %vm359_vm2, %v17346_v33 }
 0x1de   : > { %v1976_v54 = vpop.f32.mrf.mxu3  ;;  %11669 = vmatmul.msk.bf16.vlgmr.msra.gmra.mxu1 %vm359_vm2, %v17347_v1  ;;  %11670 = vmatmul.msk.bf16.vlgmr.msra.gmra.mxu2 %vm359_vm2, %v17348_v55  ;;  %v17351_v1 = vld [vmem:[#allocation36_spill] sm:$0xff] }
 0x1df   : > { %v13896_v38 = vadd.f32 %v1976_v54, %v13775_v20  ;;  %2685 = vmatpush.bf16.msra.mxu0 %v13884_v50  ;;  %2699 = vmatpush.bf16.msra.mxu1 %v13884_v50 }
 0x1e0   : > { %2713 = vmatpush.bf16.msra.mxu2 %v13884_v50 }
 0x1e1   : > { %v2016_v26 = vpop.f32.mrf.mxu2 }
 0x1e2   : > { %v13902_v11 = vadd.f32 %v2016_v26, %v13781_v59  ;;  %v1990_v13 = vpop.f32.mrf.mxu0 }
 0x1e3   : > { %11671 = vmatmul.msk.bf16.vlgmr.msra.gmra.mxu3 %vm359_vm2, %v17349_v37  ;;  %v13907_v29 = vadd.f32 %v1990_v13, %v13786_v40  ;;  %v2004_v31 = vpop.f32.mrf.mxu1 }
 0x1e4   : > { %v13910_v20 = vadd.f32 %v2004_v31, %v13789_v32  ;;  %2727 = vmatpush.bf16.msra.mxu3 %v13884_v50  ;;  %v17350_v32 = vld [vmem:[#allocation35_spill] sm:$0xff] }
 0x1e6   : > { %v2039_v47 = vpop.f32.mrf.mxu3 }
 0x1e7   : > { %v13914_v54 = vadd.f32 %v2039_v47, %v13793_v0  ;;  %v17352_v0 = vld [vmem:[#allocation37_spill] sm:$0xff] }
 0x1e9   : > { %v2018_v55 = vpop.f32.mrf.mxu2 }
 0x1ea   : > { %v13917_v59 = vadd.f32 %v2018_v55, %v13796_v2  ;;  %v2082_v26 = vpop.f32.mrf.mxu0 }
 0x1eb   : > { %v13920_v37 = vadd.f32 %v2082_v26, %v13799_v62  ;;  %v2096_v40 = vpop.f32.mrf.mxu1  ;;  %v13935_v62 = vrot.slane %v13457_v36, 2 }
 0x1ec   : > { %v13923_v13 = vadd.f32 %v2096_v40, %v13806_v25 }
 0x1ed   : > { %11672 = vmatmul.msk.bf16.vlgmr.msrb.gmra.mxu0 %vm359_vm2, %v17350_v32  ;;  %17353 = vst [vmem:[#allocation13_spill] sm:$0xff] %v13935_v62 }
 0x1ee   : > { %v2041_v31 = vpop.f32.mrf.mxu3  ;;  %11673 = vmatmul.msk.bf16.vlgmr.msrb.gmra.mxu1 %vm359_vm2, %v17351_v1  ;;  %11674 = vmatmul.msk.bf16.vlgmr.msrb.gmra.mxu2 %vm359_vm2, %v17352_v0 }
 0x1ef   : > { %v13932_v2 = vadd.f32 %v2041_v31, %v13815_v8  ;;  %2741 = vmatpush.bf16.msrb.mxu0 %v13884_v50  ;;  %2755 = vmatpush.bf16.msrb.mxu1 %v13884_v50 }
 0x1f0   : > { %2769 = vmatpush.bf16.msrb.mxu2 %v13884_v50 }
 0x1f1   : > { %v2110_v25 = vpop.f32.mrf.mxu2 }
 0x1f2   : > { %v13941_v55 = vadd.f32 %v2110_v25, %v13823_v22  ;;  %v2084_v47 = vpop.f32.mrf.mxu0 }
 0x1f3   : > { %11675 = vmatmul.msk.bf16.vlgmr.msrb.gmra.mxu3 %vm359_vm2, %v13935_v62  ;;  %v13946_v8 = vadd.f32 %v2084_v47, %v13828_v48  ;;  %v2098_v26 = vpop.f32.mrf.mxu1 }
 0x1f4   : > { %v13949_v40 = vadd.f32 %v2098_v26, %v13831_v61  ;;  %2783 = vmatpush.bf16.msrb.mxu3 %v13884_v50 }
 0x1f6   : > { %v2124_v31 = vpop.f32.mrf.mxu3 }
 0x1f7   : > { %v13953_v0 = vadd.f32 %v2124_v31, %v13835_v23 }
 0x1f9   : > { %v2112_v1 = vpop.f32.mrf.mxu2 }
 0x1fa   : > { %v13956_v22 = vadd.f32 %v2112_v1, %v13838_v39  ;;  %v2138_v25 = vpop.f32.mrf.mxu0 }
 0x1fb   : > { %v13959_v62 = vadd.f32 %v2138_v25, %v13841_v30  ;;  %v2152_v48 = vpop.f32.mrf.mxu1 }
 0x1fc   : > { %v13962_v47 = vadd.f32 %v2152_v48, %v13844_v57  ;;  %v17354_v57 = vld [vmem:[#allocation6_spill] sm:$0xff] }
 0x1fd   : > { %11677 = vmatmul.msk.bf16.vlgmr.msra.gmra.mxu0 %vm359_vm2, %v12809_v35 }
 0x1fe   : > { %v2126_v61 = vpop.f32.mrf.mxu3  ;;  %11678 = vmatmul.msk.bf16.vlgmr.msra.gmra.mxu1 %vm359_vm2, %v12821_v49  ;;  %11679 = vmatmul.msk.bf16.vlgmr.msra.gmra.mxu2 %vm359_vm2, %v12839_v5 }
 0x1ff   : > { %v13971_v23 = vadd.f32 %v2126_v61, %v13854_v52  ;;  %2797 = vmatpush.bf16.msra.mxu0 %v13884_v50  ;;  %2811 = vmatpush.bf16.msra.mxu1 %v13884_v50 }
 0x200   : > { %2825 = vmatpush.bf16.msra.mxu2 %v13884_v50 }
 0x201   : > { %v2166_v39 = vpop.f32.mrf.mxu2 }
 0x202   : > { %v13977_v30 = vadd.f32 %v2166_v39, %v13860_v34  ;;  %v2140_v35 = vpop.f32.mrf.mxu0  ;;  %v11689_v34 = vld [vmem:[%s17159_s1 + $0x16] sm:$0x3] }
 0x203   : > { %11680 = vmatmul.msk.bf16.vlgmr.msra.gmra.mxu3 %vm359_vm2, %v17354_v57  ;;  %v13982_v1 = vadd.f32 %v2140_v35, %v13865_v24  ;;  %v2154_v26 = vpop.f32.mrf.mxu1  ;;  %v14001_v35 = vand.u32 %v11689_v34, %v12773_v3 }
 0x204   : > { %v13985_v52 = vadd.f32 %v2154_v26, %v13868_v41  ;;  %2847 = vmatpush.bf16.msra.mxu3 %v13884_v50 }
 0x206   : > { %v2180_v31 = vpop.f32.mrf.mxu3 }
 0x207   : > { %v13989_v25 = vadd.f32 %v2180_v31, %v13872_v53  ;;  %v17355_v53 = vld [vmem:[#allocation7_spill] sm:$0xff]  ;;  %v17356_v31 = vld [vmem:[#allocation8_spill] sm:$0xff] }
 0x209   : > { %v2168_v48 = vpop.f32.mrf.mxu2 }
 0x20a   : > { %v13995_v61 = vadd.f32 %v2168_v48, %v13878_v56  ;;  %v2194_v24 = vpop.f32.mrf.mxu0  ;;  %v17357_v56 = vld [vmem:[#allocation9_spill] sm:$0xff] }
 0x20b   : > { %v13998_v39 = vadd.f32 %v2194_v24, %v13881_v9  ;;  %v2208_v41 = vpop.f32.mrf.mxu1 }
 0x20c   : > { %v14004_v50 = vadd.f32 %v2208_v41, %v13887_v42 }
 0x20d   : > { %11681 = vmatmul.msk.bf16.vlgmr.msrb.gmra.mxu0 %vm359_vm2, %v17355_v53 }
 0x20e   : > { %v2182_v26 = vpop.f32.mrf.mxu3  ;;  %11682 = vmatmul.msk.bf16.vlgmr.msrb.gmra.mxu1 %vm359_vm2, %v17356_v31  ;;  %11683 = vmatmul.msk.bf16.vlgmr.msrb.gmra.mxu2 %vm359_vm2, %v17357_v56  ;;  %v307_v56 = vld [vmem:[%s12786_s8 + $0xd8] sm:$0xff] }
 0x20f   : > { %v14013_v9 = vadd.f32 %v2182_v26, %v13896_v38  ;;  %2890 = vmatpush.bf16.msrb.mxu0 %v14001_v35  ;;  %2904 = vmatpush.bf16.msrb.mxu1 %v14001_v35  ;;  %v306_v26 = vld [vmem:[%s12786_s8 + $0xd0] sm:$0xff] }
 0x210   : > { %2918 = vmatpush.bf16.msrb.mxu2 %v14001_v35 }
 0x211   : > { %v2222_v42 = vpop.f32.mrf.mxu2 }
 0x212   : > { %v14019_v34 = vadd.f32 %v2222_v42, %v13902_v11  ;;  %v2196_v48 = vpop.f32.mrf.mxu0  ;;  %v338_v11 = vpack.c.bf16 %v306_v26, %v306_v26  ;;  %v339_v42 = vpack.c.bf16 %v307_v56, %v307_v56 }
 0x213   : > { %11684 = vmatmul.msk.bf16.vlgmr.msrb.gmra.mxu3 %vm359_vm2, %v12913_v16  ;;  %v14024_v24 = vadd.f32 %v2196_v48, %v13907_v29  ;;  %v2210_v41 = vpop.f32.mrf.mxu1 }
 0x214   : > { %v14027_v38 = vadd.f32 %v2210_v41, %v13910_v20  ;;  %2932 = vmatpush.bf16.msrb.mxu3 %v14001_v35  ;;  %v2834_v41 = vunpack.c.l.b16 %v338_v11  ;;  %v2835_v5 = vunpack.c.l.b16 %v339_v42 }
 0x216   : > { %v2240_v31 = vpop.f32.mrf.mxu3 }
 0x217   : > { %v14033_v53 = vadd.f32 %v2240_v31, %v13914_v54 }
 0x219   : > { %v2224_v57 = vpop.f32.mrf.mxu2 }
 0x21a   : > { %v14036_v16 = vadd.f32 %v2224_v57, %v13917_v59  ;;  %v2283_v29 = vpop.f32.mrf.mxu0 }
 0x21b   : > { %v14039_v48 = vadd.f32 %v2283_v29, %v13920_v37  ;;  %v2297_v20 = vpop.f32.mrf.mxu1  ;;  %v14053_v37 = vpack.c.b16 %v2835_v5, %v2834_v41 }
 0x21c   : > { %v14042_v49 = vadd.f32 %v2297_v20, %v13923_v13 }
 0x21d   : > { %11685 = vmatmul.msk.bf16.vlgmr.msra.gmra.mxu0 %vm359_vm2, %v12915_v17 }
 0x21e   : > { %v2242_v54 = vpop.f32.mrf.mxu3  ;;  %11686 = vmatmul.msk.bf16.vlgmr.msra.gmra.mxu1 %vm359_vm2, %v12926_v28  ;;  %11687 = vmatmul.msk.bf16.vlgmr.msra.gmra.mxu2 %vm359_vm2, %v13457_v36 }
 0x21f   : > { %v14051_v59 = vadd.f32 %v2242_v54, %v13932_v2  ;;  %2946 = vmatpush.bf16.msra.mxu0 %v14001_v35  ;;  %2960 = vmatpush.bf16.msra.mxu1 %v14001_v35 }
 0x220   : > { %2974 = vmatpush.bf16.msra.mxu2 %v14001_v35 }
 0x221   : > { %v2311_v13 = vpop.f32.mrf.mxu2 }
 0x222   : > { %v14059_v57 = vadd.f32 %v2311_v13, %v13941_v55  ;;  %v2285_v31 = vpop.f32.mrf.mxu0 }
 0x223   : > { %11688 = vmatmul.msk.bf16.vlgmr.msra.gmra.mxu3 %vm359_vm2, %v14053_v37  ;;  %v14064_v56 = vadd.f32 %v2285_v31, %v13946_v8  ;;  %v2299_v2 = vpop.f32.mrf.mxu1 }
 0x224   : > { %v14067_v5 = vadd.f32 %v2299_v2, %v13949_v40  ;;  %2988 = vmatpush.bf16.msra.mxu3 %v14001_v35 }
 0x226   : > { %v2325_v26 = vpop.f32.mrf.mxu3 }
 0x227   : > { %v14071_v11 = vadd.f32 %v2325_v26, %v13953_v0 }
 0x229   : > { %v2313_v42 = vpop.f32.mrf.mxu2 }
 0x22a   : > { %v14074_v55 = vadd.f32 %v2313_v42, %v13956_v22  ;;  %v2339_v29 = vpop.f32.mrf.mxu0 }
 0x22b   : > { %v14077_v20 = vadd.f32 %v2339_v29, %v13959_v62  ;;  %v2353_v8 = vpop.f32.mrf.mxu1 }
 0x22c   : > { %v14080_v41 = vadd.f32 %v2353_v8, %v13962_v47 }
 0x22d   : > { %11690 = vmatmul.msk.bf16.vlgmr.msrb.gmra.mxu0 %vm359_vm2, %v12832_v63 }
 0x22e   : > { %v2327_v40 = vpop.f32.mrf.mxu3  ;;  %11691 = vmatmul.msk.bf16.vlgmr.msrb.gmra.mxu1 %vm359_vm2, %v12856_v19  ;;  %11692 = vmatmul.msk.bf16.vlgmr.msrb.gmra.mxu2 %vm359_vm2, %v12886_v4 }
 0x22f   : > { %v14089_v0 = vadd.f32 %v2327_v40, %v13971_v23  ;;  %3002 = vmatpush.bf16.msrb.mxu0 %v14001_v35  ;;  %3016 = vmatpush.bf16.msrb.mxu1 %v14001_v35 }
 0x230   : > { %3030 = vmatpush.bf16.msrb.mxu2 %v14001_v35 }
 0x231   : > { %v2367_v62 = vpop.f32.mrf.mxu2 }
 0x232   : > { %v14095_v22 = vadd.f32 %v2367_v62, %v13977_v30  ;;  %v2341_v63 = vpop.f32.mrf.mxu0  ;;  %v11702_v30 = vld [vmem:[%s17159_s1 + $0x18] sm:$0x3] }
 0x233   : > { %11693 = vmatmul.msk.bf16.vlgmr.msrb.gmra.mxu3 %vm359_vm2, %v12896_v6  ;;  %v14100_v47 = vadd.f32 %v2341_v63, %v13982_v1  ;;  %v2355_v54 = vpop.f32.mrf.mxu1  ;;  %v14119_v29 = vand.u32 %v11702_v30, %v12773_v3 }
 0x234   : > { %v14103_v23 = vadd.f32 %v2355_v54, %v13985_v52  ;;  %3053 = vmatpush.bf16.msrb.mxu3 %v14001_v35 }
 0x236   : > { %v2381_v13 = vpop.f32.mrf.mxu3 }
 0x237   : > { %v14107_v31 = vadd.f32 %v2381_v13, %v13989_v25 }
 0x239   : > { %v2369_v2 = vpop.f32.mrf.mxu2 }
 0x23a   : > { %v14113_v26 = vadd.f32 %v2369_v2, %v13995_v61  ;;  %v2395_v1 = vpop.f32.mrf.mxu0 }
 0x23b   : > { %v14116_v42 = vadd.f32 %v2395_v1, %v13998_v39  ;;  %v2409_v52 = vpop.f32.mrf.mxu1 }
 0x23c   : > { %v14122_v35 = vadd.f32 %v2409_v52, %v14004_v50 }
 0x23d   : > { %11694 = vmatmul.msk.bf16.vlgmr.msra.gmra.mxu0 %vm359_vm2, %v12900_v7 }
 0x23e   : > { %v2383_v25 = vpop.f32.mrf.mxu3  ;;  %11695 = vmatmul.msk.bf16.vlgmr.msra.gmra.mxu1 %vm359_vm2, %v12919_v18  ;;  %11696 = vmatmul.msk.bf16.vlgmr.msra.gmra.mxu2 %vm359_vm2, %v12940_v44 }
 0x23f   : > { %v14131_v61 = vadd.f32 %v2383_v25, %v14013_v9  ;;  %3096 = vmatpush.bf16.msra.mxu0 %v14119_v29  ;;  %3110 = vmatpush.bf16.msra.mxu1 %v14119_v29 }
 0x240   : > { %3124 = vmatpush.bf16.msra.mxu2 %v14119_v29 }
 0x241   : > { %v2423_v39 = vpop.f32.mrf.mxu2 }
 0x242   : > { %v14137_v50 = vadd.f32 %v2423_v39, %v14019_v34  ;;  %v2397_v8 = vpop.f32.mrf.mxu0  ;;  %v17248_v34 = vshll.u32 %v14053_v37, 16 }
 0x243   : > { %11697 = vmatmul.msk.bf16.vlgmr.msra.gmra.mxu3 %vm359_vm2, %v12944_v45  ;;  %v14142_v40 = vadd.f32 %v2397_v8, %v14024_v24  ;;  %v2411_v62 = vpop.f32.mrf.mxu1 }
 0x244   : > { %v14145_v9 = vadd.f32 %v2411_v62, %v14027_v38  ;;  %3138 = vmatpush.bf16.msra.mxu3 %v14119_v29  ;;  %v17249_v38 = vshrl.u32 %v14053_v37, 16  ;;  %v3041_v52 = vrot.slane %v17248_v34, 1  ;;  %v17362_v34 = vld [vmem:[#allocation19_spill] sm:$0xff] }
 0x246   : > { %v2443_v63 = vpop.f32.mrf.mxu3 }
 0x247   : > { %v14149_v54 = vadd.f32 %v2443_v63, %v14033_v53 }
 0x249   : > { %v2425_v13 = vpop.f32.mrf.mxu2 }
 0x24a   : > { %v14153_v30 = vadd.f32 %v2425_v13, %v14036_v16  ;;  %v2486_v2 = vpop.f32.mrf.mxu0 }
 0x24b   : > { %v14156_v24 = vadd.f32 %v2486_v2, %v14039_v48  ;;  %v2500_v1 = vpop.f32.mrf.mxu1  ;;  %v14175_v48 = vor.u32 %v3041_v52, %v17249_v38 }
 0x24c   : > { %v14162_v25 = vadd.f32 %v2500_v1, %v14042_v49 }
 0x24d   : > { %11698 = vmatmul.msk.bf16.vlgmr.msrb.gmra.mxu0 %vm359_vm2, %v12948_v46 }
 0x24e   : > { %v2445_v53 = vpop.f32.mrf.mxu3  ;;  %11699 = vmatmul.msk.bf16.vlgmr.msrb.gmra.mxu1 %vm359_vm2, %v17323_v15  ;;  %11700 = vmatmul.msk.bf16.vlgmr.msrb.gmra.mxu2 %vm359_vm2, %v13579_v27 }
 0x24f   : > { %v14171_v16 = vadd.f32 %v2445_v53, %v14051_v59  ;;  %3152 = vmatpush.bf16.msrb.mxu0 %v14119_v29  ;;  %3166 = vmatpush.bf16.msrb.mxu1 %v14119_v29 }
 0x250   : > { %3180 = vmatpush.bf16.msrb.mxu2 %v14119_v29 }
 0x251   : > { %v2514_v49 = vpop.f32.mrf.mxu2 }
 0x252   : > { %v14181_v39 = vadd.f32 %v2514_v49, %v14059_v57  ;;  %v2488_v8 = vpop.f32.mrf.mxu0 }
 0x253   : > { %11701 = vmatmul.msk.bf16.vlgmr.msrb.gmra.mxu3 %vm359_vm2, %v14175_v48  ;;  %v14186_v59 = vadd.f32 %v2488_v8, %v14064_v56  ;;  %v2502_v62 = vpop.f32.mrf.mxu1  ;;  %v17358_v8 = vld [vmem:[#allocation14_spill] sm:$0xff] }
 0x254   : > { %v14189_v63 = vadd.f32 %v2502_v62, %v14067_v5  ;;  %3194 = vmatpush.bf16.msrb.mxu3 %v14119_v29  ;;  %v17360_v62 = vld [vmem:[#allocation16_spill] sm:$0xff] }
 0x256   : > { %v2528_v13 = vpop.f32.mrf.mxu3 }
 0x257   : > { %v14193_v2 = vadd.f32 %v2528_v13, %v14071_v11  ;;  %v17359_v11 = vld [vmem:[#allocation15_spill] sm:$0xff] }
 0x259   : > { %v2516_v1 = vpop.f32.mrf.mxu2 }
 0x25a   : > { %v14196_v57 = vadd.f32 %v2516_v1, %v14074_v55  ;;  %v2542_v52 = vpop.f32.mrf.mxu0 }
 0x25b   : > { %v14199_v53 = vadd.f32 %v2542_v52, %v14077_v20  ;;  %v2556_v56 = vpop.f32.mrf.mxu1 }
 0x25c   : > { %v14202_v49 = vadd.f32 %v2556_v56, %v14080_v41 }
 0x25d   : > { %11703 = vmatmul.msk.bf16.vlgmr.msra.gmra.mxu0 %vm359_vm2, %v17325_v58 }
 0x25e   : > { %v2530_v5 = vpop.f32.mrf.mxu3  ;;  %11704 = vmatmul.msk.bf16.vlgmr.msra.gmra.mxu1 %vm359_vm2, %v17358_v8  ;;  %11705 = vmatmul.msk.bf16.vlgmr.msra.gmra.mxu2 %vm359_vm2, %v17359_v11 }
 0x25f   : > { %v14211_v55 = vadd.f32 %v2530_v5, %v14089_v0  ;;  %3208 = vmatpush.bf16.msra.mxu0 %v14119_v29  ;;  %3222 = vmatpush.bf16.msra.mxu1 %v14119_v29 }
 0x260   : > { %3236 = vmatpush.bf16.msra.mxu2 %v14119_v29 }
 0x261   : > { %v2570_v20 = vpop.f32.mrf.mxu2 }
 0x262   : > { %v14217_v41 = vadd.f32 %v2570_v20, %v14095_v22  ;;  %v2544_v58 = vpop.f32.mrf.mxu0  ;;  %v11715_v22 = vld [vmem:[%s17159_s1 + $0x1a] sm:$0x3] }
 0x263   : > { %11706 = vmatmul.msk.bf16.vlgmr.msra.gmra.mxu3 %vm359_vm2, %v17360_v62  ;;  %v14222_v13 = vadd.f32 %v2544_v58, %v14100_v47  ;;  %v2558_v1 = vpop.f32.mrf.mxu1 }
 0x264   : > { %v14225_v0 = vadd.f32 %v2558_v1, %v14103_v23  ;;  %3254 = vmatpush.bf16.msra.mxu3 %v14119_v29  ;;  %v14241_v1 = vand.u32 %v11715_v22, %v12773_v3 }
 0x266   : > { %v2584_v52 = vpop.f32.mrf.mxu3 }
 0x267   : > { %v14229_v56 = vadd.f32 %v2584_v52, %v14107_v31  ;;  %v17361_v31 = vld [vmem:[#allocation17_spill] sm:$0xff] }
 0x269   : > { %v2572_v5 = vpop.f32.mrf.mxu2 }
 0x26a   : > { %v14235_v20 = vadd.f32 %v2572_v5, %v14113_v26  ;;  %v2598_v47 = vpop.f32.mrf.mxu0  ;;  %v17363_v26 = vld [vmem:[#allocation20_spill] sm:$0xff] }
 0x26b   : > { %v14238_v58 = vadd.f32 %v2598_v47, %v14116_v42  ;;  %v2612_v23 = vpop.f32.mrf.mxu1  ;;  %v17364_v47 = vld [vmem:[#allocation21_spill] sm:$0xff] }
 0x26c   : > { %v14244_v29 = vadd.f32 %v2612_v23, %v14122_v35 }
 0x26d   : > { %11707 = vmatmul.msk.bf16.vlgmr.msrb.gmra.mxu0 %vm359_vm2, %v17361_v31  ;;  %v17366_v31 = vld [vmem:[#allocation23_spill] sm:$0xff] }
 0x26e   : > { %v2586_v52 = vpop.f32.mrf.mxu3  ;;  %11708 = vmatmul.msk.bf16.vlgmr.msrb.gmra.mxu1 %vm359_vm2, %v17362_v34  ;;  %11709 = vmatmul.msk.bf16.vlgmr.msrb.gmra.mxu2 %vm359_vm2, %v17363_v26 }
 0x26f   : > { %v14253_v42 = vadd.f32 %v2586_v52, %v14131_v61  ;;  %3297 = vmatpush.bf16.msrb.mxu0 %v14241_v1  ;;  %3311 = vmatpush.bf16.msrb.mxu1 %v14241_v1 }
 0x270   : > { %3325 = vmatpush.bf16.msrb.mxu2 %v14241_v1 }
 0x271   : > { %v2626_v35 = vpop.f32.mrf.mxu2 }
 0x272   : > { %v14259_v22 = vadd.f32 %v2626_v35, %v14137_v50  ;;  %v2600_v5 = vpop.f32.mrf.mxu0 }
 0x273   : > { %11710 = vmatmul.msk.bf16.vlgmr.msrb.gmra.mxu3 %vm359_vm2, %v17364_v47  ;;  %v14264_v23 = vadd.f32 %v2600_v5, %v14142_v40  ;;  %v2614_v38 = vpop.f32.mrf.mxu1 }
 0x274   : > { %v14267_v61 = vadd.f32 %v2614_v38, %v14145_v9  ;;  %3339 = vmatpush.bf16.msrb.mxu3 %v14241_v1  ;;  %v17365_v9 = vld [vmem:[#allocation22_spill] sm:$0xff] }
 0x276   : > { %v2644_v52 = vpop.f32.mrf.mxu3 }
 0x277   : > { %v14271_v26 = vadd.f32 %v2644_v52, %v14149_v54  ;;  %v17367_v54 = vld [vmem:[#allocation12_spill] sm:$0xff] }
 0x279   : > { %v2628_v34 = vpop.f32.mrf.mxu2 }
 0x27a   : > { %v14274_v50 = vadd.f32 %v2628_v34, %v14153_v30  ;;  %v2687_v35 = vpop.f32.mrf.mxu0  ;;  %v14292_v30 = vrot.slane %v14053_v37, 1 }
 0x27b   : > { %v14277_v47 = vadd.f32 %v2687_v35, %v14156_v24  ;;  %v2701_v40 = vpop.f32.mrf.mxu1 }
 0x27c   : > { %v14280_v5 = vadd.f32 %v2701_v40, %v14162_v25  ;;  %17368 = vst [vmem:[#allocation3_spill] sm:$0xff] %v14292_v30 }
 0x27d   : > { %11711 = vmatmul.msk.bf16.vlgmr.msra.gmra.mxu0 %vm359_vm2, %v17365_v9  ;;  %v17370_v9 = vld [vmem:[#allocation18_spill] sm:$0xff] }
 0x27e   : > { %v2646_v38 = vpop.f32.mrf.mxu3  ;;  %11712 = vmatmul.msk.bf16.vlgmr.msra.gmra.mxu1 %vm359_vm2, %v17366_v31  ;;  %11713 = vmatmul.msk.bf16.vlgmr.msra.gmra.mxu2 %vm359_vm2, %v17367_v54 }
 0x27f   : > { %v14289_v34 = vadd.f32 %v2646_v38, %v14171_v16  ;;  %3353 = vmatpush.bf16.msra.mxu0 %v14241_v1  ;;  %3367 = vmatpush.bf16.msra.mxu1 %v14241_v1 }
 0x280   : > { %3381 = vmatpush.bf16.msra.mxu2 %v14241_v1 }
 0x281   : > { %v2715_v24 = vpop.f32.mrf.mxu2 }
 0x282   : > { %v14298_v25 = vadd.f32 %v2715_v24, %v14181_v39  ;;  %v2689_v52 = vpop.f32.mrf.mxu0 }
 0x283   : > { %11714 = vmatmul.msk.bf16.vlgmr.msra.gmra.mxu3 %vm359_vm2, %v14292_v30  ;;  %v14303_v16 = vadd.f32 %v2689_v52, %v14186_v59  ;;  %v2703_v35 = vpop.f32.mrf.mxu1 }
 0x284   : > { %v14306_v40 = vadd.f32 %v2703_v35, %v14189_v63  ;;  %3395 = vmatpush.bf16.msra.mxu3 %v14241_v1  ;;  %v17369_v63 = vld [vmem:[#allocation4_spill] sm:$0xff] }
 0x286   : > { %v2729_v38 = vpop.f32.mrf.mxu3 }
 0x287   : > { %v14310_v54 = vadd.f32 %v2729_v38, %v14193_v2  ;;  %v17371_v2 = vld [vmem:[#allocation24_spill] sm:$0xff]  ;;  %v17372_v38 = vld [vmem:[#allocation25_spill] sm:$0xff] }
 0x289   : > { %v2717_v31 = vpop.f32.mrf.mxu2 }
 0x28a   : > { %v14313_v39 = vadd.f32 %v2717_v31, %v14196_v57  ;;  %v2743_v24 = vpop.f32.mrf.mxu0 }
 0x28b   : > { %v14316_v30 = vadd.f32 %v2743_v24, %v14199_v53  ;;  %v2757_v59 = vpop.f32.mrf.mxu1 }
 0x28c   : > { %v14319_v52 = vadd.f32 %v2757_v59, %v14202_v49 }
 0x28d   : > { %11716 = vmatmul.msk.bf16.vlgmr.msrb.gmra.mxu0 %vm359_vm2, %v17369_v63 }
 0x28e   : > { %v2731_v35 = vpop.f32.mrf.mxu3  ;;  %11717 = vmatmul.msk.bf16.vlgmr.msrb.gmra.mxu1 %vm359_vm2, %v17370_v9  ;;  %11718 = vmatmul.msk.bf16.vlgmr.msrb.gmra.mxu2 %vm359_vm2, %v17371_v2  ;;  %v17374_v2 = vld [vmem:[#allocation27_spill] sm:$0xff] }
 0x28f   : > { %v14328_v57 = vadd.f32 %v2731_v35, %v14211_v55  ;;  %3409 = vmatpush.bf16.msrb.mxu0 %v14241_v1  ;;  %3423 = vmatpush.bf16.msrb.mxu1 %v14241_v1 }
 0x290   : > { %3437 = vmatpush.bf16.msrb.mxu2 %v14241_v1 }
 0x291   : > { %v2771_v53 = vpop.f32.mrf.mxu2 }
 0x292   : > { %v14334_v49 = vadd.f32 %v2771_v53, %v14217_v41  ;;  %v2745_v31 = vpop.f32.mrf.mxu0  ;;  %v11728_v41 = vld [vmem:[%s17159_s1 + $0x1c] sm:$0x3] }
 0x293   : > { %11719 = vmatmul.msk.bf16.vlgmr.msrb.gmra.mxu3 %vm359_vm2, %v17372_v38  ;;  %v14339_v24 = vadd.f32 %v2745_v31, %v14222_v13  ;;  %v2759_v59 = vpop.f32.mrf.mxu1 }
 0x294   : > { %v14342_v55 = vadd.f32 %v2759_v59, %v14225_v0  ;;  %3457 = vmatpush.bf16.msrb.mxu3 %v14241_v1  ;;  %v14358_v59 = vand.u32 %v11728_v41, %v12773_v3 }
 0x296   : > { %v2785_v63 = vpop.f32.mrf.mxu3 }
 0x297   : > { %v14346_v35 = vadd.f32 %v2785_v63, %v14229_v56  ;;  %v17373_v56 = vld [vmem:[#allocation26_spill] sm:$0xff] }
 0x299   : > { %v2773_v53 = vpop.f32.mrf.mxu2 }
 0x29a   : > { %v14352_v38 = vadd.f32 %v2773_v53, %v14235_v20  ;;  %v2799_v13 = vpop.f32.mrf.mxu0  ;;  %v17375_v20 = vld [vmem:[#allocation28_spill] sm:$0xff] }
 0x29b   : > { %v14355_v31 = vadd.f32 %v2799_v13, %v14238_v58  ;;  %v2813_v0 = vpop.f32.mrf.mxu1 }
 0x29c   : > { %v14361_v1 = vadd.f32 %v2813_v0, %v14244_v29 }
 0x29d   : > { %11720 = vmatmul.msk.bf16.vlgmr.msra.gmra.mxu0 %vm359_vm2, %v17373_v56 }
 0x29e   : > { %v2787_v63 = vpop.f32.mrf.mxu3  ;;  %11721 = vmatmul.msk.bf16.vlgmr.msra.gmra.mxu1 %vm359_vm2, %v17374_v2  ;;  %11722 = vmatmul.msk.bf16.vlgmr.msra.gmra.mxu2 %vm359_vm2, %v17375_v20 }
 0x29f   : > { %v14370_v58 = vadd.f32 %v2787_v63, %v14253_v42  ;;  %3500 = vmatpush.bf16.msra.mxu0 %v14358_v59  ;;  %3514 = vmatpush.bf16.msra.mxu1 %v14358_v59 }
 0x2a0   : > { %3528 = vmatpush.bf16.msra.mxu2 %v14358_v59 }
 0x2a1   : > { %v2827_v29 = vpop.f32.mrf.mxu2 }
 0x2a2   : > { %v14376_v41 = vadd.f32 %v2827_v29, %v14259_v22  ;;  %v2801_v53 = vpop.f32.mrf.mxu0 }
 0x2a3   : > { %11723 = vmatmul.msk.bf16.vlgmr.msra.gmra.mxu3 %vm359_vm2, %v13171_v21  ;;  %v14381_v13 = vadd.f32 %v2801_v53, %v14264_v23  ;;  %v2815_v0 = vpop.f32.mrf.mxu1  ;;  %v17376_v53 = vshrl.u32 %v14053_v37, 16 }
 0x2a4   : > { %v14384_v42 = vadd.f32 %v2815_v0, %v14267_v61  ;;  %3542 = vmatpush.bf16.msra.mxu3 %v14358_v59  ;;  %v17377_v61 = vshll.u32 %v14053_v37, 16 }
 0x2a5   : > { %v3444_v56 = vrot.slane %v17376_v53, 1 }
 0x2a6   : > { %v2849_v63 = vpop.f32.mrf.mxu3  ;;  %v3445_v0 = vrot.slane %v17377_v61, 2 }
 0x2a7   : > { %v14388_v20 = vadd.f32 %v2849_v63, %v14271_v26 }
 0x2a9   : > { %v2829_v2 = vpop.f32.mrf.mxu2 }
 0x2aa   : > { %v14391_v22 = vadd.f32 %v2829_v2, %v14274_v50  ;;  %v2892_v29 = vpop.f32.mrf.mxu0  ;;  %v14412_v50 = vor.u32 %v3445_v0, %v3444_v56 }
 0x2ab   : > { %v14394_v21 = vadd.f32 %v2892_v29, %v14277_v47  ;;  %v2906_v23 = vpop.f32.mrf.mxu1 }
 0x2ac   : > { %v14401_v9 = vadd.f32 %v2906_v23, %v14280_v5 }
 0x2ad   : > { %11724 = vmatmul.msk.bf16.vlgmr.msrb.gmra.mxu0 %vm359_vm2, %v13173_v10 }
 0x2ae   : > { %v2851_v26 = vpop.f32.mrf.mxu3  ;;  %11725 = vmatmul.msk.bf16.vlgmr.msrb.gmra.mxu1 %vm359_vm2, %v13193_v14  ;;  %11726 = vmatmul.msk.bf16.vlgmr.msrb.gmra.mxu2 %vm359_vm2, %v13817_v60 }
 0x2af   : > { %v14410_v47 = vadd.f32 %v2851_v26, %v14289_v34  ;;  %3556 = vmatpush.bf16.msrb.mxu0 %v14358_v59  ;;  %3570 = vmatpush.bf16.msrb.mxu1 %v14358_v59 }
 0x2b0   : > { %3584 = vmatpush.bf16.msrb.mxu2 %v14358_v59 }
 0x2b1   : > { %v2920_v5 = vpop.f32.mrf.mxu2 }
 0x2b2   : > { %v14418_v2 = vadd.f32 %v2920_v5, %v14298_v25  ;;  %v2894_v63 = vpop.f32.mrf.mxu0 }
 0x2b3   : > { %11727 = vmatmul.msk.bf16.vlgmr.msrb.gmra.mxu3 %vm359_vm2, %v14412_v50  ;;  %v14423_v29 = vadd.f32 %v2894_v63, %v14303_v16  ;;  %v2908_v34 = vpop.f32.mrf.mxu1 }
 0x2b4   : > { %v14426_v56 = vadd.f32 %v2908_v34, %v14306_v40  ;;  %3598 = vmatpush.bf16.msrb.mxu3 %v14358_v59 }
 0x2b6   : > { %v2934_v23 = vpop.f32.mrf.mxu3 }
 0x2b7   : > { %v14430_v53 = vadd.f32 %v2934_v23, %v14310_v54 }
 0x2b9   : > { %v2922_v61 = vpop.f32.mrf.mxu2 }
 0x2ba   : > { %v14433_v25 = vadd.f32 %v2922_v61, %v14313_v39  ;;  %v2948_v0 = vpop.f32.mrf.mxu0 }
 0x2bb   : > { %v14436_v26 = vadd.f32 %v2948_v0, %v14316_v30  ;;  %v2962_v16 = vpop.f32.mrf.mxu1 }
 0x2bc   : > { %v14439_v5 = vadd.f32 %v2962_v16, %v14319_v52 }
 0x2bd   : > { %11729 = vmatmul.msk.bf16.vlgmr.msra.gmra.mxu0 %vm359_vm2, %v13219_v51 }
 0x2be   : > { %v2936_v40 = vpop.f32.mrf.mxu3  ;;  %11730 = vmatmul.msk.bf16.vlgmr.msra.gmra.mxu1 %vm359_vm2, %v13237_v43  ;;  %11731 = vmatmul.msk.bf16.vlgmr.msra.gmra.mxu2 %vm359_vm2, %v13261_v12 }
 0x2bf   : > { %v14448_v54 = vadd.f32 %v2936_v40, %v14328_v57  ;;  %3612 = vmatpush.bf16.msra.mxu0 %v14358_v59  ;;  %3626 = vmatpush.bf16.msra.mxu1 %v14358_v59 }
 0x2c0   : > { %3640 = vmatpush.bf16.msra.mxu2 %v14358_v59 }
 0x2c1   : > { %v2976_v30 = vpop.f32.mrf.mxu2 }
 0x2c2   : > { %v14454_v39 = vadd.f32 %v2976_v30, %v14334_v49  ;;  %v2950_v51 = vpop.f32.mrf.mxu0  ;;  %v11741_v49 = vld [vmem:[%s17159_s1 + $0x1e] sm:$0x3] }
 0x2c3   : > { %11732 = vmatmul.msk.bf16.vlgmr.msra.gmra.mxu3 %vm359_vm2, %v17346_v33  ;;  %v14459_v52 = vadd.f32 %v2950_v51, %v14339_v24  ;;  %v2964_v63 = vpop.f32.mrf.mxu1  ;;  %v14478_v40 = vand.u32 %v11741_v49, %v12773_v3  ;;  %v17379_v51 = vld [vmem:[#allocation33_spill] sm:$0xff] }
 0x2c4   : > { %v14462_v57 = vadd.f32 %v2964_v63, %v14342_v55  ;;  %3658 = vmatpush.bf16.msra.mxu3 %v14358_v59 }
 0x2c6   : > { %v2990_v34 = vpop.f32.mrf.mxu3 }
 0x2c7   : > { %v14466_v23 = vadd.f32 %v2990_v34, %v14346_v35  ;;  %v17378_v35 = vld [vmem:[#allocation32_spill] sm:$0xff] }
 0x2c9   : > { %v2978_v61 = vpop.f32.mrf.mxu2 }
 0x2ca   : > { %v14472_v0 = vadd.f32 %v2978_v61, %v14352_v38  ;;  %v3004_v24 = vpop.f32.mrf.mxu0  ;;  %v17380_v38 = vld [vmem:[#allocation34_spill] sm:$0xff] }
 0x2cb   : > { %v14475_v16 = vadd.f32 %v3004_v24, %v14355_v31  ;;  %v3018_v55 = vpop.f32.mrf.mxu1 }
 0x2cc   : > { %v14481_v59 = vadd.f32 %v3018_v55, %v14361_v1 }
 0x2cd   : > { %11733 = vmatmul.msk.bf16.vlgmr.msrb.gmra.mxu0 %vm359_vm2, %v17378_v35 }
 0x2ce   : > { %v2992_v30 = vpop.f32.mrf.mxu3  ;;  %11734 = vmatmul.msk.bf16.vlgmr.msrb.gmra.mxu1 %vm359_vm2, %v17379_v51  ;;  %11735 = vmatmul.msk.bf16.vlgmr.msrb.gmra.mxu2 %vm359_vm2, %v17380_v38  ;;  %v17382_v38 = vld [vmem:[#allocation37_spill] sm:$0xff] }
 0x2cf   : > { %v14490_v31 = vadd.f32 %v2992_v30, %v14370_v58  ;;  %3701 = vmatpush.bf16.msrb.mxu0 %v14478_v40  ;;  %3715 = vmatpush.bf16.msrb.mxu1 %v14478_v40 }
 0x2d0   : > { %3729 = vmatpush.bf16.msrb.mxu2 %v14478_v40 }
 0x2d1   : > { %v3032_v1 = vpop.f32.mrf.mxu2 }
 0x2d2   : > { %v14496_v63 = vadd.f32 %v3032_v1, %v14376_v41  ;;  %v3006_v34 = vpop.f32.mrf.mxu0 }
 0x2d3   : > { %11736 = vmatmul.msk.bf16.vlgmr.msrb.gmra.mxu3 %vm359_vm2, %v17350_v32  ;;  %v14501_v49 = vadd.f32 %v3006_v34, %v14381_v13  ;;  %v3020_v61 = vpop.f32.mrf.mxu1 }
 0x2d4   : > { %v14504_v58 = vadd.f32 %v3020_v61, %v14384_v42  ;;  %3743 = vmatpush.bf16.msrb.mxu3 %v14478_v40  ;;  %v17381_v42 = vld [vmem:[#allocation36_spill] sm:$0xff] }
 0x2d6   : > { %v3055_v24 = vpop.f32.mrf.mxu3 }
 0x2d7   : > { %v14508_v55 = vadd.f32 %v3055_v24, %v14388_v20  ;;  %v17383_v20 = vld [vmem:[#allocation13_spill] sm:$0xff] }
 0x2d9   : > { %v3034_v30 = vpop.f32.mrf.mxu2 }
 0x2da   : > { %v14511_v41 = vadd.f32 %v3034_v30, %v14391_v22  ;;  %v3098_v1 = vpop.f32.mrf.mxu0 }
 0x2db   : > { %v14514_v32 = vadd.f32 %v3098_v1, %v14394_v21  ;;  %v3112_v13 = vpop.f32.mrf.mxu1  ;;  %v14529_v21 = vrot.slane %v14053_v37, 2 }
 0x2dc   : > { %v14517_v34 = vadd.f32 %v3112_v13, %v14401_v9 }
 0x2dd   : > { %11737 = vmatmul.msk.bf16.vlgmr.msra.gmra.mxu0 %vm359_vm2, %v17381_v42  ;;  %17384 = vst [vmem:[#allocation14_spill] sm:$0xff] %v14529_v21  ;;  %v17386_v42 = vld [vmem:[#allocation5_spill] sm:$0xff] }
 0x2de   : > { %v3057_v61 = vpop.f32.mrf.mxu3  ;;  %11738 = vmatmul.msk.bf16.vlgmr.msra.gmra.mxu1 %vm359_vm2, %v17382_v38  ;;  %11739 = vmatmul.msk.bf16.vlgmr.msra.gmra.mxu2 %vm359_vm2, %v17383_v20 }
 0x2df   : > { %v14526_v22 = vadd.f32 %v3057_v61, %v14410_v47  ;;  %3757 = vmatpush.bf16.msra.mxu0 %v14478_v40  ;;  %3771 = vmatpush.bf16.msra.mxu1 %v14478_v40 }
 0x2e0   : > { %3785 = vmatpush.bf16.msra.mxu2 %v14478_v40 }
 0x2e1   : > { %v3126_v9 = vpop.f32.mrf.mxu2 }
 0x2e2   : > { %v14535_v24 = vadd.f32 %v3126_v9, %v14418_v2  ;;  %v3100_v30 = vpop.f32.mrf.mxu0 }
 0x2e3   : > { %11740 = vmatmul.msk.bf16.vlgmr.msra.gmra.mxu3 %vm359_vm2, %v14529_v21  ;;  %v14540_v47 = vadd.f32 %v3100_v30, %v14423_v29  ;;  %v3114_v1 = vpop.f32.mrf.mxu1 }
 0x2e4   : > { %v14543_v13 = vadd.f32 %v3114_v1, %v14426_v56  ;;  %3799 = vmatpush.bf16.msra.mxu3 %v14478_v40  ;;  %v17385_v56 = vld [vmem:[#allocation2_spill] sm:$0xff] }
 0x2e6   : > { %v3140_v61 = vpop.f32.mrf.mxu3 }
 0x2e7   : > { %v14547_v20 = vadd.f32 %v3140_v61, %v14430_v53  ;;  %v17387_v53 = vld [vmem:[#allocation6_spill] sm:$0xff]  ;;  %v17388_v61 = vld [vmem:[#allocation7_spill] sm:$0xff] }
 0x2e9   : > { %v3128_v38 = vpop.f32.mrf.mxu2 }
 0x2ea   : > { %v14550_v2 = vadd.f32 %v3128_v38, %v14433_v25  ;;  %v3154_v9 = vpop.f32.mrf.mxu0 }
 0x2eb   : > { %v14553_v21 = vadd.f32 %v3154_v9, %v14436_v26  ;;  %v3168_v29 = vpop.f32.mrf.mxu1 }
 0x2ec   : > { %v14556_v30 = vadd.f32 %v3168_v29, %v14439_v5 }
 0x2ed   : > { %11742 = vmatmul.msk.bf16.vlgmr.msrb.gmra.mxu0 %vm359_vm2, %v17385_v56 }
 0x2ee   : > { %v3142_v1 = vpop.f32.mrf.mxu3  ;;  %11743 = vmatmul.msk.bf16.vlgmr.msrb.gmra.mxu1 %vm359_vm2, %v17386_v42  ;;  %11744 = vmatmul.msk.bf16.vlgmr.msrb.gmra.mxu2 %vm359_vm2, %v17387_v53  ;;  %v17390_v53 = vld [vmem:[#allocation9_spill] sm:$0xff] }
 0x2ef   : > { %v14565_v25 = vadd.f32 %v3142_v1, %v14448_v54  ;;  %3813 = vmatpush.bf16.msrb.mxu0 %v14478_v40  ;;  %3827 = vmatpush.bf16.msrb.mxu1 %v14478_v40 }
 0x2f0   : > { %3841 = vmatpush.bf16.msrb.mxu2 %v14478_v40 }
 0x2f1   : > { %v3182_v26 = vpop.f32.mrf.mxu2 }
 0x2f2   : > { %v14571_v5 = vadd.f32 %v3182_v26, %v14454_v39  ;;  %v3156_v38 = vpop.f32.mrf.mxu0  ;;  %v11754_v39 = vld [vmem:[%s17159_s1 + $0x20] sm:$0x3] }
 0x2f3   : > { %11745 = vmatmul.msk.bf16.vlgmr.msrb.gmra.mxu3 %vm359_vm2, %v17388_v61  ;;  %v14576_v9 = vadd.f32 %v3156_v38, %v14459_v52  ;;  %v3170_v29 = vpop.f32.mrf.mxu1 }
 0x2f4   : > { %v14579_v54 = vadd.f32 %v3170_v29, %v14462_v57  ;;  %3863 = vmatpush.bf16.msrb.mxu3 %v14478_v40  ;;  %v14595_v29 = vand.u32 %v11754_v39, %v12773_v3 }
 0x2f6   : > { %v3196_v56 = vpop.f32.mrf.mxu3 }
 0x2f7   : > { %v14583_v1 = vadd.f32 %v3196_v56, %v14466_v23  ;;  %v17389_v23 = vld [vmem:[#allocation8_spill] sm:$0xff] }
 0x2f9   : > { %v3184_v26 = vpop.f32.mrf.mxu2 }
 0x2fa   : > { %v14589_v61 = vadd.f32 %v3184_v26, %v14472_v0  ;;  %v3210_v52 = vpop.f32.mrf.mxu0  ;;  %v17391_v0 = vld [vmem:[#allocation10_spill] sm:$0xff] }
 0x2fb   : > { %v14592_v38 = vadd.f32 %v3210_v52, %v14475_v16  ;;  %v3224_v57 = vpop.f32.mrf.mxu1 }
 0x2fc   : > { %v14598_v40 = vadd.f32 %v3224_v57, %v14481_v59 }
 0x2fd   : > { %11746 = vmatmul.msk.bf16.vlgmr.msra.gmra.mxu0 %vm359_vm2, %v17389_v23 }
 0x2fe   : > { %v3198_v56 = vpop.f32.mrf.mxu3  ;;  %11747 = vmatmul.msk.bf16.vlgmr.msra.gmra.mxu1 %vm359_vm2, %v17390_v53  ;;  %11748 = vmatmul.msk.bf16.vlgmr.msra.gmra.mxu2 %vm359_vm2, %v17391_v0  ;;  %v309_v0 = vld [vmem:[%s12786_s8 + $0xe8] sm:$0xff] }
 0x2ff   : > { %v14607_v16 = vadd.f32 %v3198_v56, %v14490_v31  ;;  %3906 = vmatpush.bf16.msra.mxu0 %v14595_v29  ;;  %3920 = vmatpush.bf16.msra.mxu1 %v14595_v29  ;;  %v308_v56 = vld [vmem:[%s12786_s8 + $0xe0] sm:$0xff] }
 0x300   : > { %3934 = vmatpush.bf16.msra.mxu2 %v14595_v29 }
 0x301   : > { %v3238_v59 = vpop.f32.mrf.mxu2 }
 0x302   : > { %v14613_v39 = vadd.f32 %v3238_v59, %v14496_v63  ;;  %v3212_v26 = vpop.f32.mrf.mxu0  ;;  %v340_v63 = vpack.c.bf16 %v308_v56, %v308_v56  ;;  %v341_v59 = vpack.c.bf16 %v309_v0, %v309_v0 }
 0x303   : > { %11749 = vmatmul.msk.bf16.vlgmr.msra.gmra.mxu3 %vm359_vm2, %v12915_v17  ;;  %v14618_v52 = vadd.f32 %v3212_v26, %v14501_v49  ;;  %v3226_v57 = vpop.f32.mrf.mxu1 }
 0x304   : > { %v14621_v31 = vadd.f32 %v3226_v57, %v14504_v58  ;;  %3948 = vmatpush.bf16.msra.mxu3 %v14595_v29  ;;  %v3850_v57 = vunpack.c.l.b16 %v340_v63  ;;  %v3851_v51 = vunpack.c.l.b16 %v341_v59 }
 0x306   : > { %v3256_v53 = vpop.f32.mrf.mxu3 }
 0x307   : > { %v14627_v23 = vadd.f32 %v3256_v53, %v14508_v55 }
 0x309   : > { %v3240_v42 = vpop.f32.mrf.mxu2 }
 0x30a   : > { %v14630_v17 = vadd.f32 %v3240_v42, %v14511_v41  ;;  %v3299_v49 = vpop.f32.mrf.mxu0 }
 0x30b   : > { %v14633_v26 = vadd.f32 %v3299_v49, %v14514_v32  ;;  %v3313_v58 = vpop.f32.mrf.mxu1  ;;  %v14647_v32 = vpack.c.b16 %v3851_v51, %v3850_v57 }
 0x30c   : > { %v14636_v35 = vadd.f32 %v3313_v58, %v14517_v34 }
 0x30d   : > { %11750 = vmatmul.msk.bf16.vlgmr.msrb.gmra.mxu0 %vm359_vm2, %v12926_v28 }
 0x30e   : > { %v3258_v55 = vpop.f32.mrf.mxu3  ;;  %11751 = vmatmul.msk.bf16.vlgmr.msrb.gmra.mxu1 %vm359_vm2, %v13457_v36  ;;  %11752 = vmatmul.msk.bf16.vlgmr.msrb.gmra.mxu2 %vm359_vm2, %v14053_v37 }
 0x30f   : > { %v14645_v41 = vadd.f32 %v3258_v55, %v14526_v22  ;;  %3962 = vmatpush.bf16.msrb.mxu0 %v14595_v29  ;;  %3976 = vmatpush.bf16.msrb.mxu1 %v14595_v29 }
 0x310   : > { %3990 = vmatpush.bf16.msrb.mxu2 %v14595_v29 }
 0x311   : > { %v3327_v34 = vpop.f32.mrf.mxu2 }
 0x312   : > { %v14653_v42 = vadd.f32 %v3327_v34, %v14535_v24  ;;  %v3301_v53 = vpop.f32.mrf.mxu0 }
 0x313   : > { %11753 = vmatmul.msk.bf16.vlgmr.msrb.gmra.mxu3 %vm359_vm2, %v14647_v32  ;;  %v14658_v0 = vadd.f32 %v3301_v53, %v14540_v47  ;;  %v3315_v22 = vpop.f32.mrf.mxu1 }
 0x314   : > { %v14661_v51 = vadd.f32 %v3315_v22, %v14543_v13  ;;  %4004 = vmatpush.bf16.msrb.mxu3 %v14595_v29 }
 0x316   : > { %v3341_v56 = vpop.f32.mrf.mxu3 }
 0x317   : > { %v14665_v63 = vadd.f32 %v3341_v56, %v14547_v20 }
 0x319   : > { %v3329_v59 = vpop.f32.mrf.mxu2 }
 0x31a   : > { %v14668_v24 = vadd.f32 %v3329_v59, %v14550_v2  ;;  %v3355_v49 = vpop.f32.mrf.mxu0 }
 0x31b   : > { %v14671_v58 = vadd.f32 %v3355_v49, %v14553_v21  ;;  %v3369_v47 = vpop.f32.mrf.mxu1 }
 0x31c   : > { %v14674_v57 = vadd.f32 %v3369_v47, %v14556_v30 }
 0x31d   : > { %11755 = vmatmul.msk.bf16.vlgmr.msra.gmra.mxu0 %vm359_vm2, %v12856_v19 }
 0x31e   : > { %v3343_v13 = vpop.f32.mrf.mxu3  ;;  %11756 = vmatmul.msk.bf16.vlgmr.msra.gmra.mxu1 %vm359_vm2, %v12886_v4  ;;  %11757 = vmatmul.msk.bf16.vlgmr.msra.gmra.mxu2 %vm359_vm2, %v12896_v6 }
 0x31f   : > { %v14683_v20 = vadd.f32 %v3343_v13, %v14565_v25  ;;  %4018 = vmatpush.bf16.msra.mxu0 %v14595_v29  ;;  %4032 = vmatpush.bf16.msra.mxu1 %v14595_v29 }
 0x320   : > { %4046 = vmatpush.bf16.msra.mxu2 %v14595_v29 }
 0x321   : > { %v3383_v21 = vpop.f32.mrf.mxu2 }
 0x322   : > { %v14689_v2 = vadd.f32 %v3383_v21, %v14571_v5  ;;  %v3357_v19 = vpop.f32.mrf.mxu0  ;;  %v11767_v5 = vld [vmem:[%s17159_s1 + $0x22] sm:$0x3] }
 0x323   : > { %11758 = vmatmul.msk.bf16.vlgmr.msra.gmra.mxu3 %vm359_vm2, %v12900_v7  ;;  %v14694_v30 = vadd.f32 %v3357_v19, %v14576_v9  ;;  %v3371_v55 = vpop.f32.mrf.mxu1  ;;  %v14713_v49 = vand.u32 %v11767_v5, %v12773_v3 }
 0x324   : > { %v14697_v25 = vadd.f32 %v3371_v55, %v14579_v54  ;;  %4069 = vmatpush.bf16.msra.mxu3 %v14595_v29 }
 0x326   : > { %v3397_v34 = vpop.f32.mrf.mxu3 }
 0x327   : > { %v14701_v53 = vadd.f32 %v3397_v34, %v14583_v1 }
 0x329   : > { %v3385_v22 = vpop.f32.mrf.mxu2 }
 0x32a   : > { %v14707_v56 = vadd.f32 %v3385_v22, %v14589_v61  ;;  %v3411_v9 = vpop.f32.mrf.mxu0 }
 0x32b   : > { %v14710_v59 = vadd.f32 %v3411_v9, %v14592_v38  ;;  %v3425_v54 = vpop.f32.mrf.mxu1 }
 0x32c   : > { %v14716_v29 = vadd.f32 %v3425_v54, %v14598_v40 }
 0x32d   : > { %11759 = vmatmul.msk.bf16.vlgmr.msrb.gmra.mxu0 %vm359_vm2, %v12919_v18 }
 0x32e   : > { %v3399_v1 = vpop.f32.mrf.mxu3  ;;  %11760 = vmatmul.msk.bf16.vlgmr.msrb.gmra.mxu1 %vm359_vm2, %v12940_v44  ;;  %11761 = vmatmul.msk.bf16.vlgmr.msrb.gmra.mxu2 %vm359_vm2, %v12944_v45 }
 0x32f   : > { %v14725_v61 = vadd.f32 %v3399_v1, %v14607_v16  ;;  %4112 = vmatpush.bf16.msrb.mxu0 %v14713_v49  ;;  %4126 = vmatpush.bf16.msrb.mxu1 %v14713_v49 }
 0x330   : > { %4140 = vmatpush.bf16.msrb.mxu2 %v14713_v49 }
 0x331   : > { %v3439_v38 = vpop.f32.mrf.mxu2 }
 0x332   : > { %v14731_v40 = vadd.f32 %v3439_v38, %v14613_v39  ;;  %v3413_v47 = vpop.f32.mrf.mxu0  ;;  %v17258_v39 = vshll.u32 %v14647_v32, 16 }
 0x333   : > { %11762 = vmatmul.msk.bf16.vlgmr.msrb.gmra.mxu3 %vm359_vm2, %v12948_v46  ;;  %v14736_v13 = vadd.f32 %v3413_v47, %v14618_v52  ;;  %v3427_v21 = vpop.f32.mrf.mxu1 }
 0x334   : > { %v14739_v16 = vadd.f32 %v3427_v21, %v14621_v31  ;;  %4154 = vmatpush.bf16.msrb.mxu3 %v14713_v49  ;;  %v17259_v31 = vshrl.u32 %v14647_v32, 16  ;;  %v4057_v54 = vrot.slane %v17258_v39, 1 }
 0x336   : > { %v3459_v19 = vpop.f32.mrf.mxu3 }
 0x337   : > { %v14743_v55 = vadd.f32 %v3459_v19, %v14627_v23 }
 0x339   : > { %v3441_v34 = vpop.f32.mrf.mxu2 }
 0x33a   : > { %v14747_v5 = vadd.f32 %v3441_v34, %v14630_v17  ;;  %v3502_v22 = vpop.f32.mrf.mxu0 }
 0x33b   : > { %v14750_v52 = vadd.f32 %v3502_v22, %v14633_v26  ;;  %v3516_v9 = vpop.f32.mrf.mxu1  ;;  %v14769_v26 = vor.u32 %v4057_v54, %v17259_v31 }
 0x33c   : > { %v14756_v1 = vadd.f32 %v3516_v9, %v14636_v35 }
 0x33d   : > { %11763 = vmatmul.msk.bf16.vlgmr.msra.gmra.mxu0 %vm359_vm2, %v17323_v15 }
 0x33e   : > { %v3461_v23 = vpop.f32.mrf.mxu3  ;;  %11764 = vmatmul.msk.bf16.vlgmr.msra.gmra.mxu1 %vm359_vm2, %v13579_v27  ;;  %11765 = vmatmul.msk.bf16.vlgmr.msra.gmra.mxu2 %vm359_vm2, %v14175_v48 }
 0x33f   : > { %v14765_v17 = vadd.f32 %v3461_v23, %v14645_v41  ;;  %4168 = vmatpush.bf16.msra.mxu0 %v14713_v49  ;;  %4182 = vmatpush.bf16.msra.mxu1 %v14713_v49 }
 0x340   : > { %4196 = vmatpush.bf16.msra.mxu2 %v14713_v49 }
 0x341   : > { %v3530_v35 = vpop.f32.mrf.mxu2 }
 0x342   : > { %v14775_v38 = vadd.f32 %v3530_v35, %v14653_v42  ;;  %v3504_v47 = vpop.f32.mrf.mxu0 }
 0x343   : > { %11766 = vmatmul.msk.bf16.vlgmr.msra.gmra.mxu3 %vm359_vm2, %v14769_v26  ;;  %v14780_v41 = vadd.f32 %v3504_v47, %v14658_v0  ;;  %v3518_v21 = vpop.f32.mrf.mxu1 }
 0x344   : > { %v14783_v19 = vadd.f32 %v3518_v21, %v14661_v51  ;;  %4210 = vmatpush.bf16.msra.mxu3 %v14713_v49 }
 0x346   : > { %v3544_v34 = vpop.f32.mrf.mxu3 }
 0x347   : > { %v14787_v22 = vadd.f32 %v3544_v34, %v14665_v63 }
 0x349   : > { %v3532_v9 = vpop.f32.mrf.mxu2 }
 0x34a   : > { %v14790_v42 = vadd.f32 %v3532_v9, %v14668_v24  ;;  %v3558_v54 = vpop.f32.mrf.mxu0 }
 0x34b   : > { %v14793_v23 = vadd.f32 %v3558_v54, %v14671_v58  ;;  %v3572_v0 = vpop.f32.mrf.mxu1 }
 0x34c   : > { %v14796_v35 = vadd.f32 %v3572_v0, %v14674_v57  ;;  %v17392_v57 = vld [vmem:[#allocation17_spill] sm:$0xff] }
 0x34d   : > { %11768 = vmatmul.msk.bf16.vlgmr.msrb.gmra.mxu0 %vm359_vm2, %v17358_v8 }
 0x34e   : > { %v3546_v51 = vpop.f32.mrf.mxu3  ;;  %11769 = vmatmul.msk.bf16.vlgmr.msrb.gmra.mxu1 %vm359_vm2, %v17359_v11  ;;  %11770 = vmatmul.msk.bf16.vlgmr.msrb.gmra.mxu2 %vm359_vm2, %v17360_v62 }
 0x34f   : > { %v14805_v63 = vadd.f32 %v3546_v51, %v14683_v20  ;;  %4224 = vmatpush.bf16.msrb.mxu0 %v14713_v49  ;;  %4238 = vmatpush.bf16.msrb.mxu1 %v14713_v49 }
 0x350   : > { %4252 = vmatpush.bf16.msrb.mxu2 %v14713_v49 }
 0x351   : > { %v3586_v24 = vpop.f32.mrf.mxu2 }
 0x352   : > { %v14811_v58 = vadd.f32 %v3586_v24, %v14689_v2  ;;  %v3560_v8 = vpop.f32.mrf.mxu0  ;;  %v11780_v2 = vld [vmem:[%s17159_s1 + $0x24] sm:$0x3] }
 0x353   : > { %11771 = vmatmul.msk.bf16.vlgmr.msrb.gmra.mxu3 %vm359_vm2, %v17392_v57  ;;  %v14816_v47 = vadd.f32 %v3560_v8, %v14694_v30  ;;  %v3574_v21 = vpop.f32.mrf.mxu1  ;;  %v14835_v24 = vand.u32 %v11780_v2, %v12773_v3 }
 0x354   : > { %v14819_v20 = vadd.f32 %v3574_v21, %v14697_v25  ;;  %4270 = vmatpush.bf16.msrb.mxu3 %v14713_v49  ;;  %v17394_v21 = vld [vmem:[#allocation20_spill] sm:$0xff] }
 0x356   : > { %v3600_v34 = vpop.f32.mrf.mxu3 }
 0x357   : > { %v14823_v9 = vadd.f32 %v3600_v34, %v14701_v53  ;;  %v17393_v53 = vld [vmem:[#allocation19_spill] sm:$0xff] }
 0x359   : > { %v3588_v54 = vpop.f32.mrf.mxu2 }
 0x35a   : > { %v14829_v0 = vadd.f32 %v3588_v54, %v14707_v56  ;;  %v3614_v30 = vpop.f32.mrf.mxu0  ;;  %v17395_v56 = vld [vmem:[#allocation21_spill] sm:$0xff]  ;;  %v17396_v54 = vld [vmem:[#allocation22_spill] sm:$0xff] }
 0x35b   : > { %v14832_v51 = vadd.f32 %v3614_v30, %v14710_v59  ;;  %v3628_v25 = vpop.f32.mrf.mxu1 }
 0x35c   : > { %v14838_v49 = vadd.f32 %v3628_v25, %v14716_v29 }
 0x35d   : > { %11772 = vmatmul.msk.bf16.vlgmr.msra.gmra.mxu0 %vm359_vm2, %v17393_v53 }
 0x35e   : > { %v3602_v8 = vpop.f32.mrf.mxu3  ;;  %11773 = vmatmul.msk.bf16.vlgmr.msra.gmra.mxu1 %vm359_vm2, %v17394_v21  ;;  %11774 = vmatmul.msk.bf16.vlgmr.msra.gmra.mxu2 %vm359_vm2, %v17395_v56  ;;  %v17398_v56 = vld [vmem:[#allocation12_spill] sm:$0xff] }
 0x35f   : > { %v14847_v59 = vadd.f32 %v3602_v8, %v14725_v61  ;;  %4313 = vmatpush.bf16.msra.mxu0 %v14835_v24  ;;  %4327 = vmatpush.bf16.msra.mxu1 %v14835_v24 }
 0x360   : > { %4341 = vmatpush.bf16.msra.mxu2 %v14835_v24 }
 0x361   : > { %v3642_v29 = vpop.f32.mrf.mxu2 }
 0x362   : > { %v14853_v34 = vadd.f32 %v3642_v29, %v14731_v40  ;;  %v3616_v2 = vpop.f32.mrf.mxu0 }
 0x363   : > { %11775 = vmatmul.msk.bf16.vlgmr.msra.gmra.mxu3 %vm359_vm2, %v17396_v54  ;;  %v14858_v30 = vadd.f32 %v3616_v2, %v14736_v13  ;;  %v3630_v25 = vpop.f32.mrf.mxu1 }
 0x364   : > { %v14861_v61 = vadd.f32 %v3630_v25, %v14739_v16  ;;  %4355 = vmatpush.bf16.msra.mxu3 %v14835_v24  ;;  %v17397_v16 = vld [vmem:[#allocation23_spill] sm:$0xff] }
 0x366   : > { %v3660_v8 = vpop.f32.mrf.mxu3 }
 0x367   : > { %v14865_v39 = vadd.f32 %v3660_v8, %v14743_v55  ;;  %v17399_v55 = vld [vmem:[#allocation3_spill] sm:$0xff] }
 0x369   : > { %v3644_v31 = vpop.f32.mrf.mxu2 }
 0x36a   : > { %v14868_v40 = vadd.f32 %v3644_v31, %v14747_v5  ;;  %v3703_v29 = vpop.f32.mrf.mxu0 }
 0x36b   : > { %v14871_v54 = vadd.f32 %v3703_v29, %v14750_v52  ;;  %v3717_v13 = vpop.f32.mrf.mxu1  ;;  %v17260_v52 = vrot.slane %v14647_v32, 1 }
 0x36c   : > { %v14874_v2 = vadd.f32 %v3717_v13, %v14756_v1 }
 0x36d   : > { %11776 = vmatmul.msk.bf16.vlgmr.msrb.gmra.mxu0 %vm359_vm2, %v17397_v16  ;;  %v17401_v16 = vld [vmem:[#allocation24_spill] sm:$0xff] }
 0x36e   : > { %v3662_v25 = vpop.f32.mrf.mxu3  ;;  %11777 = vmatmul.msk.bf16.vlgmr.msrb.gmra.mxu1 %vm359_vm2, %v17398_v56  ;;  %11778 = vmatmul.msk.bf16.vlgmr.msrb.gmra.mxu2 %vm359_vm2, %v17399_v55 }
 0x36f   : > { %v14883_v5 = vadd.f32 %v3662_v25, %v14765_v17  ;;  %4369 = vmatpush.bf16.msrb.mxu0 %v14835_v24  ;;  %4383 = vmatpush.bf16.msrb.mxu1 %v14835_v24 }
 0x370   : > { %4397 = vmatpush.bf16.msrb.mxu2 %v14835_v24 }
 0x371   : > { %v3731_v31 = vpop.f32.mrf.mxu2 }
 0x372   : > { %v14890_v1 = vadd.f32 %v3731_v31, %v14775_v38  ;;  %v3705_v8 = vpop.f32.mrf.mxu0 }
 0x373   : > { %11779 = vmatmul.msk.bf16.vlgmr.msrb.gmra.mxu3 %vm359_vm2, %v17260_v52  ;;  %v14896_v17 = vadd.f32 %v3705_v8, %v14780_v41  ;;  %v3719_v29 = vpop.f32.mrf.mxu1 }
 0x374   : > { %v14899_v13 = vadd.f32 %v3719_v29, %v14783_v19  ;;  %4411 = vmatpush.bf16.msrb.mxu3 %v14835_v24  ;;  %v17400_v19 = vld [vmem:[#allocation18_spill] sm:$0xff] }
 0x376   : > { %v3745_v25 = vpop.f32.mrf.mxu3 }
 0x377   : > { %v14903_v55 = vadd.f32 %v3745_v25, %v14787_v22  ;;  %v17402_v22 = vld [vmem:[#allocation25_spill] sm:$0xff]  ;;  %v17403_v25 = vld [vmem:[#allocation26_spill] sm:$0xff] }
 0x379   : > { %v3733_v38 = vpop.f32.mrf.mxu2 }
 0x37a   : > { %v14906_v31 = vadd.f32 %v3733_v38, %v14790_v42  ;;  %v3759_v56 = vpop.f32.mrf.mxu0 }
 0x37b   : > { %v14909_v52 = vadd.f32 %v3759_v56, %v14793_v23  ;;  %v3773_v41 = vpop.f32.mrf.mxu1 }
 0x37c   : > { %v14912_v8 = vadd.f32 %v3773_v41, %v14796_v35 }
 0x37d   : > { %11781 = vmatmul.msk.bf16.vlgmr.msra.gmra.mxu0 %vm359_vm2, %v17400_v19 }
 0x37e   : > { %v3747_v29 = vpop.f32.mrf.mxu3  ;;  %11782 = vmatmul.msk.bf16.vlgmr.msra.gmra.mxu1 %vm359_vm2, %v17401_v16  ;;  %11783 = vmatmul.msk.bf16.vlgmr.msra.gmra.mxu2 %vm359_vm2, %v17402_v22  ;;  %v17405_v22 = vld [vmem:[#allocation28_spill] sm:$0xff] }
 0x37f   : > { %v14921_v42 = vadd.f32 %v3747_v29, %v14805_v63  ;;  %4425 = vmatpush.bf16.msra.mxu0 %v14835_v24  ;;  %4439 = vmatpush.bf16.msra.mxu1 %v14835_v24 }
 0x380   : > { %4453 = vmatpush.bf16.msra.mxu2 %v14835_v24 }
 0x381   : > { %v3787_v23 = vpop.f32.mrf.mxu2 }
 0x382   : > { %v14927_v35 = vadd.f32 %v3787_v23, %v14811_v58  ;;  %v3761_v56 = vpop.f32.mrf.mxu0  ;;  %v11793_v58 = vld [vmem:[%s17159_s1 + $0x26] sm:$0x3] }
 0x383   : > { %11784 = vmatmul.msk.bf16.vlgmr.msra.gmra.mxu3 %vm359_vm2, %v17403_v25  ;;  %v14932_v38 = vadd.f32 %v3761_v56, %v14816_v47  ;;  %v3775_v41 = vpop.f32.mrf.mxu1 }
 0x384   : > { %v14935_v63 = vadd.f32 %v3775_v41, %v14819_v20  ;;  %4473 = vmatpush.bf16.msra.mxu3 %v14835_v24  ;;  %v14951_v41 = vand.u32 %v11793_v58, %v12773_v3 }
 0x386   : > { %v3801_v19 = vpop.f32.mrf.mxu3 }
 0x387   : > { %v14939_v29 = vadd.f32 %v3801_v19, %v14823_v9  ;;  %v17404_v9 = vld [vmem:[#allocation27_spill] sm:$0xff] }
 0x389   : > { %v3789_v23 = vpop.f32.mrf.mxu2 }
 0x38a   : > { %v14945_v25 = vadd.f32 %v3789_v23, %v14829_v0  ;;  %v3815_v47 = vpop.f32.mrf.mxu0  ;;  %v17406_v0 = vld [vmem:[#allocation29_spill] sm:$0xff] }
 0x38b   : > { %v14948_v56 = vadd.f32 %v3815_v47, %v14832_v51  ;;  %v3829_v20 = vpop.f32.mrf.mxu1 }
 0x38c   : > { %v14954_v24 = vadd.f32 %v3829_v20, %v14838_v49 }
 0x38d   : > { %11785 = vmatmul.msk.bf16.vlgmr.msrb.gmra.mxu0 %vm359_vm2, %v17404_v9 }
 0x38e   : > { %v3803_v19 = vpop.f32.mrf.mxu3  ;;  %11786 = vmatmul.msk.bf16.vlgmr.msrb.gmra.mxu1 %vm359_vm2, %v17405_v22  ;;  %11787 = vmatmul.msk.bf16.vlgmr.msrb.gmra.mxu2 %vm359_vm2, %v17406_v0 }
 0x38f   : > { %v14963_v51 = vadd.f32 %v3803_v19, %v14847_v59  ;;  %4516 = vmatpush.bf16.msrb.mxu0 %v14951_v41  ;;  %4530 = vmatpush.bf16.msrb.mxu1 %v14951_v41 }
 0x390   : > { %4544 = vmatpush.bf16.msrb.mxu2 %v14951_v41 }
 0x391   : > { %v3843_v49 = vpop.f32.mrf.mxu2 }
 0x392   : > { %v14969_v58 = vadd.f32 %v3843_v49, %v14853_v34  ;;  %v3817_v23 = vpop.f32.mrf.mxu0 }
 0x393   : > { %11788 = vmatmul.msk.bf16.vlgmr.msrb.gmra.mxu3 %vm359_vm2, %v13173_v10  ;;  %v14974_v47 = vadd.f32 %v3817_v23, %v14858_v30  ;;  %v3831_v20 = vpop.f32.mrf.mxu1  ;;  %v17407_v23 = vshrl.u32 %v14647_v32, 16 }
 0x394   : > { %v14977_v59 = vadd.f32 %v3831_v20, %v14861_v61  ;;  %4558 = vmatpush.bf16.msrb.mxu3 %v14951_v41  ;;  %v17408_v61 = vshll.u32 %v14647_v32, 16 }
 0x395   : > { %v4460_v9 = vrot.slane %v17407_v23, 1 }
 0x396   : > { %v3865_v19 = vpop.f32.mrf.mxu3  ;;  %v4461_v20 = vrot.slane %v17408_v61, 2 }
 0x397   : > { %v14981_v0 = vadd.f32 %v3865_v19, %v14865_v39 }
 0x399   : > { %v3845_v22 = vpop.f32.mrf.mxu2 }
 0x39a   : > { %v14984_v34 = vadd.f32 %v3845_v22, %v14868_v40  ;;  %v3908_v49 = vpop.f32.mrf.mxu0  ;;  %v15005_v40 = vor.u32 %v4461_v20, %v4460_v9 }
 0x39b   : > { %v14987_v10 = vadd.f32 %v3908_v49, %v14871_v54  ;;  %v3922_v30 = vpop.f32.mrf.mxu1 }
 0x39c   : > { %v14994_v16 = vadd.f32 %v3922_v30, %v14874_v2 }
 0x39d   : > { %11789 = vmatmul.msk.bf16.vlgmr.msra.gmra.mxu0 %vm359_vm2, %v13193_v14 }
 0x39e   : > { %v3867_v39 = vpop.f32.mrf.mxu3  ;;  %11790 = vmatmul.msk.bf16.vlgmr.msra.gmra.mxu1 %vm359_vm2, %v13817_v60  ;;  %11791 = vmatmul.msk.bf16.vlgmr.msra.gmra.mxu2 %vm359_vm2, %v14412_v50 }
 0x39f   : > { %v15003_v54 = vadd.f32 %v3867_v39, %v14883_v5  ;;  %4572 = vmatpush.bf16.msra.mxu0 %v14951_v41  ;;  %4586 = vmatpush.bf16.msra.mxu1 %v14951_v41 }
 0x3a0   : > { %4600 = vmatpush.bf16.msra.mxu2 %v14951_v41 }
 0x3a1   : > { %v3936_v2 = vpop.f32.mrf.mxu2 }
 0x3a2   : > { %v15011_v22 = vadd.f32 %v3936_v2, %v14890_v1  ;;  %v3910_v19 = vpop.f32.mrf.mxu0 }
 0x3a3   : > { %11792 = vmatmul.msk.bf16.vlgmr.msra.gmra.mxu3 %vm359_vm2, %v15005_v40  ;;  %v15016_v49 = vadd.f32 %v3910_v19, %v14896_v17  ;;  %v3924_v5 = vpop.f32.mrf.mxu1 }
 0x3a4   : > { %v15019_v9 = vadd.f32 %v3924_v5, %v14899_v13  ;;  %4614 = vmatpush.bf16.msra.mxu3 %v14951_v41 }
 0x3a6   : > { %v3950_v30 = vpop.f32.mrf.mxu3 }
 0x3a7   : > { %v15023_v23 = vadd.f32 %v3950_v30, %v14903_v55 }
 0x3a9   : > { %v3938_v61 = vpop.f32.mrf.mxu2 }
 0x3aa   : > { %v15026_v1 = vadd.f32 %v3938_v61, %v14906_v31  ;;  %v3964_v20 = vpop.f32.mrf.mxu0 }
 0x3ab   : > { %v15029_v39 = vadd.f32 %v3964_v20, %v14909_v52  ;;  %v3978_v17 = vpop.f32.mrf.mxu1 }
 0x3ac   : > { %v15032_v2 = vadd.f32 %v3978_v17, %v14912_v8  ;;  %v17409_v8 = vld [vmem:[#allocation32_spill] sm:$0xff] }
 0x3ad   : > { %11794 = vmatmul.msk.bf16.vlgmr.msrb.gmra.mxu0 %vm359_vm2, %v13237_v43 }
 0x3ae   : > { %v3952_v13 = vpop.f32.mrf.mxu3  ;;  %11795 = vmatmul.msk.bf16.vlgmr.msrb.gmra.mxu1 %vm359_vm2, %v13261_v12  ;;  %11796 = vmatmul.msk.bf16.vlgmr.msrb.gmra.mxu2 %vm359_vm2, %v17346_v33 }
 0x3af   : > { %v15041_v55 = vadd.f32 %v3952_v13, %v14921_v42  ;;  %4628 = vmatpush.bf16.msrb.mxu0 %v14951_v41  ;;  %4642 = vmatpush.bf16.msrb.mxu1 %v14951_v41 }
 0x3b0   : > { %4656 = vmatpush.bf16.msrb.mxu2 %v14951_v41 }
 0x3b1   : > { %v3992_v52 = vpop.f32.mrf.mxu2 }
 0x3b2   : > { %v15047_v31 = vadd.f32 %v3992_v52, %v14927_v35  ;;  %v3966_v43 = vpop.f32.mrf.mxu0  ;;  %v11806_v35 = vld [vmem:[%s17159_s1 + $0x28] sm:$0x3] }
 0x3b3   : > { %11797 = vmatmul.msk.bf16.vlgmr.msrb.gmra.mxu3 %vm359_vm2, %v17409_v8  ;;  %v15052_v19 = vadd.f32 %v3966_v43, %v14932_v38  ;;  %v3980_v5 = vpop.f32.mrf.mxu1  ;;  %v15071_v52 = vand.u32 %v11806_v35, %v12773_v3 }
 0x3b4   : > { %v15055_v42 = vadd.f32 %v3980_v5, %v14935_v63  ;;  %4674 = vmatpush.bf16.msrb.mxu3 %v14951_v41  ;;  %v17411_v5 = vld [vmem:[#allocation34_spill] sm:$0xff] }
 0x3b6   : > { %v4006_v30 = vpop.f32.mrf.mxu3 }
 0x3b7   : > { %v15059_v61 = vadd.f32 %v4006_v30, %v14939_v29  ;;  %v17410_v29 = vld [vmem:[#allocation33_spill] sm:$0xff] }
 0x3b9   : > { %v3994_v20 = vpop.f32.mrf.mxu2 }
 0x3ba   : > { %v15065_v17 = vadd.f32 %v3994_v20, %v14945_v25  ;;  %v4020_v38 = vpop.f32.mrf.mxu0  ;;  %v17412_v25 = vld [vmem:[#allocation35_spill] sm:$0xff]  ;;  %v17413_v20 = vld [vmem:[#allocation36_spill] sm:$0xff] }
 0x3bb   : > { %v15068_v13 = vadd.f32 %v4020_v38, %v14948_v56  ;;  %v4034_v63 = vpop.f32.mrf.mxu1 }
 0x3bc   : > { %v15074_v41 = vadd.f32 %v4034_v63, %v14954_v24 }
 0x3bd   : > { %11798 = vmatmul.msk.bf16.vlgmr.msra.gmra.mxu0 %vm359_vm2, %v17410_v29  ;;  %v17415_v29 = vld [vmem:[#allocation13_spill] sm:$0xff] }
 0x3be   : > { %v4008_v43 = vpop.f32.mrf.mxu3  ;;  %11799 = vmatmul.msk.bf16.vlgmr.msra.gmra.mxu1 %vm359_vm2, %v17411_v5  ;;  %11800 = vmatmul.msk.bf16.vlgmr.msra.gmra.mxu2 %vm359_vm2, %v17412_v25 }
 0x3bf   : > { %v15083_v56 = vadd.f32 %v4008_v43, %v14963_v51  ;;  %4717 = vmatpush.bf16.msra.mxu0 %v15071_v52  ;;  %4731 = vmatpush.bf16.msra.mxu1 %v15071_v52 }
 0x3c0   : > { %4745 = vmatpush.bf16.msra.mxu2 %v15071_v52 }
 0x3c1   : > { %v4048_v24 = vpop.f32.mrf.mxu2 }
 0x3c2   : > { %v15089_v30 = vadd.f32 %v4048_v24, %v14969_v58  ;;  %v4022_v35 = vpop.f32.mrf.mxu0 }
 0x3c3   : > { %11801 = vmatmul.msk.bf16.vlgmr.msra.gmra.mxu3 %vm359_vm2, %v17413_v20  ;;  %v15094_v38 = vadd.f32 %v4022_v35, %v14974_v47  ;;  %v4036_v63 = vpop.f32.mrf.mxu1 }
 0x3c4   : > { %v15097_v51 = vadd.f32 %v4036_v63, %v14977_v59  ;;  %4759 = vmatpush.bf16.msra.mxu3 %v15071_v52  ;;  %v17414_v59 = vld [vmem:[#allocation37_spill] sm:$0xff] }
 0x3c6   : > { %v4071_v43 = vpop.f32.mrf.mxu3 }
 0x3c7   : > { %v15101_v25 = vadd.f32 %v4071_v43, %v14981_v0  ;;  %v17416_v0 = vld [vmem:[#allocation14_spill] sm:$0xff] }
 0x3c9   : > { %v4050_v5 = vpop.f32.mrf.mxu2 }
 0x3ca   : > { %v15104_v58 = vadd.f32 %v4050_v5, %v14984_v34  ;;  %v4114_v24 = vpop.f32.mrf.mxu0 }
 0x3cb   : > { %v15107_v20 = vadd.f32 %v4114_v24, %v14987_v10  ;;  %v4128_v47 = vpop.f32.mrf.mxu1  ;;  %v17262_v10 = vrot.slane %v14647_v32, 2 }
 0x3cc   : > { %v15110_v35 = vadd.f32 %v4128_v47, %v14994_v16 }
 0x3cd   : > { %11802 = vmatmul.msk.bf16.vlgmr.msrb.gmra.mxu0 %vm359_vm2, %v17414_v59  ;;  %v17418_v59 = vld [vmem:[#allocation6_spill] sm:$0xff] }
 0x3ce   : > { %v4073_v63 = vpop.f32.mrf.mxu3  ;;  %11803 = vmatmul.msk.bf16.vlgmr.msrb.gmra.mxu1 %vm359_vm2, %v17415_v29  ;;  %11804 = vmatmul.msk.bf16.vlgmr.msrb.gmra.mxu2 %vm359_vm2, %v17416_v0 }
 0x3cf   : > { %v15119_v34 = vadd.f32 %v4073_v63, %v15003_v54  ;;  %4773 = vmatpush.bf16.msrb.mxu0 %v15071_v52  ;;  %4787 = vmatpush.bf16.msrb.mxu1 %v15071_v52 }
 0x3d0   : > { %4801 = vmatpush.bf16.msrb.mxu2 %v15071_v52 }
 0x3d1   : > { %v4142_v16 = vpop.f32.mrf.mxu2 }
 0x3d2   : > { %v15126_v5 = vadd.f32 %v4142_v16, %v15011_v22  ;;  %v4116_v43 = vpop.f32.mrf.mxu0 }
 0x3d3   : > { %11805 = vmatmul.msk.bf16.vlgmr.msrb.gmra.mxu3 %vm359_vm2, %v17262_v10  ;;  %v15132_v54 = vadd.f32 %v4116_v43, %v15016_v49  ;;  %v4130_v24 = vpop.f32.mrf.mxu1 }
 0x3d4   : > { %v15135_v47 = vadd.f32 %v4130_v24, %v15019_v9  ;;  %4815 = vmatpush.bf16.msrb.mxu3 %v15071_v52  ;;  %v17417_v9 = vld [vmem:[#allocation5_spill] sm:$0xff] }
 0x3d6   : > { %v4156_v63 = vpop.f32.mrf.mxu3 }
 0x3d7   : > { %v15139_v0 = vadd.f32 %v4156_v63, %v15023_v23  ;;  %v17419_v23 = vld [vmem:[#allocation7_spill] sm:$0xff]  ;;  %v17420_v63 = vld [vmem:[#allocation8_spill] sm:$0xff] }
 0x3d9   : > { %v4144_v22 = vpop.f32.mrf.mxu2 }
 0x3da   : > { %v15142_v16 = vadd.f32 %v4144_v22, %v15026_v1  ;;  %v4170_v29 = vpop.f32.mrf.mxu0 }
 0x3db   : > { %v15145_v10 = vadd.f32 %v4170_v29, %v15029_v39  ;;  %v4184_v49 = vpop.f32.mrf.mxu1 }
 0x3dc   : > { %v15148_v43 = vadd.f32 %v4184_v49, %v15032_v2 }
 0x3dd   : > { %11807 = vmatmul.msk.bf16.vlgmr.msra.gmra.mxu0 %vm359_vm2, %v17417_v9 }
 0x3de   : > { %v4158_v24 = vpop.f32.mrf.mxu3  ;;  %11808 = vmatmul.msk.bf16.vlgmr.msra.gmra.mxu1 %vm359_vm2, %v17418_v59  ;;  %11809 = vmatmul.msk.bf16.vlgmr.msra.gmra.mxu2 %vm359_vm2, %v17419_v23 }
 0x3df   : > { %v15157_v1 = vadd.f32 %v4158_v24, %v15041_v55  ;;  %4829 = vmatpush.bf16.msra.mxu0 %v15071_v52  ;;  %4843 = vmatpush.bf16.msra.mxu1 %v15071_v52 }
 0x3e0   : > { %4857 = vmatpush.bf16.msra.mxu2 %v15071_v52 }
 0x3e1   : > { %v4198_v39 = vpop.f32.mrf.mxu2 }
 0x3e2   : > { %v15163_v2 = vadd.f32 %v4198_v39, %v15047_v31  ;;  %v4172_v29 = vpop.f32.mrf.mxu0  ;;  %v11819_v31 = vld [vmem:[%s17159_s1 + $0x2a] sm:$0x3] }
 0x3e3   : > { %11810 = vmatmul.msk.bf16.vlgmr.msra.gmra.mxu3 %vm359_vm2, %v17420_v63  ;;  %v15168_v59 = vadd.f32 %v4172_v29, %v15052_v19  ;;  %v4186_v22 = vpop.f32.mrf.mxu1  ;;  %v15187_v29 = vand.u32 %v11819_v31, %v12773_v3 }
 0x3e4   : > { %v15171_v55 = vadd.f32 %v4186_v22, %v15055_v42  ;;  %4879 = vmatpush.bf16.msra.mxu3 %v15071_v52  ;;  %v17422_v22 = vld [vmem:[#allocation10_spill] sm:$0xff] }
 0x3e6   : > { %v4212_v49 = vpop.f32.mrf.mxu3 }
 0x3e7   : > { %v15175_v9 = vadd.f32 %v4212_v49, %v15059_v61  ;;  %v17421_v61 = vld [vmem:[#allocation9_spill] sm:$0xff] }
 0x3e9   : > { %v4200_v24 = vpop.f32.mrf.mxu2 }
 0x3ea   : > { %v15181_v23 = vadd.f32 %v4200_v24, %v15065_v17  ;;  %v4226_v19 = vpop.f32.mrf.mxu0  ;;  %v17423_v17 = vld [vmem:[#allocation11_spill] sm:$0xff] }
 0x3eb   : > { %v15184_v39 = vadd.f32 %v4226_v19, %v15068_v13  ;;  %v4240_v42 = vpop.f32.mrf.mxu1 }
 0x3ec   : > { %v15190_v52 = vadd.f32 %v4240_v42, %v15074_v41  ;;  %v310_v42 = vld [vmem:[%s12786_s8 + $0xf0] sm:$0xff] }
 0x3ed   : > { %11811 = vmatmul.msk.bf16.vlgmr.msrb.gmra.mxu0 %vm359_vm2, %v17421_v61  ;;  %v311_v61 = vld [vmem:[%s12786_s8 + $0xf8] sm:$0xff] }
 0x3ee   : > { %v4214_v63 = vpop.f32.mrf.mxu3  ;;  %11812 = vmatmul.msk.bf16.vlgmr.msrb.gmra.mxu1 %vm359_vm2, %v17422_v22  ;;  %11813 = vmatmul.msk.bf16.vlgmr.msrb.gmra.mxu2 %vm359_vm2, %v17423_v17  ;;  %v343_v17 = vpack.c.bf16 %v311_v61, %v311_v61 }
 0x3ef   : > { %v15199_v13 = vadd.f32 %v4214_v63, %v15083_v56  ;;  %4922 = vmatpush.bf16.msrb.mxu0 %v15187_v29  ;;  %4936 = vmatpush.bf16.msrb.mxu1 %v15187_v29 }
 0x3f0   : > { %4950 = vmatpush.bf16.msrb.mxu2 %v15187_v29  ;;  %v4867_v8 = vunpack.c.l.b16 %v343_v17 }
 0x3f1   : > { %v4254_v41 = vpop.f32.mrf.mxu2 }
 0x3f2   : > { %v15205_v49 = vadd.f32 %v4254_v41, %v15089_v30  ;;  %v4228_v31 = vpop.f32.mrf.mxu0  ;;  %v342_v30 = vpack.c.bf16 %v310_v42, %v310_v42 }
 0x3f3   : > { %11814 = vmatmul.msk.bf16.vlgmr.msrb.gmra.mxu3 %vm359_vm2, %v12926_v28  ;;  %v15210_v24 = vadd.f32 %v4228_v31, %v15094_v38  ;;  %v4242_v19 = vpop.f32.mrf.mxu1 }
 0x3f4   : > { %v15213_v56 = vadd.f32 %v4242_v19, %v15097_v51  ;;  %4964 = vmatpush.bf16.msrb.mxu3 %v15187_v29  ;;  %v4866_v19 = vunpack.c.l.b16 %v342_v30 }
 0x3f6   : > { %v4272_v63 = vpop.f32.mrf.mxu3 }
 0x3f7   : > { %v15219_v22 = vadd.f32 %v4272_v63, %v15101_v25 }
 0x3f9   : > { %v4256_v41 = vpop.f32.mrf.mxu2 }
 0x3fa   : > { %v15222_v28 = vadd.f32 %v4256_v41, %v15104_v58  ;;  %v4315_v38 = vpop.f32.mrf.mxu0 }
 0x3fb   : > { %v15225_v31 = vadd.f32 %v4315_v38, %v15107_v20  ;;  %v4329_v51 = vpop.f32.mrf.mxu1  ;;  %v15239_v20 = vpack.c.b16 %v4867_v8, %v4866_v19 }
 0x3fc   : > { %v15228_v33 = vadd.f32 %v4329_v51, %v15110_v35 }
 0x3fd   : > { %11815 = vmatmul.msk.bf16.vlgmr.msra.gmra.mxu0 %vm359_vm2, %v13457_v36 }
 0x3fe   : > { %v4274_v25 = vpop.f32.mrf.mxu3  ;;  %11816 = vmatmul.msk.bf16.vlgmr.msra.gmra.mxu1 %vm359_vm2, %v14053_v37  ;;  %11817 = vmatmul.msk.bf16.vlgmr.msra.gmra.mxu2 %vm359_vm2, %v14647_v32 }
 0x3ff   : > { %v15237_v58 = vadd.f32 %v4274_v25, %v15119_v34  ;;  %4978 = vmatpush.bf16.msra.mxu0 %v15187_v29  ;;  %4992 = vmatpush.bf16.msra.mxu1 %v15187_v29 }
 0x400   : > { %5006 = vmatpush.bf16.msra.mxu2 %v15187_v29 }
 0x401   : > { %v4343_v35 = vpop.f32.mrf.mxu2 }
 0x402   : > { %v15245_v36 = vadd.f32 %v4343_v35, %v15126_v5  ;;  %v4317_v42 = vpop.f32.mrf.mxu0 }
 0x403   : > { %11818 = vmatmul.msk.bf16.vlgmr.msra.gmra.mxu3 %vm359_vm2, %v15239_v20  ;;  %v15250_v37 = vadd.f32 %v4317_v42, %v15132_v54  ;;  %v4331_v34 = vpop.f32.mrf.mxu1 }
 0x404   : > { %v15253_v8 = vadd.f32 %v4331_v34, %v15135_v47  ;;  %5020 = vmatpush.bf16.msra.mxu3 %v15187_v29 }
 0x406   : > { %v4357_v61 = vpop.f32.mrf.mxu3 }
 0x407   : > { %v15257_v63 = vadd.f32 %v4357_v61, %v15139_v0 }
 0x409   : > { %v4345_v30 = vpop.f32.mrf.mxu2 }
 0x40a   : > { %v15260_v5 = vadd.f32 %v4345_v30, %v15142_v16  ;;  %v4371_v17 = vpop.f32.mrf.mxu0 }
 0x40b   : > { %v15263_v41 = vadd.f32 %v4371_v17, %v15145_v10  ;;  %v4385_v54 = vpop.f32.mrf.mxu1 }
 0x40c   : > { %v15266_v38 = vadd.f32 %v4385_v54, %v15148_v43 }
 0x40d   : > { %11820 = vmatmul.msk.bf16.vlgmr.msrb.gmra.mxu0 %vm359_vm2, %v12886_v4 }
 0x40e   : > { %v4359_v47 = vpop.f32.mrf.mxu3  ;;  %11821 = vmatmul.msk.bf16.vlgmr.msrb.gmra.mxu1 %vm359_vm2, %v12896_v6  ;;  %11822 = vmatmul.msk.bf16.vlgmr.msrb.gmra.mxu2 %vm359_vm2, %v12900_v7 }
 0x40f   : > { %v15275_v0 = vadd.f32 %v4359_v47, %v15157_v1  ;;  %5034 = vmatpush.bf16.msrb.mxu0 %v15187_v29  ;;  %5048 = vmatpush.bf16.msrb.mxu1 %v15187_v29 }
 0x410   : > { %5062 = vmatpush.bf16.msrb.mxu2 %v15187_v29 }
 0x411   : > { %v4399_v10 = vpop.f32.mrf.mxu2 }
 0x412   : > { %v15281_v16 = vadd.f32 %v4399_v10, %v15163_v2  ;;  %v4373_v4 = vpop.f32.mrf.mxu0  ;;  %v11832_v2 = vld [vmem:[%s17159_s1 + $0x2c] sm:$0x3] }
 0x413   : > { %11823 = vmatmul.msk.bf16.vlgmr.msrb.gmra.mxu3 %vm359_vm2, %v12919_v18  ;;  %v15286_v6 = vadd.f32 %v4373_v4, %v15168_v59  ;;  %v4387_v7 = vpop.f32.mrf.mxu1  ;;  %v15305_v35 = vand.u32 %v11832_v2, %v12773_v3 }
 0x414   : > { %v15289_v43 = vadd.f32 %v4387_v7, %v15171_v55  ;;  %5085 = vmatpush.bf16.msrb.mxu3 %v15187_v29 }
 0x416   : > { %v4413_v1 = vpop.f32.mrf.mxu3 }
 0x417   : > { %v15293_v51 = vadd.f32 %v4413_v1, %v15175_v9 }
 0x419   : > { %v4401_v19 = vpop.f32.mrf.mxu2 }
 0x41a   : > { %v15299_v18 = vadd.f32 %v4401_v19, %v15181_v23  ;;  %v4427_v59 = vpop.f32.mrf.mxu0 }
 0x41b   : > { %v15302_v25 = vadd.f32 %v4427_v59, %v15184_v39  ;;  %v4441_v55 = vpop.f32.mrf.mxu1 }
 0x41c   : > { %v15308_v29 = vadd.f32 %v4441_v55, %v15190_v52 }
 0x41d   : > { %11824 = vmatmul.msk.bf16.vlgmr.msra.gmra.mxu0 %vm359_vm2, %v12940_v44 }
 0x41e   : > { %v4415_v9 = vpop.f32.mrf.mxu3  ;;  %11825 = vmatmul.msk.bf16.vlgmr.msra.gmra.mxu1 %vm359_vm2, %v12944_v45  ;;  %11826 = vmatmul.msk.bf16.vlgmr.msra.gmra.mxu2 %vm359_vm2, %v12948_v46 }
 0x41f   : > { %v15317_v23 = vadd.f32 %v4415_v9, %v15199_v13  ;;  %5128 = vmatpush.bf16.msra.mxu0 %v15305_v35  ;;  %5142 = vmatpush.bf16.msra.mxu1 %v15305_v35 }
 0x420   : > { %5156 = vmatpush.bf16.msra.mxu2 %v15305_v35 }
 0x421   : > { %v4455_v39 = vpop.f32.mrf.mxu2 }
 0x422   : > { %v15323_v52 = vadd.f32 %v4455_v39, %v15205_v49  ;;  %v4429_v44 = vpop.f32.mrf.mxu0  ;;  %v5071_v49 = vshll.u32 %v15239_v20, 16 }
 0x423   : > { %11827 = vmatmul.msk.bf16.vlgmr.msra.gmra.mxu3 %vm359_vm2, %v17323_v15  ;;  %v15328_v45 = vadd.f32 %v4429_v44, %v15210_v24  ;;  %v4443_v46 = vpop.f32.mrf.mxu1 }
 0x424   : > { %v15331_v13 = vadd.f32 %v4443_v46, %v15213_v56  ;;  %5170 = vmatpush.bf16.msra.mxu3 %v15305_v35  ;;  %v5069_v56 = vshrl.u32 %v15239_v20, 16  ;;  %v5073_v54 = vrot.slane %v5071_v49, 1  ;;  %v17424_v46 = vld [vmem:[#allocation21_spill] sm:$0xff] }
 0x426   : > { %v4475_v42 = vpop.f32.mrf.mxu3 }
 0x427   : > { %v15335_v34 = vadd.f32 %v4475_v42, %v15219_v22 }
 0x429   : > { %v4457_v61 = vpop.f32.mrf.mxu2 }
 0x42a   : > { %v15339_v30 = vadd.f32 %v4457_v61, %v15222_v28  ;;  %v4518_v15 = vpop.f32.mrf.mxu0  ;;  %v17426_v61 = vld [vmem:[#allocation23_spill] sm:$0xff] }
 0x42b   : > { %v15342_v24 = vadd.f32 %v4518_v15, %v15225_v31  ;;  %v4532_v17 = vpop.f32.mrf.mxu1  ;;  %v5074_v31 = vor.u32 %v5073_v54, %v5069_v56 }
 0x42c   : > { %v15348_v47 = vadd.f32 %v4532_v17, %v15228_v33 }
 0x42d   : > { %11828 = vmatmul.msk.bf16.vlgmr.msrb.gmra.mxu0 %vm359_vm2, %v13579_v27 }
 0x42e   : > { %v4477_v22 = vpop.f32.mrf.mxu3  ;;  %11829 = vmatmul.msk.bf16.vlgmr.msrb.gmra.mxu1 %vm359_vm2, %v14175_v48  ;;  %11830 = vmatmul.msk.bf16.vlgmr.msrb.gmra.mxu2 %vm359_vm2, %v14769_v26 }
 0x42f   : > { %v15357_v28 = vadd.f32 %v4477_v22, %v15237_v58  ;;  %5184 = vmatpush.bf16.msrb.mxu0 %v15305_v35  ;;  %5198 = vmatpush.bf16.msrb.mxu1 %v15305_v35 }
 0x430   : > { %5212 = vmatpush.bf16.msrb.mxu2 %v15305_v35 }
 0x431   : > { %v4546_v27 = vpop.f32.mrf.mxu2 }
 0x432   : > { %v15365_v33 = vadd.f32 %v4546_v27, %v15245_v36  ;;  %v4520_v48 = vpop.f32.mrf.mxu0 }
 0x433   : > { %11831 = vmatmul.msk.bf16.vlgmr.msrb.gmra.mxu3 %vm359_vm2, %v5074_v31  ;;  %v15369_v26 = vadd.f32 %v4520_v48, %v15250_v37  ;;  %v4534_v58 = vpop.f32.mrf.mxu1 }
 0x434   : > { %v15372_v10 = vadd.f32 %v4534_v58, %v15253_v8  ;;  %5226 = vmatpush.bf16.msrb.mxu3 %v15305_v35 }
 0x436   : > { %v4560_v4 = vpop.f32.mrf.mxu3 }
 0x437   : > { %v15376_v7 = vadd.f32 %v4560_v4, %v15257_v63 }
 0x439   : > { %v4548_v1 = vpop.f32.mrf.mxu2 }
 0x43a   : > { %v15379_v36 = vadd.f32 %v4548_v1, %v15260_v5  ;;  %v4574_v2 = vpop.f32.mrf.mxu0  ;;  %v17428_v1 = vld [vmem:[#allocation3_spill] sm:$0xff] }
 0x43b   : > { %v15382_v19 = vadd.f32 %v4574_v2, %v15263_v41  ;;  %v4588_v37 = vpop.f32.mrf.mxu1 }
 0x43c   : > { %v15385_v59 = vadd.f32 %v4588_v37, %v15266_v38 }
 0x43d   : > { %11833 = vmatmul.msk.bf16.vlgmr.msra.gmra.mxu0 %vm359_vm2, %v17359_v11 }
 0x43e   : > { %v4562_v8 = vpop.f32.mrf.mxu3  ;;  %11834 = vmatmul.msk.bf16.vlgmr.msra.gmra.mxu1 %vm359_vm2, %v17360_v62  ;;  %11835 = vmatmul.msk.bf16.vlgmr.msra.gmra.mxu2 %vm359_vm2, %v17392_v57 }
 0x43f   : > { %v15394_v63 = vadd.f32 %v4562_v8, %v15275_v0  ;;  %5240 = vmatpush.bf16.msra.mxu0 %v15305_v35  ;;  %5254 = vmatpush.bf16.msra.mxu1 %v15305_v35 }
 0x440   : > { %5268 = vmatpush.bf16.msra.mxu2 %v15305_v35 }
 0x441   : > { %v4602_v5 = vpop.f32.mrf.mxu2 }
 0x442   : > { %v15400_v41 = vadd.f32 %v4602_v5, %v15281_v16  ;;  %v4576_v11 = vpop.f32.mrf.mxu0  ;;  %v11845_v16 = vld [vmem:[%s17159_s1 + $0x2e] sm:$0x3] }
 0x443   : > { %11836 = vmatmul.msk.bf16.vlgmr.msra.gmra.mxu3 %vm359_vm2, %v17393_v53  ;;  %v15405_v62 = vadd.f32 %v4576_v11, %v15286_v6  ;;  %v4590_v57 = vpop.f32.mrf.mxu1  ;;  %v15424_v44 = vand.u32 %v11845_v16, %v12773_v3 }
 0x444   : > { %v15408_v38 = vadd.f32 %v4590_v57, %v15289_v43  ;;  %5286 = vmatpush.bf16.msra.mxu3 %v15305_v35 }
 0x446   : > { %v4616_v0 = vpop.f32.mrf.mxu3 }
 0x447   : > { %v15412_v55 = vadd.f32 %v4616_v0, %v15293_v51 }
 0x449   : > { %v4604_v9 = vpop.f32.mrf.mxu2 }
 0x44a   : > { %v15418_v53 = vadd.f32 %v4604_v9, %v15299_v18  ;;  %v4630_v6 = vpop.f32.mrf.mxu0  ;;  %v17425_v18 = vld [vmem:[#allocation22_spill] sm:$0xff] }
 0x44b   : > { %v15421_v39 = vadd.f32 %v4630_v6, %v15302_v25  ;;  %v4644_v43 = vpop.f32.mrf.mxu1 }
 0x44c   : > { %v15427_v35 = vadd.f32 %v4644_v43, %v15308_v29 }
 0x44d   : > { %11837 = vmatmul.msk.bf16.vlgmr.msrb.gmra.mxu0 %vm359_vm2, %v17394_v21 }
 0x44e   : > { %v4618_v51 = vpop.f32.mrf.mxu3  ;;  %11838 = vmatmul.msk.bf16.vlgmr.msrb.gmra.mxu1 %vm359_vm2, %v17424_v46  ;;  %11839 = vmatmul.msk.bf16.vlgmr.msrb.gmra.mxu2 %vm359_vm2, %v17425_v18  ;;  %v17433_v18 = vld [vmem:[#allocation27_spill] sm:$0xff] }
 0x44f   : > { %v15436_v25 = vadd.f32 %v4618_v51, %v15317_v23  ;;  %5329 = vmatpush.bf16.msrb.mxu0 %v15424_v44  ;;  %5343 = vmatpush.bf16.msrb.mxu1 %v15424_v44  ;;  %v17431_v51 = vld [vmem:[#allocation25_spill] sm:$0xff] }
 0x450   : > { %5357 = vmatpush.bf16.msrb.mxu2 %v15424_v44 }
 0x451   : > { %v4658_v29 = vpop.f32.mrf.mxu2 }
 0x452   : > { %v15442_v42 = vadd.f32 %v4658_v29, %v15323_v52  ;;  %v4632_v21 = vpop.f32.mrf.mxu0 }
 0x453   : > { %11840 = vmatmul.msk.bf16.vlgmr.msrb.gmra.mxu3 %vm359_vm2, %v17426_v61  ;;  %v15447_v15 = vadd.f32 %v4632_v21, %v15328_v45  ;;  %v4646_v17 = vpop.f32.mrf.mxu1 }
 0x454   : > { %v15450_v23 = vadd.f32 %v4646_v17, %v15331_v13  ;;  %5371 = vmatpush.bf16.msrb.mxu3 %v15424_v44  ;;  %v17427_v13 = vld [vmem:[#allocation12_spill] sm:$0xff] }
 0x456   : > { %v4676_v54 = vpop.f32.mrf.mxu3 }
 0x457   : > { %v15454_v22 = vadd.f32 %v4676_v54, %v15335_v34  ;;  %v17429_v34 = vrot.slane %v14647_v32, 1 }
 0x459   : > { %v4660_v31 = vpop.f32.mrf.mxu2 }
 0x45a   : > { %v15457_v52 = vadd.f32 %v4660_v31, %v15339_v30  ;;  %v4719_v27 = vpop.f32.mrf.mxu0 }
 0x45b   : > { %v15460_v48 = vadd.f32 %v4719_v27, %v15342_v24  ;;  %v4733_v45 = vpop.f32.mrf.mxu1  ;;  %v5275_v24 = vrot.slane %v15239_v20, 1 }
 0x45c   : > { %v15463_v58 = vadd.f32 %v4733_v45, %v15348_v47 }
 0x45d   : > { %11841 = vmatmul.msk.bf16.vlgmr.msra.gmra.mxu0 %vm359_vm2, %v17427_v13 }
 0x45e   : > { %v4678_v4 = vpop.f32.mrf.mxu3  ;;  %11842 = vmatmul.msk.bf16.vlgmr.msra.gmra.mxu1 %vm359_vm2, %v17428_v1  ;;  %11843 = vmatmul.msk.bf16.vlgmr.msra.gmra.mxu2 %vm359_vm2, %v17429_v34  ;;  %v17436_v1 = vld [vmem:[#allocation30_spill] sm:$0xff] }
 0x45f   : > { %v15473_v30 = vadd.f32 %v4678_v4, %v15357_v28  ;;  %5385 = vmatpush.bf16.msra.mxu0 %v15424_v44  ;;  %5399 = vmatpush.bf16.msra.mxu1 %v15424_v44  ;;  %v17435_v4 = vld [vmem:[#allocation29_spill] sm:$0xff] }
 0x460   : > { %5413 = vmatpush.bf16.msra.mxu2 %v15424_v44 }
 0x461   : > { %v4747_v47 = vpop.f32.mrf.mxu2 }
 0x462   : > { %v15480_v2 = vadd.f32 %v4747_v47, %v15365_v33  ;;  %v4721_v37 = vpop.f32.mrf.mxu0 }
 0x463   : > { %11844 = vmatmul.msk.bf16.vlgmr.msra.gmra.mxu3 %vm359_vm2, %v5275_v24  ;;  %v15484_v8 = vadd.f32 %v4721_v37, %v15369_v26  ;;  %v4735_v28 = vpop.f32.mrf.mxu1 }
 0x464   : > { %v15487_v5 = vadd.f32 %v4735_v28, %v15372_v10  ;;  %5427 = vmatpush.bf16.msra.mxu3 %v15424_v44  ;;  %v17430_v10 = vld [vmem:[#allocation24_spill] sm:$0xff] }
 0x466   : > { %v4761_v11 = vpop.f32.mrf.mxu3 }
 0x467   : > { %v15491_v57 = vadd.f32 %v4761_v11, %v15376_v7  ;;  %v17432_v7 = vld [vmem:[#allocation26_spill] sm:$0xff] }
 0x469   : > { %v4749_v0 = vpop.f32.mrf.mxu2 }
 0x46a   : > { %v15494_v33 = vadd.f32 %v4749_v0, %v15379_v36  ;;  %v4775_v16 = vpop.f32.mrf.mxu0 }
 0x46b   : > { %v15497_v9 = vadd.f32 %v4775_v16, %v15382_v19  ;;  %v4789_v26 = vpop.f32.mrf.mxu1 }
 0x46c   : > { %v15500_v6 = vadd.f32 %v4789_v26, %v15385_v59 }
 0x46d   : > { %11846 = vmatmul.msk.bf16.vlgmr.msrb.gmra.mxu0 %vm359_vm2, %v17430_v10 }
 0x46e   : > { %v4763_v43 = vpop.f32.mrf.mxu3  ;;  %11847 = vmatmul.msk.bf16.vlgmr.msrb.gmra.mxu1 %vm359_vm2, %v17431_v51  ;;  %11848 = vmatmul.msk.bf16.vlgmr.msrb.gmra.mxu2 %vm359_vm2, %v17432_v7  ;;  %v17437_v7 = vld [vmem:[#allocation31_spill] sm:$0xff] }
 0x46f   : > { %v15509_v36 = vadd.f32 %v4763_v43, %v15394_v63  ;;  %5441 = vmatpush.bf16.msrb.mxu0 %v15424_v44  ;;  %5455 = vmatpush.bf16.msrb.mxu1 %v15424_v44 }
 0x470   : > { %5469 = vmatpush.bf16.msrb.mxu2 %v15424_v44 }
 0x471   : > { %v4803_v19 = vpop.f32.mrf.mxu2 }
 0x472   : > { %v15515_v59 = vadd.f32 %v4803_v19, %v15400_v41  ;;  %v4777_v46 = vpop.f32.mrf.mxu0  ;;  %v11858_v41 = vld [vmem:[%s17159_s1 + $0x30] sm:$0x3] }
 0x473   : > { %11849 = vmatmul.msk.bf16.vlgmr.msrb.gmra.mxu3 %vm359_vm2, %v17433_v18  ;;  %v15520_v29 = vadd.f32 %v4777_v46, %v15405_v62  ;;  %v4791_v21 = vpop.f32.mrf.mxu1  ;;  %v5523_v45 = vand.u32 %v11858_v41, %v12773_v3  ;;  %v17438_v19 = vld [vmem:[#allocation32_spill] sm:$0xff] }
 0x474   : > { %v15523_v63 = vadd.f32 %v4791_v21, %v15408_v38  ;;  %5489 = vmatpush.bf16.msrb.mxu3 %v15424_v44 }
 0x476   : > { %v4817_v61 = vpop.f32.mrf.mxu3 }
 0x477   : > { %v15527_v17 = vadd.f32 %v4817_v61, %v15412_v55  ;;  %v17434_v55 = vld [vmem:[#allocation28_spill] sm:$0xff] }
 0x479   : > { %v4805_v54 = vpop.f32.mrf.mxu2 }
 0x47a   : > { %v15533_v31 = vadd.f32 %v4805_v54, %v15418_v53  ;;  %v4831_v62 = vpop.f32.mrf.mxu0 }
 0x47b   : > { %v15536_v27 = vadd.f32 %v4831_v62, %v15421_v39  ;;  %v4845_v38 = vpop.f32.mrf.mxu1 }
 0x47c   : > { %v15540_v44 = vadd.f32 %v4845_v38, %v15427_v35 }
 0x47d   : > { %11850 = vmatmul.msk.bf16.vlgmr.msra.gmra.mxu0 %vm359_vm2, %v17434_v55 }
 0x47e   : > { %v4819_v13 = vpop.f32.mrf.mxu3  ;;  %11851 = vmatmul.msk.bf16.vlgmr.msra.gmra.mxu1 %vm359_vm2, %v17435_v4  ;;  %11852 = vmatmul.msk.bf16.vlgmr.msra.gmra.mxu2 %vm359_vm2, %v17436_v1 }
 0x47f   : > { %v15549_v53 = vadd.f32 %v4819_v13, %v15436_v25  ;;  %5532 = vmatpush.bf16.msra.mxu0 %v5523_v45  ;;  %5546 = vmatpush.bf16.msra.mxu1 %v5523_v45  ;;  %v17441_v13 = vld [vmem:[#allocation35_spill] sm:$0xff] }
 0x480   : > { %5560 = vmatpush.bf16.msra.mxu2 %v5523_v45 }
 0x481   : > { %v4859_v3 = vpop.f32.mrf.mxu2 }
 0x482   : > { %v15552_v39 = vadd.f32 %v4859_v3, %v15442_v42  ;;  %v4833_v35 = vpop.f32.mrf.mxu0 }
 0x483   : > { %11853 = vmatmul.msk.bf16.vlgmr.msra.gmra.mxu3 %vm359_vm2, %v13193_v14  ;;  %v15557_v34 = vadd.f32 %v4833_v35, %v15447_v15  ;;  %v4847_v24 = vpop.f32.mrf.mxu1  ;;  %v5476_v14 = vrot.slane %v5069_v56, 1  ;;  %v5477_v15 = vrot.slane %v5071_v49, 2 }
 0x484   : > { %v15560_v47 = vadd.f32 %v4847_v24, %v15450_v23  ;;  %5574 = vmatpush.bf16.msra.mxu3 %v5523_v45 }
 0x486   : > { %v4881_v25 = vpop.f32.mrf.mxu3 }
 0x487   : > { %v4908_v37 = vadd.f32 %v4881_v25, %v15454_v22 }
 0x489   : > { %v4861_v28 = vpop.f32.mrf.mxu2 }
 0x48a   : > { %v15564_v11 = vadd.f32 %v4861_v28, %v15457_v52  ;;  %v4924_v42 = vpop.f32.mrf.mxu0 }
 0x48b   : > { %v5092_v0 = vadd.f32 %v4924_v42, %v15460_v48  ;;  %v4938_v16 = vpop.f32.mrf.mxu1  ;;  %v5478_v48 = vor.u32 %v5477_v15, %v5476_v14  ;;  %v17444_v14 = vld [vmem:[#allocation13_spill] sm:$0xff]  ;;  %v17445_v15 = vld [vmem:[#allocation14_spill] sm:$0xff] }
 0x48c   : > { %v5094_v23 = vadd.f32 %v4938_v16, %v15463_v58 }
 0x48d   : > { %11854 = vmatmul.msk.bf16.vlgmr.msrb.gmra.mxu0 %vm359_vm2, %v13817_v60 }
 0x48e   : > { %v4883_v22 = vpop.f32.mrf.mxu3  ;;  %11855 = vmatmul.msk.bf16.vlgmr.msrb.gmra.mxu1 %vm359_vm2, %v14412_v50  ;;  %11856 = vmatmul.msk.bf16.vlgmr.msrb.gmra.mxu2 %vm359_vm2, %v15005_v40 }
 0x48f   : > { %v15579_v52 = vadd.f32 %v4883_v22, %v15473_v30  ;;  %5588 = vmatpush.bf16.msrb.mxu0 %v5523_v45  ;;  %5602 = vmatpush.bf16.msrb.mxu1 %v5523_v45  ;;  %v17446_v22 = vrot.slane %v14647_v32, 2 }
 0x490   : > { %5616 = vmatpush.bf16.msrb.mxu2 %v5523_v45 }
 0x491   : > { %v4952_v49 = vpop.f32.mrf.mxu2 }
 0x492   : > { %v5096_v56 = vadd.f32 %v4952_v49, %v15480_v2  ;;  %v15582_v58 = vpop.f32.mrf.mxu0 }
 0x493   : > { %11857 = vmatmul.msk.bf16.vlgmr.msrb.gmra.mxu3 %vm359_vm2, %v5478_v48  ;;  %v15585_v60 = vpop.f32.mrf.mxu1 }
 0x494   : > { %5630 = vmatpush.bf16.msrb.mxu3 %v5523_v45 }
 0x496   : > { %v4966_v50 = vpop.f32.mrf.mxu3 }
 0x497   : > { %v5098_v40 = vadd.f32 %v4966_v50, %v15491_v57 }
 0x499   : > { %v15588_v26 = vpop.f32.mrf.mxu2 }
 0x49a   : > { %v4980_v30 = vpop.f32.mrf.mxu0 }
 0x49b   : > { %v5100_v10 = vadd.f32 %v4980_v30, %v15497_v9  ;;  %v4994_v43 = vpop.f32.mrf.mxu1 }
 0x49c   : > { %v5102_v51 = vadd.f32 %v4994_v43, %v15500_v6  ;;  %v17439_v6 = vld [vmem:[#allocation33_spill] sm:$0xff] }
 0x49d   : > { %11859 = vmatmul.msk.bf16.vlgmr.msra.gmra.mxu0 %vm359_vm2, %v13261_v12 }
 0x49e   : > { %v15594_v2 = vpop.f32.mrf.mxu3  ;;  %11860 = vmatmul.msk.bf16.vlgmr.msra.gmra.mxu1 %vm359_vm2, %v17437_v7  ;;  %11861 = vmatmul.msk.bf16.vlgmr.msra.gmra.mxu2 %vm359_vm2, %v17438_v19 }
 0x49f   : > { %5644 = vmatpush.bf16.msra.mxu0 %v5523_v45  ;;  %5658 = vmatpush.bf16.msra.mxu1 %v5523_v45 }
 0x4a0   : > { %5672 = vmatpush.bf16.msra.mxu2 %v5523_v45 }
 0x4a1   : > { %v5008_v57 = vpop.f32.mrf.mxu2 }
 0x4a2   : > { %v5104_v9 = vadd.f32 %v5008_v57, %v15515_v59  ;;  %v15601_v46 = vpop.f32.mrf.mxu0  ;;  %v17440_v59 = vld [vmem:[#allocation34_spill] sm:$0xff] }
 0x4a3   : > { %11862 = vmatmul.msk.bf16.vlgmr.msra.gmra.mxu3 %vm359_vm2, %v17439_v6  ;;  %v15605_v12 = vpop.f32.mrf.mxu1 }
 0x4a4   : > { %5690 = vmatpush.bf16.msra.mxu3 %v5523_v45  ;;  %v17442_v45 = vld [vmem:[#allocation36_spill] sm:$0xff] }
 0x4a6   : > { %v5022_v18 = vpop.f32.mrf.mxu3 }
 0x4a7   : > { %v5106_v21 = vadd.f32 %v5022_v18, %v15527_v17 }
 0x4a9   : > { %v15608_v61 = vpop.f32.mrf.mxu2 }
 0x4aa   : > { %v5036_v41 = vpop.f32.mrf.mxu0 }
 0x4ab   : > { %v5108_v54 = vadd.f32 %v5036_v41, %v15536_v27  ;;  %v5050_v62 = vpop.f32.mrf.mxu1  ;;  %v17443_v27 = vld [vmem:[#allocation37_spill] sm:$0xff] }
 0x4ac   : > { %v5110_v38 = vadd.f32 %v5050_v62, %v15540_v44 }
 0x4ad   : > { %11863 = vmatmul.msk.bf16.vlgmr.msrb.gmra.mxu0 %vm359_vm2, %v17440_v59 }
 0x4ae   : > { %v15614_v55 = vpop.f32.mrf.mxu3  ;;  %11864 = vmatmul.msk.bf16.vlgmr.msrb.gmra.mxu1 %vm359_vm2, %v17441_v13  ;;  %11865 = vmatmul.msk.bf16.vlgmr.msrb.gmra.mxu2 %vm359_vm2, %v17442_v45 }
 0x4b1   : > { %v5064_v17 = vpop.f32.mrf.mxu2 }
 0x4b2   : > { %v5112_v4 = vadd.f32 %v5064_v17, %v15552_v39  ;;  %v15621_v1 = vpop.f32.mrf.mxu0 }
 0x4b3   : > { %11866 = vmatmul.msk.bf16.vlgmr.msrb.gmra.mxu3 %vm359_vm2, %v17443_v27  ;;  %v15625_v44 = vpop.f32.mrf.mxu1 }
 0x4b6   : > { %v5087_v3 = vpop.f32.mrf.mxu3 }
 0x4b7   : > { %v5114_v35 = vadd.f32 %v5087_v3, %v4908_v37  ;;  %v5679_v37 = vrot.slane %v15239_v20, 2 }
 0x4b9   : > { %v15627_v24 = vpop.f32.mrf.mxu2 }
 0x4ba   : > { %v5130_v25 = vpop.f32.mrf.mxu0 }
 0x4bb   : > { %v15629_v28 = vadd.f32 %v5130_v25, %v5092_v0  ;;  %v5144_v42 = vpop.f32.mrf.mxu1 }
 0x4bc   : > { %v15631_v16 = vadd.f32 %v5144_v42, %v5094_v23 }
 0x4bd   : > { %11867 = vmatmul.msk.bf16.vlgmr.msra.gmra.mxu0 %vm359_vm2, %v17444_v14 }
 0x4be   : > { %v15635_v39 = vpop.f32.mrf.mxu3  ;;  %11868 = vmatmul.msk.bf16.vlgmr.msra.gmra.mxu1 %vm359_vm2, %v17445_v15  ;;  %11869 = vmatmul.msk.bf16.vlgmr.msra.gmra.mxu2 %vm359_vm2, %v17446_v22 }
 0x4c1   : > { %v5158_v48 = vpop.f32.mrf.mxu2 }
 0x4c2   : > { %v15643_v0 = vadd.f32 %v5158_v48, %v5096_v56  ;;  %v15645_v49 = vpop.f32.mrf.mxu0 }
 0x4c3   : > { %11870 = vmatmul.msk.bf16.vlgmr.msra.gmra.mxu3 %vm359_vm2, %v5679_v37  ;;  %v15648_v23 = vpop.f32.mrf.mxu1 }
 0x4c6   : > { %v5172_v50 = vpop.f32.mrf.mxu3 }
 0x4c7   : > { %v15650_v30 = vadd.f32 %v5172_v50, %v5098_v40 }
 0x4c9   : > { %v15652_v43 = vpop.f32.mrf.mxu2 }
 0x4ca   : > { %v5186_v7 = vpop.f32.mrf.mxu0 }
 0x4cb   : > { %v15654_v32 = vadd.f32 %v5186_v7, %v5100_v10  ;;  %v5200_v19 = vpop.f32.mrf.mxu1 }
 0x4cc   : > { %v15656_v57 = vadd.f32 %v5200_v19, %v5102_v51 }
 0x4ce   : > { %17447 = vst [vmem:[#allocation15_spill] sm:$0xff] %v15656_v57  ;;  %v15658_v20 = vpop.f32.mrf.mxu3 }
 0x4d1   : > { %v5214_v56 = vpop.f32.mrf.mxu2 }
 0x4d2   : > { %v15660_v6 = vadd.f32 %v5214_v56, %v5104_v9  ;;  %v15662_v18 = vpop.f32.mrf.mxu0 }
 0x4d3   : > { %v15664_v41 = vpop.f32.mrf.mxu1 }
 0x4d4   : > { %17448 = vst [vmem:[#allocation16_spill] sm:$0xff] %v15660_v6 }
 0x4d6   : > { %v5228_v62 = vpop.f32.mrf.mxu3 }
 0x4d7   : > { %v15666_v40 = vadd.f32 %v5228_v62, %v5106_v21 }
 0x4d9   : > { %17449 = vst [vmem:[#allocation4_spill] sm:$0xff] %v15666_v40  ;;  %v15668_v59 = vpop.f32.mrf.mxu2 }
 0x4da   : > { %v5242_v13 = vpop.f32.mrf.mxu0 }
 0x4db   : > { %v5309_v10 = vadd.f32 %v5242_v13, %v5108_v54  ;;  %v5256_v45 = vpop.f32.mrf.mxu1 }
 0x4dc   : > { %v5311_v17 = vadd.f32 %v5256_v45, %v5110_v38 }
 0x4de   : > { %v15670_v51 = vpop.f32.mrf.mxu3 }
 0x4e1   : > { %v5270_v27 = vpop.f32.mrf.mxu2 }
 0x4e2   : > { %v5313_v3 = vadd.f32 %v5270_v27, %v5112_v4  ;;  %v15672_v25 = vpop.f32.mrf.mxu0 }
 0x4e3   : > { %v15674_v9 = vpop.f32.mrf.mxu1 }
 0x4e6   : > { %v5288_v42 = vpop.f32.mrf.mxu3 }
 0x4e7   : > { %v5315_v14 = vadd.f32 %v5288_v42, %v5114_v35 }
 0x4e9   : > { %v15676_v15 = vpop.f32.mrf.mxu2 }
 0x4ea   : > { %v5331_v21 = vpop.f32.mrf.mxu0 }
 0x4eb   : > { %v5345_v22 = vpop.f32.mrf.mxu1 }
 0x4ee   : > { %v15678_v37 = vpop.f32.mrf.mxu3 }
 0x4ef   : > { %17450 = vst [vmem:[#allocation2_spill] sm:$0xff] %v15678_v37 }
 0x4f1   : > { %v5359_v48 = vpop.f32.mrf.mxu2 }
 0x4f2   : > { %v5333_v54 = vpop.f32.mrf.mxu0 }
 0x4f3   : > { %v5347_v50 = vpop.f32.mrf.mxu1 }
 0x4f6   : > { %v15680_v38 = vpop.f32.mrf.mxu3 }
 0x4f9   : > { %v15682_v7 = vpop.f32.mrf.mxu2 }
 0x4fa   : > { %v15684_v4 = vpop.f32.mrf.mxu0 }
 0x4fb   : > { %v15686_v19 = vpop.f32.mrf.mxu1 }
 0x4fc   : > { %17451 = vst [vmem:[#allocation17_spill] sm:$0xff] %v15686_v19 }
 0x4fe   : > { %v15688_v56 = vpop.f32.mrf.mxu3 }
 0x4ff   : > { %17452 = vst [vmem:[#allocation19_spill] sm:$0xff] %v15688_v56 }
 0x501   : > { %v15690_v35 = vpop.f32.mrf.mxu2 }
 0x502   : > { %17453 = vst [vmem:[#allocation20_spill] sm:$0xff] %v15690_v35  ;;  %v15692_v62 = vpop.f32.mrf.mxu0 }
 0x503   : > { %17454 = vst [vmem:[#allocation18_spill] sm:$0xff] %v15692_v62  ;;  %v15694_v13 = vpop.f32.mrf.mxu1 }
 0x504   : > { %17455 = vst [vmem:[#allocation5_spill] sm:$0xff] %v15694_v13  ;;  %v12620_v13 = vld [vmem:[%s17161_s3 + $0x8] sm:$0xff] }
 0x505   : > { %5831 = vmatpush.bf16.msrb.mxu0 %v12620_v13  ;;  %5859 = vmatpush.bf16.msrb.mxu1 %v12620_v13 }
 0x506   : > { %v15696_v45 = vpop.f32.mrf.mxu3  ;;  %5887 = vmatpush.bf16.msrb.mxu2 %v12620_v13  ;;  %5915 = vmatpush.bf16.msrb.mxu3 %v12620_v13 }
 0x509   : > { %v15698_v27 = vpop.f32.mrf.mxu2  ;;  %5943 = vmatpush.bf16.msra.mxu0 %v12620_v13  ;;  %5971 = vmatpush.bf16.msra.mxu1 %v12620_v13 }
 0x50a   : > { %17456 = vst [vmem:[#allocation6_spill] sm:$0xff] %v15698_v27  ;;  %v5443_v42 = vpop.f32.mrf.mxu0  ;;  %5999 = vmatpush.bf16.msra.mxu2 %v12620_v13  ;;  %6027 = vmatpush.bf16.msra.mxu3 %v12620_v13 }
 0x50b   : > { %v15700_v37 = vadd.f32 %v5443_v42, %v5309_v10  ;;  %v5457_v40 = vpop.f32.mrf.mxu1 }
 0x50c   : > { %v15702_v6 = vadd.f32 %v5457_v40, %v5311_v17  ;;  %v5496_v40 = vadd.f32 %v5331_v21, %v15629_v28  ;;  %v5095_v28 = vadd.f32 %v15585_v60, %v15487_v5  ;;  %v5099_v5 = vadd.f32 %v15594_v2, %v15509_v36 }
 0x50d   : > { %v5111_v2 = vadd.f32 %v15625_v44, %v15560_v47 }
 0x50e   : > { %v15704_v57 = vpop.f32.mrf.mxu3 }
 0x511   : > { %v5471_v19 = vpop.f32.mrf.mxu2 }
 0x512   : > { %v15706_v56 = vadd.f32 %v5471_v19, %v5313_v3  ;;  %v15708_v35 = vpop.f32.mrf.mxu0  ;;  %v5498_v3 = vadd.f32 %v5345_v22, %v15631_v16  ;;  %v5296_v22 = vadd.f32 %v15648_v23, %v5095_v28  ;;  %v5103_v23 = vadd.f32 %v15605_v12, %v15523_v63 }
 0x513   : > { %v15710_v62 = vpop.f32.mrf.mxu1  ;;  %v5113_v63 = vadd.f32 %v15627_v24, %v15564_v11  ;;  %v15758_v12 = vadd.f32 %v15635_v39, %v15579_v52 }
 0x514   : > { %17457 = vst [vmem:[#allocation7_spill] sm:$0xff] %v15706_v56  ;;  %v15724_v56 = vld [vmem:[%s17160_s2] ss:$0 sm:$0xff]  ;;  %v5499_v60 = vadd.f32 %v5347_v50, %v5296_v22 }
 0x516   : > { %v5491_v27 = vpop.f32.mrf.mxu3 }
 0x517   : > { %v15715_v10 = vadd.f32 %v5491_v27, %v5315_v14 }
 0x519   : > { %17458 = vst [vmem:[#allocation8_spill] sm:$0xff] %v15715_v10  ;;  %v15718_v17 = vpop.f32.mrf.mxu2  ;;  %v5093_v10 = vadd.f32 %v15582_v58, %v15484_v8  ;;  %v5097_v8 = vadd.f32 %v15588_v26, %v15494_v33  ;;  %v5101_v58 = vadd.f32 %v15601_v46, %v15520_v29  ;;  %v5107_v33 = vadd.f32 %v15614_v55, %v15549_v53 }
 0x51a   : > { %17459 = vst [vmem:[#allocation9_spill] sm:$0xff] %v15718_v17  ;;  %v5534_v19 = vpop.f32.mrf.mxu0  ;;  %v5109_v29 = vadd.f32 %v15621_v1, %v15557_v34  ;;  %v5502_v53 = vadd.f32 %v15680_v38, %v15650_v30  ;;  %v5300_v55 = vadd.f32 %v15658_v20, %v5099_v5  ;;  %v5304_v30 = vadd.f32 %v15664_v41, %v5103_v23 }
 0x51b   : > { %v5697_v42 = vadd.f32 %v5534_v19, %v5496_v40  ;;  %v5548_v14 = vpop.f32.mrf.mxu1  ;;  %v5294_v13 = vadd.f32 %v15645_v49, %v5093_v10  ;;  %v5500_v19 = vadd.f32 %v5359_v48, %v15643_v0  ;;  %v5105_v48 = vadd.f32 %v15608_v61, %v15533_v31 }
 0x51c   : > { %v5699_v27 = vadd.f32 %v5548_v14, %v5498_v3  ;;  %v5298_v31 = vadd.f32 %v15652_v43, %v5097_v8  ;;  %v5302_v43 = vadd.f32 %v15662_v18, %v5101_v58  ;;  %v15777_v38 = vadd.f32 %v15670_v51, %v5107_v33  ;;  %v17461_v58 = vld [vmem:[#allocation15_spill] sm:$0xff] }
 0x51d   : > { %v5725_v16 = vadd.f32 %v15724_v56, %v5697_v42  ;;  %v5497_v17 = vadd.f32 %v5333_v54, %v5294_v13  ;;  %v15774_v54 = vadd.f32 %v15668_v59, %v5105_v48  ;;  %v5504_v13 = vadd.f32 %v15684_v4, %v15654_v32  ;;  %v17460_v4 = vld [vmem:[#allocation19_spill] sm:$0xff] }
 0x51e   : > { %v15730_v21 = vpop.f32.mrf.mxu3  ;;  %v5727_v40 = vadd.f32 %v15724_v56, %v5699_v27  ;;  %v5501_v44 = vadd.f32 %v15682_v7, %v5298_v31  ;;  %v5503_v5 = vadd.f32 %v17460_v4, %v5300_v55 }
 0x51f   : > { %v5749_v10 = vmax.f32 %v5725_v16, 0.0 }
 0x520   : > { %v5751_v26 = vmax.f32 %v5727_v40, 0.0 }
 0x521   : > { %v5562_v3 = vpop.f32.mrf.mxu2  ;;  %v15765_v47 = vpack.c.bf16 %v5749_v10, %v5749_v10 }
 0x522   : > { %v5536_v49 = vpop.f32.mrf.mxu0  ;;  %v5701_v42 = vadd.f32 %v5562_v3, %v5500_v19  ;;  %v15769_v24 = vpack.c.bf16 %v5751_v26, %v5751_v26  ;;  %v15792_v3 = vadd.f32 %v15676_v15, %v5113_v63 }
 0x523   : > { %v5698_v14 = vadd.f32 %v5536_v49, %v5497_v17  ;;  %v5550_v0 = vpop.f32.mrf.mxu1  ;;  %v15780_v17 = vadd.f32 %v15672_v25, %v5109_v29  ;;  %v5804_v18 = vunpack.c.l.b16 %v15765_v47  ;;  %v15789_v25 = vadd.f32 %v15674_v9, %v5111_v2 }
 0x524   : > { %v5700_v36 = vadd.f32 %v5550_v0, %v5499_v60  ;;  %v5729_v11 = vadd.f32 %v15724_v56, %v5701_v42  ;;  %v5839_v22 = vunpack.c.l.b16 %v15769_v24  ;;  %v17462_v60 = vld [vmem:[#allocation17_spill] sm:$0xff]  ;;  %v17464_v0 = vld [vmem:[#allocation20_spill] sm:$0xff] }
 0x525   : > { %v5726_v46 = vadd.f32 %v15724_v56, %v5698_v14  ;;  %v5506_v49 = vadd.f32 %v17462_v60, %v17461_v58  ;;  %v17463_v14 = vld [vmem:[#allocation16_spill] sm:$0xff] }
 0x526   : > { %v5576_v61 = vpop.f32.mrf.mxu3  ;;  %v5728_v34 = vadd.f32 %v15724_v56, %v5700_v36  ;;  %v5753_v41 = vmax.f32 %v5729_v11, 0.0  ;;  %v5508_v48 = vadd.f32 %v17464_v0, %v17463_v14 }
 0x527   : > { %v5750_v1 = vmax.f32 %v5726_v46, 0.0  ;;  %v5703_v52 = vadd.f32 %v5576_v61, %v5502_v53 }
 0x528   : > { %v5752_v39 = vmax.f32 %v5728_v34, 0.0  ;;  %v15803_v9 = vpack.c.bf16 %v5753_v41, %v5753_v41  ;;  %v17466_v41 = vld [vmem:[#allocation4_spill] sm:$0xff] }
 0x529   : > { %v5774_v50 = vpack.c.bf16 %v5750_v1, %v5750_v1  ;;  %v5564_v20 = vpop.f32.mrf.mxu2  ;;  %v5731_v40 = vadd.f32 %v15724_v56, %v5703_v52 }
 0x52a   : > { %v5776_v7 = vpack.c.bf16 %v5752_v39, %v5752_v39  ;;  %v5702_v27 = vadd.f32 %v5564_v20, %v5501_v44  ;;  %v5590_v28 = vpop.f32.mrf.mxu0  ;;  %v17465_v44 = vld [vmem:[#allocation18_spill] sm:$0xff] }
 0x52b   : > { %v5805_v16 = vunpack.c.l.b16 %v5774_v50  ;;  %v5604_v59 = vpop.f32.mrf.mxu1  ;;  %v5705_v32 = vadd.f32 %v5590_v28, %v5504_v13  ;;  %v5755_v26 = vmax.f32 %v5731_v40, 0.0  ;;  %v5505_v52 = vadd.f32 %v17465_v44, %v5302_v43 }
 0x52c   : > { %v5840_v51 = vunpack.c.l.b16 %v5776_v7  ;;  %v5730_v19 = vadd.f32 %v15724_v56, %v5702_v27  ;;  %v5707_v29 = vadd.f32 %v5604_v59, %v5506_v49  ;;  %v5867_v50 = vunpack.c.l.b16 %v15803_v9  ;;  %v17467_v59 = vld [vmem:[#allocation5_spill] sm:$0xff] }
 0x52d   : > { %v15794_v8 = vpack.c.b16 %v5805_v16, %v5804_v18  ;;  %v5733_v31 = vadd.f32 %v15724_v56, %v5705_v32  ;;  %v5510_v16 = vadd.f32 %v15696_v45, %v17466_v41  ;;  %v17468_v45 = vld [vmem:[#allocation2_spill] sm:$0xff]  ;;  %v15872_v41 = vadd.f32 %v15708_v35, %v15780_v17 }
 0x52e   : > { %v15799_v23 = vpack.c.b16 %v5840_v51, %v5839_v22  ;;  %v5754_v10 = vmax.f32 %v5730_v19, 0.0  ;;  %v5578_v42 = vpop.f32.mrf.mxu3  ;;  %v5735_v13 = vadd.f32 %v15724_v56, %v5707_v29  ;;  %v5507_v22 = vadd.f32 %v17467_v59, %v5304_v30 }
 0x52f   : > { %v5808_v15 = vshrl.u32 %v15794_v8, 16  ;;  %v5810_v33 = vshll.u32 %v15794_v8, 16  ;;  %v5704_v11 = vadd.f32 %v5578_v42, %v5503_v5  ;;  %v15830_v51 = vpack.c.bf16 %v5755_v26, %v5755_v26 }
 0x530   : > { %v5845_v36 = vshll.u32 %v15799_v23, 16  ;;  %v5843_v63 = vshrl.u32 %v15799_v23, 16  ;;  %v5778_v46 = vpack.c.bf16 %v5754_v10, %v5754_v10  ;;  %v5757_v32 = vmax.f32 %v5733_v31, 0.0 }
 0x531   : > { %v5812_v2 = vrot.slane %v5810_v33, 1  ;;  %v5618_v53 = vpop.f32.mrf.mxu2  ;;  %v15810_v61 = vrot.slane %v5808_v15, 1  ;;  %v15812_v34 = vrot.slane %v5810_v33, 2  ;;  %v5732_v28 = vadd.f32 %v15724_v56, %v5704_v11 }
 0x532   : > { %v5847_v55 = vrot.slane %v5845_v36, 1  ;;  %v5592_v1 = vpop.f32.mrf.mxu0  ;;  %v5868_v20 = vunpack.c.l.b16 %v5778_v46  ;;  %v5709_v18 = vadd.f32 %v5618_v53, %v5508_v48  ;;  %v5316_v58 = vadd.f32 %v17468_v45, %v15758_v12  ;;  %v17469_v48 = vld [vmem:[#allocation6_spill] sm:$0xff] }
 0x533   : > { %v5813_v39 = vor.u32 %v5812_v2, %v5808_v15  ;;  %v5606_v7 = vpop.f32.mrf.mxu1  ;;  %v5706_v40 = vadd.f32 %v5592_v1, %v5505_v52  ;;  %v5756_v19 = vmax.f32 %v5732_v28, 0.0  ;;  %v5759_v42 = vmax.f32 %v5735_v13, 0.0 }
 0x534   : > { %v15820_v27 = vor.u32 %v5847_v55, %v5843_v63  ;;  %v15827_v43 = vpack.c.b16 %v5868_v20, %v5867_v50  ;;  %v5737_v60 = vadd.f32 %v15724_v56, %v5709_v18  ;;  %v5708_v49 = vadd.f32 %v5606_v7, %v5507_v22 }
 0x535   : > { %11877 = vmatmul.msk.bf16.vlgmr.msrb.gmra.mxu0 %vm5820_vm3, %v5813_v39  ;;  %v5780_v10 = vpack.c.bf16 %v5756_v19, %v5756_v19  ;;  %v5734_v0 = vadd.f32 %v15724_v56, %v5706_v40  ;;  %v5509_v15 = vadd.f32 %v17469_v48, %v15774_v54  ;;  %v5511_v33 = vadd.f32 %v15704_v57, %v15777_v38  ;;  %v15857_v38 = vld [vmem:[%s17161_s3] sm:$0xff]  ;;  %v17470_v48 = vld [vmem:[#allocation9_spill] sm:$0xff] }
 0x536   : > { %v5632_v4 = vpop.f32.mrf.mxu3  ;;  %11878 = vmatmul.msk.bf16.vlgmr.msrb.gmra.mxu1 %vm5820_vm3, %v15820_v27  ;;  %v5873_v30 = vshll.u32 %v15827_v43, 16  ;;  %v5871_v26 = vshrl.u32 %v15827_v43, 16  ;;  %v5895_v2 = vunpack.c.l.b16 %v15830_v51  ;;  %v15849_v31 = vpack.c.bf16 %v5757_v32, %v5757_v32  ;;  %6049 = vmatpush.bf16.msrb.mxu0 %v15857_v38 }
 0x537   : > { %v5711_v14 = vadd.f32 %v5632_v4, %v5510_v16  ;;  %v5896_v46 = vunpack.c.l.b16 %v5780_v10  ;;  %v5758_v53 = vmax.f32 %v5734_v0, 0.0  ;;  %v5761_v1 = vmax.f32 %v5737_v60, 0.0  ;;  %6065 = vmatpush.bf16.msrb.mxu1 %v15857_v38 }
 0x538   : > { %v5875_v12 = vrot.slane %v5873_v30, 1  ;;  %v5736_v54 = vadd.f32 %v15724_v56, %v5708_v49  ;;  %v15861_v39 = vpack.c.bf16 %v5759_v42, %v5759_v42  ;;  %v15876_v16 = vadd.f32 %v15710_v62, %v15789_v25 }
 0x539   : > { %v5620_v29 = vpop.f32.mrf.mxu2  ;;  %v15859_v52 = vpack.c.b16 %v5896_v46, %v5895_v2  ;;  %v5739_v50 = vadd.f32 %v15724_v56, %v5711_v14  ;;  %v5782_v20 = vpack.c.bf16 %v5758_v53, %v5758_v53  ;;  %v5923_v22 = vunpack.c.l.b16 %v15849_v31 }
 0x53a   : > { %v5646_v55 = vpop.f32.mrf.mxu0  ;;  %v15851_v11 = vor.u32 %v5875_v12, %v5871_v26  ;;  %v5710_v44 = vadd.f32 %v5620_v29, %v5509_v15  ;;  %v5760_v7 = vmax.f32 %v5736_v54, 0.0  ;;  %v5951_v62 = vunpack.c.l.b16 %v15861_v39 }
 0x53b   : > { %v5660_v57 = vpop.f32.mrf.mxu1  ;;  %v5713_v13 = vadd.f32 %v5646_v55, %v15700_v37  ;;  %v5901_v59 = vshll.u32 %v15859_v52, 16  ;;  %v5924_v40 = vunpack.c.l.b16 %v5782_v20  ;;  %v5899_v35 = vshrl.u32 %v15859_v52, 16 }
 0x53c   : > { %v5738_v28 = vadd.f32 %v15724_v56, %v5710_v44  ;;  %v5715_v18 = vadd.f32 %v5660_v57, %v15702_v6  ;;  %11879 = vmatmul.msk.bf16.vlgmr.msrb.gmra.mxu2 %vm5820_vm3, %v15851_v11  ;;  %v15882_v6 = vpack.c.bf16 %v5761_v1, %v5761_v1  ;;  %v5784_v19 = vpack.c.bf16 %v5760_v7, %v5760_v7 }
 0x53d   : > { %6081 = vmatpush.bf16.msrb.mxu2 %v15857_v38  ;;  %v5903_v17 = vrot.slane %v5901_v59, 1  ;;  %v5763_v4 = vmax.f32 %v5739_v50, 0.0  ;;  %v15886_v45 = vpack.c.b16 %v5924_v40, %v5923_v22  ;;  %v5741_v14 = vadd.f32 %v15724_v56, %v5713_v13 }
 0x53e   : > { %v5634_v37 = vpop.f32.mrf.mxu3  ;;  %v5762_v32 = vmax.f32 %v5738_v28, 0.0  ;;  %v5952_v60 = vunpack.c.l.b16 %v5784_v19  ;;  %v5743_v0 = vadd.f32 %v15724_v56, %v5715_v18  ;;  %v15895_v15 = vadd.f32 %v17470_v48, %v15792_v3 }
 0x53f   : > { %v5712_v25 = vadd.f32 %v5634_v37, %v5511_v33  ;;  %v15888_v10 = vor.u32 %v5903_v17, %v5899_v35  ;;  %v15898_v12 = vadd.f32 %v15730_v21, %v5316_v58  ;;  %v15902_v33 = vrot.slane %v5843_v63, 1 }
 0x540   : > { %v5786_v49 = vpack.c.bf16 %v5762_v32, %v5762_v32  ;;  %v5929_v29 = vshll.u32 %v15886_v45, 16  ;;  %v15907_v46 = vrot.slane %v5845_v36, 2  ;;  %v15909_v53 = vpack.c.b16 %v5952_v60, %v5951_v62 }
 0x541   : > { %v5740_v42 = vadd.f32 %v15724_v56, %v5712_v25  ;;  %v5674_v2 = vpop.f32.mrf.mxu2  ;;  %11880 = vmatmul.msk.bf16.vlgmr.msrb.gmra.mxu3 %vm5820_vm3, %v15888_v10  ;;  %v15913_v21 = vpack.c.bf16 %v5763_v4, %v5763_v4  ;;  %v5927_v3 = vshrl.u32 %v15886_v45, 16  ;;  %v5979_v58 = vunpack.c.l.b16 %v15882_v6  ;;  %v17471_v25 = vld [vmem:[#allocation7_spill] sm:$0xff]  ;;  %v17472_v4 = vld [vmem:[#allocation8_spill] sm:$0xff] }
 0x542   : > { %v5980_v55 = vunpack.c.l.b16 %v5786_v49  ;;  %v5931_v63 = vrot.slane %v5929_v29, 1  ;;  %6097 = vmatpush.bf16.msrb.mxu3 %v15857_v38  ;;  %v15918_v54 = vrot.slane %v5871_v26, 1  ;;  %v15922_v36 = vrot.slane %v5873_v30, 2  ;;  %v5648_v40 = vpop.f32.mrf.mxu0 }
 0x543   : > { %v5764_v1 = vmax.f32 %v5740_v42, 0.0  ;;  %v15924_v44 = vrot.slane %v5899_v35, 1  ;;  %v5957_v57 = vshll.u32 %v15909_v53, 16  ;;  %v5765_v13 = vmax.f32 %v5741_v14, 0.0  ;;  %v5662_v49 = vpop.f32.mrf.mxu1 }
 0x544   : > { %v15927_v20 = vor.u32 %v5931_v63, %v5927_v3  ;;  %v15929_v7 = vpack.c.b16 %v5980_v55, %v5979_v58  ;;  %v6387_v18 = vrot.slane %v5901_v59, 2  ;;  %v5955_v22 = vshrl.u32 %v15909_v53, 16 }
 0x545   : > { %v5788_v28 = vpack.c.bf16 %v5764_v1, %v5764_v1  ;;  %v5959_v26 = vrot.slane %v5957_v57, 1  ;;  %v5767_v37 = vmax.f32 %v5743_v0, 0.0  ;;  %v6405_v19 = vrot.slane %v5927_v3, 1 }
 0x546   : > { %v5692_v50 = vpop.f32.mrf.mxu3  ;;  %v5983_v30 = vshrl.u32 %v15929_v7, 16  ;;  %v5985_v32 = vshll.u32 %v15929_v7, 16  ;;  %v6007_v35 = vunpack.c.l.b16 %v15913_v21  ;;  %11881 = vmatmul.msk.bf16.vlgmr.msra.gmra.mxu0 %vm5820_vm3, %v15927_v20  ;;  %v5717_v59 = vadd.f32 %v5674_v2, %v17471_v25 }
 0x547   : > { %v15937_v17 = vor.u32 %v5959_v26, %v5955_v22  ;;  %v6008_v62 = vunpack.c.l.b16 %v5788_v28  ;;  %v5719_v60 = vadd.f32 %v5692_v50, %v17472_v4  ;;  %6113 = vmatpush.bf16.msra.mxu0 %v15857_v38  ;;  %v6406_v42 = vrot.slane %v5929_v29, 2 }
 0x548   : > { %v5987_v14 = vrot.slane %v5985_v32, 1  ;;  %v15942_v0 = vpack.c.bf16 %v5765_v13, %v5765_v13  ;;  %v5714_v48 = vadd.f32 %v5648_v40, %v15872_v41  ;;  %v15947_v1 = vpack.c.bf16 %v5767_v37, %v5767_v37 }
 0x549   : > { %v15945_v55 = vpack.c.b16 %v6008_v62, %v6007_v35  ;;  %v5745_v3 = vadd.f32 %v15724_v56, %v5717_v59  ;;  %v5747_v63 = vadd.f32 %v15724_v56, %v5719_v60  ;;  %11882 = vmatmul.msk.bf16.vlgmr.msra.gmra.mxu1 %vm5820_vm3, %v15937_v17  ;;  %v6424_v2 = vrot.slane %v5955_v22, 1  ;;  %v5676_v28 = vpop.f32.mrf.mxu2 }
 0x54a   : > { %17473 = vst [vmem:[#allocation10_spill] sm:$0xff] %v15947_v1  ;;  %v15953_v58 = vor.u32 %v5987_v14, %v5983_v30  ;;  %v5742_v29 = vadd.f32 %v15724_v56, %v5714_v48  ;;  %v5716_v50 = vadd.f32 %v5662_v49, %v15876_v16  ;;  %6129 = vmatpush.bf16.msra.mxu1 %v15857_v38  ;;  %v6425_v41 = vrot.slane %v5957_v57, 2 }
 0x54b   : > { %v6443_v13 = vrot.slane %v5983_v30, 1  ;;  %v6011_v26 = vshrl.u32 %v15945_v55, 16  ;;  %v6013_v37 = vshll.u32 %v15945_v55, 16  ;;  %v6444_v40 = vrot.slane %v5985_v32, 2 }
 0x54c   : > { %v5769_v35 = vmax.f32 %v5745_v3, 0.0  ;;  %v5766_v62 = vmax.f32 %v5742_v29, 0.0  ;;  %v5744_v22 = vadd.f32 %v15724_v56, %v5716_v50  ;;  %11883 = vmatmul.msk.bf16.vlgmr.msra.gmra.mxu2 %vm5820_vm3, %v15953_v58  ;;  %v6868_v16 = vunpack.c.l.b16 %v15942_v0 }
 0x54d   : > { %v6015_v59 = vrot.slane %v6013_v37, 1  ;;  %v7505_v4 = vunpack.c.l.b16 %v15947_v1  ;;  %v5718_v57 = vadd.f32 %v5676_v28, %v15895_v15  ;;  %6145 = vmatpush.bf16.msra.mxu2 %v15857_v38  ;;  %v6462_v30 = vrot.slane %v6011_v26, 1 }
 0x54e   : > { %v5694_v25 = vpop.f32.mrf.mxu3  ;;  %v6463_v60 = vrot.slane %v6013_v37, 2  ;;  %v5790_v32 = vpack.c.bf16 %v5766_v62, %v5766_v62  ;;  %v5768_v49 = vmax.f32 %v5744_v22, 0.0  ;;  %v15973_v29 = vor.u32 %v15907_v46, %v15902_v33  ;;  %v12621_v22 = vld [vmem:[%s17161_s3 + $0x10] sm:$0xff] }
 0x54f   : > { %v15967_v14 = vor.u32 %v6015_v59, %v6011_v26  ;;  %v5746_v48 = vadd.f32 %v15724_v56, %v5718_v57  ;;  %v5720_v3 = vadd.f32 %v5694_v25, %v15898_v12  ;;  %v15975_v50 = vpack.c.bf16 %v5769_v35, %v5769_v35 }
 0x550   : > { %v5771_v5 = vmax.f32 %v5747_v63, 0.0  ;;  %v6869_v15 = vunpack.c.l.b16 %v5790_v32  ;;  %v5792_v28 = vpack.c.bf16 %v5768_v49, %v5768_v49  ;;  %v15982_v26 = vor.u32 %v15922_v36, %v15918_v54 }
 0x551   : > { %v5770_v1 = vmax.f32 %v5746_v48, 0.0  ;;  %v5748_v37 = vadd.f32 %v15724_v56, %v5720_v3  ;;  %11884 = vmatmul.msk.bf16.vlgmr.msra.gmra.mxu3 %vm5820_vm3, %v15967_v14  ;;  %v15985_v12 = vor.u32 %v6387_v18, %v15924_v44  ;;  %v15990_v63 = vor.u32 %v6406_v42, %v6405_v19 }
 0x552   : > { %v15987_v33 = vpack.c.b16 %v6869_v15, %v6868_v16  ;;  %v7506_v46 = vunpack.c.l.b16 %v5792_v28  ;;  %6161 = vmatpush.bf16.msra.mxu3 %v15857_v38  ;;  %v15992_v35 = vor.u32 %v6425_v41, %v6424_v2  ;;  %v15997_v54 = vor.u32 %v6444_v40, %v6443_v13 }
 0x553   : > { %v5794_v56 = vpack.c.bf16 %v5770_v1, %v5770_v1  ;;  %v5772_v62 = vmax.f32 %v5748_v37, 0.0  ;;  %v15999_v36 = vor.u32 %v6463_v60, %v6462_v30  ;;  %v16003_v25 = vpack.c.bf16 %v5771_v5, %v5771_v5 }
 0x554   : > { %v17274_v44 = vshrl.u32 %v15987_v33, 16  ;;  %v17275_v18 = vshll.u32 %v15987_v33, 16  ;;  %v16005_v38 = vpack.c.b16 %v7506_v46, %v7505_v4  ;;  %v8142_v1 = vunpack.c.l.b16 %v15975_v50 }
 0x555   : > { %v8143_v19 = vunpack.c.l.b16 %v5794_v56  ;;  %v5796_v42 = vpack.c.bf16 %v5772_v62, %v5772_v62  ;;  %v8779_v4 = vunpack.c.l.b16 %v16003_v25 }
 0x556   : > { %v7127_v2 = vrot.slane %v17274_v44, 1  ;;  %v7128_v41 = vrot.slane %v17275_v18, 2  ;;  %11889 = vmatmul.msk.bf16.vlgmr.msrb.gmra.mxu0 %vm5820_vm3, %v15765_v47  ;;  %v17270_v13 = vshrl.u32 %v16005_v38, 16  ;;  %v17271_v5 = vshll.u32 %v16005_v38, 16 }
 0x557   : > { %6187 = vmatpush.bf16.msrb.mxu0 %v12621_v22  ;;  %v16016_v40 = vpack.c.b16 %v8143_v19, %v8142_v1  ;;  %v8780_v59 = vunpack.c.l.b16 %v5796_v42  ;;  %v12622_v19 = vld [vmem:[%s17161_s3 + $0x18] sm:$0xff]  ;;  %v6170_v42 = vrot.slane %v15794_v8, 1  ;;  %v17273_v1 = vrot.slane %v15799_v23, 1 }
 0x558   : > { %v16018_v16 = vor.u32 %v7128_v41, %v7127_v2  ;;  %v7764_v57 = vrot.slane %v17270_v13, 1  ;;  %v7765_v30 = vrot.slane %v17271_v5, 2  ;;  %v16073_v2 = vrot.slane %v15827_v43, 1 }
 0x559   : > { %11890 = vmatmul.msk.bf16.vlgmr.msrb.gmra.mxu1 %vm5820_vm3, %v15769_v24  ;;  %v17268_v47 = vshrl.u32 %v16016_v40, 16  ;;  %v17269_v60 = vshll.u32 %v16016_v40, 16  ;;  %v16029_v32 = vpack.c.b16 %v8780_v59, %v8779_v4  ;;  %v16083_v41 = vrot.slane %v15886_v45, 1 }
 0x55a   : > { %6204 = vmatpush.bf16.msrb.mxu1 %v12621_v22  ;;  %v16031_v49 = vor.u32 %v7765_v30, %v7764_v57  ;;  %v16088_v59 = vrot.slane %v15909_v53, 1  ;;  %v16093_v4 = vrot.slane %v15929_v7, 1  ;;  %v16098_v57 = vrot.slane %v15945_v55, 1  ;;  %v12623_v30 = vld [vmem:[%s17161_s3 + $0x20] sm:$0xff] }
 0x55b   : > { %v8401_v48 = vrot.slane %v17268_v47, 1  ;;  %v8402_v3 = vrot.slane %v17269_v60, 2  ;;  %v17266_v15 = vshrl.u32 %v16029_v32, 16  ;;  %v17267_v28 = vshll.u32 %v16029_v32, 16 }
 0x55c   : > { %11891 = vmatmul.msk.bf16.vlgmr.msrb.gmra.mxu2 %vm5820_vm3, %v15803_v9  ;;  %v16148_v47 = vrot.slane %v15909_v53, 2  ;;  %v16158_v13 = vrot.slane %v15945_v55, 2 }
 0x55d   : > { %6221 = vmatpush.bf16.msrb.mxu2 %v12621_v22  ;;  %v16041_v37 = vor.u32 %v8402_v3, %v8401_v48  ;;  %v16045_v46 = vrot.slane %v17266_v15, 1  ;;  %v16049_v56 = vrot.slane %v17267_v28, 2  ;;  %v17475_v48 = vor.u32 %v15812_v34, %v15810_v61  ;;  %v12624_v3 = vld [vmem:[%s17161_s3 + $0x28] sm:$0xff] }
 0x55e   : > { %v16133_v15 = vrot.slane %v15827_v43, 2 }
 0x55f   : > { %17474 = vst [vmem:[#allocation11_spill] sm:$0xff] %v16045_v46 }
 0x561   : > { %11892 = vmatmul.msk.bf16.vlgmr.msrb.gmra.mxu3 %vm5820_vm3, %v15830_v51 }
 0x562   : > { %6238 = vmatpush.bf16.msrb.mxu3 %v12621_v22 }
 0x566   : > { %11893 = vmatmul.msk.bf16.vlgmr.msra.gmra.mxu0 %vm5820_vm3, %v15849_v31 }
 0x567   : > { %6255 = vmatpush.bf16.msra.mxu0 %v12621_v22 }
 0x569   : > { %11894 = vmatmul.msk.bf16.vlgmr.msra.gmra.mxu1 %vm5820_vm3, %v15861_v39 }
 0x56a   : > { %6272 = vmatpush.bf16.msra.mxu1 %v12621_v22 }
 0x56c   : > { %11895 = vmatmul.msk.bf16.vlgmr.msra.gmra.mxu2 %vm5820_vm3, %v15882_v6 }
 0x56d   : > { %6289 = vmatpush.bf16.msra.mxu2 %v12621_v22 }
 0x571   : > { %11896 = vmatmul.msk.bf16.vlgmr.msra.gmra.mxu3 %vm5820_vm3, %v15913_v21 }
 0x572   : > { %6306 = vmatpush.bf16.msra.mxu3 %v12621_v22  ;;  %v16078_v22 = vrot.slane %v15859_v52, 1 }
 0x576   : > { %11903 = vmatmul.msk.bf16.vlgmr.msrb.gmra.mxu0 %vm5820_vm3, %v6170_v42  ;;  %v17272_v42 = vrot.slane %v15799_v23, 2 }
 0x577   : > { %6342 = vmatpush.bf16.msrb.mxu0 %v12622_v19 }
 0x579   : > { %11904 = vmatmul.msk.bf16.vlgmr.msrb.gmra.mxu1 %vm5820_vm3, %v17273_v1 }
 0x57a   : > { %6361 = vmatpush.bf16.msrb.mxu1 %v12622_v19 }
 0x57c   : > { %11905 = vmatmul.msk.bf16.vlgmr.msrb.gmra.mxu2 %vm5820_vm3, %v16073_v2 }
 0x57d   : > { %6380 = vmatpush.bf16.msrb.mxu2 %v12622_v19 }
 0x581   : > { %11906 = vmatmul.msk.bf16.vlgmr.msrb.gmra.mxu3 %vm5820_vm3, %v16078_v22 }
 0x582   : > { %6399 = vmatpush.bf16.msrb.mxu3 %v12622_v19 }
 0x586   : > { %11907 = vmatmul.msk.bf16.vlgmr.msra.gmra.mxu0 %vm5820_vm3, %v16083_v41 }
 0x587   : > { %6418 = vmatpush.bf16.msra.mxu0 %v12622_v19 }
 0x589   : > { %11908 = vmatmul.msk.bf16.vlgmr.msra.gmra.mxu1 %vm5820_vm3, %v16088_v59 }
 0x58a   : > { %6437 = vmatpush.bf16.msra.mxu1 %v12622_v19 }
 0x58c   : > { %11909 = vmatmul.msk.bf16.vlgmr.msra.gmra.mxu2 %vm5820_vm3, %v16093_v4 }
 0x58d   : > { %6456 = vmatpush.bf16.msra.mxu2 %v12622_v19 }
 0x591   : > { %11910 = vmatmul.msk.bf16.vlgmr.msra.gmra.mxu3 %vm5820_vm3, %v16098_v57 }
 0x592   : > { %6475 = vmatpush.bf16.msra.mxu3 %v12622_v19  ;;  %v6492_v19 = vrot.slane %v15794_v8, 2  ;;  %v16138_v8 = vrot.slane %v15859_v52, 2  ;;  %v16153_v52 = vrot.slane %v15929_v7, 2  ;;  %v12625_v7 = vld [vmem:[%s17161_s3 + $0x30] sm:$0xff] }
 0x596   : > { %11917 = vmatmul.msk.bf16.vlgmr.msrb.gmra.mxu0 %vm5820_vm3, %v17475_v48 }
 0x597   : > { %6509 = vmatpush.bf16.msrb.mxu0 %v12623_v30 }
 0x599   : > { %11918 = vmatmul.msk.bf16.vlgmr.msrb.gmra.mxu1 %vm5820_vm3, %v15973_v29 }
 0x59a   : > { %6526 = vmatpush.bf16.msrb.mxu1 %v12623_v30 }
 0x59c   : > { %11919 = vmatmul.msk.bf16.vlgmr.msrb.gmra.mxu2 %vm5820_vm3, %v15982_v26 }
 0x59d   : > { %6543 = vmatpush.bf16.msrb.mxu2 %v12623_v30 }
 0x5a1   : > { %11920 = vmatmul.msk.bf16.vlgmr.msrb.gmra.mxu3 %vm5820_vm3, %v15985_v12 }
 0x5a2   : > { %6560 = vmatpush.bf16.msrb.mxu3 %v12623_v30 }
 0x5a6   : > { %11921 = vmatmul.msk.bf16.vlgmr.msra.gmra.mxu0 %vm5820_vm3, %v15990_v63 }
 0x5a7   : > { %6577 = vmatpush.bf16.msra.mxu0 %v12623_v30 }
 0x5a9   : > { %11922 = vmatmul.msk.bf16.vlgmr.msra.gmra.mxu1 %vm5820_vm3, %v15992_v35 }
 0x5aa   : > { %6594 = vmatpush.bf16.msra.mxu1 %v12623_v30 }
 0x5ac   : > { %11923 = vmatmul.msk.bf16.vlgmr.msra.gmra.mxu2 %vm5820_vm3, %v15997_v54 }
 0x5ad   : > { %6611 = vmatpush.bf16.msra.mxu2 %v12623_v30 }
 0x5b1   : > { %11924 = vmatmul.msk.bf16.vlgmr.msra.gmra.mxu3 %vm5820_vm3, %v15999_v36 }
 0x5b2   : > { %v5833_v61 = vpop.f32.mrf.mxu0  ;;  %6628 = vmatpush.bf16.msra.mxu3 %v12623_v30 }
 0x5b3   : > { %v5861_v34 = vpop.f32.mrf.mxu1 }
 0x5b6   : > { %11931 = vmatmul.msk.bf16.vlgmr.msrb.gmra.mxu0 %vm5820_vm3, %v6492_v19  ;;  %v16143_v19 = vrot.slane %v15886_v45, 2 }
 0x5b7   : > { %6658 = vmatpush.bf16.msrb.mxu0 %v12624_v3 }
 0x5b9   : > { %11932 = vmatmul.msk.bf16.vlgmr.msrb.gmra.mxu1 %vm5820_vm3, %v17272_v42 }
 0x5ba   : > { %v5835_v48 = vpop.f32.mrf.mxu0  ;;  %6671 = vmatpush.bf16.msrb.mxu1 %v12624_v3 }
 0x5bb   : > { %v5863_v62 = vpop.f32.mrf.mxu1 }
 0x5bc   : > { %11933 = vmatmul.msk.bf16.vlgmr.msrb.gmra.mxu2 %vm5820_vm3, %v16133_v15 }
 0x5bd   : > { %6684 = vmatpush.bf16.msrb.mxu2 %v12624_v3 }
 0x5bf   : > { %v5889_v30 = vpop.f32.mrf.mxu2 }
 0x5c1   : > { %11934 = vmatmul.msk.bf16.vlgmr.msrb.gmra.mxu3 %vm5820_vm3, %v16138_v8 }
 0x5c2   : > { %6697 = vmatpush.bf16.msrb.mxu3 %v12624_v3 }
 0x5c3   : > { %v5945_v62 = vpop.f32.mrf.mxu0 }
 0x5c4   : > { %v5917_v48 = vpop.f32.mrf.mxu3 }
 0x5c6   : > { %v5973_v28 = vpop.f32.mrf.mxu1  ;;  %11935 = vmatmul.msk.bf16.vlgmr.msra.gmra.mxu0 %vm5820_vm3, %v16143_v19 }
 0x5c7   : > { %v5891_v43 = vpop.f32.mrf.mxu2  ;;  %6710 = vmatpush.bf16.msra.mxu0 %v12624_v3 }
 0x5c9   : > { %11936 = vmatmul.msk.bf16.vlgmr.msra.gmra.mxu1 %vm5820_vm3, %v16148_v47 }
 0x5ca   : > { %6723 = vmatpush.bf16.msra.mxu1 %v12624_v3 }
 0x5cb   : > { %v5947_v60 = vpop.f32.mrf.mxu0 }
 0x5cc   : > { %v5919_v45 = vpop.f32.mrf.mxu3  ;;  %11937 = vmatmul.msk.bf16.vlgmr.msra.gmra.mxu2 %vm5820_vm3, %v16153_v52 }
 0x5cd   : > { %6736 = vmatpush.bf16.msra.mxu2 %v12624_v3 }
 0x5ce   : > { %v5975_v43 = vpop.f32.mrf.mxu1 }
 0x5cf   : > { %v6001_v53 = vpop.f32.mrf.mxu2 }
 0x5d1   : > { %11938 = vmatmul.msk.bf16.vlgmr.msra.gmra.mxu3 %vm5820_vm3, %v16158_v13 }
 0x5d2   : > { %6752 = vmatpush.bf16.msra.mxu3 %v12624_v3 }
 0x5d3   : > { %v6051_v5 = vpop.f32.mrf.mxu0 }
 0x5d4   : > { %v6029_v60 = vpop.f32.mrf.mxu3  ;;  %v6052_v45 = vadd.f32 %v6051_v5, %v5833_v61 }
 0x5d6   : > { %v6067_v42 = vpop.f32.mrf.mxu1  ;;  %11945 = vmatmul.msk.bf16.vlgmr.msrb.gmra.mxu0 %vm5820_vm3, %v15769_v24 }
 0x5d7   : > { %v6068_v43 = vadd.f32 %v6067_v42, %v5861_v34  ;;  %v6003_v1 = vpop.f32.mrf.mxu2  ;;  %6782 = vmatpush.bf16.msrb.mxu0 %v12625_v7 }
 0x5d9   : > { %11946 = vmatmul.msk.bf16.vlgmr.msrb.gmra.mxu1 %vm5820_vm3, %v15803_v9 }
 0x5da   : > { %6795 = vmatpush.bf16.msrb.mxu1 %v12625_v7 }
 0x5db   : > { %v6053_v55 = vpop.f32.mrf.mxu0 }
 0x5dc   : > { %v6031_v3 = vpop.f32.mrf.mxu3  ;;  %11947 = vmatmul.msk.bf16.vlgmr.msrb.gmra.mxu2 %vm5820_vm3, %v15830_v51 }
 0x5dd   : > { %6808 = vmatpush.bf16.msrb.mxu2 %v12625_v7 }
 0x5de   : > { %v6069_v44 = vpop.f32.mrf.mxu1 }
 0x5df   : > { %v6083_v18 = vpop.f32.mrf.mxu2 }
 0x5e0   : > { %v6084_v5 = vadd.f32 %v6083_v18, %v5889_v30 }
 0x5e1   : > { %11948 = vmatmul.msk.bf16.vlgmr.msrb.gmra.mxu3 %vm5820_vm3, %v15849_v31 }
 0x5e2   : > { %6821 = vmatpush.bf16.msrb.mxu3 %v12625_v7 }
 0x5e3   : > { %v6115_v24 = vpop.f32.mrf.mxu0 }
 0x5e4   : > { %v6099_v1 = vpop.f32.mrf.mxu3  ;;  %v6116_v61 = vadd.f32 %v6115_v24, %v5945_v62  ;;  %v12626_v24 = vld [vmem:[%s17161_s3 + $0x38] sm:$0xff] }
 0x5e5   : > { %v6100_v34 = vadd.f32 %v6099_v1, %v5917_v48 }
 0x5e6   : > { %v6131_v42 = vpop.f32.mrf.mxu1  ;;  %11949 = vmatmul.msk.bf16.vlgmr.msra.gmra.mxu0 %vm5820_vm3, %v15861_v39 }
 0x5e7   : > { %v6132_v55 = vadd.f32 %v6131_v42, %v5973_v28  ;;  %v6085_v3 = vpop.f32.mrf.mxu2  ;;  %6834 = vmatpush.bf16.msra.mxu0 %v12625_v7 }
 0x5e9   : > { %11950 = vmatmul.msk.bf16.vlgmr.msra.gmra.mxu1 %vm5820_vm3, %v15882_v6 }
 0x5ea   : > { %6847 = vmatpush.bf16.msra.mxu1 %v12625_v7 }
 0x5eb   : > { %v6117_v44 = vpop.f32.mrf.mxu0 }
 0x5ec   : > { %v6101_v18 = vpop.f32.mrf.mxu3  ;;  %11951 = vmatmul.msk.bf16.vlgmr.msra.gmra.mxu2 %vm5820_vm3, %v15913_v21 }
 0x5ed   : > { %6860 = vmatpush.bf16.msra.mxu2 %v12625_v7 }
 0x5ee   : > { %v6133_v30 = vpop.f32.mrf.mxu1 }
 0x5ef   : > { %v6147_v62 = vpop.f32.mrf.mxu2 }
 0x5f0   : > { %v6148_v48 = vadd.f32 %v6147_v62, %v6001_v53 }
 0x5f1   : > { %11952 = vmatmul.msk.bf16.vlgmr.msra.gmra.mxu3 %vm5820_vm3, %v15942_v0 }
 0x5f2   : > { %6888 = vmatpush.bf16.msra.mxu3 %v12625_v7 }
 0x5f3   : > { %v6189_v28 = vpop.f32.mrf.mxu0 }
 0x5f4   : > { %v6163_v1 = vpop.f32.mrf.mxu3  ;;  %v6312_v42 = vadd.f32 %v6189_v28, %v6052_v45 }
 0x5f5   : > { %v6164_v3 = vadd.f32 %v6163_v1, %v6029_v60 }
 0x5f6   : > { %v6206_v44 = vpop.f32.mrf.mxu1  ;;  %11959 = vmatmul.msk.bf16.vlgmr.msrb.gmra.mxu0 %vm5820_vm3, %v15820_v27 }
 0x5f7   : > { %v6313_v18 = vadd.f32 %v6206_v44, %v6068_v43  ;;  %v6149_v30 = vpop.f32.mrf.mxu2  ;;  %6918 = vmatpush.bf16.msrb.mxu0 %v12626_v24 }
 0x5f9   : > { %11960 = vmatmul.msk.bf16.vlgmr.msrb.gmra.mxu1 %vm5820_vm3, %v15851_v11 }
 0x5fa   : > { %6931 = vmatpush.bf16.msrb.mxu1 %v12626_v24 }
 0x5fb   : > { %v6191_v53 = vpop.f32.mrf.mxu0 }
 0x5fc   : > { %v6165_v7 = vpop.f32.mrf.mxu3  ;;  %11961 = vmatmul.msk.bf16.vlgmr.msrb.gmra.mxu2 %vm5820_vm3, %v15888_v10 }
 0x5fd   : > { %6944 = vmatpush.bf16.msrb.mxu2 %v12626_v24 }
 0x5fe   : > { %v6208_v62 = vpop.f32.mrf.mxu1 }
 0x5ff   : > { %v6223_v45 = vpop.f32.mrf.mxu2 }
 0x600   : > { %v6314_v60 = vadd.f32 %v6223_v45, %v6084_v5  ;;  %v17476_v5 = vshll.u32 %v15987_v33, 16 }
 0x601   : > { %11962 = vmatmul.msk.bf16.vlgmr.msrb.gmra.mxu3 %vm5820_vm3, %v15927_v20 }
 0x602   : > { %6957 = vmatpush.bf16.msrb.mxu3 %v12626_v24  ;;  %v6876_v7 = vrot.slane %v17476_v5, 1 }
 0x603   : > { %v6257_v27 = vpop.f32.mrf.mxu0 }
 0x604   : > { %v6240_v43 = vpop.f32.mrf.mxu3  ;;  %v6316_v28 = vadd.f32 %v6257_v27, %v6116_v61 }
 0x605   : > { %v6315_v1 = vadd.f32 %v6240_v43, %v6100_v34  ;;  %v17477_v34 = vshrl.u32 %v15987_v33, 16 }
 0x606   : > { %v6274_v44 = vpop.f32.mrf.mxu1  ;;  %11963 = vmatmul.msk.bf16.vlgmr.msra.gmra.mxu0 %vm5820_vm3, %v15937_v17 }
 0x607   : > { %v6317_v30 = vadd.f32 %v6274_v44, %v6132_v55  ;;  %v6225_v53 = vpop.f32.mrf.mxu2  ;;  %6970 = vmatpush.bf16.msra.mxu0 %v12626_v24  ;;  %v16202_v27 = vor.u32 %v6876_v7, %v17477_v34 }
 0x608   : > { %v12627_v53 = vld [vmem:[%s17161_s3 + $0x40] sm:$0xff] }
 0x609   : > { %11964 = vmatmul.msk.bf16.vlgmr.msra.gmra.mxu1 %vm5820_vm3, %v15953_v58 }
 0x60a   : > { %6983 = vmatpush.bf16.msra.mxu1 %v12626_v24 }
 0x60b   : > { %v6259_v62 = vpop.f32.mrf.mxu0 }
 0x60c   : > { %v6242_v45 = vpop.f32.mrf.mxu3  ;;  %11965 = vmatmul.msk.bf16.vlgmr.msra.gmra.mxu2 %vm5820_vm3, %v15967_v14 }
 0x60d   : > { %6996 = vmatpush.bf16.msra.mxu2 %v12626_v24 }
 0x60e   : > { %v6276_v61 = vpop.f32.mrf.mxu1 }
 0x60f   : > { %v6291_v55 = vpop.f32.mrf.mxu2  ;;  %v17478_v61 = vrot.slane %v15799_v23, 1 }
 0x610   : > { %v6318_v43 = vadd.f32 %v6291_v55, %v6148_v48 }
 0x611   : > { %11966 = vmatmul.msk.bf16.vlgmr.msra.gmra.mxu3 %vm5820_vm3, %v16202_v27 }
 0x612   : > { %7013 = vmatpush.bf16.msra.mxu3 %v12626_v24 }
 0x613   : > { %v6344_v44 = vpop.f32.mrf.mxu0 }
 0x614   : > { %v6308_v5 = vpop.f32.mrf.mxu3  ;;  %v6481_v62 = vadd.f32 %v6344_v44, %v6312_v42 }
 0x615   : > { %v6319_v45 = vadd.f32 %v6308_v5, %v6164_v3 }
 0x616   : > { %v6363_v46 = vpop.f32.mrf.mxu1  ;;  %11973 = vmatmul.msk.bf16.vlgmr.msrb.gmra.mxu0 %vm5820_vm3, %v17478_v61 }
 0x617   : > { %v6482_v7 = vadd.f32 %v6363_v46, %v6313_v18  ;;  %v6293_v34 = vpop.f32.mrf.mxu2  ;;  %7043 = vmatpush.bf16.msrb.mxu0 %v12627_v53 }
 0x619   : > { %11974 = vmatmul.msk.bf16.vlgmr.msrb.gmra.mxu1 %vm5820_vm3, %v16073_v2 }
 0x61a   : > { %7056 = vmatpush.bf16.msrb.mxu1 %v12627_v53 }
 0x61b   : > { %v6346_v48 = vpop.f32.mrf.mxu0 }
 0x61c   : > { %v6310_v24 = vpop.f32.mrf.mxu3  ;;  %11975 = vmatmul.msk.bf16.vlgmr.msrb.gmra.mxu2 %vm5820_vm3, %v16078_v22 }
 0x61d   : > { %7069 = vmatpush.bf16.msrb.mxu2 %v12627_v53 }
 0x61e   : > { %v6365_v42 = vpop.f32.mrf.mxu1 }
 0x61f   : > { %v6382_v3 = vpop.f32.mrf.mxu2 }
 0x620   : > { %v6483_v55 = vadd.f32 %v6382_v3, %v6314_v60 }
 0x621   : > { %11976 = vmatmul.msk.bf16.vlgmr.msrb.gmra.mxu3 %vm5820_vm3, %v16083_v41 }
 0x622   : > { %7082 = vmatpush.bf16.msrb.mxu3 %v12627_v53 }
 0x623   : > { %v6420_v46 = vpop.f32.mrf.mxu0 }
 0x624   : > { %v6401_v18 = vpop.f32.mrf.mxu3  ;;  %v6485_v44 = vadd.f32 %v6420_v46, %v6316_v28  ;;  %v16225_v28 = vrot.slane %v15987_v33, 1  ;;  %v12628_v46 = vld [vmem:[%s17161_s3 + $0x48] sm:$0xff] }
 0x625   : > { %v6484_v5 = vadd.f32 %v6401_v18, %v6315_v1 }
 0x626   : > { %v6439_v61 = vpop.f32.mrf.mxu1  ;;  %11977 = vmatmul.msk.bf16.vlgmr.msra.gmra.mxu0 %vm5820_vm3, %v16088_v59 }
 0x627   : > { %v6486_v34 = vadd.f32 %v6439_v61, %v6317_v30  ;;  %v6384_v48 = vpop.f32.mrf.mxu2  ;;  %7095 = vmatpush.bf16.msra.mxu0 %v12627_v53 }
 0x629   : > { %11978 = vmatmul.msk.bf16.vlgmr.msra.gmra.mxu1 %vm5820_vm3, %v16093_v4 }
 0x62a   : > { %7108 = vmatpush.bf16.msra.mxu1 %v12627_v53 }
 0x62b   : > { %v6422_v60 = vpop.f32.mrf.mxu0 }
 0x62c   : > { %v6403_v24 = vpop.f32.mrf.mxu3  ;;  %11979 = vmatmul.msk.bf16.vlgmr.msra.gmra.mxu2 %vm5820_vm3, %v16098_v57 }
 0x62d   : > { %7121 = vmatpush.bf16.msra.mxu2 %v12627_v53 }
 0x62e   : > { %v6441_v42 = vpop.f32.mrf.mxu1 }
 0x62f   : > { %v6458_v1 = vpop.f32.mrf.mxu2 }
 0x630   : > { %v6487_v3 = vadd.f32 %v6458_v1, %v6318_v43 }
 0x631   : > { %11980 = vmatmul.msk.bf16.vlgmr.msra.gmra.mxu3 %vm5820_vm3, %v16225_v28 }
 0x632   : > { %7140 = vmatpush.bf16.msra.mxu3 %v12627_v53 }
 0x633   : > { %v6511_v30 = vpop.f32.mrf.mxu0 }
 0x634   : > { %v6477_v18 = vpop.f32.mrf.mxu3  ;;  %v6634_v61 = vadd.f32 %v6511_v30, %v6481_v62 }
 0x635   : > { %v6488_v48 = vadd.f32 %v6477_v18, %v6319_v45 }
 0x636   : > { %v6528_v60 = vpop.f32.mrf.mxu1  ;;  %11987 = vmatmul.msk.bf16.vlgmr.msrb.gmra.mxu0 %vm5820_vm3, %v15973_v29 }
 0x637   : > { %v6635_v24 = vadd.f32 %v6528_v60, %v6482_v7  ;;  %v6460_v42 = vpop.f32.mrf.mxu2  ;;  %7170 = vmatpush.bf16.msrb.mxu0 %v12628_v46 }
 0x639   : > { %11988 = vmatmul.msk.bf16.vlgmr.msrb.gmra.mxu1 %vm5820_vm3, %v15982_v26 }
 0x63a   : > { %7183 = vmatpush.bf16.msrb.mxu1 %v12628_v46 }
 0x63b   : > { %v6513_v43 = vpop.f32.mrf.mxu0 }
 0x63c   : > { %v6479_v53 = vpop.f32.mrf.mxu3  ;;  %11989 = vmatmul.msk.bf16.vlgmr.msrb.gmra.mxu2 %vm5820_vm3, %v15985_v12 }
 0x63d   : > { %7196 = vmatpush.bf16.msrb.mxu2 %v12628_v46 }
 0x63e   : > { %v6530_v1 = vpop.f32.mrf.mxu1 }
 0x63f   : > { %v6545_v62 = vpop.f32.mrf.mxu2 }
 0x640   : > { %v6636_v45 = vadd.f32 %v6545_v62, %v6483_v55  ;;  %v12629_v62 = vld [vmem:[%s17161_s3 + $0x50] sm:$0xff] }
 0x641   : > { %11990 = vmatmul.msk.bf16.vlgmr.msrb.gmra.mxu3 %vm5820_vm3, %v15990_v63 }
 0x642   : > { %7209 = vmatpush.bf16.msrb.mxu3 %v12628_v46 }
 0x643   : > { %v6579_v29 = vpop.f32.mrf.mxu0 }
 0x644   : > { %v6562_v7 = vpop.f32.mrf.mxu3  ;;  %v6638_v30 = vadd.f32 %v6579_v29, %v6485_v44 }
 0x645   : > { %v6637_v18 = vadd.f32 %v6562_v7, %v6484_v5 }
 0x646   : > { %v6596_v60 = vpop.f32.mrf.mxu1  ;;  %11991 = vmatmul.msk.bf16.vlgmr.msra.gmra.mxu0 %vm5820_vm3, %v15992_v35 }
 0x647   : > { %v6639_v42 = vadd.f32 %v6596_v60, %v6486_v34  ;;  %v6547_v43 = vpop.f32.mrf.mxu2  ;;  %7222 = vmatpush.bf16.msra.mxu0 %v12628_v46 }
 0x649   : > { %11992 = vmatmul.msk.bf16.vlgmr.msra.gmra.mxu1 %vm5820_vm3, %v15997_v54 }
 0x64a   : > { %7235 = vmatpush.bf16.msra.mxu1 %v12628_v46 }
 0x64b   : > { %v6581_v55 = vpop.f32.mrf.mxu0 }
 0x64c   : > { %v6564_v53 = vpop.f32.mrf.mxu3  ;;  %11993 = vmatmul.msk.bf16.vlgmr.msra.gmra.mxu2 %vm5820_vm3, %v15999_v36  ;;  %v17479_v55 = vrot.slane %v15799_v23, 2 }
 0x64d   : > { %7248 = vmatpush.bf16.msra.mxu2 %v12628_v46 }
 0x64e   : > { %v6598_v1 = vpop.f32.mrf.mxu1 }
 0x64f   : > { %v6613_v44 = vpop.f32.mrf.mxu2 }
 0x650   : > { %v6640_v5 = vadd.f32 %v6613_v44, %v6487_v3 }
 0x651   : > { %11994 = vmatmul.msk.bf16.vlgmr.msra.gmra.mxu3 %vm5820_vm3, %v16018_v16 }
 0x652   : > { %7265 = vmatpush.bf16.msra.mxu3 %v12628_v46 }
 0x653   : > { %v6660_v34 = vpop.f32.mrf.mxu0 }
 0x654   : > { %v6630_v29 = vpop.f32.mrf.mxu3  ;;  %v6758_v7 = vadd.f32 %v6660_v34, %v6634_v61 }
 0x655   : > { %v6641_v60 = vadd.f32 %v6630_v29, %v6488_v48 }
 0x656   : > { %v6673_v43 = vpop.f32.mrf.mxu1  ;;  %12001 = vmatmul.msk.bf16.vlgmr.msrb.gmra.mxu0 %vm5820_vm3, %v17479_v55 }
 0x657   : > { %v6759_v53 = vadd.f32 %v6673_v43, %v6635_v24  ;;  %v6615_v1 = vpop.f32.mrf.mxu2  ;;  %7295 = vmatpush.bf16.msrb.mxu0 %v12629_v62 }
 0x659   : > { %12002 = vmatmul.msk.bf16.vlgmr.msrb.gmra.mxu1 %vm5820_vm3, %v16133_v15 }
 0x65a   : > { %7308 = vmatpush.bf16.msrb.mxu1 %v12629_v62 }
 0x65b   : > { %v6662_v3 = vpop.f32.mrf.mxu0 }
 0x65c   : > { %v6632_v46 = vpop.f32.mrf.mxu3  ;;  %12003 = vmatmul.msk.bf16.vlgmr.msrb.gmra.mxu2 %vm5820_vm3, %v16138_v8 }
 0x65d   : > { %7321 = vmatpush.bf16.msrb.mxu2 %v12629_v62 }
 0x65e   : > { %v6675_v61 = vpop.f32.mrf.mxu1 }
 0x65f   : > { %v6686_v48 = vpop.f32.mrf.mxu2 }
 0x660   : > { %v6760_v44 = vadd.f32 %v6686_v48, %v6636_v45  ;;  %v12630_v48 = vld [vmem:[%s17161_s3 + $0x58] sm:$0xff] }
 0x661   : > { %12004 = vmatmul.msk.bf16.vlgmr.msrb.gmra.mxu3 %vm5820_vm3, %v16143_v19 }
 0x662   : > { %7334 = vmatpush.bf16.msrb.mxu3 %v12629_v62 }
 0x663   : > { %v6712_v23 = vpop.f32.mrf.mxu0 }
 0x664   : > { %v6699_v24 = vpop.f32.mrf.mxu3  ;;  %v6762_v34 = vadd.f32 %v6712_v23, %v6638_v30  ;;  %v16267_v30 = vrot.slane %v15987_v33, 2 }
 0x665   : > { %v6761_v29 = vadd.f32 %v6699_v24, %v6637_v18 }
 0x666   : > { %v6725_v43 = vpop.f32.mrf.mxu1  ;;  %12005 = vmatmul.msk.bf16.vlgmr.msra.gmra.mxu0 %vm5820_vm3, %v16148_v47 }
 0x667   : > { %v6763_v55 = vadd.f32 %v6725_v43, %v6639_v42  ;;  %v6688_v1 = vpop.f32.mrf.mxu2  ;;  %7347 = vmatpush.bf16.msra.mxu0 %v12629_v62 }
 0x669   : > { %12006 = vmatmul.msk.bf16.vlgmr.msra.gmra.mxu1 %vm5820_vm3, %v16153_v52 }
 0x66a   : > { %7360 = vmatpush.bf16.msra.mxu1 %v12629_v62 }
 0x66b   : > { %v6714_v45 = vpop.f32.mrf.mxu0 }
 0x66c   : > { %v6701_v3 = vpop.f32.mrf.mxu3  ;;  %12007 = vmatmul.msk.bf16.vlgmr.msra.gmra.mxu2 %vm5820_vm3, %v16158_v13 }
 0x66d   : > { %7373 = vmatpush.bf16.msra.mxu2 %v12629_v62 }
 0x66e   : > { %v6727_v46 = vpop.f32.mrf.mxu1 }
 0x66f   : > { %v6738_v18 = vpop.f32.mrf.mxu2 }
 0x670   : > { %v6764_v61 = vadd.f32 %v6738_v18, %v6640_v5 }
 0x671   : > { %12008 = vmatmul.msk.bf16.vlgmr.msra.gmra.mxu3 %vm5820_vm3, %v16267_v30 }
 0x672   : > { %7389 = vmatpush.bf16.msra.mxu3 %v12629_v62 }
 0x673   : > { %v6784_v42 = vpop.f32.mrf.mxu0 }
 0x674   : > { %v6754_v23 = vpop.f32.mrf.mxu3  ;;  %v6894_v24 = vadd.f32 %v6784_v42, %v6758_v7 }
 0x675   : > { %v6765_v43 = vadd.f32 %v6754_v23, %v6641_v60 }
 0x676   : > { %v6797_v1 = vpop.f32.mrf.mxu1  ;;  %12015 = vmatmul.msk.bf16.vlgmr.msrb.gmra.mxu0 %vm5820_vm3, %v15803_v9 }
 0x677   : > { %v6895_v33 = vadd.f32 %v6797_v1, %v6759_v53  ;;  %v6740_v45 = vpop.f32.mrf.mxu2  ;;  %7419 = vmatpush.bf16.msrb.mxu0 %v12630_v48 }
 0x679   : > { %12016 = vmatmul.msk.bf16.vlgmr.msrb.gmra.mxu1 %vm5820_vm3, %v15830_v51 }
 0x67a   : > { %7432 = vmatpush.bf16.msrb.mxu1 %v12630_v48 }
 0x67b   : > { %v6786_v5 = vpop.f32.mrf.mxu0 }
 0x67c   : > { %v6756_v62 = vpop.f32.mrf.mxu3  ;;  %12017 = vmatmul.msk.bf16.vlgmr.msrb.gmra.mxu2 %vm5820_vm3, %v15849_v31 }
 0x67d   : > { %7445 = vmatpush.bf16.msrb.mxu2 %v12630_v48  ;;  %v17480_v62 = vld [vmem:[#allocation10_spill] sm:$0xff] }
 0x67e   : > { %v6799_v3 = vpop.f32.mrf.mxu1 }
 0x67f   : > { %v6810_v7 = vpop.f32.mrf.mxu2  ;;  %v12631_v3 = vld [vmem:[%s17161_s3 + $0x60] sm:$0xff] }
 0x680   : > { %v6896_v60 = vadd.f32 %v6810_v7, %v6760_v44 }
 0x681   : > { %12018 = vmatmul.msk.bf16.vlgmr.msrb.gmra.mxu3 %vm5820_vm3, %v15861_v39 }
 0x682   : > { %7458 = vmatpush.bf16.msrb.mxu3 %v12630_v48 }
 0x683   : > { %v6836_v9 = vpop.f32.mrf.mxu0 }
 0x684   : > { %v6823_v53 = vpop.f32.mrf.mxu3  ;;  %v6898_v46 = vadd.f32 %v6836_v9, %v6762_v34 }
 0x685   : > { %v6897_v18 = vadd.f32 %v6823_v53, %v6761_v29 }
 0x686   : > { %v6849_v42 = vpop.f32.mrf.mxu1  ;;  %12019 = vmatmul.msk.bf16.vlgmr.msra.gmra.mxu0 %vm5820_vm3, %v15882_v6 }
 0x687   : > { %v6899_v23 = vadd.f32 %v6849_v42, %v6763_v55  ;;  %v6812_v1 = vpop.f32.mrf.mxu2  ;;  %7471 = vmatpush.bf16.msra.mxu0 %v12630_v48 }
 0x689   : > { %12020 = vmatmul.msk.bf16.vlgmr.msra.gmra.mxu1 %vm5820_vm3, %v15913_v21 }
 0x68a   : > { %7484 = vmatpush.bf16.msra.mxu1 %v12630_v48 }
 0x68b   : > { %v6838_v44 = vpop.f32.mrf.mxu0 }
 0x68c   : > { %v6825_v45 = vpop.f32.mrf.mxu3  ;;  %12021 = vmatmul.msk.bf16.vlgmr.msra.gmra.mxu2 %vm5820_vm3, %v15942_v0 }
 0x68d   : > { %7497 = vmatpush.bf16.msra.mxu2 %v12630_v48 }
 0x68e   : > { %v6851_v5 = vpop.f32.mrf.mxu1 }
 0x68f   : > { %v6862_v34 = vpop.f32.mrf.mxu2 }
 0x690   : > { %v6900_v29 = vadd.f32 %v6862_v34, %v6764_v61 }
 0x691   : > { %12022 = vmatmul.msk.bf16.vlgmr.msra.gmra.mxu3 %vm5820_vm3, %v17480_v62 }
 0x692   : > { %7525 = vmatpush.bf16.msra.mxu3 %v12630_v48 }
 0x693   : > { %v6920_v55 = vpop.f32.mrf.mxu0 }
 0x694   : > { %v6890_v7 = vpop.f32.mrf.mxu3  ;;  %v7019_v9 = vadd.f32 %v6920_v55, %v6894_v24 }
 0x695   : > { %v6901_v53 = vadd.f32 %v6890_v7, %v6765_v43 }
 0x696   : > { %v6933_v42 = vpop.f32.mrf.mxu1  ;;  %12029 = vmatmul.msk.bf16.vlgmr.msrb.gmra.mxu0 %vm5820_vm3, %v15851_v11 }
 0x697   : > { %v7020_v1 = vadd.f32 %v6933_v42, %v6895_v33  ;;  %v6864_v44 = vpop.f32.mrf.mxu2  ;;  %7555 = vmatpush.bf16.msrb.mxu0 %v12631_v3 }
 0x699   : > { %12030 = vmatmul.msk.bf16.vlgmr.msrb.gmra.mxu1 %vm5820_vm3, %v15888_v10 }
 0x69a   : > { %7568 = vmatpush.bf16.msrb.mxu1 %v12631_v3 }
 0x69b   : > { %v6922_v61 = vpop.f32.mrf.mxu0 }
 0x69c   : > { %v6892_v48 = vpop.f32.mrf.mxu3  ;;  %12031 = vmatmul.msk.bf16.vlgmr.msrb.gmra.mxu2 %vm5820_vm3, %v15927_v20 }
 0x69d   : > { %7581 = vmatpush.bf16.msrb.mxu2 %v12631_v3 }
 0x69e   : > { %v6935_v45 = vpop.f32.mrf.mxu1 }
 0x69f   : > { %v6946_v24 = vpop.f32.mrf.mxu2 }
 0x6a0   : > { %v7021_v43 = vadd.f32 %v6946_v24, %v6896_v60  ;;  %v17481_v60 = vshll.u32 %v16005_v38, 16 }
 0x6a1   : > { %12032 = vmatmul.msk.bf16.vlgmr.msrb.gmra.mxu3 %vm5820_vm3, %v15937_v17 }
 0x6a2   : > { %7594 = vmatpush.bf16.msrb.mxu3 %v12631_v3  ;;  %v7513_v44 = vrot.slane %v17481_v60, 1 }
 0x6a3   : > { %v6972_v11 = vpop.f32.mrf.mxu0 }
 0x6a4   : > { %v6959_v33 = vpop.f32.mrf.mxu3  ;;  %v7023_v5 = vadd.f32 %v6972_v11, %v6898_v46 }
 0x6a5   : > { %v7022_v34 = vadd.f32 %v6959_v33, %v6897_v18  ;;  %v17482_v18 = vshrl.u32 %v16005_v38, 16  ;;  %v12632_v33 = vld [vmem:[%s17161_s3 + $0x68] sm:$0xff] }
 0x6a6   : > { %v6985_v55 = vpop.f32.mrf.mxu1  ;;  %12033 = vmatmul.msk.bf16.vlgmr.msra.gmra.mxu0 %vm5820_vm3, %v15953_v58 }
 0x6a7   : > { %v7024_v7 = vadd.f32 %v6985_v55, %v6899_v23  ;;  %v6948_v42 = vpop.f32.mrf.mxu2  ;;  %7607 = vmatpush.bf16.msra.mxu0 %v12631_v3  ;;  %v16311_v45 = vor.u32 %v7513_v44, %v17482_v18 }
 0x6a9   : > { %12034 = vmatmul.msk.bf16.vlgmr.msra.gmra.mxu1 %vm5820_vm3, %v15967_v14 }
 0x6aa   : > { %7620 = vmatpush.bf16.msra.mxu1 %v12631_v3 }
 0x6ab   : > { %v6974_v61 = vpop.f32.mrf.mxu0 }
 0x6ac   : > { %v6961_v48 = vpop.f32.mrf.mxu3  ;;  %12035 = vmatmul.msk.bf16.vlgmr.msra.gmra.mxu2 %vm5820_vm3, %v16202_v27 }
 0x6ad   : > { %7633 = vmatpush.bf16.msra.mxu2 %v12631_v3 }
 0x6ae   : > { %v6987_v46 = vpop.f32.mrf.mxu1 }
 0x6af   : > { %v6998_v23 = vpop.f32.mrf.mxu2 }
 0x6b0   : > { %v7025_v24 = vadd.f32 %v6998_v23, %v6900_v29 }
 0x6b1   : > { %12036 = vmatmul.msk.bf16.vlgmr.msra.gmra.mxu3 %vm5820_vm3, %v16311_v45 }
 0x6b2   : > { %7650 = vmatpush.bf16.msra.mxu3 %v12631_v3 }
 0x6b3   : > { %v7045_v11 = vpop.f32.mrf.mxu0 }
 0x6b4   : > { %v7015_v55 = vpop.f32.mrf.mxu3  ;;  %v7146_v42 = vadd.f32 %v7045_v11, %v7019_v9 }
 0x6b5   : > { %v7026_v60 = vadd.f32 %v7015_v55, %v6901_v53 }
 0x6b6   : > { %v7058_v61 = vpop.f32.mrf.mxu1  ;;  %12043 = vmatmul.msk.bf16.vlgmr.msrb.gmra.mxu0 %vm5820_vm3, %v16073_v2 }
 0x6b7   : > { %v7147_v44 = vadd.f32 %v7058_v61, %v7020_v1  ;;  %v7000_v48 = vpop.f32.mrf.mxu2  ;;  %7680 = vmatpush.bf16.msrb.mxu0 %v12632_v33 }
 0x6b9   : > { %12044 = vmatmul.msk.bf16.vlgmr.msrb.gmra.mxu1 %vm5820_vm3, %v16078_v22 }
 0x6ba   : > { %7693 = vmatpush.bf16.msrb.mxu1 %v12632_v33 }
 0x6bb   : > { %v7047_v29 = vpop.f32.mrf.mxu0 }
 0x6bc   : > { %v7017_v3 = vpop.f32.mrf.mxu3  ;;  %12045 = vmatmul.msk.bf16.vlgmr.msrb.gmra.mxu2 %vm5820_vm3, %v16083_v41 }
 0x6bd   : > { %7706 = vmatpush.bf16.msrb.mxu2 %v12632_v33 }
 0x6be   : > { %v7060_v46 = vpop.f32.mrf.mxu1 }
 0x6bf   : > { %v7071_v9 = vpop.f32.mrf.mxu2  ;;  %v12633_v46 = vld [vmem:[%s17161_s3 + $0x70] sm:$0xff] }
 0x6c0   : > { %v7148_v53 = vadd.f32 %v7071_v9, %v7021_v43 }
 0x6c1   : > { %12046 = vmatmul.msk.bf16.vlgmr.msrb.gmra.mxu3 %vm5820_vm3, %v16088_v59 }
 0x6c2   : > { %7719 = vmatpush.bf16.msrb.mxu3 %v12632_v33 }
 0x6c3   : > { %v7097_v2 = vpop.f32.mrf.mxu0 }
 0x6c4   : > { %v7084_v1 = vpop.f32.mrf.mxu3  ;;  %v7150_v18 = vadd.f32 %v7097_v2, %v7023_v5  ;;  %v16333_v5 = vrot.slane %v16005_v38, 1 }
 0x6c5   : > { %v7149_v23 = vadd.f32 %v7084_v1, %v7022_v34 }
 0x6c6   : > { %v7110_v11 = vpop.f32.mrf.mxu1  ;;  %12047 = vmatmul.msk.bf16.vlgmr.msra.gmra.mxu0 %vm5820_vm3, %v16093_v4 }
 0x6c7   : > { %v7151_v55 = vadd.f32 %v7110_v11, %v7024_v7  ;;  %v7073_v61 = vpop.f32.mrf.mxu2  ;;  %7732 = vmatpush.bf16.msra.mxu0 %v12632_v33 }
 0x6c9   : > { %12048 = vmatmul.msk.bf16.vlgmr.msra.gmra.mxu1 %vm5820_vm3, %v16098_v57 }
 0x6ca   : > { %7745 = vmatpush.bf16.msra.mxu1 %v12632_v33 }
 0x6cb   : > { %v7099_v43 = vpop.f32.mrf.mxu0 }
 0x6cc   : > { %v7086_v48 = vpop.f32.mrf.mxu3  ;;  %12049 = vmatmul.msk.bf16.vlgmr.msra.gmra.mxu2 %vm5820_vm3, %v16225_v28 }
 0x6cd   : > { %7758 = vmatpush.bf16.msra.mxu2 %v12632_v33 }
 0x6ce   : > { %v7112_v29 = vpop.f32.mrf.mxu1 }
 0x6cf   : > { %v7123_v34 = vpop.f32.mrf.mxu2 }
 0x6d0   : > { %v7152_v3 = vadd.f32 %v7123_v34, %v7025_v24 }
 0x6d1   : > { %12050 = vmatmul.msk.bf16.vlgmr.msra.gmra.mxu3 %vm5820_vm3, %v16333_v5 }
 0x6d2   : > { %7777 = vmatpush.bf16.msra.mxu3 %v12632_v33 }
 0x6d3   : > { %v7172_v7 = vpop.f32.mrf.mxu0 }
 0x6d4   : > { %v7142_v9 = vpop.f32.mrf.mxu3  ;;  %v7271_v2 = vadd.f32 %v7172_v7, %v7146_v42 }
 0x6d5   : > { %v7153_v1 = vadd.f32 %v7142_v9, %v7026_v60 }
 0x6d6   : > { %v7185_v11 = vpop.f32.mrf.mxu1  ;;  %12057 = vmatmul.msk.bf16.vlgmr.msrb.gmra.mxu0 %vm5820_vm3, %v15982_v26 }
 0x6d7   : > { %v7272_v61 = vadd.f32 %v7185_v11, %v7147_v44  ;;  %v7125_v43 = vpop.f32.mrf.mxu2  ;;  %7807 = vmatpush.bf16.msrb.mxu0 %v12633_v46 }
 0x6d9   : > { %12058 = vmatmul.msk.bf16.vlgmr.msrb.gmra.mxu1 %vm5820_vm3, %v15985_v12 }
 0x6da   : > { %7820 = vmatpush.bf16.msrb.mxu1 %v12633_v46 }
 0x6db   : > { %v7174_v24 = vpop.f32.mrf.mxu0 }
 0x6dc   : > { %v7144_v33 = vpop.f32.mrf.mxu3  ;;  %12059 = vmatmul.msk.bf16.vlgmr.msrb.gmra.mxu2 %vm5820_vm3, %v15990_v63 }
 0x6dd   : > { %7833 = vmatpush.bf16.msrb.mxu2 %v12633_v46  ;;  %v12634_v33 = vld [vmem:[%s17161_s3 + $0x78] sm:$0xff] }
 0x6de   : > { %v7187_v48 = vpop.f32.mrf.mxu1 }
 0x6df   : > { %v7198_v42 = vpop.f32.mrf.mxu2 }
 0x6e0   : > { %v7273_v60 = vadd.f32 %v7198_v42, %v7148_v53 }
 0x6e1   : > { %12060 = vmatmul.msk.bf16.vlgmr.msrb.gmra.mxu3 %vm5820_vm3, %v15992_v35 }
 0x6e2   : > { %7846 = vmatpush.bf16.msrb.mxu3 %v12633_v46 }
 0x6e3   : > { %v7224_v26 = vpop.f32.mrf.mxu0 }
 0x6e4   : > { %v7211_v44 = vpop.f32.mrf.mxu3  ;;  %v7275_v29 = vadd.f32 %v7224_v26, %v7150_v18 }
 0x6e5   : > { %v7274_v34 = vadd.f32 %v7211_v44, %v7149_v23 }
 0x6e6   : > { %v7237_v7 = vpop.f32.mrf.mxu1  ;;  %12061 = vmatmul.msk.bf16.vlgmr.msra.gmra.mxu0 %vm5820_vm3, %v15997_v54 }
 0x6e7   : > { %v7276_v9 = vadd.f32 %v7237_v7, %v7151_v55  ;;  %v7200_v11 = vpop.f32.mrf.mxu2  ;;  %7859 = vmatpush.bf16.msra.mxu0 %v12633_v46 }
 0x6e9   : > { %12062 = vmatmul.msk.bf16.vlgmr.msra.gmra.mxu1 %vm5820_vm3, %v15999_v36 }
 0x6ea   : > { %7872 = vmatpush.bf16.msra.mxu1 %v12633_v46 }
 0x6eb   : > { %v7226_v53 = vpop.f32.mrf.mxu0 }
 0x6ec   : > { %v7213_v43 = vpop.f32.mrf.mxu3  ;;  %12063 = vmatmul.msk.bf16.vlgmr.msra.gmra.mxu2 %vm5820_vm3, %v16018_v16 }
 0x6ed   : > { %7885 = vmatpush.bf16.msra.mxu2 %v12633_v46 }
 0x6ee   : > { %v7239_v24 = vpop.f32.mrf.mxu1 }
 0x6ef   : > { %v7250_v18 = vpop.f32.mrf.mxu2 }
 0x6f0   : > { %v7277_v23 = vadd.f32 %v7250_v18, %v7152_v3 }
 0x6f1   : > { %12064 = vmatmul.msk.bf16.vlgmr.msra.gmra.mxu3 %vm5820_vm3, %v16031_v49 }
 0x6f2   : > { %7902 = vmatpush.bf16.msra.mxu3 %v12633_v46 }
 0x6f3   : > { %v7297_v55 = vpop.f32.mrf.mxu0 }
 0x6f4   : > { %v7267_v48 = vpop.f32.mrf.mxu3  ;;  %v7395_v42 = vadd.f32 %v7297_v55, %v7271_v2 }
 0x6f5   : > { %v7278_v26 = vadd.f32 %v7267_v48, %v7153_v1 }
 0x6f6   : > { %v7310_v44 = vpop.f32.mrf.mxu1  ;;  %12071 = vmatmul.msk.bf16.vlgmr.msrb.gmra.mxu0 %vm5820_vm3, %v16133_v15 }
 0x6f7   : > { %v7396_v7 = vadd.f32 %v7310_v44, %v7272_v61  ;;  %v7252_v11 = vpop.f32.mrf.mxu2  ;;  %7932 = vmatpush.bf16.msrb.mxu0 %v12634_v33 }
 0x6f9   : > { %12072 = vmatmul.msk.bf16.vlgmr.msrb.gmra.mxu1 %vm5820_vm3, %v16138_v8 }
 0x6fa   : > { %7945 = vmatpush.bf16.msrb.mxu1 %v12634_v33 }
 0x6fb   : > { %v7299_v3 = vpop.f32.mrf.mxu0 }
 0x6fc   : > { %v7269_v46 = vpop.f32.mrf.mxu3  ;;  %12073 = vmatmul.msk.bf16.vlgmr.msrb.gmra.mxu2 %vm5820_vm3, %v16143_v19 }
 0x6fd   : > { %7958 = vmatpush.bf16.msrb.mxu2 %v12634_v33  ;;  %v12635_v46 = vld [vmem:[%s17161_s3 + $0x80] sm:$0xff] }
 0x6fe   : > { %v7312_v53 = vpop.f32.mrf.mxu1 }
 0x6ff   : > { %v7323_v2 = vpop.f32.mrf.mxu2 }
 0x700   : > { %v7397_v1 = vadd.f32 %v7323_v2, %v7273_v60 }
 0x701   : > { %12074 = vmatmul.msk.bf16.vlgmr.msrb.gmra.mxu3 %vm5820_vm3, %v16148_v47 }
 0x702   : > { %7971 = vmatpush.bf16.msrb.mxu3 %v12634_v33 }
 0x703   : > { %v7349_v15 = vpop.f32.mrf.mxu0 }
 0x704   : > { %v7336_v61 = vpop.f32.mrf.mxu3  ;;  %v7399_v43 = vadd.f32 %v7349_v15, %v7275_v29  ;;  %v16374_v29 = vrot.slane %v16005_v38, 2 }
 0x705   : > { %v7398_v24 = vadd.f32 %v7336_v61, %v7274_v34 }
 0x706   : > { %v7362_v18 = vpop.f32.mrf.mxu1  ;;  %12075 = vmatmul.msk.bf16.vlgmr.msra.gmra.mxu0 %vm5820_vm3, %v16153_v52 }
 0x707   : > { %v7400_v55 = vadd.f32 %v7362_v18, %v7276_v9  ;;  %v7325_v48 = vpop.f32.mrf.mxu2  ;;  %7984 = vmatpush.bf16.msra.mxu0 %v12634_v33 }
 0x709   : > { %12076 = vmatmul.msk.bf16.vlgmr.msra.gmra.mxu1 %vm5820_vm3, %v16158_v13 }
 0x70a   : > { %7997 = vmatpush.bf16.msra.mxu1 %v12634_v33 }
 0x70b   : > { %v7351_v60 = vpop.f32.mrf.mxu0 }
 0x70c   : > { %v7338_v44 = vpop.f32.mrf.mxu3  ;;  %12077 = vmatmul.msk.bf16.vlgmr.msra.gmra.mxu2 %vm5820_vm3, %v16267_v30 }
 0x70d   : > { %8010 = vmatpush.bf16.msra.mxu2 %v12634_v33 }
 0x70e   : > { %v7364_v11 = vpop.f32.mrf.mxu1 }
 0x70f   : > { %v7375_v34 = vpop.f32.mrf.mxu2 }
 0x710   : > { %v7401_v3 = vadd.f32 %v7375_v34, %v7277_v23 }
 0x711   : > { %12078 = vmatmul.msk.bf16.vlgmr.msra.gmra.mxu3 %vm5820_vm3, %v16374_v29 }
 0x712   : > { %8026 = vmatpush.bf16.msra.mxu3 %v12634_v33 }
 0x713   : > { %v7421_v9 = vpop.f32.mrf.mxu0 }
 0x714   : > { %v7391_v53 = vpop.f32.mrf.mxu3  ;;  %v7531_v2 = vadd.f32 %v7421_v9, %v7395_v42 }
 0x715   : > { %v7402_v15 = vadd.f32 %v7391_v53, %v7278_v26 }
 0x716   : > { %v7434_v61 = vpop.f32.mrf.mxu1  ;;  %12085 = vmatmul.msk.bf16.vlgmr.msrb.gmra.mxu0 %vm5820_vm3, %v15830_v51 }
 0x717   : > { %v7532_v38 = vadd.f32 %v7434_v61, %v7396_v7  ;;  %v7377_v18 = vpop.f32.mrf.mxu2  ;;  %8056 = vmatpush.bf16.msrb.mxu0 %v12635_v46 }
 0x718   : > { %v12636_v18 = vld [vmem:[%s17161_s3 + $0x88] sm:$0xff] }
 0x719   : > { %12086 = vmatmul.msk.bf16.vlgmr.msrb.gmra.mxu1 %vm5820_vm3, %v15849_v31 }
 0x71a   : > { %8069 = vmatpush.bf16.msrb.mxu1 %v12635_v46 }
 0x71b   : > { %v7423_v23 = vpop.f32.mrf.mxu0 }
 0x71c   : > { %v7393_v33 = vpop.f32.mrf.mxu3  ;;  %12087 = vmatmul.msk.bf16.vlgmr.msrb.gmra.mxu2 %vm5820_vm3, %v15861_v39 }
 0x71d   : > { %8082 = vmatpush.bf16.msrb.mxu2 %v12635_v46 }
 0x71e   : > { %v7436_v48 = vpop.f32.mrf.mxu1 }
 0x71f   : > { %v7447_v42 = vpop.f32.mrf.mxu2 }
 0x720   : > { %v7533_v26 = vadd.f32 %v7447_v42, %v7397_v1 }
 0x721   : > { %12088 = vmatmul.msk.bf16.vlgmr.msrb.gmra.mxu3 %vm5820_vm3, %v15882_v6 }
 0x722   : > { %8095 = vmatpush.bf16.msrb.mxu3 %v12635_v46 }
 0x723   : > { %v7473_v51 = vpop.f32.mrf.mxu0 }
 0x724   : > { %v7460_v7 = vpop.f32.mrf.mxu3  ;;  %v7535_v60 = vadd.f32 %v7473_v51, %v7399_v43 }
 0x725   : > { %v7534_v44 = vadd.f32 %v7460_v7, %v7398_v24 }
 0x726   : > { %v7486_v11 = vpop.f32.mrf.mxu1  ;;  %12089 = vmatmul.msk.bf16.vlgmr.msra.gmra.mxu0 %vm5820_vm3, %v15913_v21 }
 0x727   : > { %v7536_v34 = vadd.f32 %v7486_v11, %v7400_v55  ;;  %v7449_v9 = vpop.f32.mrf.mxu2  ;;  %8108 = vmatpush.bf16.msra.mxu0 %v12635_v46 }
 0x729   : > { %12090 = vmatmul.msk.bf16.vlgmr.msra.gmra.mxu1 %vm5820_vm3, %v15942_v0 }
 0x72a   : > { %8121 = vmatpush.bf16.msra.mxu1 %v12635_v46 }
 0x72b   : > { %v7475_v1 = vpop.f32.mrf.mxu0 }
 0x72c   : > { %v7462_v53 = vpop.f32.mrf.mxu3  ;;  %12091 = vmatmul.msk.bf16.vlgmr.msra.gmra.mxu2 %vm5820_vm3, %v17480_v62 }
 0x72d   : > { %8134 = vmatpush.bf16.msra.mxu2 %v12635_v46 }
 0x72e   : > { %v7488_v61 = vpop.f32.mrf.mxu1 }
 0x72f   : > { %v7499_v43 = vpop.f32.mrf.mxu2 }
 0x730   : > { %v7537_v24 = vadd.f32 %v7499_v43, %v7401_v3 }
 0x731   : > { %12092 = vmatmul.msk.bf16.vlgmr.msra.gmra.mxu3 %vm5820_vm3, %v15975_v50 }
 0x732   : > { %8162 = vmatpush.bf16.msra.mxu3 %v12635_v46 }
 0x733   : > { %v7557_v55 = vpop.f32.mrf.mxu0 }
 0x734   : > { %v7527_v23 = vpop.f32.mrf.mxu3  ;;  %v7656_v33 = vadd.f32 %v7557_v55, %v7531_v2 }
 0x735   : > { %v7538_v48 = vadd.f32 %v7527_v23, %v7402_v15 }
 0x736   : > { %v7570_v42 = vpop.f32.mrf.mxu1  ;;  %12099 = vmatmul.msk.bf16.vlgmr.msrb.gmra.mxu0 %vm5820_vm3, %v15888_v10 }
 0x737   : > { %v7657_v51 = vadd.f32 %v7570_v42, %v7532_v38  ;;  %v7501_v7 = vpop.f32.mrf.mxu2  ;;  %8192 = vmatpush.bf16.msrb.mxu0 %v12636_v18 }
 0x739   : > { %12100 = vmatmul.msk.bf16.vlgmr.msrb.gmra.mxu1 %vm5820_vm3, %v15927_v20 }
 0x73a   : > { %8205 = vmatpush.bf16.msrb.mxu1 %v12636_v18 }
 0x73b   : > { %v7559_v3 = vpop.f32.mrf.mxu0 }
 0x73c   : > { %v7529_v46 = vpop.f32.mrf.mxu3  ;;  %12101 = vmatmul.msk.bf16.vlgmr.msrb.gmra.mxu2 %vm5820_vm3, %v15937_v17 }
 0x73d   : > { %8218 = vmatpush.bf16.msrb.mxu2 %v12636_v18 }
 0x73e   : > { %v7572_v11 = vpop.f32.mrf.mxu1 }
 0x73f   : > { %v7583_v2 = vpop.f32.mrf.mxu2  ;;  %v12637_v11 = vld [vmem:[%s17161_s3 + $0x90] sm:$0xff] }
 0x740   : > { %v7658_v15 = vadd.f32 %v7583_v2, %v7533_v26  ;;  %v17483_v26 = vshll.u32 %v16016_v40, 16 }
 0x741   : > { %12102 = vmatmul.msk.bf16.vlgmr.msrb.gmra.mxu3 %vm5820_vm3, %v15953_v58 }
 0x742   : > { %8231 = vmatpush.bf16.msrb.mxu3 %v12636_v18  ;;  %v8150_v55 = vrot.slane %v17483_v26, 1 }
 0x743   : > { %v7609_v10 = vpop.f32.mrf.mxu0 }
 0x744   : > { %v7596_v38 = vpop.f32.mrf.mxu3  ;;  %v7660_v9 = vadd.f32 %v7609_v10, %v7535_v60 }
 0x745   : > { %v7659_v1 = vadd.f32 %v7596_v38, %v7534_v44  ;;  %v17484_v44 = vshrl.u32 %v16016_v40, 16 }
 0x746   : > { %v7622_v53 = vpop.f32.mrf.mxu1  ;;  %12103 = vmatmul.msk.bf16.vlgmr.msra.gmra.mxu0 %vm5820_vm3, %v15967_v14 }
 0x747   : > { %v7661_v61 = vadd.f32 %v7622_v53, %v7536_v34  ;;  %v7585_v43 = vpop.f32.mrf.mxu2  ;;  %8244 = vmatpush.bf16.msra.mxu0 %v12636_v18  ;;  %v16418_v7 = vor.u32 %v8150_v55, %v17484_v44 }
 0x749   : > { %12104 = vmatmul.msk.bf16.vlgmr.msra.gmra.mxu1 %vm5820_vm3, %v16202_v27 }
 0x74a   : > { %8257 = vmatpush.bf16.msra.mxu1 %v12636_v18 }
 0x74b   : > { %v7611_v23 = vpop.f32.mrf.mxu0 }
 0x74c   : > { %v7598_v42 = vpop.f32.mrf.mxu3  ;;  %12105 = vmatmul.msk.bf16.vlgmr.msra.gmra.mxu2 %vm5820_vm3, %v16311_v45 }
 0x74d   : > { %8270 = vmatpush.bf16.msra.mxu2 %v12636_v18 }
 0x74e   : > { %v7624_v60 = vpop.f32.mrf.mxu1 }
 0x74f   : > { %v7635_v34 = vpop.f32.mrf.mxu2 }
 0x750   : > { %v7662_v3 = vadd.f32 %v7635_v34, %v7537_v24 }
 0x751   : > { %12106 = vmatmul.msk.bf16.vlgmr.msra.gmra.mxu3 %vm5820_vm3, %v16418_v7 }
 0x752   : > { %8287 = vmatpush.bf16.msra.mxu3 %v12636_v18 }
 0x753   : > { %v7682_v46 = vpop.f32.mrf.mxu0 }
 0x754   : > { %v7652_v2 = vpop.f32.mrf.mxu3  ;;  %v7783_v10 = vadd.f32 %v7682_v46, %v7656_v33 }
 0x755   : > { %v7663_v38 = vadd.f32 %v7652_v2, %v7538_v48 }
 0x756   : > { %v7695_v53 = vpop.f32.mrf.mxu1  ;;  %12113 = vmatmul.msk.bf16.vlgmr.msrb.gmra.mxu0 %vm5820_vm3, %v16078_v22 }
 0x757   : > { %v7784_v43 = vadd.f32 %v7695_v53, %v7657_v51  ;;  %v7637_v26 = vpop.f32.mrf.mxu2  ;;  %8317 = vmatpush.bf16.msrb.mxu0 %v12637_v11 }
 0x758   : > { %v12638_v26 = vld [vmem:[%s17161_s3 + $0x98] sm:$0xff] }
 0x759   : > { %12114 = vmatmul.msk.bf16.vlgmr.msrb.gmra.mxu1 %vm5820_vm3, %v16083_v41 }
 0x75a   : > { %8330 = vmatpush.bf16.msrb.mxu1 %v12637_v11 }
 0x75b   : > { %v7684_v24 = vpop.f32.mrf.mxu0 }
 0x75c   : > { %v7654_v18 = vpop.f32.mrf.mxu3  ;;  %12115 = vmatmul.msk.bf16.vlgmr.msrb.gmra.mxu2 %vm5820_vm3, %v16088_v59 }
 0x75d   : > { %8343 = vmatpush.bf16.msrb.mxu2 %v12637_v11 }
 0x75e   : > { %v7697_v55 = vpop.f32.mrf.mxu1 }
 0x75f   : > { %v7708_v33 = vpop.f32.mrf.mxu2 }
 0x760   : > { %v7785_v48 = vadd.f32 %v7708_v33, %v7658_v15 }
 0x761   : > { %12116 = vmatmul.msk.bf16.vlgmr.msrb.gmra.mxu3 %vm5820_vm3, %v16093_v4 }
 0x762   : > { %8356 = vmatpush.bf16.msrb.mxu3 %v12637_v11 }
 0x763   : > { %v7734_v22 = vpop.f32.mrf.mxu0 }
 0x764   : > { %v7721_v51 = vpop.f32.mrf.mxu3  ;;  %v7787_v23 = vadd.f32 %v7734_v22, %v7660_v9  ;;  %v8276_v9 = vrot.slane %v16016_v40, 1 }
 0x765   : > { %v7786_v42 = vadd.f32 %v7721_v51, %v7659_v1 }
 0x766   : > { %v7747_v60 = vpop.f32.mrf.mxu1  ;;  %12117 = vmatmul.msk.bf16.vlgmr.msra.gmra.mxu0 %vm5820_vm3, %v16098_v57 }
 0x767   : > { %v7788_v44 = vadd.f32 %v7747_v60, %v7661_v61  ;;  %v7710_v34 = vpop.f32.mrf.mxu2  ;;  %8369 = vmatpush.bf16.msra.mxu0 %v12637_v11 }
 0x769   : > { %12118 = vmatmul.msk.bf16.vlgmr.msra.gmra.mxu1 %vm5820_vm3, %v16225_v28 }
 0x76a   : > { %8382 = vmatpush.bf16.msra.mxu1 %v12637_v11 }
 0x76b   : > { %v7736_v15 = vpop.f32.mrf.mxu0 }
 0x76c   : > { %v7723_v46 = vpop.f32.mrf.mxu3  ;;  %12119 = vmatmul.msk.bf16.vlgmr.msra.gmra.mxu2 %vm5820_vm3, %v16333_v5 }
 0x76d   : > { %8395 = vmatpush.bf16.msra.mxu2 %v12637_v11 }
 0x76e   : > { %v7749_v2 = vpop.f32.mrf.mxu1 }
 0x76f   : > { %v7760_v1 = vpop.f32.mrf.mxu2 }
 0x770   : > { %v7789_v53 = vadd.f32 %v7760_v1, %v7662_v3 }
 0x771   : > { %12120 = vmatmul.msk.bf16.vlgmr.msra.gmra.mxu3 %vm5820_vm3, %v8276_v9 }
 0x772   : > { %8414 = vmatpush.bf16.msra.mxu3 %v12637_v11 }
 0x773   : > { %v7809_v61 = vpop.f32.mrf.mxu0 }
 0x774   : > { %v7779_v24 = vpop.f32.mrf.mxu3  ;;  %v7908_v18 = vadd.f32 %v7809_v61, %v7783_v10 }
 0x775   : > { %v7790_v55 = vadd.f32 %v7779_v24, %v7663_v38 }
 0x776   : > { %v7822_v33 = vpop.f32.mrf.mxu1  ;;  %12127 = vmatmul.msk.bf16.vlgmr.msrb.gmra.mxu0 %vm5820_vm3, %v15985_v12 }
 0x777   : > { %v7909_v22 = vadd.f32 %v7822_v33, %v7784_v43  ;;  %v7762_v51 = vpop.f32.mrf.mxu2  ;;  %8444 = vmatpush.bf16.msrb.mxu0 %v12638_v26  ;;  %v12639_v33 = vld [vmem:[%s17161_s3 + $0xa0] sm:$0xff] }
 0x779   : > { %12128 = vmatmul.msk.bf16.vlgmr.msrb.gmra.mxu1 %vm5820_vm3, %v15990_v63 }
 0x77a   : > { %8457 = vmatpush.bf16.msrb.mxu1 %v12638_v26 }
 0x77b   : > { %v7811_v3 = vpop.f32.mrf.mxu0 }
 0x77c   : > { %v7781_v11 = vpop.f32.mrf.mxu3  ;;  %12129 = vmatmul.msk.bf16.vlgmr.msrb.gmra.mxu2 %vm5820_vm3, %v15992_v35 }
 0x77d   : > { %8470 = vmatpush.bf16.msrb.mxu2 %v12638_v26 }
 0x77e   : > { %v7824_v60 = vpop.f32.mrf.mxu1 }
 0x77f   : > { %v7835_v10 = vpop.f32.mrf.mxu2 }
 0x780   : > { %v7910_v38 = vadd.f32 %v7835_v10, %v7785_v48 }
 0x781   : > { %12130 = vmatmul.msk.bf16.vlgmr.msrb.gmra.mxu3 %vm5820_vm3, %v15997_v54 }
 0x782   : > { %8483 = vmatpush.bf16.msrb.mxu3 %v12638_v26 }
 0x783   : > { %v7861_v12 = vpop.f32.mrf.mxu0 }
 0x784   : > { %v7848_v43 = vpop.f32.mrf.mxu3  ;;  %v7912_v34 = vadd.f32 %v7861_v12, %v7787_v23 }
 0x785   : > { %v7911_v15 = vadd.f32 %v7848_v43, %v7786_v42 }
 0x786   : > { %v7874_v46 = vpop.f32.mrf.mxu1  ;;  %12131 = vmatmul.msk.bf16.vlgmr.msra.gmra.mxu0 %vm5820_vm3, %v15999_v36 }
 0x787   : > { %v7913_v2 = vadd.f32 %v7874_v46, %v7788_v44  ;;  %v7837_v1 = vpop.f32.mrf.mxu2  ;;  %8496 = vmatpush.bf16.msra.mxu0 %v12638_v26 }
 0x789   : > { %12132 = vmatmul.msk.bf16.vlgmr.msra.gmra.mxu1 %vm5820_vm3, %v16018_v16 }
 0x78a   : > { %8509 = vmatpush.bf16.msra.mxu1 %v12638_v26 }
 0x78b   : > { %v7863_v48 = vpop.f32.mrf.mxu0 }
 0x78c   : > { %v7850_v61 = vpop.f32.mrf.mxu3  ;;  %12133 = vmatmul.msk.bf16.vlgmr.msra.gmra.mxu2 %vm5820_vm3, %v16031_v49 }
 0x78d   : > { %8522 = vmatpush.bf16.msra.mxu2 %v12638_v26 }
 0x78e   : > { %v7876_v24 = vpop.f32.mrf.mxu1 }
 0x78f   : > { %v7887_v23 = vpop.f32.mrf.mxu2 }
 0x790   : > { %v7914_v42 = vadd.f32 %v7887_v23, %v7789_v53 }
 0x791   : > { %12134 = vmatmul.msk.bf16.vlgmr.msra.gmra.mxu3 %vm5820_vm3, %v16041_v37 }
 0x792   : > { %8539 = vmatpush.bf16.msra.mxu3 %v12638_v26 }
 0x793   : > { %v7934_v44 = vpop.f32.mrf.mxu0 }
 0x794   : > { %v7904_v51 = vpop.f32.mrf.mxu3  ;;  %v8032_v3 = vadd.f32 %v7934_v44, %v7908_v18 }
 0x795   : > { %v7915_v11 = vadd.f32 %v7904_v51, %v7790_v55 }
 0x796   : > { %v7947_v60 = vpop.f32.mrf.mxu1  ;;  %12141 = vmatmul.msk.bf16.vlgmr.msrb.gmra.mxu0 %vm5820_vm3, %v16138_v8 }
 0x797   : > { %v8033_v10 = vadd.f32 %v7947_v60, %v7909_v22  ;;  %v7889_v12 = vpop.f32.mrf.mxu2  ;;  %8569 = vmatpush.bf16.msrb.mxu0 %v12639_v33  ;;  %v12640_v60 = vld [vmem:[%s17161_s3 + $0xa8] sm:$0xff] }
 0x799   : > { %12142 = vmatmul.msk.bf16.vlgmr.msrb.gmra.mxu1 %vm5820_vm3, %v16143_v19 }
 0x79a   : > { %8582 = vmatpush.bf16.msrb.mxu1 %v12639_v33 }
 0x79b   : > { %v7936_v53 = vpop.f32.mrf.mxu0 }
 0x79c   : > { %v7906_v26 = vpop.f32.mrf.mxu3  ;;  %12143 = vmatmul.msk.bf16.vlgmr.msrb.gmra.mxu2 %vm5820_vm3, %v16148_v47 }
 0x79d   : > { %8595 = vmatpush.bf16.msrb.mxu2 %v12639_v33 }
 0x79e   : > { %v7949_v43 = vpop.f32.mrf.mxu1 }
 0x79f   : > { %v7960_v18 = vpop.f32.mrf.mxu2 }
 0x7a0   : > { %v8034_v55 = vadd.f32 %v7960_v18, %v7910_v38 }
 0x7a1   : > { %12144 = vmatmul.msk.bf16.vlgmr.msrb.gmra.mxu3 %vm5820_vm3, %v16153_v52 }
 0x7a2   : > { %8608 = vmatpush.bf16.msrb.mxu3 %v12639_v33 }
 0x7a3   : > { %v7986_v8 = vpop.f32.mrf.mxu0 }
 0x7a4   : > { %v7973_v22 = vpop.f32.mrf.mxu3  ;;  %v8036_v46 = vadd.f32 %v7986_v8, %v7912_v34  ;;  %v8528_v34 = vrot.slane %v16016_v40, 2 }
 0x7a5   : > { %v8035_v1 = vadd.f32 %v7973_v22, %v7911_v15 }
 0x7a6   : > { %v7999_v48 = vpop.f32.mrf.mxu1  ;;  %12145 = vmatmul.msk.bf16.vlgmr.msra.gmra.mxu0 %vm5820_vm3, %v16158_v13 }
 0x7a7   : > { %v8037_v61 = vadd.f32 %v7999_v48, %v7913_v2  ;;  %v7962_v24 = vpop.f32.mrf.mxu2  ;;  %8621 = vmatpush.bf16.msra.mxu0 %v12639_v33 }
 0x7a9   : > { %12146 = vmatmul.msk.bf16.vlgmr.msra.gmra.mxu1 %vm5820_vm3, %v16267_v30 }
 0x7aa   : > { %8634 = vmatpush.bf16.msra.mxu1 %v12639_v33 }
 0x7ab   : > { %v7988_v38 = vpop.f32.mrf.mxu0 }
 0x7ac   : > { %v7975_v23 = vpop.f32.mrf.mxu3  ;;  %12147 = vmatmul.msk.bf16.vlgmr.msra.gmra.mxu2 %vm5820_vm3, %v16374_v29 }
 0x7ad   : > { %8647 = vmatpush.bf16.msra.mxu2 %v12639_v33 }
 0x7ae   : > { %v8001_v44 = vpop.f32.mrf.mxu1 }
 0x7af   : > { %v8012_v15 = vpop.f32.mrf.mxu2 }
 0x7b0   : > { %v8038_v51 = vadd.f32 %v8012_v15, %v7914_v42 }
 0x7b1   : > { %12148 = vmatmul.msk.bf16.vlgmr.msra.gmra.mxu3 %vm5820_vm3, %v8528_v34 }
 0x7b2   : > { %8663 = vmatpush.bf16.msra.mxu3 %v12639_v33 }
 0x7b3   : > { %v8058_v2 = vpop.f32.mrf.mxu0 }
 0x7b4   : > { %v8028_v12 = vpop.f32.mrf.mxu3  ;;  %v8168_v53 = vadd.f32 %v8058_v2, %v8032_v3 }
 0x7b5   : > { %v8039_v26 = vadd.f32 %v8028_v12, %v7915_v11 }
 0x7b6   : > { %v8071_v43 = vpop.f32.mrf.mxu1  ;;  %12155 = vmatmul.msk.bf16.vlgmr.msrb.gmra.mxu0 %vm5820_vm3, %v15849_v31 }
 0x7b7   : > { %v8169_v18 = vadd.f32 %v8071_v43, %v8033_v10  ;;  %v8014_v8 = vpop.f32.mrf.mxu2  ;;  %8693 = vmatpush.bf16.msrb.mxu0 %v12640_v60 }
 0x7b9   : > { %12156 = vmatmul.msk.bf16.vlgmr.msrb.gmra.mxu1 %vm5820_vm3, %v15861_v39 }
 0x7ba   : > { %8706 = vmatpush.bf16.msrb.mxu1 %v12640_v60 }
 0x7bb   : > { %v8060_v42 = vpop.f32.mrf.mxu0 }
 0x7bc   : > { %v8030_v33 = vpop.f32.mrf.mxu3  ;;  %12157 = vmatmul.msk.bf16.vlgmr.msrb.gmra.mxu2 %vm5820_vm3, %v15882_v6 }
 0x7bd   : > { %8719 = vmatpush.bf16.msrb.mxu2 %v12640_v60 }
 0x7be   : > { %v8073_v22 = vpop.f32.mrf.mxu1 }
 0x7bf   : > { %v8084_v3 = vpop.f32.mrf.mxu2 }
 0x7c0   : > { %v8170_v11 = vadd.f32 %v8084_v3, %v8034_v55 }
 0x7c1   : > { %12158 = vmatmul.msk.bf16.vlgmr.msrb.gmra.mxu3 %vm5820_vm3, %v15913_v21 }
 0x7c2   : > { %8732 = vmatpush.bf16.msrb.mxu3 %v12640_v60 }
 0x7c3   : > { %v8110_v31 = vpop.f32.mrf.mxu0 }
 0x7c4   : > { %v8097_v10 = vpop.f32.mrf.mxu3  ;;  %v8172_v48 = vadd.f32 %v8110_v31, %v8036_v46  ;;  %v17486_v31 = vshrl.u32 %v16029_v32, 16 }
 0x7c5   : > { %v8171_v24 = vadd.f32 %v8097_v10, %v8035_v1 }
 0x7c6   : > { %v8123_v38 = vpop.f32.mrf.mxu1  ;;  %12159 = vmatmul.msk.bf16.vlgmr.msra.gmra.mxu0 %vm5820_vm3, %v15942_v0 }
 0x7c7   : > { %v8173_v39 = vadd.f32 %v8123_v38, %v8037_v61  ;;  %v8086_v23 = vpop.f32.mrf.mxu2  ;;  %8745 = vmatpush.bf16.msra.mxu0 %v12640_v60  ;;  %v12641_v61 = vld [vmem:[%s17161_s3 + $0xb0] sm:$0xff] }
 0x7c9   : > { %12160 = vmatmul.msk.bf16.vlgmr.msra.gmra.mxu1 %vm5820_vm3, %v17480_v62 }
 0x7ca   : > { %8758 = vmatpush.bf16.msra.mxu1 %v12640_v60 }
 0x7cb   : > { %v8112_v6 = vpop.f32.mrf.mxu0 }
 0x7cc   : > { %v8099_v55 = vpop.f32.mrf.mxu3  ;;  %12161 = vmatmul.msk.bf16.vlgmr.msra.gmra.mxu2 %vm5820_vm3, %v15975_v50 }
 0x7cd   : > { %8771 = vmatpush.bf16.msra.mxu2 %v12640_v60 }
 0x7ce   : > { %v8125_v21 = vpop.f32.mrf.mxu1 }
 0x7cf   : > { %v8136_v46 = vpop.f32.mrf.mxu2 }
 0x7d0   : > { %v8174_v1 = vadd.f32 %v8136_v46, %v8038_v51 }
 0x7d1   : > { %12162 = vmatmul.msk.bf16.vlgmr.msra.gmra.mxu3 %vm5820_vm3, %v16003_v25 }
 0x7d2   : > { %8799 = vmatpush.bf16.msra.mxu3 %v12640_v60 }
 0x7d3   : > { %v8194_v0 = vpop.f32.mrf.mxu0 }
 0x7d4   : > { %v8164_v62 = vpop.f32.mrf.mxu3  ;;  %v8293_v44 = vadd.f32 %v8194_v0, %v8168_v53 }
 0x7d5   : > { %v8175_v15 = vadd.f32 %v8164_v62, %v8039_v26 }
 0x7d6   : > { %v8207_v2 = vpop.f32.mrf.mxu1  ;;  %12169 = vmatmul.msk.bf16.vlgmr.msrb.gmra.mxu0 %vm5820_vm3, %v15927_v20 }
 0x7d7   : > { %v8294_v50 = vadd.f32 %v8207_v2, %v8169_v18  ;;  %v8138_v12 = vpop.f32.mrf.mxu2  ;;  %8829 = vmatpush.bf16.msrb.mxu0 %v12641_v61 }
 0x7d9   : > { %12170 = vmatmul.msk.bf16.vlgmr.msrb.gmra.mxu1 %vm5820_vm3, %v15937_v17 }
 0x7da   : > { %8842 = vmatpush.bf16.msrb.mxu1 %v12641_v61 }
 0x7db   : > { %v8196_v25 = vpop.f32.mrf.mxu0 }
 0x7dc   : > { %v8166_v51 = vpop.f32.mrf.mxu3  ;;  %12171 = vmatmul.msk.bf16.vlgmr.msrb.gmra.mxu2 %vm5820_vm3, %v15953_v58  ;;  %v17485_v58 = vshll.u32 %v16029_v32, 16  ;;  %v8913_v25 = vrot.slane %v16029_v32, 1 }
 0x7dd   : > { %8855 = vmatpush.bf16.msrb.mxu2 %v12641_v61 }
 0x7de   : > { %v8209_v60 = vpop.f32.mrf.mxu1  ;;  %v8787_v22 = vrot.slane %v17485_v58, 1 }
 0x7df   : > { %v8220_v53 = vpop.f32.mrf.mxu2 }
 0x7e0   : > { %v8295_v26 = vadd.f32 %v8220_v53, %v8170_v11 }
 0x7e1   : > { %12172 = vmatmul.msk.bf16.vlgmr.msrb.gmra.mxu3 %vm5820_vm3, %v15967_v14 }
 0x7e2   : > { %8868 = vmatpush.bf16.msrb.mxu3 %v12641_v61 }
 0x7e3   : > { %v8246_v20 = vpop.f32.mrf.mxu0 }
 0x7e4   : > { %v8233_v43 = vpop.f32.mrf.mxu3  ;;  %v8297_v18 = vadd.f32 %v8246_v20, %v8172_v48 }
 0x7e5   : > { %v8296_v8 = vadd.f32 %v8233_v43, %v8171_v24  ;;  %v12642_v24 = vld [vmem:[%s17161_s3 + $0xb8] sm:$0xff] }
 0x7e6   : > { %v8259_v42 = vpop.f32.mrf.mxu1  ;;  %12173 = vmatmul.msk.bf16.vlgmr.msra.gmra.mxu0 %vm5820_vm3, %v16202_v27  ;;  %v8788_v27 = vor.u32 %v8787_v22, %v17486_v31 }
 0x7e7   : > { %v8298_v17 = vadd.f32 %v8259_v42, %v8173_v39  ;;  %v8222_v33 = vpop.f32.mrf.mxu2  ;;  %8881 = vmatpush.bf16.msra.mxu0 %v12641_v61 }
 0x7e9   : > { %12174 = vmatmul.msk.bf16.vlgmr.msra.gmra.mxu1 %vm5820_vm3, %v16311_v45 }
 0x7ea   : > { %8894 = vmatpush.bf16.msra.mxu1 %v12641_v61 }
 0x7eb   : > { %v8248_v14 = vpop.f32.mrf.mxu0 }
 0x7ec   : > { %v8235_v3 = vpop.f32.mrf.mxu3  ;;  %12175 = vmatmul.msk.bf16.vlgmr.msra.gmra.mxu2 %vm5820_vm3, %v16418_v7 }
 0x7ed   : > { %8907 = vmatpush.bf16.msra.mxu2 %v12641_v61 }
 0x7ee   : > { %v8261_v11 = vpop.f32.mrf.mxu1 }
 0x7ef   : > { %v8272_v10 = vpop.f32.mrf.mxu2 }
 0x7f0   : > { %v8299_v48 = vadd.f32 %v8272_v10, %v8174_v1 }
 0x7f1   : > { %12176 = vmatmul.msk.bf16.vlgmr.msra.gmra.mxu3 %vm5820_vm3, %v8788_v27 }
 0x7f2   : > { %8924 = vmatpush.bf16.msra.mxu3 %v12641_v61 }
 0x7f3   : > { %v8319_v45 = vpop.f32.mrf.mxu0 }
 0x7f4   : > { %v8289_v38 = vpop.f32.mrf.mxu3  ;;  %v8420_v39 = vadd.f32 %v8319_v45, %v8293_v44  ;;  %v17487_v45 = vld [vmem:[#allocation11_spill] sm:$0xff] }
 0x7f5   : > { %v8300_v23 = vadd.f32 %v8289_v38, %v8175_v15 }
 0x7f6   : > { %v8332_v6 = vpop.f32.mrf.mxu1  ;;  %12183 = vmatmul.msk.bf16.vlgmr.msrb.gmra.mxu0 %vm5820_vm3, %v16083_v41 }
 0x7f7   : > { %v8421_v7 = vadd.f32 %v8332_v6, %v8294_v50  ;;  %v8274_v55 = vpop.f32.mrf.mxu2  ;;  %8954 = vmatpush.bf16.msrb.mxu0 %v12642_v24 }
 0x7f9   : > { %12184 = vmatmul.msk.bf16.vlgmr.msrb.gmra.mxu1 %vm5820_vm3, %v16088_v59 }
 0x7fa   : > { %8967 = vmatpush.bf16.msrb.mxu1 %v12642_v24 }
 0x7fb   : > { %v8321_v21 = vpop.f32.mrf.mxu0 }
 0x7fc   : > { %v8291_v46 = vpop.f32.mrf.mxu3  ;;  %12185 = vmatmul.msk.bf16.vlgmr.msrb.gmra.mxu2 %vm5820_vm3, %v16093_v4 }
 0x7fd   : > { %8980 = vmatpush.bf16.msrb.mxu2 %v12642_v24 }
 0x7fe   : > { %v8334_v1 = vpop.f32.mrf.mxu1 }
 0x7ff   : > { %v8345_v0 = vpop.f32.mrf.mxu2 }
 0x800   : > { %v8422_v61 = vadd.f32 %v8345_v0, %v8295_v26 }
 0x801   : > { %12186 = vmatmul.msk.bf16.vlgmr.msrb.gmra.mxu3 %vm5820_vm3, %v16098_v57 }
 0x802   : > { %8993 = vmatpush.bf16.msrb.mxu3 %v12642_v24 }
 0x803   : > { %v8371_v41 = vpop.f32.mrf.mxu0 }
 0x804   : > { %v8358_v62 = vpop.f32.mrf.mxu3  ;;  %v8424_v44 = vadd.f32 %v8371_v41, %v8297_v18 }
 0x805   : > { %v8423_v15 = vadd.f32 %v8358_v62, %v8296_v8 }
 0x806   : > { %v8384_v2 = vpop.f32.mrf.mxu1  ;;  %12187 = vmatmul.msk.bf16.vlgmr.msra.gmra.mxu0 %vm5820_vm3, %v16225_v28 }
 0x807   : > { %v8425_v59 = vadd.f32 %v8384_v2, %v8298_v17  ;;  %v8347_v50 = vpop.f32.mrf.mxu2  ;;  %9006 = vmatpush.bf16.msra.mxu0 %v12642_v24 }
 0x809   : > { %12188 = vmatmul.msk.bf16.vlgmr.msra.gmra.mxu1 %vm5820_vm3, %v16333_v5  ;;  %v12643_v5 = vld [vmem:[%s17161_s3 + $0xc0] sm:$0xff] }
 0x80a   : > { %9019 = vmatpush.bf16.msra.mxu1 %v12642_v24 }
 0x80b   : > { %v8373_v4 = vpop.f32.mrf.mxu0 }
 0x80c   : > { %v8360_v12 = vpop.f32.mrf.mxu3  ;;  %12189 = vmatmul.msk.bf16.vlgmr.msra.gmra.mxu2 %vm5820_vm3, %v8276_v9 }
 0x80d   : > { %9032 = vmatpush.bf16.msra.mxu2 %v12642_v24 }
 0x80e   : > { %v8386_v57 = vpop.f32.mrf.mxu1 }
 0x80f   : > { %v8397_v51 = vpop.f32.mrf.mxu2 }
 0x810   : > { %v8426_v60 = vadd.f32 %v8397_v51, %v8299_v48 }
 0x811   : > { %12190 = vmatmul.msk.bf16.vlgmr.msra.gmra.mxu3 %vm5820_vm3, %v8913_v25 }
 0x812   : > { %9051 = vmatpush.bf16.msra.mxu3 %v12642_v24  ;;  %v17488_v24 = vor.u32 %v16049_v56, %v17487_v45 }
 0x813   : > { %v8446_v28 = vpop.f32.mrf.mxu0 }
 0x814   : > { %v8416_v53 = vpop.f32.mrf.mxu3  ;;  %v8545_v26 = vadd.f32 %v8446_v28, %v8420_v39 }
 0x815   : > { %v8427_v20 = vadd.f32 %v8416_v53, %v8300_v23 }
 0x816   : > { %v8459_v43 = vpop.f32.mrf.mxu1  ;;  %12197 = vmatmul.msk.bf16.vlgmr.msrb.gmra.mxu0 %vm5820_vm3, %v15990_v63 }
 0x817   : > { %v8546_v9 = vadd.f32 %v8459_v43, %v8421_v7  ;;  %v8399_v18 = vpop.f32.mrf.mxu2  ;;  %9081 = vmatpush.bf16.msrb.mxu0 %v12643_v5 }
 0x819   : > { %12198 = vmatmul.msk.bf16.vlgmr.msrb.gmra.mxu1 %vm5820_vm3, %v15992_v35 }
 0x81a   : > { %9094 = vmatpush.bf16.msrb.mxu1 %v12643_v5 }
 0x81b   : > { %v8448_v8 = vpop.f32.mrf.mxu0 }
 0x81c   : > { %v8418_v42 = vpop.f32.mrf.mxu3  ;;  %12199 = vmatmul.msk.bf16.vlgmr.msrb.gmra.mxu2 %vm5820_vm3, %v15997_v54 }
 0x81d   : > { %9107 = vmatpush.bf16.msrb.mxu2 %v12643_v5 }
 0x81e   : > { %v8461_v17 = vpop.f32.mrf.mxu1 }
 0x81f   : > { %v8472_v33 = vpop.f32.mrf.mxu2 }
 0x820   : > { %v8547_v58 = vadd.f32 %v8472_v33, %v8422_v61 }
 0x821   : > { %12200 = vmatmul.msk.bf16.vlgmr.msrb.gmra.mxu3 %vm5820_vm3, %v15999_v36 }
 0x822   : > { %9120 = vmatpush.bf16.msrb.mxu3 %v12643_v5 }
 0x823   : > { %v8498_v63 = vpop.f32.mrf.mxu0 }
 0x824   : > { %v8485_v22 = vpop.f32.mrf.mxu3  ;;  %v8549_v14 = vadd.f32 %v8498_v63, %v8424_v44 }
 0x825   : > { %v8548_v3 = vadd.f32 %v8485_v22, %v8423_v15  ;;  %v9165_v15 = vrot.slane %v16029_v32, 2 }
 0x826   : > { %v8511_v11 = vpop.f32.mrf.mxu1  ;;  %12201 = vmatmul.msk.bf16.vlgmr.msra.gmra.mxu0 %vm5820_vm3, %v16018_v16 }
 0x827   : > { %v8550_v35 = vadd.f32 %v8511_v11, %v8425_v59  ;;  %v8474_v31 = vpop.f32.mrf.mxu2  ;;  %9133 = vmatpush.bf16.msra.mxu0 %v12643_v5 }
 0x829   : > { %12202 = vmatmul.msk.bf16.vlgmr.msra.gmra.mxu1 %vm5820_vm3, %v16031_v49 }
 0x82a   : > { %9146 = vmatpush.bf16.msra.mxu1 %v12643_v5 }
 0x82b   : > { %v8500_v54 = vpop.f32.mrf.mxu0 }
 0x82c   : > { %v8487_v27 = vpop.f32.mrf.mxu3  ;;  %12203 = vmatmul.msk.bf16.vlgmr.msra.gmra.mxu2 %vm5820_vm3, %v16041_v37 }
 0x82d   : > { %9159 = vmatpush.bf16.msra.mxu2 %v12643_v5 }
 0x82e   : > { %v8513_v36 = vpop.f32.mrf.mxu1 }
 0x82f   : > { %v8524_v10 = vpop.f32.mrf.mxu2 }
 0x830   : > { %v8551_v48 = vadd.f32 %v8524_v10, %v8426_v60 }
 0x831   : > { %12204 = vmatmul.msk.bf16.vlgmr.msra.gmra.mxu3 %vm5820_vm3, %v17488_v24 }
 0x832   : > { %9176 = vmatpush.bf16.msra.mxu3 %v12643_v5 }
 0x833   : > { %v8571_v16 = vpop.f32.mrf.mxu0 }
 0x834   : > { %v8541_v38 = vpop.f32.mrf.mxu3  ;;  %v8669_v39 = vadd.f32 %v8571_v16, %v8545_v26 }
 0x835   : > { %v8552_v49 = vadd.f32 %v8541_v38, %v8427_v20 }
 0x836   : > { %v8584_v23 = vpop.f32.mrf.mxu1  ;;  %12211 = vmatmul.msk.bf16.vlgmr.msrb.gmra.mxu0 %vm5820_vm3, %v16143_v19 }
 0x837   : > { %v8670_v6 = vadd.f32 %v8584_v23, %v8546_v9  ;;  %v8526_v37 = vpop.f32.mrf.mxu2 }
 0x839   : > { %12212 = vmatmul.msk.bf16.vlgmr.msrb.gmra.mxu1 %vm5820_vm3, %v16148_v47 }
 0x83b   : > { %v8573_v7 = vpop.f32.mrf.mxu0 }
 0x83c   : > { %v8543_v55 = vpop.f32.mrf.mxu3  ;;  %12213 = vmatmul.msk.bf16.vlgmr.msrb.gmra.mxu2 %vm5820_vm3, %v16153_v52 }
 0x83e   : > { %v8586_v56 = vpop.f32.mrf.mxu1 }
 0x83f   : > { %v8597_v21 = vpop.f32.mrf.mxu2 }
 0x840   : > { %v8671_v46 = vadd.f32 %v8597_v21, %v8547_v58 }
 0x841   : > { %12214 = vmatmul.msk.bf16.vlgmr.msrb.gmra.mxu3 %vm5820_vm3, %v16158_v13 }
 0x843   : > { %v8623_v1 = vpop.f32.mrf.mxu0 }
 0x844   : > { %v8610_v0 = vpop.f32.mrf.mxu3  ;;  %v8673_v61 = vadd.f32 %v8623_v1, %v8549_v14 }
 0x845   : > { %v8672_v19 = vadd.f32 %v8610_v0, %v8548_v3 }
 0x846   : > { %v8636_v41 = vpop.f32.mrf.mxu1  ;;  %12215 = vmatmul.msk.bf16.vlgmr.msra.gmra.mxu0 %vm5820_vm3, %v16267_v30 }
 0x847   : > { %v8674_v47 = vadd.f32 %v8636_v41, %v8550_v35  ;;  %v8599_v62 = vpop.f32.mrf.mxu2 }
 0x849   : > { %12216 = vmatmul.msk.bf16.vlgmr.msra.gmra.mxu1 %vm5820_vm3, %v16374_v29 }
 0x84b   : > { %v8625_v52 = vpop.f32.mrf.mxu0 }
 0x84c   : > { %v8612_v44 = vpop.f32.mrf.mxu3  ;;  %12217 = vmatmul.msk.bf16.vlgmr.msra.gmra.mxu2 %vm5820_vm3, %v8528_v34 }
 0x84e   : > { %v8638_v13 = vpop.f32.mrf.mxu1 }
 0x84f   : > { %v8649_v2 = vpop.f32.mrf.mxu2  ;;  %v12646_v13 = vld [vmem:[%s17163_s5 + $0x10] sm:$0xff] }
 0x850   : > { %v8675_v59 = vadd.f32 %v8649_v2, %v8551_v48 }
 0x851   : > { %12218 = vmatmul.msk.bf16.vlgmr.msra.gmra.mxu3 %vm5820_vm3, %v9165_v15 }
 0x853   : > { %v8695_v50 = vpop.f32.mrf.mxu0 }
 0x854   : > { %v8665_v30 = vpop.f32.mrf.mxu3  ;;  %v16582_v4 = vadd.f32 %v8695_v50, %v8669_v39 }
 0x855   : > { %v8676_v12 = vadd.f32 %v8665_v30, %v8552_v49 }
 0x856   : > { %v8708_v57 = vpop.f32.mrf.mxu1 }
 0x857   : > { %v16584_v29 = vadd.f32 %v8708_v57, %v8670_v6  ;;  %v8651_v25 = vpop.f32.mrf.mxu2 }
 0x858   : > { %v16612_v25 = vld [vmem:[%s17162_s4] ss:$0 sm:$0xff] }
 0x85b   : > { %v8697_v51 = vpop.f32.mrf.mxu0 }
 0x85c   : > { %v8667_v40 = vpop.f32.mrf.mxu3 }
 0x85e   : > { %v8710_v60 = vpop.f32.mrf.mxu1 }
 0x85f   : > { %v8721_v34 = vpop.f32.mrf.mxu2  ;;  %v12645_v60 = vld [vmem:[%s17163_s5 + $0x8] sm:$0xff] }
 0x860   : > { %v16586_v28 = vadd.f32 %v8721_v34, %v8671_v46 }
 0x863   : > { %v8747_v32 = vpop.f32.mrf.mxu0 }
 0x864   : > { %v8734_v5 = vpop.f32.mrf.mxu3  ;;  %v8809_v53 = vadd.f32 %v8747_v32, %v8673_v61 }
 0x865   : > { %v16588_v26 = vadd.f32 %v8734_v5, %v8672_v19 }
 0x866   : > { %v8760_v20 = vpop.f32.mrf.mxu1 }
 0x867   : > { %v8810_v43 = vadd.f32 %v8760_v20, %v8674_v47  ;;  %v8723_v9 = vpop.f32.mrf.mxu2  ;;  %v12647_v47 = vld [vmem:[%s17163_s5 + $0x18] sm:$0xff] }
 0x868   : > { %9259 = vmatpush.bf16.msrb.mxu0 %v12647_v47  ;;  %9285 = vmatpush.bf16.msrb.mxu1 %v12647_v47 }
 0x869   : > { %9311 = vmatpush.bf16.msrb.mxu2 %v12647_v47  ;;  %9337 = vmatpush.bf16.msrb.mxu3 %v12647_v47 }
 0x86b   : > { %v8749_v18 = vpop.f32.mrf.mxu0 }
 0x86c   : > { %v8736_v8 = vpop.f32.mrf.mxu3  ;;  %9260 = vmatpush.bf16.msrb.mxu0 %v12646_v13  ;;  %9286 = vmatpush.bf16.msrb.mxu1 %v12646_v13 }
 0x86d   : > { %9312 = vmatpush.bf16.msrb.mxu2 %v12646_v13  ;;  %9338 = vmatpush.bf16.msrb.mxu3 %v12646_v13 }
 0x86e   : > { %v8762_v42 = vpop.f32.mrf.mxu1 }
 0x86f   : > { %v8773_v17 = vpop.f32.mrf.mxu2 }
 0x870   : > { %v8811_v33 = vadd.f32 %v8773_v17, %v8675_v59  ;;  %9365 = vmatpush.bf16.msra.mxu0 %v12645_v60  ;;  %9381 = vmatpush.bf16.msra.mxu1 %v12645_v60 }
 0x871   : > { %9397 = vmatpush.bf16.msra.mxu2 %v12645_v60  ;;  %9413 = vmatpush.bf16.msra.mxu3 %v12645_v60 }
 0x873   : > { %v8831_v58 = vpop.f32.mrf.mxu0 }
 0x874   : > { %v8801_v63 = vpop.f32.mrf.mxu3  ;;  %v8930_v30 = vadd.f32 %v8831_v58, %v16582_v4  ;;  %v12644_v4 = vld [vmem:[%s17163_s5] sm:$0xff] }
 0x875   : > { %v8812_v22 = vadd.f32 %v8801_v63, %v8676_v12  ;;  %9366 = vmatpush.bf16.msra.mxu0 %v12644_v4  ;;  %9382 = vmatpush.bf16.msra.mxu1 %v12644_v4 }
 0x876   : > { %v8844_v14 = vpop.f32.mrf.mxu1  ;;  %9398 = vmatpush.bf16.msra.mxu2 %v12644_v4  ;;  %9414 = vmatpush.bf16.msra.mxu3 %v12644_v4 }
 0x877   : > { %v8775_v3 = vpop.f32.mrf.mxu2  ;;  %v8931_v51 = vadd.f32 %v8844_v14, %v16584_v29 }
 0x87b   : > { %v8833_v11 = vpop.f32.mrf.mxu0 }
 0x87c   : > { %v8803_v35 = vpop.f32.mrf.mxu3 }
 0x87e   : > { %v8846_v31 = vpop.f32.mrf.mxu1 }
 0x87f   : > { %v16590_v54 = vpop.f32.mrf.mxu2 }
 0x883   : > { %v8883_v27 = vpop.f32.mrf.mxu0 }
 0x884   : > { %v16592_v36 = vpop.f32.mrf.mxu3  ;;  %v8934_v10 = vadd.f32 %v8883_v27, %v8809_v53 }
 0x886   : > { %v8896_v48 = vpop.f32.mrf.mxu1 }
 0x887   : > { %v8935_v45 = vadd.f32 %v8896_v48, %v8810_v43  ;;  %v8859_v24 = vpop.f32.mrf.mxu2  ;;  %v8933_v48 = vadd.f32 %v16592_v36, %v16588_v26 }
 0x88b   : > { %v8885_v16 = vpop.f32.mrf.mxu0 }
 0x88c   : > { %v8872_v38 = vpop.f32.mrf.mxu3 }
 0x88e   : > { %v8898_v39 = vpop.f32.mrf.mxu1 }
 0x88f   : > { %v8909_v49 = vpop.f32.mrf.mxu2 }
 0x890   : > { %v8936_v23 = vadd.f32 %v8909_v49, %v8811_v33 }
 0x893   : > { %v8956_v6 = vpop.f32.mrf.mxu0 }
 0x894   : > { %v8926_v37 = vpop.f32.mrf.mxu3  ;;  %v9057_v57 = vadd.f32 %v8956_v6, %v8930_v30 }
 0x895   : > { %v8937_v7 = vadd.f32 %v8926_v37, %v8812_v22  ;;  %v8932_v22 = vadd.f32 %v16590_v54, %v16586_v28 }
 0x896   : > { %v8969_v55 = vpop.f32.mrf.mxu1 }
 0x897   : > { %v8911_v56 = vpop.f32.mrf.mxu2  ;;  %v9058_v5 = vadd.f32 %v8969_v55, %v8931_v51  ;;  %v12649_v55 = vld [vmem:[%s17163_s5 + $0x28] sm:$0xff] }
 0x89b   : > { %v8958_v21 = vpop.f32.mrf.mxu0 }
 0x89c   : > { %v8928_v46 = vpop.f32.mrf.mxu3 }
 0x89e   : > { %v8971_v1 = vpop.f32.mrf.mxu1 }
 0x89f   : > { %v8982_v0 = vpop.f32.mrf.mxu2 }
 0x8a0   : > { %v9059_v35 = vadd.f32 %v8982_v0, %v8932_v22  ;;  %v12652_v22 = vld [vmem:[%s17163_s5 + $0x40] sm:$0xff] }
 0x8a3   : > { %v9008_v61 = vpop.f32.mrf.mxu0 }
 0x8a4   : > { %v16594_v19 = vpop.f32.mrf.mxu3  ;;  %v16596_v41 = vadd.f32 %v9008_v61, %v8934_v10 }
 0x8a5   : > { %v9060_v54 = vadd.f32 %v16594_v19, %v8933_v48 }
 0x8a6   : > { %v9021_v62 = vpop.f32.mrf.mxu1 }
 0x8a7   : > { %v16601_v52 = vadd.f32 %v9021_v62, %v8935_v45  ;;  %v8984_v44 = vpop.f32.mrf.mxu2 }
 0x8ab   : > { %v9010_v15 = vpop.f32.mrf.mxu0 }
 0x8ac   : > { %v8997_v2 = vpop.f32.mrf.mxu3 }
 0x8ae   : > { %v9023_v59 = vpop.f32.mrf.mxu1 }
 0x8af   : > { %v9034_v50 = vpop.f32.mrf.mxu2 }
 0x8b0   : > { %v16607_v12 = vadd.f32 %v9034_v50, %v8936_v23 }
 0x8b3   : > { %v9083_v40 = vpop.f32.mrf.mxu0 }
 0x8b4   : > { %v9053_v34 = vpop.f32.mrf.mxu3  ;;  %v9182_v32 = vadd.f32 %v9083_v40, %v9057_v57 }
 0x8b5   : > { %v16618_v53 = vadd.f32 %v9053_v34, %v8937_v7 }
 0x8b6   : > { %v9194_v20 = vadd.f32 %v16612_v25, %v9182_v32  ;;  %v9096_v43 = vpop.f32.mrf.mxu1 }
 0x8b7   : > { %v9183_v29 = vadd.f32 %v9096_v43, %v9058_v5  ;;  %v9036_v9 = vpop.f32.mrf.mxu2 }
 0x8b8   : > { %v9202_v18 = vmax.f32 %v9194_v20, 0.0 }
 0x8b9   : > { %v9195_v8 = vadd.f32 %v16612_v25, %v9183_v29 }
 0x8ba   : > { %v16625_v42 = vpack.c.bf16 %v9202_v18, %v9202_v18 }
 0x8bb   : > { %v9203_v17 = vmax.f32 %v9195_v8, 0.0  ;;  %v9085_v33 = vpop.f32.mrf.mxu0 }
 0x8bc   : > { %v9228_v58 = vunpack.c.l.b16 %v16625_v42  ;;  %v9055_v63 = vpop.f32.mrf.mxu3 }
 0x8bd   : > { %v16630_v14 = vpack.c.bf16 %v9203_v17, %v9203_v17 }
 0x8be   : > { %v16632_v3 = vpack.c.b16 %v9228_v58, %v9228_v58  ;;  %v9098_v11 = vpop.f32.mrf.mxu1  ;;  %v12650_v58 = vld [vmem:[%s17163_s5 + $0x30] sm:$0xff] }
 0x8bf   : > { %v9267_v31 = vunpack.c.l.b16 %v16630_v14  ;;  %v9109_v27 = vpop.f32.mrf.mxu2 }
 0x8c0   : > { %v9233_v10 = vshll.u32 %v16632_v3, 16  ;;  %v9184_v24 = vadd.f32 %v9109_v27, %v9059_v35  ;;  %v9231_v16 = vshrl.u32 %v16632_v3, 16 }
 0x8c1   : > { %v16638_v45 = vpack.c.b16 %v9267_v31, %v9267_v31 }
 0x8c2   : > { %v9235_v28 = vrot.slane %v9233_v10, 1  ;;  %v9196_v23 = vadd.f32 %v16612_v25, %v9184_v24  ;;  %v9514_v11 = vrot.slane %v9231_v16, 1  ;;  %v9515_v35 = vrot.slane %v9233_v10, 2  ;;  %v12655_v24 = vld [vmem:[%s17163_s5 + $0x58] sm:$0xff] }
 0x8c3   : > { %v9272_v38 = vshll.u32 %v16638_v45, 16  ;;  %v9135_v39 = vpop.f32.mrf.mxu0  ;;  %v9270_v6 = vshrl.u32 %v16638_v45, 16  ;;  %v9454_v63 = vrot.slane %v16638_v45, 1 }
 0x8c4   : > { %v9236_v49 = vor.u32 %v9235_v28, %v9231_v16  ;;  %v9122_v26 = vpop.f32.mrf.mxu3  ;;  %v9186_v36 = vadd.f32 %v9135_v39, %v16596_v41  ;;  %v9204_v56 = vmax.f32 %v9196_v23, 0.0  ;;  %v12648_v41 = vld [vmem:[%s17163_s5 + $0x20] sm:$0xff]  ;;  %v9516_v16 = vor.u32 %v9515_v35, %v9514_v11 }
 0x8c5   : > { %v9274_v37 = vrot.slane %v9272_v38, 1  ;;  %v9185_v7 = vadd.f32 %v9122_v26, %v9060_v54  ;;  %v9545_v27 = vrot.slane %v9270_v6, 1  ;;  %v9546_v48 = vrot.slane %v9272_v38, 2  ;;  %v12654_v54 = vld [vmem:[%s17163_s5 + $0x50] sm:$0xff] }
 0x8c6   : > { %v16656_v21 = vadd.f32 %v16612_v25, %v9186_v36  ;;  %v9148_v46 = vpop.f32.mrf.mxu1  ;;  %12231 = vmatmul.msk.bf16.vlgmr.msrb.gmra.mxu0 %vm9249_vm4, %v9236_v49  ;;  %v16668_v47 = vpack.c.bf16 %v9204_v56, %v9204_v56  ;;  %v12657_v36 = vld [vmem:[%s17163_s5 + $0x68] sm:$0xff]  ;;  %v12659_v56 = vld [vmem:[%s17163_s5 + $0x78] sm:$0xff] }
 0x8c7   : > { %v9197_v1 = vadd.f32 %v16612_v25, %v9185_v7  ;;  %v9187_v0 = vadd.f32 %v9148_v46, %v16601_v52  ;;  %v16663_v61 = vor.u32 %v9274_v37, %v9270_v6  ;;  %v9111_v19 = vpop.f32.mrf.mxu2  ;;  %9447 = vmatpush.bf16.msrb.mxu0 %v12649_v55  ;;  %v16757_v10 = vor.u32 %v9546_v48, %v9545_v27  ;;  %v12669_v27 = vld [vmem:[%s17163_s5 + $0xc8] sm:$0xff] }
 0x8c8   : > { %v9293_v52 = vunpack.c.l.b16 %v16668_v47  ;;  %v9611_v6 = vrot.slane %v16632_v3, 2  ;;  %v9640_v7 = vrot.slane %v16638_v45, 2  ;;  %v12661_v19 = vld [vmem:[%s17163_s5 + $0x88] sm:$0xff] }
 0x8c9   : > { %v9205_v62 = vmax.f32 %v9197_v1, 0.0  ;;  %v16671_v44 = vadd.f32 %v16612_v25, %v9187_v0  ;;  %12232 = vmatmul.msk.bf16.vlgmr.msrb.gmra.mxu1 %vm9249_vm4, %v16663_v61  ;;  %v12658_v1 = vld [vmem:[%s17163_s5 + $0x70] sm:$0xff]  ;;  %v9206_v0 = vmax.f32 %v16656_v21, 0.0  ;;  %v12660_v21 = vld [vmem:[%s17163_s5 + $0x80] sm:$0xff] }
 0x8ca   : > { %9464 = vmatpush.bf16.msrb.mxu1 %v12649_v55  ;;  %v16678_v2 = vpack.c.b16 %v9293_v52, %v9293_v52 }
 0x8cb   : > { %v16676_v13 = vpack.c.bf16 %v9205_v62, %v9205_v62  ;;  %v9137_v15 = vpop.f32.mrf.mxu0  ;;  %9448 = vmatpush.bf16.msrb.mxu0 %v12648_v41 }
 0x8cc   : > { %v9124_v59 = vpop.f32.mrf.mxu3  ;;  %v9298_v30 = vshll.u32 %v16678_v2, 16  ;;  %v9296_v34 = vshrl.u32 %v16678_v2, 16  ;;  %v16740_v31 = vrot.slane %v16678_v2, 1 }
 0x8cd   : > { %v9319_v50 = vunpack.c.l.b16 %v16676_v13 }
 0x8ce   : > { %v9150_v57 = vpop.f32.mrf.mxu1  ;;  %9465 = vmatpush.bf16.msrb.mxu1 %v12648_v41  ;;  %v9300_v32 = vrot.slane %v9298_v30, 1  ;;  %v9564_v38 = vrot.slane %v9296_v34, 1  ;;  %v9565_v39 = vrot.slane %v9298_v30, 2 }
 0x8cf   : > { %v16682_v51 = vpack.c.b16 %v9319_v50, %v9319_v50  ;;  %v9161_v40 = vpop.f32.mrf.mxu2  ;;  %v12662_v50 = vld [vmem:[%s17163_s5 + $0x90] sm:$0xff]  ;;  %v12665_v57 = vld [vmem:[%s17163_s5 + $0xa8] sm:$0xff] }
 0x8d0   : > { %v9188_v60 = vadd.f32 %v9161_v40, %v16607_v12  ;;  %v16694_v20 = vor.u32 %v9300_v32, %v9296_v34  ;;  %v12651_v12 = vld [vmem:[%s17163_s5 + $0x38] sm:$0xff]  ;;  %v16770_v26 = vor.u32 %v9565_v39, %v9564_v38  ;;  %v12668_v38 = vld [vmem:[%s17163_s5 + $0xc0] sm:$0xff] }
 0x8d1   : > { %v9324_v5 = vshll.u32 %v16682_v51, 16  ;;  %v9322_v43 = vshrl.u32 %v16682_v51, 16  ;;  %v16752_v28 = vrot.slane %v16682_v51, 1  ;;  %v16799_v46 = vrot.slane %v16682_v51, 2 }
 0x8d2   : > { %v16690_v4 = vadd.f32 %v16612_v25, %v9188_v60  ;;  %12233 = vmatmul.msk.bf16.vlgmr.msrb.gmra.mxu2 %vm9249_vm4, %v16694_v20  ;;  %v12664_v60 = vld [vmem:[%s17163_s5 + $0xa0] sm:$0xff] }
 0x8d3   : > { %v9326_v29 = vrot.slane %v9324_v5, 1  ;;  %9481 = vmatpush.bf16.msrb.mxu2 %v12649_v55  ;;  %v9583_v49 = vrot.slane %v9322_v43, 1  ;;  %v9584_v23 = vrot.slane %v9324_v5, 2 }
 0x8d4   : > { %v9178_v9 = vpop.f32.mrf.mxu3 }
 0x8d5   : > { %v9189_v18 = vadd.f32 %v9178_v9, %v16618_v53  ;;  %v16705_v8 = vor.u32 %v9326_v29, %v9322_v43  ;;  %v16778_v37 = vor.u32 %v9584_v23, %v9583_v49 }
 0x8d6   : > { %12243 = vmatmul.msk.bf16.vlgmr.msra.gmra.mxu0 %vm9249_vm4, %v16625_v42  ;;  %v9425_v42 = vrot.slane %v16632_v3, 1  ;;  %v16791_v3 = vrot.slane %v16678_v2, 2  ;;  %v12663_v2 = vld [vmem:[%s17163_s5 + $0x98] sm:$0xff] }
 0x8d7   : > { %v16710_v17 = vadd.f32 %v16612_v25, %v9189_v18  ;;  %12234 = vmatmul.msk.bf16.vlgmr.msrb.gmra.mxu3 %vm9249_vm4, %v16705_v8  ;;  %v9163_v33 = vpop.f32.mrf.mxu2  ;;  %9538 = vmatpush.bf16.msra.mxu0 %v12651_v12  ;;  %v12653_v25 = vld [vmem:[%s17163_s5 + $0x48] sm:$0xff] }
 0x8d8   : > { %9498 = vmatpush.bf16.msrb.mxu3 %v12649_v55  ;;  %9482 = vmatpush.bf16.msrb.mxu2 %v12648_v41  ;;  %v12656_v55 = vld [vmem:[%s17163_s5 + $0x60] sm:$0xff] }
 0x8d9   : > { %12244 = vmatmul.msk.bf16.vlgmr.msra.gmra.mxu1 %vm9249_vm4, %v16630_v14 }
 0x8da   : > { %9557 = vmatpush.bf16.msra.mxu1 %v12651_v12 }
 0x8db   : > { %9539 = vmatpush.bf16.msra.mxu0 %v12650_v58 }
 0x8dc   : > { %v9180_v53 = vpop.f32.mrf.mxu3  ;;  %9499 = vmatpush.bf16.msrb.mxu3 %v12648_v41 }
 0x8de   : > { %9558 = vmatpush.bf16.msra.mxu1 %v12650_v58 }
 0x8e2   : > { %12245 = vmatmul.msk.bf16.vlgmr.msra.gmra.mxu2 %vm9249_vm4, %v16668_v47 }
 0x8e3   : > { %9576 = vmatpush.bf16.msra.mxu2 %v12651_v12 }
 0x8e6   : > { %12259 = vmatmul.msk.bf16.vlgmr.msrb.gmra.mxu0 %vm9249_vm4, %v9425_v42 }
 0x8e7   : > { %12246 = vmatmul.msk.bf16.vlgmr.msra.gmra.mxu3 %vm9249_vm4, %v16676_v13  ;;  %9633 = vmatpush.bf16.msrb.mxu0 %v12653_v25 }
 0x8e8   : > { %9595 = vmatpush.bf16.msra.mxu3 %v12651_v12  ;;  %9577 = vmatpush.bf16.msra.mxu2 %v12650_v58  ;;  %v12667_v12 = vld [vmem:[%s17163_s5 + $0xb8] sm:$0xff] }
 0x8e9   : > { %12260 = vmatmul.msk.bf16.vlgmr.msrb.gmra.mxu1 %vm9249_vm4, %v9454_v63 }
 0x8ea   : > { %9650 = vmatpush.bf16.msrb.mxu1 %v12653_v25 }
 0x8eb   : > { %9634 = vmatpush.bf16.msrb.mxu0 %v12652_v22 }
 0x8ec   : > { %9596 = vmatpush.bf16.msra.mxu3 %v12650_v58 }
 0x8ee   : > { %9651 = vmatpush.bf16.msrb.mxu1 %v12652_v22 }
 0x8f2   : > { %12261 = vmatmul.msk.bf16.vlgmr.msrb.gmra.mxu2 %vm9249_vm4, %v16740_v31 }
 0x8f3   : > { %9667 = vmatpush.bf16.msrb.mxu2 %v12653_v25 }
 0x8f6   : > { %12275 = vmatmul.msk.bf16.vlgmr.msra.gmra.mxu0 %vm9249_vm4, %v9516_v16 }
 0x8f7   : > { %12262 = vmatmul.msk.bf16.vlgmr.msrb.gmra.mxu3 %vm9249_vm4, %v16752_v28  ;;  %9718 = vmatpush.bf16.msra.mxu0 %v12655_v24 }
 0x8f8   : > { %9684 = vmatpush.bf16.msrb.mxu3 %v12653_v25  ;;  %9668 = vmatpush.bf16.msrb.mxu2 %v12652_v22  ;;  %v12666_v25 = vld [vmem:[%s17163_s5 + $0xb0] sm:$0xff] }
 0x8f9   : > { %12276 = vmatmul.msk.bf16.vlgmr.msra.gmra.mxu1 %vm9249_vm4, %v16757_v10 }
 0x8fa   : > { %9731 = vmatpush.bf16.msra.mxu1 %v12655_v24 }
 0x8fb   : > { %9719 = vmatpush.bf16.msra.mxu0 %v12654_v54 }
 0x8fc   : > { %9685 = vmatpush.bf16.msrb.mxu3 %v12652_v22 }
 0x8fe   : > { %9732 = vmatpush.bf16.msra.mxu1 %v12654_v54 }
 0x902   : > { %12277 = vmatmul.msk.bf16.vlgmr.msra.gmra.mxu2 %vm9249_vm4, %v16770_v26 }
 0x903   : > { %9744 = vmatpush.bf16.msra.mxu2 %v12655_v24 }
 0x906   : > { %12291 = vmatmul.msk.bf16.vlgmr.msrb.gmra.mxu0 %vm9249_vm4, %v9611_v6 }
 0x907   : > { %12278 = vmatmul.msk.bf16.vlgmr.msra.gmra.mxu3 %vm9249_vm4, %v16778_v37  ;;  %9794 = vmatpush.bf16.msrb.mxu0 %v12657_v36 }
 0x908   : > { %9760 = vmatpush.bf16.msra.mxu3 %v12655_v24  ;;  %9745 = vmatpush.bf16.msra.mxu2 %v12654_v54 }
 0x909   : > { %12292 = vmatmul.msk.bf16.vlgmr.msrb.gmra.mxu1 %vm9249_vm4, %v9640_v7 }
 0x90a   : > { %9807 = vmatpush.bf16.msrb.mxu1 %v12657_v36 }
 0x90b   : > { %9795 = vmatpush.bf16.msrb.mxu0 %v12656_v55 }
 0x90c   : > { %9761 = vmatpush.bf16.msra.mxu3 %v12654_v54 }
 0x90e   : > { %9808 = vmatpush.bf16.msrb.mxu1 %v12656_v55 }
 0x912   : > { %12293 = vmatmul.msk.bf16.vlgmr.msrb.gmra.mxu2 %vm9249_vm4, %v16791_v3 }
 0x913   : > { %9820 = vmatpush.bf16.msrb.mxu2 %v12657_v36 }
 0x916   : > { %12307 = vmatmul.msk.bf16.vlgmr.msra.gmra.mxu0 %vm9249_vm4, %v16630_v14  ;;  %v16811_v14 = vpack.c.bf16 %v9206_v0, %v9206_v0  ;;  %v12671_v0 = vld [vmem:[%s17163_s5 + $0xd8] sm:$0xff] }
 0x917   : > { %12294 = vmatmul.msk.bf16.vlgmr.msrb.gmra.mxu3 %vm9249_vm4, %v16799_v46  ;;  %9880 = vmatpush.bf16.msra.mxu0 %v12659_v56 }
 0x918   : > { %9846 = vmatpush.bf16.msrb.mxu3 %v12657_v36  ;;  %9821 = vmatpush.bf16.msrb.mxu2 %v12656_v55  ;;  %v9828_v41 = vunpack.c.l.b16 %v16811_v14  ;;  %v9207_v36 = vmax.f32 %v16671_v44, 0.0 }
 0x919   : > { %12308 = vmatmul.msk.bf16.vlgmr.msra.gmra.mxu1 %vm9249_vm4, %v16668_v47 }
 0x91a   : > { %9893 = vmatpush.bf16.msra.mxu1 %v12659_v56  ;;  %v16826_v62 = vpack.c.b16 %v9828_v41, %v9828_v41 }
 0x91b   : > { %9881 = vmatpush.bf16.msra.mxu0 %v12658_v1 }
 0x91c   : > { %9847 = vmatpush.bf16.msrb.mxu3 %v12656_v55  ;;  %v9831_v15 = vshrl.u32 %v16826_v62, 16  ;;  %v16855_v51 = vrot.slane %v16826_v62, 1  ;;  %v16889_v24 = vrot.slane %v16826_v62, 2  ;;  %v16901_v55 = vpack.c.bf16 %v9207_v36, %v9207_v36 }
 0x91e   : > { %9894 = vmatpush.bf16.msra.mxu1 %v12658_v1  ;;  %v9990_v5 = vrot.slane %v9831_v15, 1  ;;  %v10223_v41 = vunpack.c.l.b16 %v16901_v55 }
 0x922   : > { %12309 = vmatmul.msk.bf16.vlgmr.msra.gmra.mxu2 %vm9249_vm4, %v16676_v13 }
 0x923   : > { %9906 = vmatpush.bf16.msra.mxu2 %v12659_v56 }
 0x926   : > { %12323 = vmatmul.msk.bf16.vlgmr.msrb.gmra.mxu0 %vm9249_vm4, %v16663_v61  ;;  %v9833_v61 = vshll.u32 %v16826_v62, 16 }
 0x927   : > { %12310 = vmatmul.msk.bf16.vlgmr.msra.gmra.mxu3 %vm9249_vm4, %v16811_v14  ;;  %9957 = vmatpush.bf16.msrb.mxu0 %v12661_v19 }
 0x928   : > { %9923 = vmatpush.bf16.msra.mxu3 %v12659_v56  ;;  %9907 = vmatpush.bf16.msra.mxu2 %v12658_v1  ;;  %v9835_v52 = vrot.slane %v9833_v61, 1  ;;  %v9991_v43 = vrot.slane %v9833_v61, 2  ;;  %v12670_v61 = vld [vmem:[%s17163_s5 + $0xd0] sm:$0xff] }
 0x929   : > { %12324 = vmatmul.msk.bf16.vlgmr.msrb.gmra.mxu1 %vm9249_vm4, %v16694_v20 }
 0x92a   : > { %9970 = vmatpush.bf16.msrb.mxu1 %v12661_v19  ;;  %v16837_v59 = vor.u32 %v9835_v52, %v9831_v15  ;;  %v16871_v18 = vor.u32 %v9991_v43, %v9990_v5  ;;  %v16916_v15 = vpack.c.b16 %v10223_v41, %v10223_v41  ;;  %v12673_v43 = vld [vmem:[%s17163_s5 + $0xe8] sm:$0xff] }
 0x92b   : > { %9958 = vmatpush.bf16.msrb.mxu0 %v12660_v21 }
 0x92c   : > { %9924 = vmatpush.bf16.msra.mxu3 %v12658_v1 }
 0x92e   : > { %9971 = vmatpush.bf16.msrb.mxu1 %v12660_v21 }
 0x932   : > { %12325 = vmatmul.msk.bf16.vlgmr.msrb.gmra.mxu2 %vm9249_vm4, %v16705_v8 }
 0x933   : > { %9983 = vmatpush.bf16.msrb.mxu2 %v12661_v19 }
 0x936   : > { %12339 = vmatmul.msk.bf16.vlgmr.msra.gmra.mxu0 %vm9249_vm4, %v9454_v63 }
 0x937   : > { %12326 = vmatmul.msk.bf16.vlgmr.msrb.gmra.mxu3 %vm9249_vm4, %v16837_v59  ;;  %10036 = vmatpush.bf16.msra.mxu0 %v12663_v2 }
 0x938   : > { %10002 = vmatpush.bf16.msrb.mxu3 %v12661_v19  ;;  %9984 = vmatpush.bf16.msrb.mxu2 %v12660_v21 }
 0x939   : > { %12340 = vmatmul.msk.bf16.vlgmr.msra.gmra.mxu1 %vm9249_vm4, %v16740_v31 }
 0x93a   : > { %10049 = vmatpush.bf16.msra.mxu1 %v12663_v2 }
 0x93b   : > { %10037 = vmatpush.bf16.msra.mxu0 %v12662_v50 }
 0x93c   : > { %10003 = vmatpush.bf16.msrb.mxu3 %v12660_v21 }
 0x93e   : > { %10050 = vmatpush.bf16.msra.mxu1 %v12662_v50 }
 0x942   : > { %12341 = vmatmul.msk.bf16.vlgmr.msra.gmra.mxu2 %vm9249_vm4, %v16752_v28 }
 0x943   : > { %v9262_v30 = vpop.f32.mrf.mxu0  ;;  %10062 = vmatpush.bf16.msra.mxu2 %v12663_v2 }
 0x946   : > { %v9288_v40 = vpop.f32.mrf.mxu1  ;;  %12355 = vmatmul.msk.bf16.vlgmr.msrb.gmra.mxu0 %vm9249_vm4, %v16757_v10 }
 0x947   : > { %12342 = vmatmul.msk.bf16.vlgmr.msra.gmra.mxu3 %vm9249_vm4, %v16855_v51  ;;  %10113 = vmatpush.bf16.msrb.mxu0 %v12665_v57 }
 0x948   : > { %10079 = vmatpush.bf16.msra.mxu3 %v12663_v2  ;;  %10063 = vmatpush.bf16.msra.mxu2 %v12662_v50 }
 0x949   : > { %12356 = vmatmul.msk.bf16.vlgmr.msrb.gmra.mxu1 %vm9249_vm4, %v16770_v26 }
 0x94a   : > { %10126 = vmatpush.bf16.msrb.mxu1 %v12665_v57 }
 0x94b   : > { %v9264_v34 = vpop.f32.mrf.mxu0  ;;  %10114 = vmatpush.bf16.msrb.mxu0 %v12664_v60 }
 0x94c   : > { %10080 = vmatpush.bf16.msra.mxu3 %v12662_v50 }
 0x94e   : > { %v9290_v32 = vpop.f32.mrf.mxu1  ;;  %10127 = vmatpush.bf16.msrb.mxu1 %v12664_v60 }
 0x94f   : > { %v10226_v32 = vshrl.u32 %v16916_v15, 16 }
 0x952   : > { %12357 = vmatmul.msk.bf16.vlgmr.msrb.gmra.mxu2 %vm9249_vm4, %v16778_v37 }
 0x953   : > { %v9368_v29 = vpop.f32.mrf.mxu0  ;;  %10139 = vmatpush.bf16.msrb.mxu2 %v12665_v57 }
 0x954   : > { %v9369_v9 = vadd.f32 %v9368_v29, %v9262_v30  ;;  %v10228_v30 = vshll.u32 %v16916_v15, 16 }
 0x955   : > { %v9314_v53 = vpop.f32.mrf.mxu2 }
 0x956   : > { %v9384_v33 = vpop.f32.mrf.mxu1  ;;  %12371 = vmatmul.msk.bf16.vlgmr.msra.gmra.mxu0 %vm9249_vm4, %v9640_v7 }
 0x957   : > { %12358 = vmatmul.msk.bf16.vlgmr.msrb.gmra.mxu3 %vm9249_vm4, %v16871_v18  ;;  %v9385_v58 = vadd.f32 %v9384_v33, %v9288_v40  ;;  %10189 = vmatpush.bf16.msra.mxu0 %v12667_v12 }
 0x958   : > { %10155 = vmatpush.bf16.msrb.mxu3 %v12665_v57  ;;  %10140 = vmatpush.bf16.msrb.mxu2 %v12664_v60 }
 0x959   : > { %12372 = vmatmul.msk.bf16.vlgmr.msra.gmra.mxu1 %vm9249_vm4, %v16791_v3 }
 0x95a   : > { %v9340_v42 = vpop.f32.mrf.mxu3  ;;  %10202 = vmatpush.bf16.msra.mxu1 %v12667_v12 }
 0x95b   : > { %v9370_v45 = vpop.f32.mrf.mxu0  ;;  %10190 = vmatpush.bf16.msra.mxu0 %v12666_v25 }
 0x95c   : > { %10156 = vmatpush.bf16.msrb.mxu3 %v12664_v60  ;;  %v10230_v60 = vrot.slane %v10228_v30, 1 }
 0x95d   : > { %v9316_v22 = vpop.f32.mrf.mxu2 }
 0x95e   : > { %v9386_v63 = vpop.f32.mrf.mxu1  ;;  %10203 = vmatpush.bf16.msra.mxu1 %v12666_v25 }
 0x962   : > { %v9342_v11 = vpop.f32.mrf.mxu3  ;;  %12373 = vmatmul.msk.bf16.vlgmr.msra.gmra.mxu2 %vm9249_vm4, %v16799_v46 }
 0x963   : > { %v9450_v35 = vpop.f32.mrf.mxu0  ;;  %10215 = vmatpush.bf16.msra.mxu2 %v12667_v12 }
 0x964   : > { %v9505_v48 = vadd.f32 %v9450_v35, %v9369_v9 }
 0x965   : > { %v9400_v54 = vpop.f32.mrf.mxu2 }
 0x966   : > { %v9467_v16 = vpop.f32.mrf.mxu1  ;;  %12387 = vmatmul.msk.bf16.vlgmr.msrb.gmra.mxu0 %vm9249_vm4, %v16668_v47  ;;  %v9401_v39 = vadd.f32 %v9400_v54, %v9314_v53  ;;  %v12672_v53 = vld [vmem:[%s17163_s5 + $0xe0] sm:$0xff] }
 0x967   : > { %12374 = vmatmul.msk.bf16.vlgmr.msra.gmra.mxu3 %vm9249_vm4, %v16889_v24  ;;  %v9506_v10 = vadd.f32 %v9467_v16, %v9385_v58  ;;  %10275 = vmatpush.bf16.msrb.mxu0 %v12669_v27  ;;  %v16944_v16 = vrot.slane %v16916_v15, 1 }
 0x968   : > { %10241 = vmatpush.bf16.msra.mxu3 %v12667_v12  ;;  %10216 = vmatpush.bf16.msra.mxu2 %v12666_v25  ;;  %v16927_v12 = vor.u32 %v10230_v60, %v10226_v32 }
 0x969   : > { %12388 = vmatmul.msk.bf16.vlgmr.msrb.gmra.mxu1 %vm9249_vm4, %v16676_v13 }
 0x96a   : > { %v9416_v49 = vpop.f32.mrf.mxu3  ;;  %10288 = vmatpush.bf16.msrb.mxu1 %v12669_v27 }
 0x96b   : > { %v9417_v23 = vadd.f32 %v9416_v49, %v9340_v42  ;;  %v9452_v47 = vpop.f32.mrf.mxu0  ;;  %10276 = vmatpush.bf16.msrb.mxu0 %v12668_v38 }
 0x96c   : > { %10242 = vmatpush.bf16.msra.mxu3 %v12666_v25 }
 0x96d   : > { %v9402_v7 = vpop.f32.mrf.mxu2 }
 0x96e   : > { %v9469_v6 = vpop.f32.mrf.mxu1  ;;  %10289 = vmatpush.bf16.msrb.mxu1 %v12668_v38  ;;  %v10385_v7 = vrot.slane %v10226_v32, 1 }
 0x972   : > { %v9418_v56 = vpop.f32.mrf.mxu3  ;;  %12389 = vmatmul.msk.bf16.vlgmr.msrb.gmra.mxu2 %vm9249_vm4, %v16811_v14 }
 0x973   : > { %v9541_v1 = vpop.f32.mrf.mxu0  ;;  %10301 = vmatpush.bf16.msrb.mxu2 %v12669_v27  ;;  %v10386_v56 = vrot.slane %v10228_v30, 2 }
 0x974   : > { %v9602_v19 = vadd.f32 %v9541_v1, %v9505_v48 }
 0x975   : > { %v9484_v62 = vpop.f32.mrf.mxu2 }
 0x976   : > { %v9560_v21 = vpop.f32.mrf.mxu1  ;;  %12403 = vmatmul.msk.bf16.vlgmr.msra.gmra.mxu0 %vm9249_vm4, %v16694_v20  ;;  %v9507_v52 = vadd.f32 %v9484_v62, %v9401_v39  ;;  %v12674_v39 = vld [vmem:[%s17163_s5 + $0xf0] sm:$0xff] }
 0x977   : > { %12390 = vmatmul.msk.bf16.vlgmr.msrb.gmra.mxu3 %vm9249_vm4, %v16901_v55  ;;  %v9603_v44 = vadd.f32 %v9560_v21, %v9506_v10  ;;  %10352 = vmatpush.bf16.msra.mxu0 %v12671_v0  ;;  %v16960_v21 = vor.u32 %v10386_v56, %v10385_v7 }
 0x978   : > { %10318 = vmatpush.bf16.msrb.mxu3 %v12669_v27  ;;  %10302 = vmatpush.bf16.msrb.mxu2 %v12668_v38  ;;  %v12675_v27 = vld [vmem:[%s17163_s5 + $0xf8] sm:$0xff] }
 0x979   : > { %12404 = vmatmul.msk.bf16.vlgmr.msra.gmra.mxu1 %vm9249_vm4, %v16705_v8 }
 0x97a   : > { %v9501_v2 = vpop.f32.mrf.mxu3  ;;  %10365 = vmatpush.bf16.msra.mxu1 %v12671_v0 }
 0x97b   : > { %v9508_v20 = vadd.f32 %v9501_v2, %v9417_v23  ;;  %v9543_v50 = vpop.f32.mrf.mxu0  ;;  %10353 = vmatpush.bf16.msra.mxu0 %v12670_v61 }
 0x97c   : > { %10319 = vmatpush.bf16.msrb.mxu3 %v12668_v38 }
 0x97d   : > { %v9486_v40 = vpop.f32.mrf.mxu2 }
 0x97e   : > { %v9562_v57 = vpop.f32.mrf.mxu1  ;;  %10366 = vmatpush.bf16.msra.mxu1 %v12670_v61 }
 0x982   : > { %v9503_v34 = vpop.f32.mrf.mxu3  ;;  %12405 = vmatmul.msk.bf16.vlgmr.msra.gmra.mxu2 %vm9249_vm4, %v16837_v59 }
 0x983   : > { %v9636_v5 = vpop.f32.mrf.mxu0  ;;  %10378 = vmatpush.bf16.msra.mxu2 %v12671_v0  ;;  %v12679_v34 = vld [vmem:[%s17163_s5 + $0x118] sm:$0xff] }
 0x984   : > { %v9691_v29 = vadd.f32 %v9636_v5, %v9602_v19  ;;  %v12677_v19 = vld [vmem:[%s17163_s5 + $0x108] sm:$0xff]  ;;  %v16977_v5 = vrot.slane %v16916_v15, 2 }
 0x985   : > { %v9579_v58 = vpop.f32.mrf.mxu2 }
 0x986   : > { %v9653_v9 = vpop.f32.mrf.mxu1  ;;  %12419 = vmatmul.msk.bf16.vlgmr.msrb.gmra.mxu0 %vm9249_vm4, %v16740_v31  ;;  %v9604_v25 = vadd.f32 %v9579_v58, %v9507_v52  ;;  %v12676_v52 = vld [vmem:[%s17163_s5 + $0x100] sm:$0xff] }
 0x987   : > { %12406 = vmatmul.msk.bf16.vlgmr.msra.gmra.mxu3 %vm9249_vm4, %v16927_v12  ;;  %v9692_v33 = vadd.f32 %v9653_v9, %v9603_v44  ;;  %10431 = vmatpush.bf16.msrb.mxu0 %v12673_v43 }
 0x988   : > { %10397 = vmatpush.bf16.msra.mxu3 %v12671_v0  ;;  %10379 = vmatpush.bf16.msra.mxu2 %v12670_v61 }
 0x989   : > { %12420 = vmatmul.msk.bf16.vlgmr.msrb.gmra.mxu1 %vm9249_vm4, %v16752_v28 }
 0x98a   : > { %v9598_v42 = vpop.f32.mrf.mxu3  ;;  %10444 = vmatpush.bf16.msrb.mxu1 %v12673_v43 }
 0x98b   : > { %v9605_v45 = vadd.f32 %v9598_v42, %v9508_v20  ;;  %v9638_v31 = vpop.f32.mrf.mxu0  ;;  %10432 = vmatpush.bf16.msrb.mxu0 %v12672_v53 }
 0x98c   : > { %10398 = vmatpush.bf16.msra.mxu3 %v12670_v61 }
 0x98d   : > { %v9581_v22 = vpop.f32.mrf.mxu2 }
 0x98e   : > { %v9655_v63 = vpop.f32.mrf.mxu1  ;;  %10445 = vmatpush.bf16.msrb.mxu1 %v12672_v53 }
 0x992   : > { %v9600_v11 = vpop.f32.mrf.mxu3  ;;  %12421 = vmatmul.msk.bf16.vlgmr.msrb.gmra.mxu2 %vm9249_vm4, %v16855_v51 }
 0x993   : > { %v9721_v35 = vpop.f32.mrf.mxu0  ;;  %10457 = vmatpush.bf16.msrb.mxu2 %v12673_v43  ;;  %v12681_v11 = vld [vmem:[%s17163_s5 + $0x128] sm:$0xff] }
 0x994   : > { %v9767_v48 = vadd.f32 %v9721_v35, %v9691_v29 }
 0x995   : > { %v9670_v38 = vpop.f32.mrf.mxu2 }
 0x996   : > { %v9734_v10 = vpop.f32.mrf.mxu1  ;;  %12435 = vmatmul.msk.bf16.vlgmr.msra.gmra.mxu0 %vm9249_vm4, %v16770_v26  ;;  %v9693_v49 = vadd.f32 %v9670_v38, %v9604_v25  ;;  %v9208_v25 = vmax.f32 %v16690_v4, 0.0 }
 0x997   : > { %12422 = vmatmul.msk.bf16.vlgmr.msrb.gmra.mxu3 %vm9249_vm4, %v16944_v16  ;;  %v9768_v54 = vadd.f32 %v9734_v10, %v9692_v33  ;;  %10508 = vmatpush.bf16.msra.mxu0 %v12675_v27  ;;  %v12678_v33 = vld [vmem:[%s17163_s5 + $0x110] sm:$0xff] }
 0x998   : > { %10474 = vmatpush.bf16.msrb.mxu3 %v12673_v43  ;;  %10458 = vmatpush.bf16.msrb.mxu2 %v12672_v53  ;;  %v16989_v31 = vpack.c.bf16 %v9208_v25, %v9208_v25 }
 0x999   : > { %12436 = vmatmul.msk.bf16.vlgmr.msra.gmra.mxu1 %vm9249_vm4, %v16778_v37 }
 0x99a   : > { %v9687_v23 = vpop.f32.mrf.mxu3  ;;  %10521 = vmatpush.bf16.msra.mxu1 %v12675_v27 }
 0x99b   : > { %v9694_v47 = vadd.f32 %v9687_v23, %v9605_v45  ;;  %v9723_v26 = vpop.f32.mrf.mxu0  ;;  %10509 = vmatpush.bf16.msra.mxu0 %v12674_v39 }
 0x99c   : > { %10475 = vmatpush.bf16.msrb.mxu3 %v12672_v53 }
 0x99d   : > { %v9672_v6 = vpop.f32.mrf.mxu2 }
 0x99e   : > { %v9736_v36 = vpop.f32.mrf.mxu1  ;;  %10522 = vmatpush.bf16.msra.mxu1 %v12674_v39 }
 0x9a2   : > { %v9689_v1 = vpop.f32.mrf.mxu3  ;;  %12437 = vmatmul.msk.bf16.vlgmr.msra.gmra.mxu2 %vm9249_vm4, %v16871_v18 }
 0x9a3   : > { %v9797_v0 = vpop.f32.mrf.mxu0  ;;  %10534 = vmatpush.bf16.msra.mxu2 %v12675_v27 }
 0x9a4   : > { %v9853_v41 = vadd.f32 %v9797_v0, %v9767_v48  ;;  %v12683_v0 = vld [vmem:[%s17163_s5 + $0x138] sm:$0xff] }
 0x9a5   : > { %v9747_v61 = vpop.f32.mrf.mxu2 }
 0x9a6   : > { %v9810_v44 = vpop.f32.mrf.mxu1  ;;  %12451 = vmatmul.msk.bf16.vlgmr.msrb.gmra.mxu0 %vm9249_vm4, %v16791_v3  ;;  %v9769_v2 = vadd.f32 %v9747_v61, %v9693_v49 }
 0x9a7   : > { %12438 = vmatmul.msk.bf16.vlgmr.msra.gmra.mxu3 %vm9249_vm4, %v16960_v21  ;;  %v9854_v62 = vadd.f32 %v9810_v44, %v9768_v54  ;;  %10584 = vmatpush.bf16.msrb.mxu0 %v12677_v19  ;;  %v12680_v54 = vld [vmem:[%s17163_s5 + $0x120] sm:$0xff] }
 0x9a8   : > { %10550 = vmatpush.bf16.msra.mxu3 %v12675_v27  ;;  %10535 = vmatpush.bf16.msra.mxu2 %v12674_v39  ;;  %v10618_v27 = vunpack.c.l.b16 %v16989_v31 }
 0x9a9   : > { %12452 = vmatmul.msk.bf16.vlgmr.msrb.gmra.mxu1 %vm9249_vm4, %v16799_v46 }
 0x9aa   : > { %v9763_v20 = vpop.f32.mrf.mxu3  ;;  %10597 = vmatpush.bf16.msrb.mxu1 %v12677_v19 }
 0x9ab   : > { %v9770_v50 = vadd.f32 %v9763_v20, %v9694_v47  ;;  %v9799_v3 = vpop.f32.mrf.mxu0  ;;  %10585 = vmatpush.bf16.msrb.mxu0 %v12676_v52 }
 0x9ac   : > { %10551 = vmatpush.bf16.msra.mxu3 %v12674_v39  ;;  %v17004_v39 = vpack.c.b16 %v10618_v27, %v10618_v27 }
 0x9ad   : > { %v9749_v57 = vpop.f32.mrf.mxu2 }
 0x9ae   : > { %v9812_v30 = vpop.f32.mrf.mxu1  ;;  %10598 = vmatpush.bf16.msrb.mxu1 %v12676_v52  ;;  %v10623_v47 = vshll.u32 %v17004_v39, 16  ;;  %v10621_v56 = vshrl.u32 %v17004_v39, 16 }
 0x9b0   : > { %v10625_v6 = vrot.slane %v10623_v47, 1 }
 0x9b2   : > { %v9765_v40 = vpop.f32.mrf.mxu3  ;;  %12453 = vmatmul.msk.bf16.vlgmr.msrb.gmra.mxu2 %vm9249_vm4, %v16889_v24 }
 0x9b3   : > { %v9883_v60 = vpop.f32.mrf.mxu0  ;;  %10610 = vmatpush.bf16.msrb.mxu2 %v12677_v19 }
 0x9b4   : > { %v9930_v32 = vadd.f32 %v9883_v60, %v9853_v41  ;;  %v17015_v41 = vor.u32 %v10625_v6, %v10621_v56  ;;  %v12685_v60 = vld [vmem:[%s17163_s5 + $0x148] sm:$0xff] }
 0x9b5   : > { %v9823_v9 = vpop.f32.mrf.mxu2  ;;  %v12689_v6 = vld [vmem:[%s17163_s5 + $0x168] sm:$0xff] }
 0x9b6   : > { %v9896_v43 = vpop.f32.mrf.mxu1  ;;  %12467 = vmatmul.msk.bf16.vlgmr.msra.gmra.mxu0 %vm9249_vm4, %v16676_v13  ;;  %v9855_v58 = vadd.f32 %v9823_v9, %v9769_v2 }
 0x9b7   : > { %12454 = vmatmul.msk.bf16.vlgmr.msrb.gmra.mxu3 %vm9249_vm4, %v16977_v5  ;;  %v9931_v29 = vadd.f32 %v9896_v43, %v9854_v62  ;;  %10670 = vmatpush.bf16.msra.mxu0 %v12679_v34 }
 0x9b8   : > { %10636 = vmatpush.bf16.msrb.mxu3 %v12677_v19  ;;  %10611 = vmatpush.bf16.msrb.mxu2 %v12676_v52 }
 0x9b9   : > { %12468 = vmatmul.msk.bf16.vlgmr.msra.gmra.mxu1 %vm9249_vm4, %v16811_v14 }
 0x9ba   : > { %v9849_v15 = vpop.f32.mrf.mxu3  ;;  %10683 = vmatpush.bf16.msra.mxu1 %v12679_v34 }
 0x9bb   : > { %v9856_v53 = vadd.f32 %v9849_v15, %v9770_v50  ;;  %v9885_v13 = vpop.f32.mrf.mxu0  ;;  %10671 = vmatpush.bf16.msra.mxu0 %v12678_v33 }
 0x9bc   : > { %10637 = vmatpush.bf16.msrb.mxu3 %v12676_v52  ;;  %v12682_v52 = vld [vmem:[%s17163_s5 + $0x130] sm:$0xff] }
 0x9bd   : > { %v9825_v45 = vpop.f32.mrf.mxu2 }
 0x9be   : > { %v9898_v42 = vpop.f32.mrf.mxu1  ;;  %10684 = vmatpush.bf16.msra.mxu1 %v12678_v33  ;;  %v10781_v45 = vrot.slane %v10623_v47, 2 }
 0x9bf   : > { %v10780_v42 = vrot.slane %v10621_v56, 1  ;;  %v10859_v56 = vrot.slane %v17004_v39, 2 }
 0x9c1   : > { %v17047_v27 = vor.u32 %v10781_v45, %v10780_v42 }
 0x9c2   : > { %v9851_v63 = vpop.f32.mrf.mxu3  ;;  %12469 = vmatmul.msk.bf16.vlgmr.msra.gmra.mxu2 %vm9249_vm4, %v16901_v55 }
 0x9c3   : > { %v9960_v22 = vpop.f32.mrf.mxu0  ;;  %10696 = vmatpush.bf16.msra.mxu2 %v12679_v34 }
 0x9c4   : > { %v10009_v35 = vadd.f32 %v9960_v22, %v9930_v32  ;;  %v10703_v32 = vrot.slane %v17004_v39, 1 }
 0x9c5   : > { %v9909_v10 = vpop.f32.mrf.mxu2 }
 0x9c6   : > { %v9973_v48 = vpop.f32.mrf.mxu1  ;;  %12483 = vmatmul.msk.bf16.vlgmr.msrb.gmra.mxu0 %vm9249_vm4, %v16705_v8  ;;  %v9932_v38 = vadd.f32 %v9909_v10, %v9855_v58 }
 0x9c7   : > { %12470 = vmatmul.msk.bf16.vlgmr.msra.gmra.mxu3 %vm9249_vm4, %v16989_v31  ;;  %v10010_v4 = vadd.f32 %v9973_v48, %v9931_v29  ;;  %10747 = vmatpush.bf16.msrb.mxu0 %v12681_v11 }
 0x9c8   : > { %10713 = vmatpush.bf16.msra.mxu3 %v12679_v34  ;;  %10697 = vmatpush.bf16.msra.mxu2 %v12678_v33 }
 0x9c9   : > { %12484 = vmatmul.msk.bf16.vlgmr.msrb.gmra.mxu1 %vm9249_vm4, %v16837_v59 }
 0x9ca   : > { %v9926_v49 = vpop.f32.mrf.mxu3  ;;  %10760 = vmatpush.bf16.msrb.mxu1 %v12681_v11 }
 0x9cb   : > { %v9933_v8 = vadd.f32 %v9926_v49, %v9856_v53  ;;  %v9962_v23 = vpop.f32.mrf.mxu0  ;;  %10748 = vmatpush.bf16.msrb.mxu0 %v12680_v54 }
 0x9cc   : > { %10714 = vmatpush.bf16.msra.mxu3 %v12678_v33  ;;  %v12684_v33 = vld [vmem:[%s17163_s5 + $0x140] sm:$0xff] }
 0x9cd   : > { %v9911_v36 = vpop.f32.mrf.mxu2 }
 0x9ce   : > { %v9975_v26 = vpop.f32.mrf.mxu1  ;;  %10761 = vmatpush.bf16.msrb.mxu1 %v12680_v54 }
 0x9d2   : > { %v9928_v7 = vpop.f32.mrf.mxu3  ;;  %12485 = vmatmul.msk.bf16.vlgmr.msrb.gmra.mxu2 %vm9249_vm4, %v16927_v12 }
 0x9d3   : > { %v10039_v1 = vpop.f32.mrf.mxu0  ;;  %10773 = vmatpush.bf16.msrb.mxu2 %v12681_v11 }
 0x9d4   : > { %v10086_v19 = vadd.f32 %v10039_v1, %v10009_v35 }
 0x9d5   : > { %v9986_v61 = vpop.f32.mrf.mxu2 }
 0x9d6   : > { %v10052_v44 = vpop.f32.mrf.mxu1  ;;  %12499 = vmatmul.msk.bf16.vlgmr.msra.gmra.mxu0 %vm9249_vm4, %v16752_v28  ;;  %v10011_v2 = vadd.f32 %v9986_v61, %v9932_v38 }
 0x9d7   : > { %12486 = vmatmul.msk.bf16.vlgmr.msrb.gmra.mxu3 %vm9249_vm4, %v17015_v41  ;;  %v10087_v62 = vadd.f32 %v10052_v44, %v10010_v4  ;;  %10826 = vmatpush.bf16.msra.mxu0 %v12683_v0  ;;  %v12688_v44 = vld [vmem:[%s17163_s5 + $0x160] sm:$0xff] }
 0x9d8   : > { %10792 = vmatpush.bf16.msrb.mxu3 %v12681_v11  ;;  %10774 = vmatpush.bf16.msrb.mxu2 %v12680_v54  ;;  %v12687_v11 = vld [vmem:[%s17163_s5 + $0x158] sm:$0xff] }
 0x9d9   : > { %12500 = vmatmul.msk.bf16.vlgmr.msra.gmra.mxu1 %vm9249_vm4, %v16855_v51 }
 0x9da   : > { %v10005_v20 = vpop.f32.mrf.mxu3  ;;  %10839 = vmatpush.bf16.msra.mxu1 %v12683_v0 }
 0x9db   : > { %v10012_v50 = vadd.f32 %v10005_v20, %v9933_v8  ;;  %v10041_v28 = vpop.f32.mrf.mxu0  ;;  %10827 = vmatpush.bf16.msra.mxu0 %v12682_v52 }
 0x9dc   : > { %10793 = vmatpush.bf16.msrb.mxu3 %v12680_v54  ;;  %v12686_v54 = vld [vmem:[%s17163_s5 + $0x150] sm:$0xff] }
 0x9dd   : > { %v9988_v30 = vpop.f32.mrf.mxu2 }
 0x9de   : > { %v10054_v3 = vpop.f32.mrf.mxu1  ;;  %10840 = vmatpush.bf16.msra.mxu1 %v12682_v52 }
 0x9e2   : > { %v10007_v57 = vpop.f32.mrf.mxu3  ;;  %12501 = vmatmul.msk.bf16.vlgmr.msra.gmra.mxu2 %vm9249_vm4, %v16944_v16 }
 0x9e3   : > { %v10116_v40 = vpop.f32.mrf.mxu0  ;;  %10852 = vmatpush.bf16.msra.mxu2 %v12683_v0  ;;  %v12691_v57 = vld [vmem:[%s17163_s5 + $0x178] sm:$0xff] }
 0x9e4   : > { %v10162_v34 = vadd.f32 %v10116_v40, %v10086_v19 }
 0x9e5   : > { %v10065_v9 = vpop.f32.mrf.mxu2 }
 0x9e6   : > { %v10129_v43 = vpop.f32.mrf.mxu1  ;;  %12515 = vmatmul.msk.bf16.vlgmr.msrb.gmra.mxu0 %vm9249_vm4, %v16778_v37  ;;  %v10088_v58 = vadd.f32 %v10065_v9, %v10011_v2  ;;  %v9209_v2 = vmax.f32 %v16710_v17, 0.0 }
 0x9e7   : > { %12502 = vmatmul.msk.bf16.vlgmr.msra.gmra.mxu3 %vm9249_vm4, %v10703_v32  ;;  %v10163_v29 = vadd.f32 %v10129_v43, %v10087_v62  ;;  %10903 = vmatpush.bf16.msrb.mxu0 %v12685_v60  ;;  %v12690_v43 = vld [vmem:[%s17163_s5 + $0x170] sm:$0xff] }
 0x9e8   : > { %10869 = vmatpush.bf16.msra.mxu3 %v12683_v0  ;;  %10853 = vmatpush.bf16.msra.mxu2 %v12682_v52  ;;  %v9217_v28 = vpack.c.bf16 %v9209_v2, %v9209_v2 }
 0x9e9   : > { %12516 = vmatmul.msk.bf16.vlgmr.msrb.gmra.mxu1 %vm9249_vm4, %v16871_v18 }
 0x9ea   : > { %v10082_v15 = vpop.f32.mrf.mxu3  ;;  %10916 = vmatpush.bf16.msrb.mxu1 %v12685_v60  ;;  %v11013_v40 = vunpack.c.l.b16 %v9217_v28 }
 0x9eb   : > { %v10089_v37 = vadd.f32 %v10082_v15, %v10012_v50  ;;  %v10118_v53 = vpop.f32.mrf.mxu0  ;;  %10904 = vmatpush.bf16.msrb.mxu0 %v12684_v33 }
 0x9ec   : > { %10870 = vmatpush.bf16.msra.mxu3 %v12682_v52  ;;  %v17086_v9 = vpack.c.b16 %v11013_v40, %v11013_v40 }
 0x9ed   : > { %v10067_v25 = vpop.f32.mrf.mxu2 }
 0x9ee   : > { %v10131_v13 = vpop.f32.mrf.mxu1  ;;  %10917 = vmatpush.bf16.msrb.mxu1 %v12684_v33  ;;  %v11016_v25 = vshrl.u32 %v17086_v9, 16  ;;  %v11254_v40 = vrot.slane %v17086_v9, 2 }
 0x9f2   : > { %v10084_v63 = vpop.f32.mrf.mxu3  ;;  %12517 = vmatmul.msk.bf16.vlgmr.msrb.gmra.mxu2 %vm9249_vm4, %v16960_v21 }
 0x9f3   : > { %v10192_v22 = vpop.f32.mrf.mxu0  ;;  %10929 = vmatpush.bf16.msrb.mxu2 %v12685_v60 }
 0x9f4   : > { %v10248_v35 = vadd.f32 %v10192_v22, %v10162_v34 }
 0x9f5   : > { %v10142_v10 = vpop.f32.mrf.mxu2 }
 0x9f6   : > { %v10205_v48 = vpop.f32.mrf.mxu1  ;;  %12531 = vmatmul.msk.bf16.vlgmr.msra.gmra.mxu0 %vm9249_vm4, %v16799_v46  ;;  %v10164_v38 = vadd.f32 %v10142_v10, %v10088_v58  ;;  %v11018_v58 = vshll.u32 %v17086_v9, 16 }
 0x9f7   : > { %12518 = vmatmul.msk.bf16.vlgmr.msrb.gmra.mxu3 %vm9249_vm4, %v17047_v27  ;;  %v10249_v4 = vadd.f32 %v10205_v48, %v10163_v29  ;;  %10979 = vmatpush.bf16.msra.mxu0 %v12687_v11  ;;  %v12692_v48 = vld [vmem:[%s17163_s5 + $0x180] sm:$0xff] }
 0x9f8   : > { %10945 = vmatpush.bf16.msrb.mxu3 %v12685_v60  ;;  %10930 = vmatpush.bf16.msrb.mxu2 %v12684_v33  ;;  %v11020_v53 = vrot.slane %v11018_v58, 1 }
 0x9f9   : > { %12532 = vmatmul.msk.bf16.vlgmr.msra.gmra.mxu1 %vm9249_vm4, %v16889_v24 }
 0x9fa   : > { %v10158_v49 = vpop.f32.mrf.mxu3  ;;  %10992 = vmatpush.bf16.msra.mxu1 %v12687_v11  ;;  %v11021_v63 = vor.u32 %v11020_v53, %v11016_v25 }
 0x9fb   : > { %v10165_v8 = vadd.f32 %v10158_v49, %v10089_v37  ;;  %v10194_v46 = vpop.f32.mrf.mxu0  ;;  %10980 = vmatpush.bf16.msra.mxu0 %v12686_v54 }
 0x9fc   : > { %10946 = vmatpush.bf16.msrb.mxu3 %v12684_v33 }
 0x9fd   : > { %v10144_v47 = vpop.f32.mrf.mxu2 }
 0x9fe   : > { %v10207_v23 = vpop.f32.mrf.mxu1  ;;  %10993 = vmatpush.bf16.msra.mxu1 %v12686_v54 }
 0x9ff   : > { %v11098_v23 = vrot.slane %v17086_v9, 1 }
 0xa02   : > { %v10160_v26 = vpop.f32.mrf.mxu3  ;;  %12533 = vmatmul.msk.bf16.vlgmr.msra.gmra.mxu2 %vm9249_vm4, %v16977_v5 }
 0xa03   : > { %v10278_v36 = vpop.f32.mrf.mxu0  ;;  %11005 = vmatpush.bf16.msra.mxu2 %v12687_v11 }
 0xa04   : > { %v10325_v7 = vadd.f32 %v10278_v36, %v10248_v35 }
 0xa05   : > { %v10218_v19 = vpop.f32.mrf.mxu2 }
 0xa06   : > { %v10291_v1 = vpop.f32.mrf.mxu1  ;;  %12547 = vmatmul.msk.bf16.vlgmr.msrb.gmra.mxu0 %vm9249_vm4, %v16811_v14  ;;  %v10250_v62 = vadd.f32 %v10218_v19, %v10164_v38  ;;  %v11175_v19 = vrot.slane %v11016_v25, 1 }
 0xa07   : > { %12534 = vmatmul.msk.bf16.vlgmr.msra.gmra.mxu3 %vm9249_vm4, %v10859_v56  ;;  %v10326_v0 = vadd.f32 %v10291_v1, %v10249_v4  ;;  %11065 = vmatpush.bf16.msrb.mxu0 %v12689_v6 }
 0xa08   : > { %11031 = vmatpush.bf16.msra.mxu3 %v12687_v11  ;;  %11006 = vmatpush.bf16.msra.mxu2 %v12686_v54 }
 0xa09   : > { %12548 = vmatmul.msk.bf16.vlgmr.msrb.gmra.mxu1 %vm9249_vm4, %v16901_v55 }
 0xa0a   : > { %v10244_v61 = vpop.f32.mrf.mxu3  ;;  %11078 = vmatpush.bf16.msrb.mxu1 %v12689_v6 }
 0xa0b   : > { %v10251_v14 = vadd.f32 %v10244_v61, %v10165_v8  ;;  %v10280_v52 = vpop.f32.mrf.mxu0  ;;  %11066 = vmatpush.bf16.msrb.mxu0 %v12688_v44 }
 0xa0c   : > { %11032 = vmatpush.bf16.msra.mxu3 %v12686_v54 }
 0xa0d   : > { %v10220_v50 = vpop.f32.mrf.mxu2 }
 0xa0e   : > { %v10293_v20 = vpop.f32.mrf.mxu1  ;;  %11079 = vmatpush.bf16.msrb.mxu1 %v12688_v44 }
 0xa12   : > { %v10246_v3 = vpop.f32.mrf.mxu3  ;;  %12549 = vmatmul.msk.bf16.vlgmr.msrb.gmra.mxu2 %vm9249_vm4, %v16989_v31 }
 0xa13   : > { %v10355_v30 = vpop.f32.mrf.mxu0  ;;  %11091 = vmatpush.bf16.msrb.mxu2 %v12689_v6 }
 0xa14   : > { %v10404_v55 = vadd.f32 %v10355_v30, %v10325_v7 }
 0xa15   : > { %v10304_v34 = vpop.f32.mrf.mxu2 }
 0xa16   : > { %v10368_v60 = vpop.f32.mrf.mxu1  ;;  %12563 = vmatmul.msk.bf16.vlgmr.msra.gmra.mxu0 %vm9249_vm4, %v16837_v59  ;;  %v10327_v29 = vadd.f32 %v10304_v34, %v10250_v62 }
 0xa17   : > { %12550 = vmatmul.msk.bf16.vlgmr.msrb.gmra.mxu3 %vm9249_vm4, %v9217_v28  ;;  %v10405_v17 = vadd.f32 %v10368_v60, %v10326_v0  ;;  %11142 = vmatpush.bf16.msra.mxu0 %v12691_v57 }
 0xa18   : > { %11108 = vmatpush.bf16.msrb.mxu3 %v12689_v6  ;;  %11092 = vmatpush.bf16.msrb.mxu2 %v12688_v44 }
 0xa19   : > { %12564 = vmatmul.msk.bf16.vlgmr.msra.gmra.mxu1 %vm9249_vm4, %v16927_v12  ;;  %v12693_v12 = vld [vmem:[%s17163_s5 + $0x188] sm:$0xff] }
 0xa1a   : > { %v10321_v31 = vpop.f32.mrf.mxu3  ;;  %11155 = vmatpush.bf16.msra.mxu1 %v12691_v57 }
 0xa1b   : > { %v10328_v59 = vadd.f32 %v10321_v31, %v10251_v14  ;;  %v10357_v33 = vpop.f32.mrf.mxu0  ;;  %11143 = vmatpush.bf16.msra.mxu0 %v12690_v43 }
 0xa1c   : > { %11109 = vmatpush.bf16.msrb.mxu3 %v12688_v44  ;;  %v11176_v44 = vrot.slane %v11018_v58, 2 }
 0xa1d   : > { %v10306_v37 = vpop.f32.mrf.mxu2 }
 0xa1e   : > { %v10370_v15 = vpop.f32.mrf.mxu1  ;;  %11156 = vmatpush.bf16.msra.mxu1 %v12690_v43  ;;  %v11177_v14 = vor.u32 %v11176_v44, %v11175_v19 }
 0xa22   : > { %v10323_v13 = vpop.f32.mrf.mxu3  ;;  %12565 = vmatmul.msk.bf16.vlgmr.msra.gmra.mxu2 %vm9249_vm4, %v17015_v41 }
 0xa23   : > { %v10434_v42 = vpop.f32.mrf.mxu0  ;;  %11168 = vmatpush.bf16.msra.mxu2 %v12691_v57 }
 0xa24   : > { %v10481_v45 = vadd.f32 %v10434_v42, %v10404_v55 }
 0xa25   : > { %v10381_v35 = vpop.f32.mrf.mxu2 }
 0xa26   : > { %v10447_v22 = vpop.f32.mrf.mxu1  ;;  %12579 = vmatmul.msk.bf16.vlgmr.msrb.gmra.mxu0 %vm9249_vm4, %v16855_v51  ;;  %v10406_v4 = vadd.f32 %v10381_v35, %v10327_v29 }
 0xa27   : > { %12566 = vmatmul.msk.bf16.vlgmr.msra.gmra.mxu3 %vm9249_vm4, %v11021_v63  ;;  %v10482_v11 = vadd.f32 %v10447_v22, %v10405_v17  ;;  %11221 = vmatpush.bf16.msrb.mxu0 %v12693_v12 }
 0xa28   : > { %11187 = vmatpush.bf16.msra.mxu3 %v12691_v57  ;;  %11169 = vmatpush.bf16.msra.mxu2 %v12690_v43 }
 0xa29   : > { %12580 = vmatmul.msk.bf16.vlgmr.msrb.gmra.mxu1 %vm9249_vm4, %v16944_v16 }
 0xa2a   : > { %v10400_v41 = vpop.f32.mrf.mxu3  ;;  %11234 = vmatpush.bf16.msrb.mxu1 %v12693_v12 }
 0xa2b   : > { %v10407_v10 = vadd.f32 %v10400_v41, %v10328_v59  ;;  %v10436_v54 = vpop.f32.mrf.mxu0  ;;  %11222 = vmatpush.bf16.msrb.mxu0 %v12692_v48 }
 0xa2c   : > { %11188 = vmatpush.bf16.msra.mxu3 %v12690_v43 }
 0xa2d   : > { %v10383_v38 = vpop.f32.mrf.mxu2 }
 0xa2e   : > { %v10449_v51 = vpop.f32.mrf.mxu1  ;;  %11235 = vmatpush.bf16.msrb.mxu1 %v12692_v48 }
 0xa32   : > { %v10402_v49 = vpop.f32.mrf.mxu3  ;;  %12581 = vmatmul.msk.bf16.vlgmr.msrb.gmra.mxu2 %vm9249_vm4, %v10703_v32 }
 0xa33   : > { %v10511_v8 = vpop.f32.mrf.mxu0  ;;  %11247 = vmatpush.bf16.msrb.mxu2 %v12693_v12 }
 0xa34   : > { %v10557_v46 = vadd.f32 %v10511_v8, %v10481_v45 }
 0xa35   : > { %v10460_v26 = vpop.f32.mrf.mxu2 }
 0xa36   : > { %v10524_v16 = vpop.f32.mrf.mxu1  ;;  %12595 = vmatmul.msk.bf16.vlgmr.msra.gmra.mxu0 %vm9249_vm4, %v16871_v18  ;;  %v10483_v36 = vadd.f32 %v10460_v26, %v10406_v4 }
 0xa37   : > { %12582 = vmatmul.msk.bf16.vlgmr.msrb.gmra.mxu3 %vm9249_vm4, %v11098_v23  ;;  %v10558_v47 = vadd.f32 %v10524_v16, %v10482_v11  ;;  %11248 = vmatpush.bf16.msrb.mxu2 %v12692_v48 }
 0xa38   : > { %11264 = vmatpush.bf16.msrb.mxu3 %v12693_v12 }
 0xa39   : > { %12596 = vmatmul.msk.bf16.vlgmr.msra.gmra.mxu1 %vm9249_vm4, %v16960_v21 }
 0xa3a   : > { %v10477_v6 = vpop.f32.mrf.mxu3 }
 0xa3b   : > { %v10484_v32 = vadd.f32 %v10477_v6, %v10407_v10  ;;  %v10513_v7 = vpop.f32.mrf.mxu0 }
 0xa3c   : > { %11265 = vmatpush.bf16.msrb.mxu3 %v12692_v48 }
 0xa3d   : > { %v10462_v0 = vpop.f32.mrf.mxu2 }
 0xa3e   : > { %v10526_v1 = vpop.f32.mrf.mxu1 }
 0xa42   : > { %v10479_v62 = vpop.f32.mrf.mxu3  ;;  %12597 = vmatmul.msk.bf16.vlgmr.msra.gmra.mxu2 %vm9249_vm4, %v17047_v27 }
 0xa43   : > { %v10587_v18 = vpop.f32.mrf.mxu0 }
 0xa44   : > { %v10643_v61 = vadd.f32 %v10587_v18, %v10557_v46 }
 0xa45   : > { %v10537_v2 = vpop.f32.mrf.mxu2 }
 0xa46   : > { %v10600_v52 = vpop.f32.mrf.mxu1  ;;  %12611 = vmatmul.msk.bf16.vlgmr.msrb.gmra.mxu0 %vm9249_vm4, %v16889_v24  ;;  %v10559_v20 = vadd.f32 %v10537_v2, %v10483_v36 }
 0xa47   : > { %12598 = vmatmul.msk.bf16.vlgmr.msra.gmra.mxu3 %vm9249_vm4, %v11177_v14  ;;  %v10644_v21 = vadd.f32 %v10600_v52, %v10558_v47 }
 0xa49   : > { %12612 = vmatmul.msk.bf16.vlgmr.msrb.gmra.mxu1 %vm9249_vm4, %v16977_v5 }
 0xa4a   : > { %v10553_v50 = vpop.f32.mrf.mxu3 }
 0xa4b   : > { %v10560_v28 = vadd.f32 %v10553_v50, %v10484_v32  ;;  %v10589_v3 = vpop.f32.mrf.mxu0 }
 0xa4d   : > { %v10539_v57 = vpop.f32.mrf.mxu2 }
 0xa4e   : > { %v10602_v30 = vpop.f32.mrf.mxu1 }
 0xa52   : > { %v10555_v27 = vpop.f32.mrf.mxu3  ;;  %12613 = vmatmul.msk.bf16.vlgmr.msrb.gmra.mxu2 %vm9249_vm4, %v10859_v56 }
 0xa53   : > { %v10673_v55 = vpop.f32.mrf.mxu0 }
 0xa54   : > { %v10720_v24 = vadd.f32 %v10673_v55, %v10643_v61 }
 0xa55   : > { %v10613_v34 = vpop.f32.mrf.mxu2 }
 0xa56   : > { %v10686_v60 = vpop.f32.mrf.mxu1  ;;  %v10645_v5 = vadd.f32 %v10613_v34, %v10559_v20 }
 0xa57   : > { %12614 = vmatmul.msk.bf16.vlgmr.msrb.gmra.mxu3 %vm9249_vm4, %v11254_v40  ;;  %v10721_v17 = vadd.f32 %v10686_v60, %v10644_v21 }
 0xa5a   : > { %v10639_v43 = vpop.f32.mrf.mxu3 }
 0xa5b   : > { %v10646_v29 = vadd.f32 %v10639_v43, %v10560_v28  ;;  %v10675_v31 = vpop.f32.mrf.mxu0 }
 0xa5d   : > { %v10615_v33 = vpop.f32.mrf.mxu2 }
 0xa5e   : > { %v10688_v59 = vpop.f32.mrf.mxu1 }
 0xa62   : > { %v10641_v58 = vpop.f32.mrf.mxu3 }
 0xa63   : > { %v10750_v15 = vpop.f32.mrf.mxu0 }
 0xa64   : > { %v10799_v37 = vadd.f32 %v10750_v15, %v10720_v24  ;;  %v12709_v15 = vld [vmem:[%s17164_s6] ss:$0 sm:$0xff] }
 0xa65   : > { %v10699_v56 = vpop.f32.mrf.mxu2 }
 0xa66   : > { %v10763_v39 = vpop.f32.mrf.mxu1  ;;  %v10722_v13 = vadd.f32 %v10699_v56, %v10645_v5 }
 0xa67   : > { %v10800_v53 = vadd.f32 %v10763_v39, %v10721_v17 }
 0xa6a   : > { %v10716_v25 = vpop.f32.mrf.mxu3 }
 0xa6b   : > { %v10723_v9 = vadd.f32 %v10716_v25, %v10646_v29  ;;  %v10752_v42 = vpop.f32.mrf.mxu0 }
 0xa6d   : > { %v10701_v45 = vpop.f32.mrf.mxu2 }
 0xa6e   : > { %v10765_v12 = vpop.f32.mrf.mxu1 }
 0xa72   : > { %v10718_v63 = vpop.f32.mrf.mxu3 }
 0xa73   : > { %v10829_v22 = vpop.f32.mrf.mxu0 }
 0xa74   : > { %v10876_v11 = vadd.f32 %v10829_v22, %v10799_v37 }
 0xa75   : > { %v10776_v4 = vpop.f32.mrf.mxu2 }
 0xa76   : > { %v10842_v35 = vpop.f32.mrf.mxu1  ;;  %v10801_v41 = vadd.f32 %v10776_v4, %v10722_v13 }
 0xa77   : > { %v10877_v48 = vadd.f32 %v10842_v35, %v10800_v53 }
 0xa7a   : > { %v10795_v10 = vpop.f32.mrf.mxu3 }
 0xa7b   : > { %v10802_v54 = vadd.f32 %v10795_v10, %v10723_v9  ;;  %v10831_v51 = vpop.f32.mrf.mxu0 }
 0xa7d   : > { %v10778_v49 = vpop.f32.mrf.mxu2 }
 0xa7e   : > { %v10844_v38 = vpop.f32.mrf.mxu1 }
 0xa82   : > { %v10797_v8 = vpop.f32.mrf.mxu3 }
 0xa83   : > { %v10906_v46 = vpop.f32.mrf.mxu0 }
 0xa84   : > { %v10952_v5 = vadd.f32 %v10906_v46, %v10876_v11 }
 0xa85   : > { %v10855_v47 = vpop.f32.mrf.mxu2 }
 0xa86   : > { %v10919_v23 = vpop.f32.mrf.mxu1  ;;  %v10878_v26 = vadd.f32 %v10855_v47, %v10801_v41 }
 0xa87   : > { %v10953_v16 = vadd.f32 %v10919_v23, %v10877_v48 }
 0xa8a   : > { %v10872_v36 = vpop.f32.mrf.mxu3 }
 0xa8b   : > { %v10879_v6 = vadd.f32 %v10872_v36, %v10802_v54  ;;  %v10908_v32 = vpop.f32.mrf.mxu0 }
 0xa8d   : > { %v10857_v1 = vpop.f32.mrf.mxu2 }
 0xa8e   : > { %v10921_v7 = vpop.f32.mrf.mxu1 }
 0xa92   : > { %v10874_v0 = vpop.f32.mrf.mxu3 }
 0xa93   : > { %v10982_v19 = vpop.f32.mrf.mxu0 }
 0xa94   : > { %v11038_v43 = vadd.f32 %v10982_v19, %v10952_v5 }
 0xa95   : > { %v10932_v18 = vpop.f32.mrf.mxu2 }
 0xa96   : > { %v10995_v44 = vpop.f32.mrf.mxu1  ;;  %v10954_v63 = vadd.f32 %v10932_v18, %v10878_v26 }
 0xa97   : > { %v11039_v62 = vadd.f32 %v10995_v44, %v10953_v16 }
 0xa9a   : > { %v10948_v61 = vpop.f32.mrf.mxu3 }
 0xa9b   : > { %v10984_v14 = vpop.f32.mrf.mxu0  ;;  %v10955_v35 = vadd.f32 %v10948_v61, %v10879_v6 }
 0xa9d   : > { %v10934_v21 = vpop.f32.mrf.mxu2 }
 0xa9e   : > { %v10997_v52 = vpop.f32.mrf.mxu1 }
 0xaa2   : > { %v10950_v2 = vpop.f32.mrf.mxu3 }
 0xaa3   : > { %v11068_v20 = vpop.f32.mrf.mxu0 }
 0xaa4   : > { %v11115_v59 = vadd.f32 %v11068_v20, %v11038_v43 }
 0xaa5   : > { %v11008_v28 = vpop.f32.mrf.mxu2 }
 0xaa6   : > { %v11081_v50 = vpop.f32.mrf.mxu1  ;;  %v11040_v22 = vadd.f32 %v11008_v28, %v10954_v63 }
 0xaa7   : > { %v11116_v23 = vadd.f32 %v11081_v50, %v11039_v62 }
 0xaaa   : > { %v11034_v3 = vpop.f32.mrf.mxu3 }
 0xaab   : > { %v11070_v30 = vpop.f32.mrf.mxu0  ;;  %v11041_v4 = vadd.f32 %v11034_v3, %v10955_v35 }
 0xaad   : > { %v11010_v27 = vpop.f32.mrf.mxu2 }
 0xaae   : > { %v11083_v57 = vpop.f32.mrf.mxu1 }
 0xab2   : > { %v11036_v55 = vpop.f32.mrf.mxu3 }
 0xab3   : > { %v11145_v24 = vpop.f32.mrf.mxu0 }
 0xab4   : > { %v11194_v33 = vadd.f32 %v11145_v24, %v11115_v59 }
 0xab5   : > { %v11094_v60 = vpop.f32.mrf.mxu2 }
 0xab6   : > { %v11158_v40 = vpop.f32.mrf.mxu1  ;;  %v11117_v48 = vadd.f32 %v11094_v60, %v11040_v22 }
 0xab7   : > { %v11195_v36 = vadd.f32 %v11158_v40, %v11116_v23 }
 0xaba   : > { %v11111_v17 = vpop.f32.mrf.mxu3 }
 0xabb   : > { %v11147_v34 = vpop.f32.mrf.mxu0  ;;  %v11118_v10 = vadd.f32 %v11111_v17, %v11041_v4 }
 0xabd   : > { %v11096_v31 = vpop.f32.mrf.mxu2 }
 0xabe   : > { %v11160_v29 = vpop.f32.mrf.mxu1 }
 0xac2   : > { %v11113_v58 = vpop.f32.mrf.mxu3 }
 0xac3   : > { %v11224_v37 = vpop.f32.mrf.mxu0 }
 0xac4   : > { %v11271_v39 = vadd.f32 %v11224_v37, %v11194_v33 }
 0xac5   : > { %v11171_v13 = vpop.f32.mrf.mxu2 }
 0xac6   : > { %v11237_v53 = vpop.f32.mrf.mxu1  ;;  %v11279_v56 = vadd.f32 %v12709_v15, %v11271_v39  ;;  %v11196_v41 = vadd.f32 %v11171_v13, %v11117_v48 }
 0xac7   : > { %v11272_v7 = vadd.f32 %v11237_v53, %v11195_v36 }
 0xac8   : > { %v11283_v25 = vmax.f32 %v11279_v56, 0.0 }
 0xac9   : > { %v11280_v1 = vadd.f32 %v12709_v15, %v11272_v7 }
 0xaca   : > { %v11190_v9 = vpop.f32.mrf.mxu3  ;;  %11287 = vxpose.xlu0.b32.start.end [1/1] (short) (narrow) %v11283_v25, 32 }
 0xacb   : > { %v11226_v42 = vpop.f32.mrf.mxu0  ;;  %v11197_v38 = vadd.f32 %v11190_v9, %v11118_v10  ;;  %v11284_v0 = vmax.f32 %v11280_v1, 0.0 }
 0xacd   : > { %v11173_v45 = vpop.f32.mrf.mxu2 }
 0xace   : > { %v11239_v12 = vpop.f32.mrf.mxu1 }
 0xad2   : > { %v11192_v11 = vpop.f32.mrf.mxu3 }
 0xad5   : > { %v11250_v54 = vpop.f32.mrf.mxu2 }
 0xad6   : > { %v11273_v51 = vadd.f32 %v11250_v54, %v11196_v41 }
 0xad8   : > { %v11281_v8 = vadd.f32 %v12709_v15, %v11273_v51 }
 0xada   : > { %v11267_v49 = vpop.f32.mrf.mxu3  ;;  %v11285_v16 = vmax.f32 %v11281_v8, 0.0 }
 0xadb   : > { %v11274_v46 = vadd.f32 %v11267_v49, %v11197_v38 }
 0xadc   : > { %11377 = vxpose.xlu1.b32.start.end [1/1] (short) (narrow) %v11285_v16, 32 }
 0xadd   : > { %v11282_v47 = vadd.f32 %v12709_v15, %v11274_v46  ;;  %v11252_v32 = vpop.f32.mrf.mxu2 }
 0xadf   : > { %v11286_v26 = vmax.f32 %v11282_v47, 0.0 }
 0xae1   : > { %11430 = vxpose.xlu2.b32.start.end [1/1] (short) (narrow) %v11286_v26, 32 }
 0xae2   : > { %v11269_v6 = vpop.f32.mrf.mxu3 }
 0xaea   : > { %11324 = vxpose.xlu0.b32.start.end [1/1] (short) (narrow) %v11284_v0, 32 }
 0xb6e   : > { %v11303_v19 = vpop.trf.xlu0 }
 0xb6f   : > { %11320 = vst.msk [vmem:[%s17133_s30] sm:$0xff] %vm11319_vm5, %v11303_v19 }
 0xb76   : > { %v11304_v44 = vpop.trf.xlu0 }
 0xb77   : > { %11321 = vst.msk [vmem:[%s17133_s30 + $0x8] sm:$0xff] %vm11319_vm5, %v11304_v44 }
 0xb7a   : > { %v11446_v62 = vpop.trf.xlu2 }
 0xb7e   : > { %v11305_v18 = vpop.trf.xlu0 }
 0xb7f   : > { %11322 = vst.msk [vmem:[%s17133_s30 + $0x10] sm:$0xff] %vm11319_vm5, %v11305_v18 }
 0xb80   : > { %v11393_v61 = vpop.trf.xlu1 }
 0xb82   : > { %v11447_v14 = vpop.trf.xlu2 }
 0xb86   : > { %v11306_v52 = vpop.trf.xlu0 }
 0xb87   : > { %11323 = vst.msk [vmem:[%s17133_s30 + $0x18] sm:$0xff] %vm11319_vm5, %v11306_v52 }
 0xb88   : > { %v11394_v21 = vpop.trf.xlu1 }
 0xb8a   : > { %v11448_v2 = vpop.trf.xlu2 }
 0xb8b   : > { %11470 = vrot.lane.b32.xlu0 %v11448_v2, %s12719_s25 }
 0xb8e   : > { %v11340_v20 = vpop.trf.xlu0 }
 0xb8f   : > { %11360 = vrot.lane.b32.xlu1 %v11340_v20, %s12720_s9 }
 0xb90   : > { %v11395_v50 = vpop.trf.xlu1 }
 0xb92   : > { %v11449_v57 = vpop.trf.xlu2 }
 0xb96   : > { %v11341_v28 = vpop.trf.xlu0 }
 0xb97   : > { %11362 = vrot.lane.b32.xlu1 %v11341_v28, %s12720_s9 }
 0xb98   : > { %v11396_v3 = vpop.trf.xlu1 }
 0xb99   : > { %11419 = vrot.lane.b32.xlu0 %v11396_v3, %s12721_s10 }
 0xb9e   : > { %v11342_v30 = vpop.trf.xlu0 }
 0xb9f   : > { %11466 = vrot.lane.b32.xlu1 %v11446_v62, %s12719_s25  ;;  %11364 = vrot.lane.b32.xlu2 %v11342_v30, %s12720_s9 }
 0xba1   : > { %11472 = vrot.lane.b32.xlu0 %v11449_v57, %s12719_s25 }
 0xba6   : > { %v11343_v27 = vpop.trf.xlu0 }
 0xba7   : > { %11413 = vrot.lane.b32.xlu2 %v11393_v61, %s12721_s10 }
 0xbaf   : > { %11366 = vrot.lane.b32.xlu2 %v11343_v27, %s12720_s9 }
 0xbb7   : > { %11415 = vrot.lane.b32.xlu2 %v11394_v21, %s12721_s10 }
 0xbbf   : > { %11417 = vrot.lane.b32.xlu2 %v11395_v50, %s12721_s10 }
 0xbc7   : > { %11468 = vrot.lane.b32.xlu2 %v11447_v14, %s12719_s25 }
 0xbf9   : > { %v11365_v55 = vpop.permute.xlu2 %11364 }
 0xbfa   : > { %11375 = vst.msk [vmem:[%s17133_s30 + $0x10] sm:$0xff] %vm11372_vm6, %v11365_v55 }
 0xbfd   : > { %v11471_v60 = vpop.permute.xlu0 %11470 }
 0xc01   : > { %v11361_v24 = vpop.permute.xlu1 %11360  ;;  %v11414_v40 = vpop.permute.xlu2 %11413 }
 0xc02   : > { %11373 = vst.msk [vmem:[%s17133_s30] sm:$0xff] %vm11372_vm6, %v11361_v24 }
 0xc03   : > { %11426 = vst.msk [vmem:[%s17133_s30] sm:$0xff] %vm11425_vm7, %v11414_v40 }
 0xc09   : > { %v11363_v17 = vpop.permute.xlu1 %11362  ;;  %v11367_v34 = vpop.permute.xlu2 %11366 }
 0xc0a   : > { %11374 = vst.msk [vmem:[%s17133_s30 + $0x8] sm:$0xff] %vm11372_vm6, %v11363_v17 }
 0xc0b   : > { %11376 = vst.msk [vmem:[%s17133_s30 + $0x18] sm:$0xff] %vm11372_vm6, %v11367_v34  ;;  %v11420_v5 = vpop.permute.xlu0 %11419 }
 0xc0c   : > { %11429 = vst.msk [vmem:[%s17133_s30 + $0x18] sm:$0xff] %vm11425_vm7, %v11420_v5 }
 0xc11   : > { %v11467_v43 = vpop.permute.xlu1 %11466  ;;  %v11416_v29 = vpop.permute.xlu2 %11415 }
 0xc12   : > { %11479 = vst.msk [vmem:[%s17133_s30] sm:$0xff] %vm11478_vm8, %v11467_v43 }
 0xc13   : > { %11427 = vst.msk [vmem:[%s17133_s30 + $0x8] sm:$0xff] %vm11425_vm7, %v11416_v29  ;;  %v11473_v31 = vpop.permute.xlu0 %11472 }
 0xc14   : > { %11482 = vst.msk [vmem:[%s17133_s30 + $0x18] sm:$0xff] %vm11478_vm8, %v11473_v31 }
 0xc19   : > { %v11418_v59 = vpop.permute.xlu2 %11417 }
 0xc1a   : > { %11428 = vst.msk [vmem:[%s17133_s30 + $0x10] sm:$0xff] %vm11425_vm7, %v11418_v59 }
 0xc1b   : > { %11481 = vst.msk [vmem:[%s17133_s30 + $0x10] sm:$0xff] %vm11478_vm8, %v11471_v60 }
 0xc21   : > { %v11469_v33 = vpop.permute.xlu2 %11468 }
 0xc22   : > { %11480 = vst.msk [vmem:[%s17133_s30 + $0x8] sm:$0xff] %vm11478_vm8, %v11469_v33 }
 0xc23 PF: > { %s17_s24 = sadd.s32 1, %s12716_s24  }
 0xc24   : > { %p14_p4 = scmp.ge.s32.totalorder %s17_s24, 4  }
 0xc26   :  { %16 = sbr.rel (!%p14_p4) target bundleno = 1 (0x1), region = 150 }

</bundles_post_ra>
